<compile_context>
chip_gen: v7x
topology: tpu7x:2x2x1
jax: 0.10.0
libtpu: 0.0.40
codegen_flags: <defaults>
</compile_context>

<pallas_src>
import functools

import jax
import jax.numpy as jnp
from jax.experimental import pallas as pl
from jax.experimental.pallas import tpu as pltpu

# ----------------------------- small synthetic config -----------------------------
K0, S0, C0 = 10, 5, 16          # feature-extractor conv layer 0
K1, S1, C1 = 3, 2, 32           # feature-extractor conv layer 1
H = 32                          # hidden size
HEADS = 4                       # attention heads
FFN = 64                        # feed-forward intermediate size
NLAYERS = 2                     # transformer layers
POSK, GROUPS = 4, 2             # positional conv kernel / groups
PROJ = 16                       # classifier_proj_size
NCLS = 2                        # num_classes
AUDIO_LEN = 800
BATCH = 2
EPS = 1e-5


# ----------------------------- kernel 1: conv0 + GroupNorm + GELU -----------------------------
def _fe_stage1_kernel(a_ref, w_ref, g_ref, b_ref, o_ref, *, t_out, eps):
    x = a_ref[0]                                            # (T0+1, S0); x[i, j] = audio[S0*i + j]
    wa = w_ref[0]                                           # (S0, C0)  taps 0..S0-1
    wb = w_ref[1]                                           # (S0, C0)  taps S0..2*S0-1
    h = (jnp.dot(x[0:t_out, :], wa, preferred_element_type=jnp.float32)
         + jnp.dot(x[1:t_out + 1, :], wb, preferred_element_type=jnp.float32))  # (T0, C0)
    # GroupNorm with num_groups == channels: per-sample, per-channel stats over time.
    mu = jnp.mean(h, axis=0, keepdims=True)
    var = jnp.mean(jnp.square(h - mu), axis=0, keepdims=True)
    h = (h - mu) * jax.lax.rsqrt(var + eps) * g_ref[...] + b_ref[...]
    o_ref[0] = jax.nn.gelu(h, approximate=True)


def fe_stage1(audio_r, conv0_w, gn_g, gn_b):
    B, TP1, S = audio_r.shape
    T0 = TP1 - 1
    C = conv0_w.shape[1]
    w0_r = conv0_w.reshape(2, S, C)                         # (2, S0, C0)
    return pl.pallas_call(
        functools.partial(_fe_stage1_kernel, t_out=T0, eps=EPS),
        out_shape=jax.ShapeDtypeStruct((B, T0, C), jnp.float32),
        grid=(B,),
        in_specs=[pl.BlockSpec((1, TP1, S), lambda b: (b, 0, 0)),
                  pl.BlockSpec((2, S, C), lambda b: (0, 0, 0)),
                  pl.BlockSpec((1, C), lambda b: (0, 0)),
                  pl.BlockSpec((1, C), lambda b: (0, 0))],
        out_specs=pl.BlockSpec((1, T0, C), lambda b: (b, 0, 0)),
        compiler_params=pltpu.CompilerParams(dimension_semantics=("parallel",)),
    )(audio_r, w0_r, gn_g.reshape(1, C), gn_b.reshape(1, C))


# ----------------------------- kernel 2: conv1 + GELU + LN + feature projection -----------------------------
def _fe_stage2_kernel(p_ref, w1_ref, g_ref, b_ref, fpw_ref, fpb_ref, o_ref, *, eps):
    h = jax.nn.gelu(jnp.dot(p_ref[0], w1_ref[...], preferred_element_type=jnp.float32),
                    approximate=True)                        # (T1, C1)
    mu = jnp.mean(h, axis=-1, keepdims=True)
    var = jnp.mean(jnp.square(h - mu), axis=-1, keepdims=True)
    h = (h - mu) * jax.lax.rsqrt(var + eps) * g_ref[...] + b_ref[...]
    o_ref[0] = jnp.dot(h, fpw_ref[...], preferred_element_type=jnp.float32) + fpb_ref[...]


def fe_stage2(patches, conv1_w, ln_g, ln_b, fp_w, fp_b):
    B, T1, KC = patches.shape
    C = conv1_w.shape[1]
    Hh = fp_w.shape[1]
    return pl.pallas_call(
        functools.partial(_fe_stage2_kernel, eps=EPS),
        out_shape=jax.ShapeDtypeStruct((B, T1, Hh), jnp.float32),
        grid=(B,),
        in_specs=[pl.BlockSpec((1, T1, KC), lambda b: (b, 0, 0)),
                  pl.BlockSpec((KC, C), lambda b: (0, 0)),
                  pl.BlockSpec((1, C), lambda b: (0, 0)),
                  pl.BlockSpec((1, C), lambda b: (0, 0)),
                  pl.BlockSpec((C, Hh), lambda b: (0, 0)),
                  pl.BlockSpec((1, Hh), lambda b: (0, 0))],
        out_specs=pl.BlockSpec((1, T1, Hh), lambda b: (b, 0, 0)),
        compiler_params=pltpu.CompilerParams(dimension_semantics=("parallel",)),
    )(patches, conv1_w, ln_g.reshape(1, C), ln_b.reshape(1, C), fp_w, fp_b.reshape(1, Hh))


# ----------------------------- kernel 3: pos-conv + GELU + residual + encoder LN -----------------------------
def _pos_encoder_kernel(xp_ref, w_ref, b_ref, g_ref, bln_ref, o_ref, *, t, posk, pad, eps):
    xp = xp_ref[0]                                           # (T + 2*pad, H)
    x = xp[pad:pad + t, :]                                   # residual (T, H)
    pos = jnp.dot(xp[0:t, :], w_ref[0], preferred_element_type=jnp.float32)
    for k in range(1, posk):
        pos = pos + jnp.dot(xp[k:k + t, :], w_ref[k], preferred_element_type=jnp.float32)
    pos = jax.nn.gelu(pos + b_ref[...], approximate=True)    # even kernel -> keep first T outputs
    y = x + pos
    mu = jnp.mean(y, axis=-1, keepdims=True)
    var = jnp.mean(jnp.square(y - mu), axis=-1, keepdims=True)
    o_ref[0] = (y - mu) * jax.lax.rsqrt(var + eps) * g_ref[...] + bln_ref[...]


def pos_conv_encoder(xp, w_pos, pos_b, ln_g, ln_b, t):
    B, TPAD, Hh = xp.shape
    KP = w_pos.shape[0]
    pad = (TPAD - t) // 2
    return pl.pallas_call(
        functools.partial(_pos_encoder_kernel, t=t, posk=KP, pad=pad, eps=EPS),
        out_shape=jax.ShapeDtypeStruct((B, t, Hh), jnp.float32),
        grid=(B,),
        in_specs=[pl.BlockSpec((1, TPAD, Hh), lambda b: (b, 0, 0)),
                  pl.BlockSpec((KP, Hh, Hh), lambda b: (0, 0, 0)),
                  pl.BlockSpec((1, Hh), lambda b: (0, 0)),
                  pl.BlockSpec((1, Hh), lambda b: (0, 0)),
                  pl.BlockSpec((1, Hh), lambda b: (0, 0))],
        out_specs=pl.BlockSpec((1, t, Hh), lambda b: (b, 0, 0)),
        compiler_params=pltpu.CompilerParams(dimension_semantics=("parallel",)),
    )(xp, w_pos, pos_b.reshape(1, Hh), ln_g.reshape(1, Hh), ln_b.reshape(1, Hh))


# ----------------------------- kernel 4: transformer stack + classification head -----------------------------
def _transformer_head_kernel(h_ref, wqkv_ref, bqkv_ref, wo_ref, bo_ref,
                             ln1g_ref, ln1b_ref, wff1_ref, bff1_ref,
                             wff2_ref, bff2_ref, ln2g_ref, ln2b_ref,
                             projw_ref, projb_ref, clsw_ref, clsb_ref,
                             o_ref, x_scr, *, num_heads, eps):
    layer = pl.program_id(0)

    @pl.when(layer == 0)
    def _init():
        x_scr[...] = h_ref[...]

    B, T, Hh = x_scr.shape
    D = Hh // num_heads
    scale = D ** -0.5

    wqkv = wqkv_ref[0]
    bqkv = bqkv_ref[0]
    wo = wo_ref[0]
    bo = bo_ref[0]
    g1 = ln1g_ref[0]
    b1 = ln1b_ref[0]
    wff1 = wff1_ref[0]
    bff1 = bff1_ref[0]
    wff2 = wff2_ref[0]
    bff2 = bff2_ref[0]
    g2 = ln2g_ref[0]
    b2 = ln2b_ref[0]

    def _ln(x, g, b):
        mu = jnp.mean(x, axis=-1, keepdims=True)
        var = jnp.mean(jnp.square(x - mu), axis=-1, keepdims=True)
        return (x - mu) * jax.lax.rsqrt(var + eps) * g + b

    # Post-norm WavLM/Wav2Vec2-base transformer layer, kept VMEM-resident across the grid.
    for bi in range(B):
        x = x_scr[bi]                                                        # (T, H)
        qkv = jnp.dot(x, wqkv, preferred_element_type=jnp.float32) + bqkv    # (T, 3H)
        attn = bo                                                            # (1, H) broadcast
        for hh in range(num_heads):
            q = qkv[:, hh * D:(hh + 1) * D] * scale
            k = qkv[:, Hh + hh * D:Hh + (hh + 1) * D]
            v = qkv[:, 2 * Hh + hh * D:2 * Hh + (hh + 1) * D]
            s = jax.lax.dot_general(q, k, (((1,), (1,)), ((), ())),
                                    preferred_element_type=jnp.float32)      # (T, T)
            s = s - jnp.max(s, axis=-1, keepdims=True)
            p = jnp.exp(s)
            p = p * pl.reciprocal(jnp.sum(p, axis=-1, keepdims=True), approx=True)
            o_h = jnp.dot(p, v, preferred_element_type=jnp.float32)          # (T, D)
            # equivalent to concat(heads) @ wo: fold the per-head slice of wo in here
            attn = attn + jnp.dot(o_h, wo[hh * D:(hh + 1) * D, :],
                                  preferred_element_type=jnp.float32)
        y = _ln(x + attn, g1, b1)
        ff = jax.nn.gelu(jnp.dot(y, wff1, preferred_element_type=jnp.float32) + bff1,
                         approximate=True)
        ff = jnp.dot(ff, wff2, preferred_element_type=jnp.float32) + bff2
        x_scr[bi] = _ln(y + ff, g2, b2)

    @pl.when(layer == pl.num_programs(0) - 1)
    def _head():
        # mean(projector(x)) == projector(mean(x)) for a linear projector -> pool first.
        pooled = jnp.mean(x_scr[...], axis=1)                                # (B, H)
        proj = jnp.dot(pooled, projw_ref[...],
                       preferred_element_type=jnp.float32) + projb_ref[...]
        o_ref[...] = jnp.dot(proj, clsw_ref[...],
                             preferred_element_type=jnp.float32) + clsb_ref[...]


def transformer_and_head(h, params):
    B, T, Hh = h.shape
    L = params["wqkv"].shape[0]
    F = params["wff1"].shape[2]
    P = params["proj_w"].shape[1]
    NC = params["cls_w"].shape[1]

    layer_keys = ["wqkv", "bqkv", "wo", "bo", "ln1_g", "ln1_b",
                  "wff1", "bff1", "wff2", "bff2", "ln2_g", "ln2_b"]
    layer_inputs = [params[k] for k in layer_keys]
    layer_specs = [pl.BlockSpec((1,) + params[k].shape[1:], lambda l: (l, 0, 0))
                   for k in layer_keys]

    head_inputs = [params["proj_w"], params["proj_b"].reshape(1, P),
                   params["cls_w"], params["cls_b"].reshape(1, NC)]
    head_specs = [pl.BlockSpec((Hh, P), lambda l: (0, 0)),
                  pl.BlockSpec((1, P), lambda l: (0, 0)),
                  pl.BlockSpec((P, NC), lambda l: (0, 0)),
                  pl.BlockSpec((1, NC), lambda l: (0, 0))]

    flops = L * B * T * (2 * Hh * 3 * Hh + 4 * T * Hh + 2 * Hh * Hh + 4 * Hh * F)
    transc = L * B * T * (HEADS * T + F)
    bytes_accessed = sum(int(x.size) * 4 for x in [h] + layer_inputs + head_inputs) + B * NC * 4

    return pl.pallas_call(
        functools.partial(_transformer_head_kernel, num_heads=HEADS, eps=EPS),
        out_shape=jax.ShapeDtypeStruct((B, NC), jnp.float32),
        grid=(L,),
        in_specs=[pl.BlockSpec((B, T, Hh), lambda l: (0, 0, 0))] + layer_specs + head_specs,
        out_specs=pl.BlockSpec((B, NC), lambda l: (0, 0)),
        scratch_shapes=[pltpu.VMEM((B, T, Hh), jnp.float32)],
        compiler_params=pltpu.CompilerParams(dimension_semantics=("arbitrary",)),
        cost_estimate=pl.CostEstimate(flops=int(flops), transcendentals=int(transc),
                                      bytes_accessed=int(bytes_accessed)),
    )(h, *layer_inputs, *head_inputs)


# ----------------------------- params / forward -----------------------------
def _build_pos_weight(pos_w):
    """Grouped pos-conv weights (GROUPS, POSK*cg, cg) -> block-diagonal (POSK, H, H)."""
    cg = H // GROUPS
    w = jnp.zeros((POSK, H, H), jnp.float32)
    for g in range(GROUPS):
        blk = pos_w[g].reshape(POSK, cg, cg)                 # [k, c_in, c_out]
        w = w.at[:, g * cg:(g + 1) * cg, g * cg:(g + 1) * cg].set(blk)
    return w


def init_params(key):
    def wgt(k, shape):
        return 0.02 * jax.random.normal(k, shape, dtype=jnp.float32)

    keys = iter(jax.random.split(key, 16))
    ones = lambda *s: jnp.ones(s, jnp.float32)
    zeros = lambda *s: jnp.zeros(s, jnp.float32)

    return {
        "conv0_w": wgt(next(keys), (K0 * 1, C0)),
        "gn_g": ones(C0), "gn_b": zeros(C0),
        "conv1_w": wgt(next(keys), (K1 * C0, C1)),
        "fp_ln_g": ones(C1), "fp_ln_b": zeros(C1),
        "fp_w": wgt(next(keys), (C1, H)), "fp_b": zeros(H),
        "pos_w": wgt(next(keys), (GROUPS, POSK * (H // GROUPS), H // GROUPS)),
        "pos_b": zeros(H),
        "enc_ln_g": ones(H), "enc_ln_b": zeros(H),
        # transformer layers stacked along a leading NLAYERS axis, q/k/v fused into (H, 3H)
        "wqkv": wgt(next(keys), (NLAYERS, H, 3 * H)), "bqkv": zeros(NLAYERS, 1, 3 * H),
        "wo": wgt(next(keys), (NLAYERS, H, H)), "bo": zeros(NLAYERS, 1, H),
        "ln1_g": ones(NLAYERS, 1, H), "ln1_b": zeros(NLAYERS, 1, H),
        "wff1": wgt(next(keys), (NLAYERS, H, FFN)), "bff1": zeros(NLAYERS, 1, FFN),
        "wff2": wgt(next(keys), (NLAYERS, FFN, H)), "bff2": zeros(NLAYERS, 1, H),
        "ln2_g": ones(NLAYERS, 1, H), "ln2_b": zeros(NLAYERS, 1, H),
        # classification head
        "proj_w": wgt(next(keys), (H, PROJ)), "proj_b": zeros(PROJ),
        "cls_w": wgt(next(keys), (PROJ, NCLS)), "cls_b": zeros(NCLS),
    }


def wavlm_classifier_forward(params, input_values, attention_mask=None):
    assert attention_mask is None  # TODO(synk): attention_mask path not implemented
    assert K0 == 2 * S0            # conv0 windows span exactly two reshaped stride-rows
    B, L = input_values.shape

    # ---- feature extractor stage 1: conv0 + GroupNorm + GELU (one kernel) ----
    T0 = (L - K0) // S0 + 1
    need = S0 * (T0 + 1)
    audio_r = input_values[:, :need].reshape(B, T0 + 1, S0)
    h0 = fe_stage1(audio_r, params["conv0_w"], params["gn_g"], params["gn_b"])   # (B, T0, C0)

    # ---- feature extractor stage 2 + feature projection (one kernel) ----
    T1 = (T0 - K1) // S1 + 1
    # TODO(synk): stride-2 im2col gather for conv1 is done by XLA outside the kernel.
    patches1 = jnp.concatenate(
        [h0[:, k:k + (T1 - 1) * S1 + 1:S1, :] for k in range(K1)], axis=-1)       # (B, T1, K1*C0)
    h = fe_stage2(patches1, params["conv1_w"], params["fp_ln_g"], params["fp_ln_b"],
                  params["fp_w"], params["fp_b"])                                 # (B, T1, H)

    # ---- positional conv embedding + residual + encoder LayerNorm (one kernel) ----
    pad = POSK // 2
    xp = jnp.pad(h, ((0, 0), (pad, pad), (0, 0)))
    w_pos = _build_pos_weight(params["pos_w"])
    h = pos_conv_encoder(xp, w_pos, params["pos_b"],
                         params["enc_ln_g"], params["enc_ln_b"], T1)              # (B, T1, H)

    # ---- transformer stack + mean-pool + projector + classifier (one kernel) ----
    return transformer_and_head(h, params)                                        # (B, NCLS)


if __name__ == "__main__":
    key = jax.random.PRNGKey(0)
    pkey, xkey = jax.random.split(key)
    params = init_params(pkey)
    input_values = jax.random.normal(xkey, (BATCH, AUDIO_LEN), dtype=jnp.float32)

    fwd = jax.jit(wavlm_classifier_forward)
    logits = jax.block_until_ready(fwd(params, input_values))

    assert logits.shape == (BATCH, NCLS), logits.shape
    assert bool(jnp.all(jnp.isfinite(logits)))
    print("KERNEL_OK")
</pallas_src>

<mosaic_0001>
module attributes {stable_mosaic.version = 11 : i64} {
  func.func @_fe_stage1_kernel(%arg0: i32, %arg1: memref<1x160x5xf32, #tpu.memory_space<vmem>>, %arg2: memref<2x5x16xf32, #tpu.memory_space<vmem>>, %arg3: memref<1x16xf32, #tpu.memory_space<vmem>>, %arg4: memref<1x16xf32, #tpu.memory_space<vmem>>, %arg5: memref<1x159x16xf32, #tpu.memory_space<vmem>>) attributes {dimension_semantics = [#tpu.dimension_semantics<parallel>], iteration_bounds = array<i64: 2>, scalar_prefetch = 0 : i64, scratch_operands = 0 : i64, tpu.core_type = #tpu.core_type<tc>, window_params = [{transform_indices = @transform_0, window_bounds = array<i64: 1, 160, 5>}, {pipeline_mode = #tpu.pipeline_mode<synchronous>, transform_indices = @transform_1, window_bounds = array<i64: 2, 5, 16>}, {pipeline_mode = #tpu.pipeline_mode<synchronous>, transform_indices = @transform_2, window_bounds = array<i64: 1, 16>}, {pipeline_mode = #tpu.pipeline_mode<synchronous>, transform_indices = @transform_3, window_bounds = array<i64: 1, 16>}, {transform_indices = @transform_4, window_bounds = array<i64: 1, 159, 16>}]} {
    %c0 = arith.constant 0 : index
    %c0_0 = arith.constant 0 : index
    %c0_1 = arith.constant 0 : index
    %0 = vector.load %arg1[%c0, %c0_0, %c0_1] : memref<1x160x5xf32, #tpu.memory_space<vmem>>, vector<1x160x5xf32>
    %1 = vector.shape_cast %0 : vector<1x160x5xf32> to vector<160x5xf32>
    %c0_2 = arith.constant 0 : index
    %c0_3 = arith.constant 0 : index
    %c0_4 = arith.constant 0 : index
    %2 = vector.load %arg2[%c0_2, %c0_3, %c0_4] : memref<2x5x16xf32, #tpu.memory_space<vmem>>, vector<1x5x16xf32>
    %3 = vector.shape_cast %2 : vector<1x5x16xf32> to vector<5x16xf32>
    %c1 = arith.constant 1 : index
    %c0_5 = arith.constant 0 : index
    %c0_6 = arith.constant 0 : index
    %4 = vector.load %arg2[%c1, %c0_5, %c0_6] : memref<2x5x16xf32, #tpu.memory_space<vmem>>, vector<1x5x16xf32>
    %5 = vector.shape_cast %4 : vector<1x5x16xf32> to vector<5x16xf32>
    %6 = vector.extract_strided_slice %1 {offsets = [0, 0], sizes = [159, 5], strides = [1, 1]} : vector<160x5xf32> to vector<159x5xf32>
    %cst = arith.constant dense<0.000000e+00> : vector<159x16xf32>
    %7 = tpu.matmul %6, %3, %cst {dimension_numbers = #tpu.dot_dimension_numbers<[1], [0], [0], [1], [0, 0, 1, 1], [], []>} : vector<159x5xf32>, vector<5x16xf32>, vector<159x16xf32> -> vector<159x16xf32>
    %8 = vector.extract_strided_slice %1 {offsets = [1, 0], sizes = [159, 5], strides = [1, 1]} : vector<160x5xf32> to vector<159x5xf32>
    %cst_7 = arith.constant dense<0.000000e+00> : vector<159x16xf32>
    %9 = tpu.matmul %8, %5, %cst_7 {dimension_numbers = #tpu.dot_dimension_numbers<[1], [0], [0], [1], [0, 0, 1, 1], [], []>} : vector<159x5xf32>, vector<5x16xf32>, vector<159x16xf32> -> vector<159x16xf32>
    %10 = arith.addf %7, %9 : vector<159x16xf32>
    %cst_8 = arith.constant dense<0.000000e+00> : vector<16xf32>
    %11 = vector.multi_reduction <add>, %10, %cst_8 [0] : vector<159x16xf32> to vector<16xf32>
    %12 = vector.shape_cast %11 : vector<16xf32> to vector<1x16xf32>
    %cst_9 = arith.constant 1.590000e+02 : f32
    %13 = vector.broadcast %cst_9 : f32 to vector<1x16xf32>
    %14 = arith.divf %12, %13 : vector<1x16xf32>
    %15 = vector.broadcast %14 : vector<1x16xf32> to vector<159x16xf32>
    %16 = arith.subf %10, %15 : vector<159x16xf32>
    %17 = arith.mulf %16, %16 : vector<159x16xf32>
    %cst_10 = arith.constant dense<0.000000e+00> : vector<16xf32>
    %18 = vector.multi_reduction <add>, %17, %cst_10 [0] : vector<159x16xf32> to vector<16xf32>
    %19 = vector.shape_cast %18 : vector<16xf32> to vector<1x16xf32>
    %cst_11 = arith.constant 1.590000e+02 : f32
    %20 = vector.broadcast %cst_11 : f32 to vector<1x16xf32>
    %21 = arith.divf %19, %20 : vector<1x16xf32>
    %22 = vector.broadcast %14 : vector<1x16xf32> to vector<159x16xf32>
    %23 = arith.subf %10, %22 : vector<159x16xf32>
    %cst_12 = arith.constant 9.99999974E-6 : f32
    %24 = vector.broadcast %cst_12 : f32 to vector<1x16xf32>
    %25 = arith.addf %21, %24 : vector<1x16xf32>
    %26 = math.rsqrt %25 : vector<1x16xf32>
    %27 = vector.broadcast %26 : vector<1x16xf32> to vector<159x16xf32>
    %28 = arith.mulf %23, %27 : vector<159x16xf32>
    %c0_13 = arith.constant 0 : index
    %c0_14 = arith.constant 0 : index
    %29 = vector.load %arg3[%c0_13, %c0_14] : memref<1x16xf32, #tpu.memory_space<vmem>>, vector<1x16xf32>
    %30 = vector.broadcast %29 : vector<1x16xf32> to vector<159x16xf32>
    %31 = arith.mulf %28, %30 : vector<159x16xf32>
    %c0_15 = arith.constant 0 : index
    %c0_16 = arith.constant 0 : index
    %32 = vector.load %arg4[%c0_15, %c0_16] : memref<1x16xf32, #tpu.memory_space<vmem>>, vector<1x16xf32>
    %33 = vector.broadcast %32 : vector<1x16xf32> to vector<159x16xf32>
    %34 = arith.addf %31, %33 : vector<159x16xf32>
    %35 = arith.mulf %34, %34 : vector<159x16xf32>
    %36 = arith.mulf %34, %35 : vector<159x16xf32>
    %cst_17 = arith.constant 4.471500e-02 : f32
    %37 = vector.broadcast %cst_17 : f32 to vector<159x16xf32>
    %38 = arith.mulf %37, %36 : vector<159x16xf32>
    %39 = arith.addf %34, %38 : vector<159x16xf32>
    %cst_18 = arith.constant 0.797884583 : f32
    %40 = vector.broadcast %cst_18 : f32 to vector<159x16xf32>
    %41 = arith.mulf %40, %39 : vector<159x16xf32>
    %42 = math.tanh %41 : vector<159x16xf32>
    %cst_19 = arith.constant 1.000000e+00 : f32
    %43 = vector.broadcast %cst_19 : f32 to vector<159x16xf32>
    %44 = arith.addf %43, %42 : vector<159x16xf32>
    %cst_20 = arith.constant 5.000000e-01 : f32
    %45 = vector.broadcast %cst_20 : f32 to vector<159x16xf32>
    %46 = arith.mulf %45, %44 : vector<159x16xf32>
    %47 = arith.mulf %34, %46 : vector<159x16xf32>
    %c0_21 = arith.constant 0 : index
    %c0_22 = arith.constant 0 : index
    %c0_23 = arith.constant 0 : index
    %48 = vector.load %arg5[%c0_21, %c0_22, %c0_23] : memref<1x159x16xf32, #tpu.memory_space<vmem>>, vector<1x159x16xf32>
    %49 = vector.shape_cast %48 : vector<1x159x16xf32> to vector<159x16xf32>
    %50 = vector.shape_cast %47 : vector<159x16xf32> to vector<1x159x16xf32>
    tpu.vector_store %arg5[%c0_21, %c0_22, %c0_23], %50 {strides = array<i32>} : memref<1x159x16xf32, #tpu.memory_space<vmem>>, vector<1x159x16xf32>,
    return
  }
  func.func @transform_0(%arg0: i32) -> (i32, i32, i32) {
    %c0_i32 = arith.constant 0 : i32
    %c0_i32_0 = arith.constant 0 : i32
    %c0_i32_1 = arith.constant 0 : i32
    return %arg0, %c0_i32, %c0_i32_0 : i32, i32, i32
  }
  func.func @transform_1(%arg0: i32) -> (i32, i32, i32) {
    %c0_i32 = arith.constant 0 : i32
    %c0_i32_0 = arith.constant 0 : i32
    %c0_i32_1 = arith.constant 0 : i32
    %c0_i32_2 = arith.constant 0 : i32
    return %c0_i32, %c0_i32_0, %c0_i32_1 : i32, i32, i32
  }
  func.func @transform_2(%arg0: i32) -> (i32, i32) {
    %c0_i32 = arith.constant 0 : i32
    %c0_i32_0 = arith.constant 0 : i32
    %c0_i32_1 = arith.constant 0 : i32
    return %c0_i32, %c0_i32_0 : i32, i32
  }
  func.func @transform_3(%arg0: i32) -> (i32, i32) {
    %c0_i32 = arith.constant 0 : i32
    %c0_i32_0 = arith.constant 0 : i32
    %c0_i32_1 = arith.constant 0 : i32
    return %c0_i32, %c0_i32_0 : i32, i32
  }
  func.func @transform_4(%arg0: i32) -> (i32, i32, i32) {
    %c0_i32 = arith.constant 0 : i32
    %c0_i32_0 = arith.constant 0 : i32
    %c0_i32_1 = arith.constant 0 : i32
    return %arg0, %c0_i32, %c0_i32_0 : i32, i32, i32
  }
}

module attributes {stable_mosaic.version = 11 : i64} {
  func.func @_fe_stage2_kernel(%arg0: i32, %arg1: memref<1x79x48xf32, #tpu.memory_space<vmem>>, %arg2: memref<48x32xf32, #tpu.memory_space<vmem>>, %arg3: memref<1x32xf32, #tpu.memory_space<vmem>>, %arg4: memref<1x32xf32, #tpu.memory_space<vmem>>, %arg5: memref<32x32xf32, #tpu.memory_space<vmem>>, %arg6: memref<1x32xf32, #tpu.memory_space<vmem>>, %arg7: memref<1x79x32xf32, #tpu.memory_space<vmem>>) attributes {dimension_semantics = [#tpu.dimension_semantics<parallel>], iteration_bounds = array<i64: 2>, scalar_prefetch = 0 : i64, scratch_operands = 0 : i64, tpu.core_type = #tpu.core_type<tc>, window_params = [{transform_indices = @transform_0, window_bounds = array<i64: 1, 79, 48>}, {pipeline_mode = #tpu.pipeline_mode<synchronous>, transform_indices = @transform_1, window_bounds = array<i64: 48, 32>}, {pipeline_mode = #tpu.pipeline_mode<synchronous>, transform_indices = @transform_2, window_bounds = array<i64: 1, 32>}, {pipeline_mode = #tpu.pipeline_mode<synchronous>, transform_indices = @transform_3, window_bounds = array<i64: 1, 32>}, {pipeline_mode = #tpu.pipeline_mode<synchronous>, transform_indices = @transform_4, window_bounds = array<i64: 32, 32>}, {pipeline_mode = #tpu.pipeline_mode<synchronous>, transform_indices = @transform_5, window_bounds = array<i64: 1, 32>}, {transform_indices = @transform_6, window_bounds = array<i64: 1, 79, 32>}]} {
    %c0 = arith.constant 0 : index
    %c0_0 = arith.constant 0 : index
    %c0_1 = arith.constant 0 : index
    %0 = vector.load %arg1[%c0, %c0_0, %c0_1] : memref<1x79x48xf32, #tpu.memory_space<vmem>>, vector<1x79x48xf32>
    %1 = vector.shape_cast %0 : vector<1x79x48xf32> to vector<79x48xf32>
    %c0_2 = arith.constant 0 : index
    %c0_3 = arith.constant 0 : index
    %2 = vector.load %arg2[%c0_2, %c0_3] : memref<48x32xf32, #tpu.memory_space<vmem>>, vector<48x32xf32>
    %cst = arith.constant dense<0.000000e+00> : vector<79x32xf32>
    %3 = tpu.matmul %1, %2, %cst {dimension_numbers = #tpu.dot_dimension_numbers<[1], [0], [0], [1], [0, 0, 1, 1], [], []>} : vector<79x48xf32>, vector<48x32xf32>, vector<79x32xf32> -> vector<79x32xf32>
    %4 = arith.mulf %3, %3 : vector<79x32xf32>
    %5 = arith.mulf %3, %4 : vector<79x32xf32>
    %cst_4 = arith.constant 4.471500e-02 : f32
    %6 = vector.broadcast %cst_4 : f32 to vector<79x32xf32>
    %7 = arith.mulf %6, %5 : vector<79x32xf32>
    %8 = arith.addf %3, %7 : vector<79x32xf32>
    %cst_5 = arith.constant 0.797884583 : f32
    %9 = vector.broadcast %cst_5 : f32 to vector<79x32xf32>
    %10 = arith.mulf %9, %8 : vector<79x32xf32>
    %11 = math.tanh %10 : vector<79x32xf32>
    %cst_6 = arith.constant 1.000000e+00 : f32
    %12 = vector.broadcast %cst_6 : f32 to vector<79x32xf32>
    %13 = arith.addf %12, %11 : vector<79x32xf32>
    %cst_7 = arith.constant 5.000000e-01 : f32
    %14 = vector.broadcast %cst_7 : f32 to vector<79x32xf32>
    %15 = arith.mulf %14, %13 : vector<79x32xf32>
    %16 = arith.mulf %3, %15 : vector<79x32xf32>
    %cst_8 = arith.constant dense<0.000000e+00> : vector<79xf32>
    %17 = vector.multi_reduction <add>, %16, %cst_8 [1] : vector<79x32xf32> to vector<79xf32>
    %18 = vector.shape_cast %17 : vector<79xf32> to vector<79x1xf32>
    %cst_9 = arith.constant 3.200000e+01 : f32
    %19 = vector.broadcast %cst_9 : f32 to vector<79x1xf32>
    %20 = arith.divf %18, %19 : vector<79x1xf32>
    %21 = vector.broadcast %20 : vector<79x1xf32> to vector<79x32xf32>
    %22 = arith.subf %16, %21 : vector<79x32xf32>
    %23 = arith.mulf %22, %22 : vector<79x32xf32>
    %cst_10 = arith.constant dense<0.000000e+00> : vector<79xf32>
    %24 = vector.multi_reduction <add>, %23, %cst_10 [1] : vector<79x32xf32> to vector<79xf32>
    %25 = vector.shape_cast %24 : vector<79xf32> to vector<79x1xf32>
    %cst_11 = arith.constant 3.200000e+01 : f32
    %26 = vector.broadcast %cst_11 : f32 to vector<79x1xf32>
    %27 = arith.divf %25, %26 : vector<79x1xf32>
    %28 = vector.broadcast %20 : vector<79x1xf32> to vector<79x32xf32>
    %29 = arith.subf %16, %28 : vector<79x32xf32>
    %cst_12 = arith.constant 9.99999974E-6 : f32
    %30 = vector.broadcast %cst_12 : f32 to vector<79x1xf32>
    %31 = arith.addf %27, %30 : vector<79x1xf32>
    %32 = math.rsqrt %31 : vector<79x1xf32>
    %33 = vector.broadcast %32 : vector<79x1xf32> to vector<79x32xf32>
    %34 = arith.mulf %29, %33 : vector<79x32xf32>
    %c0_13 = arith.constant 0 : index
    %c0_14 = arith.constant 0 : index
    %35 = vector.load %arg3[%c0_13, %c0_14] : memref<1x32xf32, #tpu.memory_space<vmem>>, vector<1x32xf32>
    %36 = vector.broadcast %35 : vector<1x32xf32> to vector<79x32xf32>
    %37 = arith.mulf %34, %36 : vector<79x32xf32>
    %c0_15 = arith.constant 0 : index
    %c0_16 = arith.constant 0 : index
    %38 = vector.load %arg4[%c0_15, %c0_16] : memref<1x32xf32, #tpu.memory_space<vmem>>, vector<1x32xf32>
    %39 = vector.broadcast %38 : vector<1x32xf32> to vector<79x32xf32>
    %40 = arith.addf %37, %39 : vector<79x32xf32>
    %c0_17 = arith.constant 0 : index
    %c0_18 = arith.constant 0 : index
    %41 = vector.load %arg5[%c0_17, %c0_18] : memref<32x32xf32, #tpu.memory_space<vmem>>, vector<32x32xf32>
    %cst_19 = arith.constant dense<0.000000e+00> : vector<79x32xf32>
    %42 = tpu.matmul %40, %41, %cst_19 {dimension_numbers = #tpu.dot_dimension_numbers<[1], [0], [0], [1], [0, 0, 1, 1], [], []>} : vector<79x32xf32>, vector<32x32xf32>, vector<79x32xf32> -> vector<79x32xf32>
    %c0_20 = arith.constant 0 : index
    %c0_21 = arith.constant 0 : index
    %43 = vector.load %arg6[%c0_20, %c0_21] : memref<1x32xf32, #tpu.memory_space<vmem>>, vector<1x32xf32>
    %44 = vector.broadcast %43 : vector<1x32xf32> to vector<79x32xf32>
    %45 = arith.addf %42, %44 : vector<79x32xf32>
    %c0_22 = arith.constant 0 : index
    %c0_23 = arith.constant 0 : index
    %c0_24 = arith.constant 0 : index
    %46 = vector.load %arg7[%c0_22, %c0_23, %c0_24] : memref<1x79x32xf32, #tpu.memory_space<vmem>>, vector<1x79x32xf32>
    %47 = vector.shape_cast %46 : vector<1x79x32xf32> to vector<79x32xf32>
    %48 = vector.shape_cast %45 : vector<79x32xf32> to vector<1x79x32xf32>
    tpu.vector_store %arg7[%c0_22, %c0_23, %c0_24], %48 {strides = array<i32>} : memref<1x79x32xf32, #tpu.memory_space<vmem>>, vector<1x79x32xf32>,
    return
  }
  func.func @transform_0(%arg0: i32) -> (i32, i32, i32) {
    %c0_i32 = arith.constant 0 : i32
    %c0_i32_0 = arith.constant 0 : i32
    %c0_i32_1 = arith.constant 0 : i32
    return %arg0, %c0_i32, %c0_i32_0 : i32, i32, i32
  }
  func.func @transform_1(%arg0: i32) -> (i32, i32) {
    %c0_i32 = arith.constant 0 : i32
    %c0_i32_0 = arith.constant 0 : i32
    %c0_i32_1 = arith.constant 0 : i32
    return %c0_i32, %c0_i32_0 : i32, i32
  }
  func.func @transform_2(%arg0: i32) -> (i32, i32) {
    %c0_i32 = arith.constant 0 : i32
    %c0_i32_0 = arith.constant 0 : i32
    %c0_i32_1 = arith.constant 0 : i32
    return %c0_i32, %c0_i32_0 : i32, i32
  }
  func.func @transform_3(%arg0: i32) -> (i32, i32) {
    %c0_i32 = arith.constant 0 : i32
    %c0_i32_0 = arith.constant 0 : i32
    %c0_i32_1 = arith.constant 0 : i32
    return %c0_i32, %c0_i32_0 : i32, i32
  }
  func.func @transform_4(%arg0: i32) -> (i32, i32) {
    %c0_i32 = arith.constant 0 : i32
    %c0_i32_0 = arith.constant 0 : i32
    %c0_i32_1 = arith.constant 0 : i32
    return %c0_i32, %c0_i32_0 : i32, i32
  }
  func.func @transform_5(%arg0: i32) -> (i32, i32) {
    %c0_i32 = arith.constant 0 : i32
    %c0_i32_0 = arith.constant 0 : i32
    %c0_i32_1 = arith.constant 0 : i32
    return %c0_i32, %c0_i32_0 : i32, i32
  }
  func.func @transform_6(%arg0: i32) -> (i32, i32, i32) {
    %c0_i32 = arith.constant 0 : i32
    %c0_i32_0 = arith.constant 0 : i32
    %c0_i32_1 = arith.constant 0 : i32
    return %arg0, %c0_i32, %c0_i32_0 : i32, i32, i32
  }
}

module attributes {stable_mosaic.version = 11 : i64} {
  func.func @_pos_encoder_kernel(%arg0: i32, %arg1: memref<1x83x32xf32, #tpu.memory_space<vmem>>, %arg2: memref<4x32x32xf32, #tpu.memory_space<vmem>>, %arg3: memref<1x32xf32, #tpu.memory_space<vmem>>, %arg4: memref<1x32xf32, #tpu.memory_space<vmem>>, %arg5: memref<1x32xf32, #tpu.memory_space<vmem>>, %arg6: memref<1x79x32xf32, #tpu.memory_space<vmem>>) attributes {dimension_semantics = [#tpu.dimension_semantics<parallel>], iteration_bounds = array<i64: 2>, scalar_prefetch = 0 : i64, scratch_operands = 0 : i64, tpu.core_type = #tpu.core_type<tc>, window_params = [{transform_indices = @transform_0, window_bounds = array<i64: 1, 83, 32>}, {pipeline_mode = #tpu.pipeline_mode<synchronous>, transform_indices = @transform_1, window_bounds = array<i64: 4, 32, 32>}, {pipeline_mode = #tpu.pipeline_mode<synchronous>, transform_indices = @transform_2, window_bounds = array<i64: 1, 32>}, {pipeline_mode = #tpu.pipeline_mode<synchronous>, transform_indices = @transform_3, window_bounds = array<i64: 1, 32>}, {pipeline_mode = #tpu.pipeline_mode<synchronous>, transform_indices = @transform_4, window_bounds = array<i64: 1, 32>}, {transform_indices = @transform_5, window_bounds = array<i64: 1, 79, 32>}]} {
    %c0 = arith.constant 0 : index
    %c0_0 = arith.constant 0 : index
    %c0_1 = arith.constant 0 : index
    %0 = vector.load %arg1[%c0, %c0_0, %c0_1] : memref<1x83x32xf32, #tpu.memory_space<vmem>>, vector<1x83x32xf32>
    %1 = vector.shape_cast %0 : vector<1x83x32xf32> to vector<83x32xf32>
    %2 = vector.extract_strided_slice %1 {offsets = [2, 0], sizes = [79, 32], strides = [1, 1]} : vector<83x32xf32> to vector<79x32xf32>
    %3 = vector.extract_strided_slice %1 {offsets = [0, 0], sizes = [79, 32], strides = [1, 1]} : vector<83x32xf32> to vector<79x32xf32>
    %c0_2 = arith.constant 0 : index
    %c0_3 = arith.constant 0 : index
    %c0_4 = arith.constant 0 : index
    %4 = vector.load %arg2[%c0_2, %c0_3, %c0_4] : memref<4x32x32xf32, #tpu.memory_space<vmem>>, vector<1x32x32xf32>
    %5 = vector.shape_cast %4 : vector<1x32x32xf32> to vector<32x32xf32>
    %cst = arith.constant dense<0.000000e+00> : vector<79x32xf32>
    %6 = tpu.matmul %3, %5, %cst {dimension_numbers = #tpu.dot_dimension_numbers<[1], [0], [0], [1], [0, 0, 1, 1], [], []>} : vector<79x32xf32>, vector<32x32xf32>, vector<79x32xf32> -> vector<79x32xf32>
    %7 = vector.extract_strided_slice %1 {offsets = [1, 0], sizes = [79, 32], strides = [1, 1]} : vector<83x32xf32> to vector<79x32xf32>
    %c1 = arith.constant 1 : index
    %c0_5 = arith.constant 0 : index
    %c0_6 = arith.constant 0 : index
    %8 = vector.load %arg2[%c1, %c0_5, %c0_6] : memref<4x32x32xf32, #tpu.memory_space<vmem>>, vector<1x32x32xf32>
    %9 = vector.shape_cast %8 : vector<1x32x32xf32> to vector<32x32xf32>
    %cst_7 = arith.constant dense<0.000000e+00> : vector<79x32xf32>
    %10 = tpu.matmul %7, %9, %cst_7 {dimension_numbers = #tpu.dot_dimension_numbers<[1], [0], [0], [1], [0, 0, 1, 1], [], []>} : vector<79x32xf32>, vector<32x32xf32>, vector<79x32xf32> -> vector<79x32xf32>
    %11 = arith.addf %6, %10 : vector<79x32xf32>
    %12 = vector.extract_strided_slice %1 {offsets = [2, 0], sizes = [79, 32], strides = [1, 1]} : vector<83x32xf32> to vector<79x32xf32>
    %c2 = arith.constant 2 : index
    %c0_8 = arith.constant 0 : index
    %c0_9 = arith.constant 0 : index
    %13 = vector.load %arg2[%c2, %c0_8, %c0_9] : memref<4x32x32xf32, #tpu.memory_space<vmem>>, vector<1x32x32xf32>
    %14 = vector.shape_cast %13 : vector<1x32x32xf32> to vector<32x32xf32>
    %cst_10 = arith.constant dense<0.000000e+00> : vector<79x32xf32>
    %15 = tpu.matmul %12, %14, %cst_10 {dimension_numbers = #tpu.dot_dimension_numbers<[1], [0], [0], [1], [0, 0, 1, 1], [], []>} : vector<79x32xf32>, vector<32x32xf32>, vector<79x32xf32> -> vector<79x32xf32>
    %16 = arith.addf %11, %15 : vector<79x32xf32>
    %17 = vector.extract_strided_slice %1 {offsets = [3, 0], sizes = [79, 32], strides = [1, 1]} : vector<83x32xf32> to vector<79x32xf32>
    %c3 = arith.constant 3 : index
    %c0_11 = arith.constant 0 : index
    %c0_12 = arith.constant 0 : index
    %18 = vector.load %arg2[%c3, %c0_11, %c0_12] : memref<4x32x32xf32, #tpu.memory_space<vmem>>, vector<1x32x32xf32>
    %19 = vector.shape_cast %18 : vector<1x32x32xf32> to vector<32x32xf32>
    %cst_13 = arith.constant dense<0.000000e+00> : vector<79x32xf32>
    %20 = tpu.matmul %17, %19, %cst_13 {dimension_numbers = #tpu.dot_dimension_numbers<[1], [0], [0], [1], [0, 0, 1, 1], [], []>} : vector<79x32xf32>, vector<32x32xf32>, vector<79x32xf32> -> vector<79x32xf32>
    %21 = arith.addf %16, %20 : vector<79x32xf32>
    %c0_14 = arith.constant 0 : index
    %c0_15 = arith.constant 0 : index
    %22 = vector.load %arg3[%c0_14, %c0_15] : memref<1x32xf32, #tpu.memory_space<vmem>>, vector<1x32xf32>
    %23 = vector.broadcast %22 : vector<1x32xf32> to vector<79x32xf32>
    %24 = arith.addf %21, %23 : vector<79x32xf32>
    %25 = arith.mulf %24, %24 : vector<79x32xf32>
    %26 = arith.mulf %24, %25 : vector<79x32xf32>
    %cst_16 = arith.constant 4.471500e-02 : f32
    %27 = vector.broadcast %cst_16 : f32 to vector<79x32xf32>
    %28 = arith.mulf %27, %26 : vector<79x32xf32>
    %29 = arith.addf %24, %28 : vector<79x32xf32>
    %cst_17 = arith.constant 0.797884583 : f32
    %30 = vector.broadcast %cst_17 : f32 to vector<79x32xf32>
    %31 = arith.mulf %30, %29 : vector<79x32xf32>
    %32 = math.tanh %31 : vector<79x32xf32>
    %cst_18 = arith.constant 1.000000e+00 : f32
    %33 = vector.broadcast %cst_18 : f32 to vector<79x32xf32>
    %34 = arith.addf %33, %32 : vector<79x32xf32>
    %cst_19 = arith.constant 5.000000e-01 : f32
    %35 = vector.broadcast %cst_19 : f32 to vector<79x32xf32>
    %36 = arith.mulf %35, %34 : vector<79x32xf32>
    %37 = arith.mulf %24, %36 : vector<79x32xf32>
    %38 = arith.addf %2, %37 : vector<79x32xf32>
    %cst_20 = arith.constant dense<0.000000e+00> : vector<79xf32>
    %39 = vector.multi_reduction <add>, %38, %cst_20 [1] : vector<79x32xf32> to vector<79xf32>
    %40 = vector.shape_cast %39 : vector<79xf32> to vector<79x1xf32>
    %cst_21 = arith.constant 3.200000e+01 : f32
    %41 = vector.broadcast %cst_21 : f32 to vector<79x1xf32>
    %42 = arith.divf %40, %41 : vector<79x1xf32>
    %43 = vector.broadcast %42 : vector<79x1xf32> to vector<79x32xf32>
    %44 = arith.subf %38, %43 : vector<79x32xf32>
    %45 = arith.mulf %44, %44 : vector<79x32xf32>
    %cst_22 = arith.constant dense<0.000000e+00> : vector<79xf32>
    %46 = vector.multi_reduction <add>, %45, %cst_22 [1] : vector<79x32xf32> to vector<79xf32>
    %47 = vector.shape_cast %46 : vector<79xf32> to vector<79x1xf32>
    %cst_23 = arith.constant 3.200000e+01 : f32
    %48 = vector.broadcast %cst_23 : f32 to vector<79x1xf32>
    %49 = arith.divf %47, %48 : vector<79x1xf32>
    %50 = vector.broadcast %42 : vector<79x1xf32> to vector<79x32xf32>
    %51 = arith.subf %38, %50 : vector<79x32xf32>
    %cst_24 = arith.constant 9.99999974E-6 : f32
    %52 = vector.broadcast %cst_24 : f32 to vector<79x1xf32>
    %53 = arith.addf %49, %52 : vector<79x1xf32>
    %54 = math.rsqrt %53 : vector<79x1xf32>
    %55 = vector.broadcast %54 : vector<79x1xf32> to vector<79x32xf32>
    %56 = arith.mulf %51, %55 : vector<79x32xf32>
    %c0_25 = arith.constant 0 : index
    %c0_26 = arith.constant 0 : index
    %57 = vector.load %arg4[%c0_25, %c0_26] : memref<1x32xf32, #tpu.memory_space<vmem>>, vector<1x32xf32>
    %58 = vector.broadcast %57 : vector<1x32xf32> to vector<79x32xf32>
    %59 = arith.mulf %56, %58 : vector<79x32xf32>
    %c0_27 = arith.constant 0 : index
    %c0_28 = arith.constant 0 : index
    %60 = vector.load %arg5[%c0_27, %c0_28] : memref<1x32xf32, #tpu.memory_space<vmem>>, vector<1x32xf32>
    %61 = vector.broadcast %60 : vector<1x32xf32> to vector<79x32xf32>
    %62 = arith.addf %59, %61 : vector<79x32xf32>
    %c0_29 = arith.constant 0 : index
    %c0_30 = arith.constant 0 : index
    %c0_31 = arith.constant 0 : index
    %63 = vector.load %arg6[%c0_29, %c0_30, %c0_31] : memref<1x79x32xf32, #tpu.memory_space<vmem>>, vector<1x79x32xf32>
    %64 = vector.shape_cast %63 : vector<1x79x32xf32> to vector<79x32xf32>
    %65 = vector.shape_cast %62 : vector<79x32xf32> to vector<1x79x32xf32>
    tpu.vector_store %arg6[%c0_29, %c0_30, %c0_31], %65 {strides = array<i32>} : memref<1x79x32xf32, #tpu.memory_space<vmem>>, vector<1x79x32xf32>,
    return
  }
  func.func @transform_0(%arg0: i32) -> (i32, i32, i32) {
    %c0_i32 = arith.constant 0 : i32
    %c0_i32_0 = arith.constant 0 : i32
    %c0_i32_1 = arith.constant 0 : i32
    return %arg0, %c0_i32, %c0_i32_0 : i32, i32, i32
  }
  func.func @transform_1(%arg0: i32) -> (i32, i32, i32) {
    %c0_i32 = arith.constant 0 : i32
    %c0_i32_0 = arith.constant 0 : i32
    %c0_i32_1 = arith.constant 0 : i32
    %c0_i32_2 = arith.constant 0 : i32
    return %c0_i32, %c0_i32_0, %c0_i32_1 : i32, i32, i32
  }
  func.func @transform_2(%arg0: i32) -> (i32, i32) {
    %c0_i32 = arith.constant 0 : i32
    %c0_i32_0 = arith.constant 0 : i32
    %c0_i32_1 = arith.constant 0 : i32
    return %c0_i32, %c0_i32_0 : i32, i32
  }
  func.func @transform_3(%arg0: i32) -> (i32, i32) {
    %c0_i32 = arith.constant 0 : i32
    %c0_i32_0 = arith.constant 0 : i32
    %c0_i32_1 = arith.constant 0 : i32
    return %c0_i32, %c0_i32_0 : i32, i32
  }
  func.func @transform_4(%arg0: i32) -> (i32, i32) {
    %c0_i32 = arith.constant 0 : i32
    %c0_i32_0 = arith.constant 0 : i32
    %c0_i32_1 = arith.constant 0 : i32
    return %c0_i32, %c0_i32_0 : i32, i32
  }
  func.func @transform_5(%arg0: i32) -> (i32, i32, i32) {
    %c0_i32 = arith.constant 0 : i32
    %c0_i32_0 = arith.constant 0 : i32
    %c0_i32_1 = arith.constant 0 : i32
    return %arg0, %c0_i32, %c0_i32_0 : i32, i32, i32
  }
}

module attributes {stable_mosaic.version = 11 : i64} {
  func.func @_transformer_head_kernel(%arg0: i32, %arg1: memref<2x79x32xf32, #tpu.memory_space<vmem>>, %arg2: memref<1x32x96xf32, #tpu.memory_space<vmem>>, %arg3: memref<1x1x96xf32, #tpu.memory_space<vmem>>, %arg4: memref<1x32x32xf32, #tpu.memory_space<vmem>>, %arg5: memref<1x1x32xf32, #tpu.memory_space<vmem>>, %arg6: memref<1x1x32xf32, #tpu.memory_space<vmem>>, %arg7: memref<1x1x32xf32, #tpu.memory_space<vmem>>, %arg8: memref<1x32x64xf32, #tpu.memory_space<vmem>>, %arg9: memref<1x1x64xf32, #tpu.memory_space<vmem>>, %arg10: memref<1x64x32xf32, #tpu.memory_space<vmem>>, %arg11: memref<1x1x32xf32, #tpu.memory_space<vmem>>, %arg12: memref<1x1x32xf32, #tpu.memory_space<vmem>>, %arg13: memref<1x1x32xf32, #tpu.memory_space<vmem>>, %arg14: memref<32x16xf32, #tpu.memory_space<vmem>>, %arg15: memref<1x16xf32, #tpu.memory_space<vmem>>, %arg16: memref<16x2xf32, #tpu.memory_space<vmem>>, %arg17: memref<1x2xf32, #tpu.memory_space<vmem>>, %arg18: memref<2x2xf32, #tpu.memory_space<vmem>>, %arg19: memref<2x79x32xf32, #tpu.memory_space<vmem>>) attributes {dimension_semantics = [#tpu.dimension_semantics<arbitrary>], iteration_bounds = array<i64: 2>, scalar_prefetch = 0 : i64, scratch_operands = 1 : i64, tpu.core_type = #tpu.core_type<tc>, window_params = [{pipeline_mode = #tpu.pipeline_mode<synchronous>, transform_indices = @transform_0, window_bounds = array<i64: 2, 79, 32>}, {transform_indices = @transform_1, window_bounds = array<i64: 1, 32, 96>}, {transform_indices = @transform_2, window_bounds = array<i64: 1, 1, 96>}, {transform_indices = @transform_3, window_bounds = array<i64: 1, 32, 32>}, {transform_indices = @transform_4, window_bounds = array<i64: 1, 1, 32>}, {transform_indices = @transform_5, window_bounds = array<i64: 1, 1, 32>}, {transform_indices = @transform_6, window_bounds = array<i64: 1, 1, 32>}, {transform_indices = @transform_7, window_bounds = array<i64: 1, 32, 64>}, {transform_indices = @transform_8, window_bounds = array<i64: 1, 1, 64>}, {transform_indices = @transform_9, window_bounds = array<i64: 1, 64, 32>}, {transform_indices = @transform_10, window_bounds = array<i64: 1, 1, 32>}, {transform_indices = @transform_11, window_bounds = array<i64: 1, 1, 32>}, {transform_indices = @transform_12, window_bounds = array<i64: 1, 1, 32>}, {pipeline_mode = #tpu.pipeline_mode<synchronous>, transform_indices = @transform_13, window_bounds = array<i64: 32, 16>}, {pipeline_mode = #tpu.pipeline_mode<synchronous>, transform_indices = @transform_14, window_bounds = array<i64: 1, 16>}, {pipeline_mode = #tpu.pipeline_mode<synchronous>, transform_indices = @transform_15, window_bounds = array<i64: 16, 2>}, {pipeline_mode = #tpu.pipeline_mode<synchronous>, transform_indices = @transform_16, window_bounds = array<i64: 1, 2>}, {pipeline_mode = #tpu.pipeline_mode<synchronous>, transform_indices = @transform_17, window_bounds = array<i64: 2, 2>}]} {
    %c0_i32 = arith.constant 0 : i32
    %0 = arith.cmpi eq, %arg0, %c0_i32 : i32
    %1 = arith.extui %0 : i1 to i32
    %c0_i32_0 = arith.constant 0 : i32
    %2 = arith.cmpi ne, %1, %c0_i32_0 : i32
    scf.if %2 {
      %c0_129 = arith.constant 0 : index
      %c0_130 = arith.constant 0 : index
      %c0_131 = arith.constant 0 : index
      %338 = vector.load %arg1[%c0_129, %c0_130, %c0_131] : memref<2x79x32xf32, #tpu.memory_space<vmem>>, vector<2x79x32xf32>
      %c0_132 = arith.constant 0 : index
      %c0_133 = arith.constant 0 : index
      %c0_134 = arith.constant 0 : index
      %339 = vector.load %arg19[%c0_132, %c0_133, %c0_134] : memref<2x79x32xf32, #tpu.memory_space<vmem>>, vector<2x79x32xf32>
      tpu.vector_store %arg19[%c0_132, %c0_133, %c0_134], %338 {strides = array<i32>} : memref<2x79x32xf32, #tpu.memory_space<vmem>>, vector<2x79x32xf32>,
    } else {
    }
    %c0 = arith.constant 0 : index
    %c0_1 = arith.constant 0 : index
    %c0_2 = arith.constant 0 : index
    %3 = vector.load %arg2[%c0, %c0_1, %c0_2] : memref<1x32x96xf32, #tpu.memory_space<vmem>>, vector<1x32x96xf32>
    %4 = vector.shape_cast %3 : vector<1x32x96xf32> to vector<32x96xf32>
    %c0_3 = arith.constant 0 : index
    %c0_4 = arith.constant 0 : index
    %c0_5 = arith.constant 0 : index
    %5 = vector.load %arg3[%c0_3, %c0_4, %c0_5] : memref<1x1x96xf32, #tpu.memory_space<vmem>>, vector<1x1x96xf32>
    %6 = vector.shape_cast %5 : vector<1x1x96xf32> to vector<1x96xf32>
    %c0_6 = arith.constant 0 : index
    %c0_7 = arith.constant 0 : index
    %c0_8 = arith.constant 0 : index
    %7 = vector.load %arg4[%c0_6, %c0_7, %c0_8] : memref<1x32x32xf32, #tpu.memory_space<vmem>>, vector<1x32x32xf32>
    %8 = vector.shape_cast %7 : vector<1x32x32xf32> to vector<32x32xf32>
    %c0_9 = arith.constant 0 : index
    %c0_10 = arith.constant 0 : index
    %c0_11 = arith.constant 0 : index
    %9 = vector.load %arg5[%c0_9, %c0_10, %c0_11] : memref<1x1x32xf32, #tpu.memory_space<vmem>>, vector<1x1x32xf32>
    %10 = vector.shape_cast %9 : vector<1x1x32xf32> to vector<1x32xf32>
    %c0_12 = arith.constant 0 : index
    %c0_13 = arith.constant 0 : index
    %c0_14 = arith.constant 0 : index
    %11 = vector.load %arg6[%c0_12, %c0_13, %c0_14] : memref<1x1x32xf32, #tpu.memory_space<vmem>>, vector<1x1x32xf32>
    %12 = vector.shape_cast %11 : vector<1x1x32xf32> to vector<1x32xf32>
    %c0_15 = arith.constant 0 : index
    %c0_16 = arith.constant 0 : index
    %c0_17 = arith.constant 0 : index
    %13 = vector.load %arg7[%c0_15, %c0_16, %c0_17] : memref<1x1x32xf32, #tpu.memory_space<vmem>>, vector<1x1x32xf32>
    %14 = vector.shape_cast %13 : vector<1x1x32xf32> to vector<1x32xf32>
    %c0_18 = arith.constant 0 : index
    %c0_19 = arith.constant 0 : index
    %c0_20 = arith.constant 0 : index
    %15 = vector.load %arg8[%c0_18, %c0_19, %c0_20] : memref<1x32x64xf32, #tpu.memory_space<vmem>>, vector<1x32x64xf32>
    %16 = vector.shape_cast %15 : vector<1x32x64xf32> to vector<32x64xf32>
    %c0_21 = arith.constant 0 : index
    %c0_22 = arith.constant 0 : index
    %c0_23 = arith.constant 0 : index
    %17 = vector.load %arg9[%c0_21, %c0_22, %c0_23] : memref<1x1x64xf32, #tpu.memory_space<vmem>>, vector<1x1x64xf32>
    %18 = vector.shape_cast %17 : vector<1x1x64xf32> to vector<1x64xf32>
    %c0_24 = arith.constant 0 : index
    %c0_25 = arith.constant 0 : index
    %c0_26 = arith.constant 0 : index
    %19 = vector.load %arg10[%c0_24, %c0_25, %c0_26] : memref<1x64x32xf32, #tpu.memory_space<vmem>>, vector<1x64x32xf32>
    %20 = vector.shape_cast %19 : vector<1x64x32xf32> to vector<64x32xf32>
    %c0_27 = arith.constant 0 : index
    %c0_28 = arith.constant 0 : index
    %c0_29 = arith.constant 0 : index
    %21 = vector.load %arg11[%c0_27, %c0_28, %c0_29] : memref<1x1x32xf32, #tpu.memory_space<vmem>>, vector<1x1x32xf32>
    %22 = vector.shape_cast %21 : vector<1x1x32xf32> to vector<1x32xf32>
    %c0_30 = arith.constant 0 : index
    %c0_31 = arith.constant 0 : index
    %c0_32 = arith.constant 0 : index
    %23 = vector.load %arg12[%c0_30, %c0_31, %c0_32] : memref<1x1x32xf32, #tpu.memory_space<vmem>>, vector<1x1x32xf32>
    %24 = vector.shape_cast %23 : vector<1x1x32xf32> to vector<1x32xf32>
    %c0_33 = arith.constant 0 : index
    %c0_34 = arith.constant 0 : index
    %c0_35 = arith.constant 0 : index
    %25 = vector.load %arg13[%c0_33, %c0_34, %c0_35] : memref<1x1x32xf32, #tpu.memory_space<vmem>>, vector<1x1x32xf32>
    %26 = vector.shape_cast %25 : vector<1x1x32xf32> to vector<1x32xf32>
    %c0_36 = arith.constant 0 : index
    %c0_37 = arith.constant 0 : index
    %c0_38 = arith.constant 0 : index
    %27 = vector.load %arg19[%c0_36, %c0_37, %c0_38] : memref<2x79x32xf32, #tpu.memory_space<vmem>>, vector<1x79x32xf32>
    %28 = vector.shape_cast %27 : vector<1x79x32xf32> to vector<79x32xf32>
    %cst = arith.constant dense<0.000000e+00> : vector<79x96xf32>
    %29 = tpu.matmul %28, %4, %cst {dimension_numbers = #tpu.dot_dimension_numbers<[1], [0], [0], [1], [0, 0, 1, 1], [], []>} : vector<79x32xf32>, vector<32x96xf32>, vector<79x96xf32> -> vector<79x96xf32>
    %30 = vector.broadcast %6 : vector<1x96xf32> to vector<79x96xf32>
    %31 = arith.addf %29, %30 : vector<79x96xf32>
    %32 = vector.extract_strided_slice %31 {offsets = [0, 0], sizes = [79, 8], strides = [1, 1]} : vector<79x96xf32> to vector<79x8xf32>
    %cst_39 = arith.constant 0.353553385 : f32
    %33 = vector.broadcast %cst_39 : f32 to vector<79x8xf32>
    %34 = arith.mulf %32, %33 : vector<79x8xf32>
    %35 = vector.extract_strided_slice %31 {offsets = [0, 32], sizes = [79, 8], strides = [1, 1]} : vector<79x96xf32> to vector<79x8xf32>
    %36 = vector.extract_strided_slice %31 {offsets = [0, 64], sizes = [79, 8], strides = [1, 1]} : vector<79x96xf32> to vector<79x8xf32>
    %cst_40 = arith.constant dense<0.000000e+00> : vector<79x79xf32>
    %37 = tpu.matmul %34, %35, %cst_40 {dimension_numbers = #tpu.dot_dimension_numbers<[1], [1], [0], [0], [0, 0, 1, 0], [], []>} : vector<79x8xf32>, vector<79x8xf32>, vector<79x79xf32> -> vector<79x79xf32>
    %cst_41 = arith.constant dense<0xFF800000> : vector<79xf32>
    %38 = vector.multi_reduction <maximumf>, %37, %cst_41 [1] : vector<79x79xf32> to vector<79xf32>
    %39 = vector.shape_cast %38 : vector<79xf32> to vector<79x1xf32>
    %40 = vector.broadcast %39 : vector<79x1xf32> to vector<79x79xf32>
    %41 = arith.subf %37, %40 : vector<79x79xf32>
    %42 = math.exp %41 : vector<79x79xf32>
    %cst_42 = arith.constant dense<0.000000e+00> : vector<79xf32>
    %43 = vector.multi_reduction <add>, %42, %cst_42 [1] : vector<79x79xf32> to vector<79xf32>
    %44 = vector.shape_cast %43 : vector<79xf32> to vector<79x1xf32>
    %45 = tpu.reciprocal %44 {approx = true} : vector<79x1xf32> -> vector<79x1xf32>
    %46 = vector.broadcast %45 : vector<79x1xf32> to vector<79x79xf32>
    %47 = arith.mulf %42, %46 : vector<79x79xf32>
    %cst_43 = arith.constant dense<0.000000e+00> : vector<79x8xf32>
    %48 = tpu.matmul %47, %36, %cst_43 {dimension_numbers = #tpu.dot_dimension_numbers<[1], [0], [0], [1], [0, 0, 1, 1], [], []>} : vector<79x79xf32>, vector<79x8xf32>, vector<79x8xf32> -> vector<79x8xf32>
    %49 = vector.extract_strided_slice %8 {offsets = [0, 0], sizes = [8, 32], strides = [1, 1]} : vector<32x32xf32> to vector<8x32xf32>
    %cst_44 = arith.constant dense<0.000000e+00> : vector<79x32xf32>
    %50 = tpu.matmul %48, %49, %cst_44 {dimension_numbers = #tpu.dot_dimension_numbers<[1], [0], [0], [1], [0, 0, 1, 1], [], []>} : vector<79x8xf32>, vector<8x32xf32>, vector<79x32xf32> -> vector<79x32xf32>
    %51 = vector.broadcast %10 : vector<1x32xf32> to vector<79x32xf32>
    %52 = arith.addf %51, %50 : vector<79x32xf32>
    %53 = vector.extract_strided_slice %31 {offsets = [0, 8], sizes = [79, 8], strides = [1, 1]} : vector<79x96xf32> to vector<79x8xf32>
    %cst_45 = arith.constant 0.353553385 : f32
    %54 = vector.broadcast %cst_45 : f32 to vector<79x8xf32>
    %55 = arith.mulf %53, %54 : vector<79x8xf32>
    %56 = vector.extract_strided_slice %31 {offsets = [0, 40], sizes = [79, 8], strides = [1, 1]} : vector<79x96xf32> to vector<79x8xf32>
    %57 = vector.extract_strided_slice %31 {offsets = [0, 72], sizes = [79, 8], strides = [1, 1]} : vector<79x96xf32> to vector<79x8xf32>
    %cst_46 = arith.constant dense<0.000000e+00> : vector<79x79xf32>
    %58 = tpu.matmul %55, %56, %cst_46 {dimension_numbers = #tpu.dot_dimension_numbers<[1], [1], [0], [0], [0, 0, 1, 0], [], []>} : vector<79x8xf32>, vector<79x8xf32>, vector<79x79xf32> -> vector<79x79xf32>
    %cst_47 = arith.constant dense<0xFF800000> : vector<79xf32>
    %59 = vector.multi_reduction <maximumf>, %58, %cst_47 [1] : vector<79x79xf32> to vector<79xf32>
    %60 = vector.shape_cast %59 : vector<79xf32> to vector<79x1xf32>
    %61 = vector.broadcast %60 : vector<79x1xf32> to vector<79x79xf32>
    %62 = arith.subf %58, %61 : vector<79x79xf32>
    %63 = math.exp %62 : vector<79x79xf32>
    %cst_48 = arith.constant dense<0.000000e+00> : vector<79xf32>
    %64 = vector.multi_reduction <add>, %63, %cst_48 [1] : vector<79x79xf32> to vector<79xf32>
    %65 = vector.shape_cast %64 : vector<79xf32> to vector<79x1xf32>
    %66 = tpu.reciprocal %65 {approx = true} : vector<79x1xf32> -> vector<79x1xf32>
    %67 = vector.broadcast %66 : vector<79x1xf32> to vector<79x79xf32>
    %68 = arith.mulf %63, %67 : vector<79x79xf32>
    %cst_49 = arith.constant dense<0.000000e+00> : vector<79x8xf32>
    %69 = tpu.matmul %68, %57, %cst_49 {dimension_numbers = #tpu.dot_dimension_numbers<[1], [0], [0], [1], [0, 0, 1, 1], [], []>} : vector<79x79xf32>, vector<79x8xf32>, vector<79x8xf32> -> vector<79x8xf32>
    %70 = vector.extract_strided_slice %8 {offsets = [8, 0], sizes = [8, 32], strides = [1, 1]} : vector<32x32xf32> to vector<8x32xf32>
    %cst_50 = arith.constant dense<0.000000e+00> : vector<79x32xf32>
    %71 = tpu.matmul %69, %70, %cst_50 {dimension_numbers = #tpu.dot_dimension_numbers<[1], [0], [0], [1], [0, 0, 1, 1], [], []>} : vector<79x8xf32>, vector<8x32xf32>, vector<79x32xf32> -> vector<79x32xf32>
    %72 = arith.addf %52, %71 : vector<79x32xf32>
    %73 = vector.extract_strided_slice %31 {offsets = [0, 16], sizes = [79, 8], strides = [1, 1]} : vector<79x96xf32> to vector<79x8xf32>
    %cst_51 = arith.constant 0.353553385 : f32
    %74 = vector.broadcast %cst_51 : f32 to vector<79x8xf32>
    %75 = arith.mulf %73, %74 : vector<79x8xf32>
    %76 = vector.extract_strided_slice %31 {offsets = [0, 48], sizes = [79, 8], strides = [1, 1]} : vector<79x96xf32> to vector<79x8xf32>
    %77 = vector.extract_strided_slice %31 {offsets = [0, 80], sizes = [79, 8], strides = [1, 1]} : vector<79x96xf32> to vector<79x8xf32>
    %cst_52 = arith.constant dense<0.000000e+00> : vector<79x79xf32>
    %78 = tpu.matmul %75, %76, %cst_52 {dimension_numbers = #tpu.dot_dimension_numbers<[1], [1], [0], [0], [0, 0, 1, 0], [], []>} : vector<79x8xf32>, vector<79x8xf32>, vector<79x79xf32> -> vector<79x79xf32>
    %cst_53 = arith.constant dense<0xFF800000> : vector<79xf32>
    %79 = vector.multi_reduction <maximumf>, %78, %cst_53 [1] : vector<79x79xf32> to vector<79xf32>
    %80 = vector.shape_cast %79 : vector<79xf32> to vector<79x1xf32>
    %81 = vector.broadcast %80 : vector<79x1xf32> to vector<79x79xf32>
    %82 = arith.subf %78, %81 : vector<79x79xf32>
    %83 = math.exp %82 : vector<79x79xf32>
    %cst_54 = arith.constant dense<0.000000e+00> : vector<79xf32>
    %84 = vector.multi_reduction <add>, %83, %cst_54 [1] : vector<79x79xf32> to vector<79xf32>
    %85 = vector.shape_cast %84 : vector<79xf32> to vector<79x1xf32>
    %86 = tpu.reciprocal %85 {approx = true} : vector<79x1xf32> -> vector<79x1xf32>
    %87 = vector.broadcast %86 : vector<79x1xf32> to vector<79x79xf32>
    %88 = arith.mulf %83, %87 : vector<79x79xf32>
    %cst_55 = arith.constant dense<0.000000e+00> : vector<79x8xf32>
    %89 = tpu.matmul %88, %77, %cst_55 {dimension_numbers = #tpu.dot_dimension_numbers<[1], [0], [0], [1], [0, 0, 1, 1], [], []>} : vector<79x79xf32>, vector<79x8xf32>, vector<79x8xf32> -> vector<79x8xf32>
    %90 = vector.extract_strided_slice %8 {offsets = [16, 0], sizes = [8, 32], strides = [1, 1]} : vector<32x32xf32> to vector<8x32xf32>
    %cst_56 = arith.constant dense<0.000000e+00> : vector<79x32xf32>
    %91 = tpu.matmul %89, %90, %cst_56 {dimension_numbers = #tpu.dot_dimension_numbers<[1], [0], [0], [1], [0, 0, 1, 1], [], []>} : vector<79x8xf32>, vector<8x32xf32>, vector<79x32xf32> -> vector<79x32xf32>
    %92 = arith.addf %72, %91 : vector<79x32xf32>
    %93 = vector.extract_strided_slice %31 {offsets = [0, 24], sizes = [79, 8], strides = [1, 1]} : vector<79x96xf32> to vector<79x8xf32>
    %cst_57 = arith.constant 0.353553385 : f32
    %94 = vector.broadcast %cst_57 : f32 to vector<79x8xf32>
    %95 = arith.mulf %93, %94 : vector<79x8xf32>
    %96 = vector.extract_strided_slice %31 {offsets = [0, 56], sizes = [79, 8], strides = [1, 1]} : vector<79x96xf32> to vector<79x8xf32>
    %97 = vector.extract_strided_slice %31 {offsets = [0, 88], sizes = [79, 8], strides = [1, 1]} : vector<79x96xf32> to vector<79x8xf32>
    %cst_58 = arith.constant dense<0.000000e+00> : vector<79x79xf32>
    %98 = tpu.matmul %95, %96, %cst_58 {dimension_numbers = #tpu.dot_dimension_numbers<[1], [1], [0], [0], [0, 0, 1, 0], [], []>} : vector<79x8xf32>, vector<79x8xf32>, vector<79x79xf32> -> vector<79x79xf32>
    %cst_59 = arith.constant dense<0xFF800000> : vector<79xf32>
    %99 = vector.multi_reduction <maximumf>, %98, %cst_59 [1] : vector<79x79xf32> to vector<79xf32>
    %100 = vector.shape_cast %99 : vector<79xf32> to vector<79x1xf32>
    %101 = vector.broadcast %100 : vector<79x1xf32> to vector<79x79xf32>
    %102 = arith.subf %98, %101 : vector<79x79xf32>
    %103 = math.exp %102 : vector<79x79xf32>
    %cst_60 = arith.constant dense<0.000000e+00> : vector<79xf32>
    %104 = vector.multi_reduction <add>, %103, %cst_60 [1] : vector<79x79xf32> to vector<79xf32>
    %105 = vector.shape_cast %104 : vector<79xf32> to vector<79x1xf32>
    %106 = tpu.reciprocal %105 {approx = true} : vector<79x1xf32> -> vector<79x1xf32>
    %107 = vector.broadcast %106 : vector<79x1xf32> to vector<79x79xf32>
    %108 = arith.mulf %103, %107 : vector<79x79xf32>
    %cst_61 = arith.constant dense<0.000000e+00> : vector<79x8xf32>
    %109 = tpu.matmul %108, %97, %cst_61 {dimension_numbers = #tpu.dot_dimension_numbers<[1], [0], [0], [1], [0, 0, 1, 1], [], []>} : vector<79x79xf32>, vector<79x8xf32>, vector<79x8xf32> -> vector<79x8xf32>
    %110 = vector.extract_strided_slice %8 {offsets = [24, 0], sizes = [8, 32], strides = [1, 1]} : vector<32x32xf32> to vector<8x32xf32>
    %cst_62 = arith.constant dense<0.000000e+00> : vector<79x32xf32>
    %111 = tpu.matmul %109, %110, %cst_62 {dimension_numbers = #tpu.dot_dimension_numbers<[1], [0], [0], [1], [0, 0, 1, 1], [], []>} : vector<79x8xf32>, vector<8x32xf32>, vector<79x32xf32> -> vector<79x32xf32>
    %112 = arith.addf %92, %111 : vector<79x32xf32>
    %113 = arith.addf %28, %112 : vector<79x32xf32>
    %cst_63 = arith.constant dense<0.000000e+00> : vector<79xf32>
    %114 = vector.multi_reduction <add>, %113, %cst_63 [1] : vector<79x32xf32> to vector<79xf32>
    %115 = vector.shape_cast %114 : vector<79xf32> to vector<79x1xf32>
    %cst_64 = arith.constant 3.200000e+01 : f32
    %116 = vector.broadcast %cst_64 : f32 to vector<79x1xf32>
    %117 = arith.divf %115, %116 : vector<79x1xf32>
    %118 = vector.broadcast %117 : vector<79x1xf32> to vector<79x32xf32>
    %119 = arith.subf %113, %118 : vector<79x32xf32>
    %120 = arith.mulf %119, %119 : vector<79x32xf32>
    %cst_65 = arith.constant dense<0.000000e+00> : vector<79xf32>
    %121 = vector.multi_reduction <add>, %120, %cst_65 [1] : vector<79x32xf32> to vector<79xf32>
    %122 = vector.shape_cast %121 : vector<79xf32> to vector<79x1xf32>
    %cst_66 = arith.constant 3.200000e+01 : f32
    %123 = vector.broadcast %cst_66 : f32 to vector<79x1xf32>
    %124 = arith.divf %122, %123 : vector<79x1xf32>
    %125 = vector.broadcast %117 : vector<79x1xf32> to vector<79x32xf32>
    %126 = arith.subf %113, %125 : vector<79x32xf32>
    %cst_67 = arith.constant 9.99999974E-6 : f32
    %127 = vector.broadcast %cst_67 : f32 to vector<79x1xf32>
    %128 = arith.addf %124, %127 : vector<79x1xf32>
    %129 = math.rsqrt %128 : vector<79x1xf32>
    %130 = vector.broadcast %129 : vector<79x1xf32> to vector<79x32xf32>
    %131 = arith.mulf %126, %130 : vector<79x32xf32>
    %132 = vector.broadcast %12 : vector<1x32xf32> to vector<79x32xf32>
    %133 = arith.mulf %131, %132 : vector<79x32xf32>
    %134 = vector.broadcast %14 : vector<1x32xf32> to vector<79x32xf32>
    %135 = arith.addf %133, %134 : vector<79x32xf32>
    %cst_68 = arith.constant dense<0.000000e+00> : vector<79x64xf32>
    %136 = tpu.matmul %135, %16, %cst_68 {dimension_numbers = #tpu.dot_dimension_numbers<[1], [0], [0], [1], [0, 0, 1, 1], [], []>} : vector<79x32xf32>, vector<32x64xf32>, vector<79x64xf32> -> vector<79x64xf32>
    %137 = vector.broadcast %18 : vector<1x64xf32> to vector<79x64xf32>
    %138 = arith.addf %136, %137 : vector<79x64xf32>
    %139 = arith.mulf %138, %138 : vector<79x64xf32>
    %140 = arith.mulf %138, %139 : vector<79x64xf32>
    %cst_69 = arith.constant 4.471500e-02 : f32
    %141 = vector.broadcast %cst_69 : f32 to vector<79x64xf32>
    %142 = arith.mulf %141, %140 : vector<79x64xf32>
    %143 = arith.addf %138, %142 : vector<79x64xf32>
    %cst_70 = arith.constant 0.797884583 : f32
    %144 = vector.broadcast %cst_70 : f32 to vector<79x64xf32>
    %145 = arith.mulf %144, %143 : vector<79x64xf32>
    %146 = math.tanh %145 : vector<79x64xf32>
    %cst_71 = arith.constant 1.000000e+00 : f32
    %147 = vector.broadcast %cst_71 : f32 to vector<79x64xf32>
    %148 = arith.addf %147, %146 : vector<79x64xf32>
    %cst_72 = arith.constant 5.000000e-01 : f32
    %149 = vector.broadcast %cst_72 : f32 to vector<79x64xf32>
    %150 = arith.mulf %149, %148 : vector<79x64xf32>
    %151 = arith.mulf %138, %150 : vector<79x64xf32>
    %cst_73 = arith.constant dense<0.000000e+00> : vector<79x32xf32>
    %152 = tpu.matmul %151, %20, %cst_73 {dimension_numbers = #tpu.dot_dimension_numbers<[1], [0], [0], [1], [0, 0, 1, 1], [], []>} : vector<79x64xf32>, vector<64x32xf32>, vector<79x32xf32> -> vector<79x32xf32>
    %153 = vector.broadcast %22 : vector<1x32xf32> to vector<79x32xf32>
    %154 = arith.addf %152, %153 : vector<79x32xf32>
    %155 = arith.addf %135, %154 : vector<79x32xf32>
    %cst_74 = arith.constant dense<0.000000e+00> : vector<79xf32>
    %156 = vector.multi_reduction <add>, %155, %cst_74 [1] : vector<79x32xf32> to vector<79xf32>
    %157 = vector.shape_cast %156 : vector<79xf32> to vector<79x1xf32>
    %cst_75 = arith.constant 3.200000e+01 : f32
    %158 = vector.broadcast %cst_75 : f32 to vector<79x1xf32>
    %159 = arith.divf %157, %158 : vector<79x1xf32>
    %160 = vector.broadcast %159 : vector<79x1xf32> to vector<79x32xf32>
    %161 = arith.subf %155, %160 : vector<79x32xf32>
    %162 = arith.mulf %161, %161 : vector<79x32xf32>
    %cst_76 = arith.constant dense<0.000000e+00> : vector<79xf32>
    %163 = vector.multi_reduction <add>, %162, %cst_76 [1] : vector<79x32xf32> to vector<79xf32>
    %164 = vector.shape_cast %163 : vector<79xf32> to vector<79x1xf32>
    %cst_77 = arith.constant 3.200000e+01 : f32
    %165 = vector.broadcast %cst_77 : f32 to vector<79x1xf32>
    %166 = arith.divf %164, %165 : vector<79x1xf32>
    %167 = vector.broadcast %159 : vector<79x1xf32> to vector<79x32xf32>
    %168 = arith.subf %155, %167 : vector<79x32xf32>
    %cst_78 = arith.constant 9.99999974E-6 : f32
    %169 = vector.broadcast %cst_78 : f32 to vector<79x1xf32>
    %170 = arith.addf %166, %169 : vector<79x1xf32>
    %171 = math.rsqrt %170 : vector<79x1xf32>
    %172 = vector.broadcast %171 : vector<79x1xf32> to vector<79x32xf32>
    %173 = arith.mulf %168, %172 : vector<79x32xf32>
    %174 = vector.broadcast %24 : vector<1x32xf32> to vector<79x32xf32>
    %175 = arith.mulf %173, %174 : vector<79x32xf32>
    %176 = vector.broadcast %26 : vector<1x32xf32> to vector<79x32xf32>
    %177 = arith.addf %175, %176 : vector<79x32xf32>
    %c0_79 = arith.constant 0 : index
    %c0_80 = arith.constant 0 : index
    %c0_81 = arith.constant 0 : index
    %178 = vector.load %arg19[%c0_79, %c0_80, %c0_81] : memref<2x79x32xf32, #tpu.memory_space<vmem>>, vector<1x79x32xf32>
    %179 = vector.shape_cast %178 : vector<1x79x32xf32> to vector<79x32xf32>
    %180 = vector.shape_cast %177 : vector<79x32xf32> to vector<1x79x32xf32>
    tpu.vector_store %arg19[%c0_79, %c0_80, %c0_81], %180 {strides = array<i32>} : memref<2x79x32xf32, #tpu.memory_space<vmem>>, vector<1x79x32xf32>,
    %c1 = arith.constant 1 : index
    %c0_82 = arith.constant 0 : index
    %c0_83 = arith.constant 0 : index
    %181 = vector.load %arg19[%c1, %c0_82, %c0_83] : memref<2x79x32xf32, #tpu.memory_space<vmem>>, vector<1x79x32xf32>
    %182 = vector.shape_cast %181 : vector<1x79x32xf32> to vector<79x32xf32>
    %cst_84 = arith.constant dense<0.000000e+00> : vector<79x96xf32>
    %183 = tpu.matmul %182, %4, %cst_84 {dimension_numbers = #tpu.dot_dimension_numbers<[1], [0], [0], [1], [0, 0, 1, 1], [], []>} : vector<79x32xf32>, vector<32x96xf32>, vector<79x96xf32> -> vector<79x96xf32>
    %184 = vector.broadcast %6 : vector<1x96xf32> to vector<79x96xf32>
    %185 = arith.addf %183, %184 : vector<79x96xf32>
    %186 = vector.extract_strided_slice %185 {offsets = [0, 0], sizes = [79, 8], strides = [1, 1]} : vector<79x96xf32> to vector<79x8xf32>
    %cst_85 = arith.constant 0.353553385 : f32
    %187 = vector.broadcast %cst_85 : f32 to vector<79x8xf32>
    %188 = arith.mulf %186, %187 : vector<79x8xf32>
    %189 = vector.extract_strided_slice %185 {offsets = [0, 32], sizes = [79, 8], strides = [1, 1]} : vector<79x96xf32> to vector<79x8xf32>
    %190 = vector.extract_strided_slice %185 {offsets = [0, 64], sizes = [79, 8], strides = [1, 1]} : vector<79x96xf32> to vector<79x8xf32>
    %cst_86 = arith.constant dense<0.000000e+00> : vector<79x79xf32>
    %191 = tpu.matmul %188, %189, %cst_86 {dimension_numbers = #tpu.dot_dimension_numbers<[1], [1], [0], [0], [0, 0, 1, 0], [], []>} : vector<79x8xf32>, vector<79x8xf32>, vector<79x79xf32> -> vector<79x79xf32>
    %cst_87 = arith.constant dense<0xFF800000> : vector<79xf32>
    %192 = vector.multi_reduction <maximumf>, %191, %cst_87 [1] : vector<79x79xf32> to vector<79xf32>
    %193 = vector.shape_cast %192 : vector<79xf32> to vector<79x1xf32>
    %194 = vector.broadcast %193 : vector<79x1xf32> to vector<79x79xf32>
    %195 = arith.subf %191, %194 : vector<79x79xf32>
    %196 = math.exp %195 : vector<79x79xf32>
    %cst_88 = arith.constant dense<0.000000e+00> : vector<79xf32>
    %197 = vector.multi_reduction <add>, %196, %cst_88 [1] : vector<79x79xf32> to vector<79xf32>
    %198 = vector.shape_cast %197 : vector<79xf32> to vector<79x1xf32>
    %199 = tpu.reciprocal %198 {approx = true} : vector<79x1xf32> -> vector<79x1xf32>
    %200 = vector.broadcast %199 : vector<79x1xf32> to vector<79x79xf32>
    %201 = arith.mulf %196, %200 : vector<79x79xf32>
    %cst_89 = arith.constant dense<0.000000e+00> : vector<79x8xf32>
    %202 = tpu.matmul %201, %190, %cst_89 {dimension_numbers = #tpu.dot_dimension_numbers<[1], [0], [0], [1], [0, 0, 1, 1], [], []>} : vector<79x79xf32>, vector<79x8xf32>, vector<79x8xf32> -> vector<79x8xf32>
    %203 = vector.extract_strided_slice %8 {offsets = [0, 0], sizes = [8, 32], strides = [1, 1]} : vector<32x32xf32> to vector<8x32xf32>
    %cst_90 = arith.constant dense<0.000000e+00> : vector<79x32xf32>
    %204 = tpu.matmul %202, %203, %cst_90 {dimension_numbers = #tpu.dot_dimension_numbers<[1], [0], [0], [1], [0, 0, 1, 1], [], []>} : vector<79x8xf32>, vector<8x32xf32>, vector<79x32xf32> -> vector<79x32xf32>
    %205 = vector.broadcast %10 : vector<1x32xf32> to vector<79x32xf32>
    %206 = arith.addf %205, %204 : vector<79x32xf32>
    %207 = vector.extract_strided_slice %185 {offsets = [0, 8], sizes = [79, 8], strides = [1, 1]} : vector<79x96xf32> to vector<79x8xf32>
    %cst_91 = arith.constant 0.353553385 : f32
    %208 = vector.broadcast %cst_91 : f32 to vector<79x8xf32>
    %209 = arith.mulf %207, %208 : vector<79x8xf32>
    %210 = vector.extract_strided_slice %185 {offsets = [0, 40], sizes = [79, 8], strides = [1, 1]} : vector<79x96xf32> to vector<79x8xf32>
    %211 = vector.extract_strided_slice %185 {offsets = [0, 72], sizes = [79, 8], strides = [1, 1]} : vector<79x96xf32> to vector<79x8xf32>
    %cst_92 = arith.constant dense<0.000000e+00> : vector<79x79xf32>
    %212 = tpu.matmul %209, %210, %cst_92 {dimension_numbers = #tpu.dot_dimension_numbers<[1], [1], [0], [0], [0, 0, 1, 0], [], []>} : vector<79x8xf32>, vector<79x8xf32>, vector<79x79xf32> -> vector<79x79xf32>
    %cst_93 = arith.constant dense<0xFF800000> : vector<79xf32>
    %213 = vector.multi_reduction <maximumf>, %212, %cst_93 [1] : vector<79x79xf32> to vector<79xf32>
    %214 = vector.shape_cast %213 : vector<79xf32> to vector<79x1xf32>
    %215 = vector.broadcast %214 : vector<79x1xf32> to vector<79x79xf32>
    %216 = arith.subf %212, %215 : vector<79x79xf32>
    %217 = math.exp %216 : vector<79x79xf32>
    %cst_94 = arith.constant dense<0.000000e+00> : vector<79xf32>
    %218 = vector.multi_reduction <add>, %217, %cst_94 [1] : vector<79x79xf32> to vector<79xf32>
    %219 = vector.shape_cast %218 : vector<79xf32> to vector<79x1xf32>
    %220 = tpu.reciprocal %219 {approx = true} : vector<79x1xf32> -> vector<79x1xf32>
    %221 = vector.broadcast %220 : vector<79x1xf32> to vector<79x79xf32>
    %222 = arith.mulf %217, %221 : vector<79x79xf32>
    %cst_95 = arith.constant dense<0.000000e+00> : vector<79x8xf32>
    %223 = tpu.matmul %222, %211, %cst_95 {dimension_numbers = #tpu.dot_dimension_numbers<[1], [0], [0], [1], [0, 0, 1, 1], [], []>} : vector<79x79xf32>, vector<79x8xf32>, vector<79x8xf32> -> vector<79x8xf32>
    %224 = vector.extract_strided_slice %8 {offsets = [8, 0], sizes = [8, 32], strides = [1, 1]} : vector<32x32xf32> to vector<8x32xf32>
    %cst_96 = arith.constant dense<0.000000e+00> : vector<79x32xf32>
    %225 = tpu.matmul %223, %224, %cst_96 {dimension_numbers = #tpu.dot_dimension_numbers<[1], [0], [0], [1], [0, 0, 1, 1], [], []>} : vector<79x8xf32>, vector<8x32xf32>, vector<79x32xf32> -> vector<79x32xf32>
    %226 = arith.addf %206, %225 : vector<79x32xf32>
    %227 = vector.extract_strided_slice %185 {offsets = [0, 16], sizes = [79, 8], strides = [1, 1]} : vector<79x96xf32> to vector<79x8xf32>
    %cst_97 = arith.constant 0.353553385 : f32
    %228 = vector.broadcast %cst_97 : f32 to vector<79x8xf32>
    %229 = arith.mulf %227, %228 : vector<79x8xf32>
    %230 = vector.extract_strided_slice %185 {offsets = [0, 48], sizes = [79, 8], strides = [1, 1]} : vector<79x96xf32> to vector<79x8xf32>
    %231 = vector.extract_strided_slice %185 {offsets = [0, 80], sizes = [79, 8], strides = [1, 1]} : vector<79x96xf32> to vector<79x8xf32>
    %cst_98 = arith.constant dense<0.000000e+00> : vector<79x79xf32>
    %232 = tpu.matmul %229, %230, %cst_98 {dimension_numbers = #tpu.dot_dimension_numbers<[1], [1], [0], [0], [0, 0, 1, 0], [], []>} : vector<79x8xf32>, vector<79x8xf32>, vector<79x79xf32> -> vector<79x79xf32>
    %cst_99 = arith.constant dense<0xFF800000> : vector<79xf32>
    %233 = vector.multi_reduction <maximumf>, %232, %cst_99 [1] : vector<79x79xf32> to vector<79xf32>
    %234 = vector.shape_cast %233 : vector<79xf32> to vector<79x1xf32>
    %235 = vector.broadcast %234 : vector<79x1xf32> to vector<79x79xf32>
    %236 = arith.subf %232, %235 : vector<79x79xf32>
    %237 = math.exp %236 : vector<79x79xf32>
    %cst_100 = arith.constant dense<0.000000e+00> : vector<79xf32>
    %238 = vector.multi_reduction <add>, %237, %cst_100 [1] : vector<79x79xf32> to vector<79xf32>
    %239 = vector.shape_cast %238 : vector<79xf32> to vector<79x1xf32>
    %240 = tpu.reciprocal %239 {approx = true} : vector<79x1xf32> -> vector<79x1xf32>
    %241 = vector.broadcast %240 : vector<79x1xf32> to vector<79x79xf32>
    %242 = arith.mulf %237, %241 : vector<79x79xf32>
    %cst_101 = arith.constant dense<0.000000e+00> : vector<79x8xf32>
    %243 = tpu.matmul %242, %231, %cst_101 {dimension_numbers = #tpu.dot_dimension_numbers<[1], [0], [0], [1], [0, 0, 1, 1], [], []>} : vector<79x79xf32>, vector<79x8xf32>, vector<79x8xf32> -> vector<79x8xf32>
    %244 = vector.extract_strided_slice %8 {offsets = [16, 0], sizes = [8, 32], strides = [1, 1]} : vector<32x32xf32> to vector<8x32xf32>
    %cst_102 = arith.constant dense<0.000000e+00> : vector<79x32xf32>
    %245 = tpu.matmul %243, %244, %cst_102 {dimension_numbers = #tpu.dot_dimension_numbers<[1], [0], [0], [1], [0, 0, 1, 1], [], []>} : vector<79x8xf32>, vector<8x32xf32>, vector<79x32xf32> -> vector<79x32xf32>
    %246 = arith.addf %226, %245 : vector<79x32xf32>
    %247 = vector.extract_strided_slice %185 {offsets = [0, 24], sizes = [79, 8], strides = [1, 1]} : vector<79x96xf32> to vector<79x8xf32>
    %cst_103 = arith.constant 0.353553385 : f32
    %248 = vector.broadcast %cst_103 : f32 to vector<79x8xf32>
    %249 = arith.mulf %247, %248 : vector<79x8xf32>
    %250 = vector.extract_strided_slice %185 {offsets = [0, 56], sizes = [79, 8], strides = [1, 1]} : vector<79x96xf32> to vector<79x8xf32>
    %251 = vector.extract_strided_slice %185 {offsets = [0, 88], sizes = [79, 8], strides = [1, 1]} : vector<79x96xf32> to vector<79x8xf32>
    %cst_104 = arith.constant dense<0.000000e+00> : vector<79x79xf32>
    %252 = tpu.matmul %249, %250, %cst_104 {dimension_numbers = #tpu.dot_dimension_numbers<[1], [1], [0], [0], [0, 0, 1, 0], [], []>} : vector<79x8xf32>, vector<79x8xf32>, vector<79x79xf32> -> vector<79x79xf32>
    %cst_105 = arith.constant dense<0xFF800000> : vector<79xf32>
    %253 = vector.multi_reduction <maximumf>, %252, %cst_105 [1] : vector<79x79xf32> to vector<79xf32>
    %254 = vector.shape_cast %253 : vector<79xf32> to vector<79x1xf32>
    %255 = vector.broadcast %254 : vector<79x1xf32> to vector<79x79xf32>
    %256 = arith.subf %252, %255 : vector<79x79xf32>
    %257 = math.exp %256 : vector<79x79xf32>
    %cst_106 = arith.constant dense<0.000000e+00> : vector<79xf32>
    %258 = vector.multi_reduction <add>, %257, %cst_106 [1] : vector<79x79xf32> to vector<79xf32>
    %259 = vector.shape_cast %258 : vector<79xf32> to vector<79x1xf32>
    %260 = tpu.reciprocal %259 {approx = true} : vector<79x1xf32> -> vector<79x1xf32>
    %261 = vector.broadcast %260 : vector<79x1xf32> to vector<79x79xf32>
    %262 = arith.mulf %257, %261 : vector<79x79xf32>
    %cst_107 = arith.constant dense<0.000000e+00> : vector<79x8xf32>
    %263 = tpu.matmul %262, %251, %cst_107 {dimension_numbers = #tpu.dot_dimension_numbers<[1], [0], [0], [1], [0, 0, 1, 1], [], []>} : vector<79x79xf32>, vector<79x8xf32>, vector<79x8xf32> -> vector<79x8xf32>
    %264 = vector.extract_strided_slice %8 {offsets = [24, 0], sizes = [8, 32], strides = [1, 1]} : vector<32x32xf32> to vector<8x32xf32>
    %cst_108 = arith.constant dense<0.000000e+00> : vector<79x32xf32>
    %265 = tpu.matmul %263, %264, %cst_108 {dimension_numbers = #tpu.dot_dimension_numbers<[1], [0], [0], [1], [0, 0, 1, 1], [], []>} : vector<79x8xf32>, vector<8x32xf32>, vector<79x32xf32> -> vector<79x32xf32>
    %266 = arith.addf %246, %265 : vector<79x32xf32>
    %267 = arith.addf %182, %266 : vector<79x32xf32>
    %cst_109 = arith.constant dense<0.000000e+00> : vector<79xf32>
    %268 = vector.multi_reduction <add>, %267, %cst_109 [1] : vector<79x32xf32> to vector<79xf32>
    %269 = vector.shape_cast %268 : vector<79xf32> to vector<79x1xf32>
    %cst_110 = arith.constant 3.200000e+01 : f32
    %270 = vector.broadcast %cst_110 : f32 to vector<79x1xf32>
    %271 = arith.divf %269, %270 : vector<79x1xf32>
    %272 = vector.broadcast %271 : vector<79x1xf32> to vector<79x32xf32>
    %273 = arith.subf %267, %272 : vector<79x32xf32>
    %274 = arith.mulf %273, %273 : vector<79x32xf32>
    %cst_111 = arith.constant dense<0.000000e+00> : vector<79xf32>
    %275 = vector.multi_reduction <add>, %274, %cst_111 [1] : vector<79x32xf32> to vector<79xf32>
    %276 = vector.shape_cast %275 : vector<79xf32> to vector<79x1xf32>
    %cst_112 = arith.constant 3.200000e+01 : f32
    %277 = vector.broadcast %cst_112 : f32 to vector<79x1xf32>
    %278 = arith.divf %276, %277 : vector<79x1xf32>
    %279 = vector.broadcast %271 : vector<79x1xf32> to vector<79x32xf32>
    %280 = arith.subf %267, %279 : vector<79x32xf32>
    %cst_113 = arith.constant 9.99999974E-6 : f32
    %281 = vector.broadcast %cst_113 : f32 to vector<79x1xf32>
    %282 = arith.addf %278, %281 : vector<79x1xf32>
    %283 = math.rsqrt %282 : vector<79x1xf32>
    %284 = vector.broadcast %283 : vector<79x1xf32> to vector<79x32xf32>
    %285 = arith.mulf %280, %284 : vector<79x32xf32>
    %286 = vector.broadcast %12 : vector<1x32xf32> to vector<79x32xf32>
    %287 = arith.mulf %285, %286 : vector<79x32xf32>
    %288 = vector.broadcast %14 : vector<1x32xf32> to vector<79x32xf32>
    %289 = arith.addf %287, %288 : vector<79x32xf32>
    %cst_114 = arith.constant dense<0.000000e+00> : vector<79x64xf32>
    %290 = tpu.matmul %289, %16, %cst_114 {dimension_numbers = #tpu.dot_dimension_numbers<[1], [0], [0], [1], [0, 0, 1, 1], [], []>} : vector<79x32xf32>, vector<32x64xf32>, vector<79x64xf32> -> vector<79x64xf32>
    %291 = vector.broadcast %18 : vector<1x64xf32> to vector<79x64xf32>
    %292 = arith.addf %290, %291 : vector<79x64xf32>
    %293 = arith.mulf %292, %292 : vector<79x64xf32>
    %294 = arith.mulf %292, %293 : vector<79x64xf32>
    %cst_115 = arith.constant 4.471500e-02 : f32
    %295 = vector.broadcast %cst_115 : f32 to vector<79x64xf32>
    %296 = arith.mulf %295, %294 : vector<79x64xf32>
    %297 = arith.addf %292, %296 : vector<79x64xf32>
    %cst_116 = arith.constant 0.797884583 : f32
    %298 = vector.broadcast %cst_116 : f32 to vector<79x64xf32>
    %299 = arith.mulf %298, %297 : vector<79x64xf32>
    %300 = math.tanh %299 : vector<79x64xf32>
    %cst_117 = arith.constant 1.000000e+00 : f32
    %301 = vector.broadcast %cst_117 : f32 to vector<79x64xf32>
    %302 = arith.addf %301, %300 : vector<79x64xf32>
    %cst_118 = arith.constant 5.000000e-01 : f32
    %303 = vector.broadcast %cst_118 : f32 to vector<79x64xf32>
    %304 = arith.mulf %303, %302 : vector<79x64xf32>
    %305 = arith.mulf %292, %304 : vector<79x64xf32>
    %cst_119 = arith.constant dense<0.000000e+00> : vector<79x32xf32>
    %306 = tpu.matmul %305, %20, %cst_119 {dimension_numbers = #tpu.dot_dimension_numbers<[1], [0], [0], [1], [0, 0, 1, 1], [], []>} : vector<79x64xf32>, vector<64x32xf32>, vector<79x32xf32> -> vector<79x32xf32>
    %307 = vector.broadcast %22 : vector<1x32xf32> to vector<79x32xf32>
    %308 = arith.addf %306, %307 : vector<79x32xf32>
    %309 = arith.addf %289, %308 : vector<79x32xf32>
    %cst_120 = arith.constant dense<0.000000e+00> : vector<79xf32>
    %310 = vector.multi_reduction <add>, %309, %cst_120 [1] : vector<79x32xf32> to vector<79xf32>
    %311 = vector.shape_cast %310 : vector<79xf32> to vector<79x1xf32>
    %cst_121 = arith.constant 3.200000e+01 : f32
    %312 = vector.broadcast %cst_121 : f32 to vector<79x1xf32>
    %313 = arith.divf %311, %312 : vector<79x1xf32>
    %314 = vector.broadcast %313 : vector<79x1xf32> to vector<79x32xf32>
    %315 = arith.subf %309, %314 : vector<79x32xf32>
    %316 = arith.mulf %315, %315 : vector<79x32xf32>
    %cst_122 = arith.constant dense<0.000000e+00> : vector<79xf32>
    %317 = vector.multi_reduction <add>, %316, %cst_122 [1] : vector<79x32xf32> to vector<79xf32>
    %318 = vector.shape_cast %317 : vector<79xf32> to vector<79x1xf32>
    %cst_123 = arith.constant 3.200000e+01 : f32
    %319 = vector.broadcast %cst_123 : f32 to vector<79x1xf32>
    %320 = arith.divf %318, %319 : vector<79x1xf32>
    %321 = vector.broadcast %313 : vector<79x1xf32> to vector<79x32xf32>
    %322 = arith.subf %309, %321 : vector<79x32xf32>
    %cst_124 = arith.constant 9.99999974E-6 : f32
    %323 = vector.broadcast %cst_124 : f32 to vector<79x1xf32>
    %324 = arith.addf %320, %323 : vector<79x1xf32>
    %325 = math.rsqrt %324 : vector<79x1xf32>
    %326 = vector.broadcast %325 : vector<79x1xf32> to vector<79x32xf32>
    %327 = arith.mulf %322, %326 : vector<79x32xf32>
    %328 = vector.broadcast %24 : vector<1x32xf32> to vector<79x32xf32>
    %329 = arith.mulf %327, %328 : vector<79x32xf32>
    %330 = vector.broadcast %26 : vector<1x32xf32> to vector<79x32xf32>
    %331 = arith.addf %329, %330 : vector<79x32xf32>
    %c1_125 = arith.constant 1 : index
    %c0_126 = arith.constant 0 : index
    %c0_127 = arith.constant 0 : index
    %332 = vector.load %arg19[%c1_125, %c0_126, %c0_127] : memref<2x79x32xf32, #tpu.memory_space<vmem>>, vector<1x79x32xf32>
    %333 = vector.shape_cast %332 : vector<1x79x32xf32> to vector<79x32xf32>
    %334 = vector.shape_cast %331 : vector<79x32xf32> to vector<1x79x32xf32>
    tpu.vector_store %arg19[%c1_125, %c0_126, %c0_127], %334 {strides = array<i32>} : memref<2x79x32xf32, #tpu.memory_space<vmem>>, vector<1x79x32xf32>,
    %c1_i32 = arith.constant 1 : i32
    %335 = arith.cmpi eq, %arg0, %c1_i32 : i32
    %336 = arith.extui %335 : i1 to i32
    %c0_i32_128 = arith.constant 0 : i32
    %337 = arith.cmpi ne, %336, %c0_i32_128 : i32
    scf.if %337 {
      %c0_129 = arith.constant 0 : index
      %c0_130 = arith.constant 0 : index
      %c0_131 = arith.constant 0 : index
      %338 = vector.load %arg19[%c0_129, %c0_130, %c0_131] : memref<2x79x32xf32, #tpu.memory_space<vmem>>, vector<2x79x32xf32>
      %cst_132 = arith.constant dense<0.000000e+00> : vector<2x32xf32>
      %339 = vector.multi_reduction <add>, %338, %cst_132 [1] : vector<2x79x32xf32> to vector<2x32xf32>
      %cst_133 = arith.constant 7.900000e+01 : f32
      %340 = vector.broadcast %cst_133 : f32 to vector<2x32xf32>
      %341 = arith.divf %339, %340 : vector<2x32xf32>
      %c0_134 = arith.constant 0 : index
      %c0_135 = arith.constant 0 : index
      %342 = vector.load %arg14[%c0_134, %c0_135] : memref<32x16xf32, #tpu.memory_space<vmem>>, vector<32x16xf32>
      %cst_136 = arith.constant dense<0.000000e+00> : vector<2x16xf32>
      %343 = tpu.matmul %341, %342, %cst_136 {dimension_numbers = #tpu.dot_dimension_numbers<[1], [0], [0], [1], [0, 0, 1, 1], [], []>} : vector<2x32xf32>, vector<32x16xf32>, vector<2x16xf32> -> vector<2x16xf32>
      %c0_137 = arith.constant 0 : index
      %c0_138 = arith.constant 0 : index
      %344 = vector.load %arg15[%c0_137, %c0_138] : memref<1x16xf32, #tpu.memory_space<vmem>>, vector<1x16xf32>
      %345 = vector.broadcast %344 : vector<1x16xf32> to vector<2x16xf32>
      %346 = arith.addf %343, %345 : vector<2x16xf32>
      %c0_139 = arith.constant 0 : index
      %c0_140 = arith.constant 0 : index
      %347 = vector.load %arg16[%c0_139, %c0_140] : memref<16x2xf32, #tpu.memory_space<vmem>>, vector<16x2xf32>
      %cst_141 = arith.constant dense<0.000000e+00> : vector<2x2xf32>
      %348 = tpu.matmul %346, %347, %cst_141 {dimension_numbers = #tpu.dot_dimension_numbers<[1], [0], [0], [1], [0, 0, 1, 1], [], []>} : vector<2x16xf32>, vector<16x2xf32>, vector<2x2xf32> -> vector<2x2xf32>
      %c0_142 = arith.constant 0 : index
      %c0_143 = arith.constant 0 : index
      %349 = vector.load %arg17[%c0_142, %c0_143] : memref<1x2xf32, #tpu.memory_space<vmem>>, vector<1x2xf32>
      %350 = vector.broadcast %349 : vector<1x2xf32> to vector<2x2xf32>
      %351 = arith.addf %348, %350 : vector<2x2xf32>
      %c0_144 = arith.constant 0 : index
      %c0_145 = arith.constant 0 : index
      %352 = vector.load %arg18[%c0_144, %c0_145] : memref<2x2xf32, #tpu.memory_space<vmem>>, vector<2x2xf32>
      tpu.vector_store %arg18[%c0_144, %c0_145], %351 {strides = array<i32>} : memref<2x2xf32, #tpu.memory_space<vmem>>, vector<2x2xf32>,
    } else {
    }
    return
  }
  func.func @transform_0(%arg0: i32) -> (i32, i32, i32) {
    %c0_i32 = arith.constant 0 : i32
    %c0_i32_0 = arith.constant 0 : i32
    %c0_i32_1 = arith.constant 0 : i32
    %c0_i32_2 = arith.constant 0 : i32
    return %c0_i32, %c0_i32_0, %c0_i32_1 : i32, i32, i32
  }
  func.func @transform_1(%arg0: i32) -> (i32, i32, i32) {
    %c0_i32 = arith.constant 0 : i32
    %c0_i32_0 = arith.constant 0 : i32
    %c0_i32_1 = arith.constant 0 : i32
    return %arg0, %c0_i32, %c0_i32_0 : i32, i32, i32
  }
  func.func @transform_2(%arg0: i32) -> (i32, i32, i32) {
    %c0_i32 = arith.constant 0 : i32
    %c0_i32_0 = arith.constant 0 : i32
    %c0_i32_1 = arith.constant 0 : i32
    return %arg0, %c0_i32, %c0_i32_0 : i32, i32, i32
  }
  func.func @transform_3(%arg0: i32) -> (i32, i32, i32) {
    %c0_i32 = arith.constant 0 : i32
    %c0_i32_0 = arith.constant 0 : i32
    %c0_i32_1 = arith.constant 0 : i32
    return %arg0, %c0_i32, %c0_i32_0 : i32, i32, i32
  }
  func.func @transform_4(%arg0: i32) -> (i32, i32, i32) {
    %c0_i32 = arith.constant 0 : i32
    %c0_i32_0 = arith.constant 0 : i32
    %c0_i32_1 = arith.constant 0 : i32
    return %arg0, %c0_i32, %c0_i32_0 : i32, i32, i32
  }
  func.func @transform_5(%arg0: i32) -> (i32, i32, i32) {
    %c0_i32 = arith.constant 0 : i32
    %c0_i32_0 = arith.constant 0 : i32
    %c0_i32_1 = arith.constant 0 : i32
    return %arg0, %c0_i32, %c0_i32_0 : i32, i32, i32
  }
  func.func @transform_6(%arg0: i32) -> (i32, i32, i32) {
    %c0_i32 = arith.constant 0 : i32
    %c0_i32_0 = arith.constant 0 : i32
    %c0_i32_1 = arith.constant 0 : i32
    return %arg0, %c0_i32, %c0_i32_0 : i32, i32, i32
  }
  func.func @transform_7(%arg0: i32) -> (i32, i32, i32) {
    %c0_i32 = arith.constant 0 : i32
    %c0_i32_0 = arith.constant 0 : i32
    %c0_i32_1 = arith.constant 0 : i32
    return %arg0, %c0_i32, %c0_i32_0 : i32, i32, i32
  }
  func.func @transform_8(%arg0: i32) -> (i32, i32, i32) {
    %c0_i32 = arith.constant 0 : i32
    %c0_i32_0 = arith.constant 0 : i32
    %c0_i32_1 = arith.constant 0 : i32
    return %arg0, %c0_i32, %c0_i32_0 : i32, i32, i32
  }
  func.func @transform_9(%arg0: i32) -> (i32, i32, i32) {
    %c0_i32 = arith.constant 0 : i32
    %c0_i32_0 = arith.constant 0 : i32
    %c0_i32_1 = arith.constant 0 : i32
    return %arg0, %c0_i32, %c0_i32_0 : i32, i32, i32
  }
  func.func @transform_10(%arg0: i32) -> (i32, i32, i32) {
    %c0_i32 = arith.constant 0 : i32
    %c0_i32_0 = arith.constant 0 : i32
    %c0_i32_1 = arith.constant 0 : i32
    return %arg0, %c0_i32, %c0_i32_0 : i32, i32, i32
  }
  func.func @transform_11(%arg0: i32) -> (i32, i32, i32) {
    %c0_i32 = arith.constant 0 : i32
    %c0_i32_0 = arith.constant 0 : i32
    %c0_i32_1 = arith.constant 0 : i32
    return %arg0, %c0_i32, %c0_i32_0 : i32, i32, i32
  }
  func.func @transform_12(%arg0: i32) -> (i32, i32, i32) {
    %c0_i32 = arith.constant 0 : i32
    %c0_i32_0 = arith.constant 0 : i32
    %c0_i32_1 = arith.constant 0 : i32
    return %arg0, %c0_i32, %c0_i32_0 : i32, i32, i32
  }
  func.func @transform_13(%arg0: i32) -> (i32, i32) {
    %c0_i32 = arith.constant 0 : i32
    %c0_i32_0 = arith.constant 0 : i32
    %c0_i32_1 = arith.constant 0 : i32
    return %c0_i32, %c0_i32_0 : i32, i32
  }
  func.func @transform_14(%arg0: i32) -> (i32, i32) {
    %c0_i32 = arith.constant 0 : i32
    %c0_i32_0 = arith.constant 0 : i32
    %c0_i32_1 = arith.constant 0 : i32
    return %c0_i32, %c0_i32_0 : i32, i32
  }
  func.func @transform_15(%arg0: i32) -> (i32, i32) {
    %c0_i32 = arith.constant 0 : i32
    %c0_i32_0 = arith.constant 0 : i32
    %c0_i32_1 = arith.constant 0 : i32
    return %c0_i32, %c0_i32_0 : i32, i32
  }
  func.func @transform_16(%arg0: i32) -> (i32, i32) {
    %c0_i32 = arith.constant 0 : i32
    %c0_i32_0 = arith.constant 0 : i32
    %c0_i32_1 = arith.constant 0 : i32
    return %c0_i32, %c0_i32_0 : i32, i32
  }
  func.func @transform_17(%arg0: i32) -> (i32, i32) {
    %c0_i32 = arith.constant 0 : i32
    %c0_i32_0 = arith.constant 0 : i32
    %c0_i32_1 = arith.constant 0 : i32
    return %c0_i32, %c0_i32_0 : i32, i32
  }
}

</mosaic_0001>

<bundles_post_ra>
// kernel: wavlm_classifier_forward.4
= control target key start
LH: loop header
LB: loop body
LE: loop exit
PB: predicated region body
PF: predicated region fallthrough
CT: control target
= control target key end

     0   :  { %s1429_s15 = smov 0   ;;  %s1916_s0 = inlined_call_operand.vmem [shape: f32[2,160,5], index: 0, kind: input, shape index: {}]   ;;  %s1917_s1 = inlined_call_operand.vmem [shape: f32[2,5,16], index: 1, kind: input, shape index: {}]   ;;  %s1918_s2 = inlined_call_operand.vmem [shape: f32[1,16], index: 2, kind: input, shape index: {}]   ;;  %s1919_s3 = inlined_call_operand.vmem [shape: f32[1,16], index: 3, kind: input, shape index: {}]   ;;  %s1920_s4 = inlined_call_operand.vmem [shape: f32[2,159,16], index: 4, kind: output, shape index: {}]  }
   0x1 LB: > { %s1165_s16 = sadd.s32 4294967295, %s1402_s15   ;;  %p1169_p0 = scmp.ge.s32.totalorder %s1402_s15, 1  ;;  %s1402_s15 = sphi %s1429_s15, %s14_s15  }
   0x2   : > { %p162_p1 = scmp.lt.s32.totalorder %s1402_s15, 3 }
   0x4   : > { %p163_p2 = pnand %p1169_p0, %p162_p1 }
   0x5   : > { %v218_v0 = vld [vmem:[%s1917_s1] sm:$0x1f] (!%p163_p2)  ;;  %vm322_vm0 = vcmask (!%p163_p2), 1044480   ;;  %v1172_v1 = vld [vmem:[%s1917_s1 + $0x8] sm:$0x1f] (!%p163_p2)  ;;  %p188_p3 = scmp.lt.s32.totalorder (!%p163_p2), %s1165_s16, 1 }
   0x6   : > { %166 = sbr.rel (%p163_p2) target bundleno = 434 (0x1b2), region = 36  ;;  %1293 = vmatprep.subr.msk.mxu0 (!%p163_p2), %vm322_vm0, %v218_v0  ;;  %1261 = vmatprep.subr.msk.mxu1 (!%p163_p2), %vm322_vm0, %v1172_v1  ;;  %vm281_vm1 = vcmask (!%p163_p2), 39936   ;;  %vm241_vm2 = vcmask (!%p163_p2), 1046528   ;;  %vm699_vm3 = vcmask (!%p163_p2), 130048   ;;  %vm737_vm4 = vcmask (!%p163_p2), 129024  }
   0x7   : > { %1294 = vmatpush3.msk.msra.mxu0 (!%p163_p2), %vm322_vm0, %v218_v0  ;;  %1262 = vmatpush3.msk.msra.mxu1 (!%p163_p2), %vm322_vm0, %v1172_v1 }
   0xd   : > { %s1922_s16 = smov (!%p188_p3, %s1165_s16), 1 }
   0xe   : > { %s1345_s21 = smul.u32 160, %s1922_s16 }
  0x10   : > { %s1451_s24 = scalar_lea.vmem %s1916_s0, %s1345_s21  ;;  %s1851_s5 = scalar_lea.vmem %s1920_s4, %s1345_s21 }
  0x11   : > { %v198_v2 = vld [vmem:[%s1451_s24] sm:$0xff]  ;;  %v199_v3 = vld [vmem:[%s1451_s24 + $0x8] sm:$0xff]  ;;  %v200_v4 = vld [vmem:[%s1451_s24 + $0x10] sm:$0xff] }
  0x12   : > { %v242_v5 = vrot.slane %v198_v2, 1  ;;  %1295 = vmatprep.mubr.msk.f32.mxu0 %vm281_vm1, %v198_v2  ;;  %v243_v6 = vrot.slane %v199_v3, 1  ;;  %v245_v7 = vrot.slane %v200_v4, 1  ;;  %v201_v8 = vld [vmem:[%s1451_s24 + $0x18] sm:$0xff]  ;;  %v202_v9 = vld [vmem:[%s1451_s24 + $0x20] sm:$0xff]  ;;  %v203_v10 = vld [vmem:[%s1451_s24 + $0x28] sm:$0xff] }
  0x13   : > { %1296 = vmatmul.mubr.msk.f32.vlgmr.msra.gmra.mrb[0].mxu0 %vm281_vm1, %v199_v3  ;;  %v247_v11 = vrot.slane %v201_v8, 1  ;;  %v249_v12 = vrot.slane %v202_v9, 1  ;;  %v251_v15 = vrot.slane %v203_v10, 1  ;;  %v204_v16 = vld [vmem:[%s1451_s24 + $0x30] sm:$0xff]  ;;  %v205_v18 = vld [vmem:[%s1451_s24 + $0x38] sm:$0xff]  ;;  %v206_v23 = vld [vmem:[%s1451_s24 + $0x40] sm:$0xff] }
  0x14   : > { %v244_v13 = vsel %vm241_vm2, %v242_v5, %v243_v6  ;;  %v246_v14 = vsel %vm241_vm2, %v243_v6, %v245_v7  ;;  %1298 = vmatprep.mubr.msk.f32.mxu0 %vm281_vm1, %v200_v4  ;;  %v253_v20 = vrot.slane %v204_v16, 1  ;;  %v255_v22 = vrot.slane %v205_v18, 1  ;;  %v207_v24 = vld [vmem:[%s1451_s24 + $0x48] sm:$0xff]  ;;  %v208_v29 = vld [vmem:[%s1451_s24 + $0x50] sm:$0xff]  ;;  %v209_v30 = vld [vmem:[%s1451_s24 + $0x58] sm:$0xff] }
  0x15   : > { %1263 = vmatprep.mubr.msk.f32.mxu1 %vm281_vm1, %v244_v13  ;;  %v248_v17 = vsel %vm241_vm2, %v245_v7, %v247_v11  ;;  %v250_v19 = vsel %vm241_vm2, %v247_v11, %v249_v12  ;;  %v252_v21 = vsel %vm241_vm2, %v249_v12, %v251_v15  ;;  %v257_v26 = vrot.slane %v206_v23, 1  ;;  %v210_v35 = vld [vmem:[%s1451_s24 + $0x60] sm:$0xff]  ;;  %v211_v36 = vld [vmem:[%s1451_s24 + $0x68] sm:$0xff]  ;;  %v212_v41 = vld [vmem:[%s1451_s24 + $0x70] sm:$0xff] }
  0x16   : > { %1264 = vmatmul.mubr.msk.f32.vlgmr.msra.gmra.mrb[0].mxu1 %vm281_vm1, %v246_v14  ;;  %v254_v25 = vsel %vm241_vm2, %v251_v15, %v253_v20  ;;  %v256_v27 = vsel %vm241_vm2, %v253_v20, %v255_v22  ;;  %v259_v28 = vrot.slane %v207_v24, 1  ;;  %v261_v32 = vrot.slane %v208_v29, 1  ;;  %v213_v42 = vld [vmem:[%s1451_s24 + $0x78] sm:$0xff]  ;;  %v214_v47 = vld [vmem:[%s1451_s24 + $0x80] sm:$0xff]  ;;  %v215_v48 = vld [vmem:[%s1451_s24 + $0x88] sm:$0xff] }
  0x17   : > { %1266 = vmatprep.mubr.msk.f32.mxu1 %vm281_vm1, %v248_v17  ;;  %1299 = vmatmul.mubr.msk.f32.gmra.mrb[2].mxu0 %vm281_vm1, %v201_v8  ;;  %v258_v31 = vsel %vm241_vm2, %v255_v22, %v257_v26  ;;  %v263_v34 = vrot.slane %v209_v30, 1  ;;  %v265_v38 = vrot.slane %v210_v35, 1  ;;  %v267_v40 = vrot.slane %v211_v36, 1  ;;  %v216_v53 = vld [vmem:[%s1451_s24 + $0x90] sm:$0xff]  ;;  %v217_v54 = vld [vmem:[%s1451_s24 + $0x98] sm:$0xff] }
  0x18   : > { %1301 = vmatprep.mubr.msk.f32.mxu0 %vm281_vm1, %v202_v9  ;;  %v260_v33 = vsel %vm241_vm2, %v257_v26, %v259_v28  ;;  %v262_v37 = vsel %vm241_vm2, %v259_v28, %v261_v32  ;;  %v269_v44 = vrot.slane %v212_v41, 1  ;;  %v271_v46 = vrot.slane %v213_v42, 1 }
  0x19   : > { %v264_v39 = vsel %vm241_vm2, %v261_v32, %v263_v34  ;;  %v266_v43 = vsel %vm241_vm2, %v263_v34, %v265_v38  ;;  %v268_v45 = vsel %vm241_vm2, %v265_v38, %v267_v40  ;;  %v273_v50 = vrot.slane %v214_v47, 1 }
  0x1a   : > { %1267 = vmatmul.mubr.msk.f32.gmra.mrb[2].mxu1 %vm281_vm1, %v250_v19  ;;  %v270_v49 = vsel %vm241_vm2, %v267_v40, %v269_v44  ;;  %v272_v51 = vsel %vm241_vm2, %v269_v44, %v271_v46  ;;  %v275_v52 = vrot.slane %v215_v48, 1  ;;  %v277_v56 = vrot.slane %v216_v53, 1 }
  0x1b   : > { %1269 = vmatprep.mubr.msk.f32.mxu1 %vm281_vm1, %v252_v21  ;;  %1302 = vmatmul.mubr.msk.f32.gmra.mrb[4].mxu0 %vm281_vm1, %v203_v10  ;;  %v274_v55 = vsel %vm241_vm2, %v271_v46, %v273_v50  ;;  %v279_v58 = vrot.slane %v217_v54, 1 }
  0x1c   : > { %1304 = vmatprep.mubr.msk.f32.mxu0 %vm281_vm1, %v204_v16  ;;  %v276_v57 = vsel %vm241_vm2, %v273_v50, %v275_v52  ;;  %v278_v59 = vsel %vm241_vm2, %v275_v52, %v277_v56 }
  0x1d   : > { %v280_v60 = vsel %vm241_vm2, %v277_v56, %v279_v58 }
  0x1e   : > { %1270 = vmatmul.mubr.msk.f32.gmra.mrb[4].mxu1 %vm281_vm1, %v254_v25 }
  0x1f   : > { %1272 = vmatprep.mubr.msk.f32.mxu1 %vm281_vm1, %v256_v27  ;;  %1305 = vmatmul.mubr.msk.f32.gmra.mrb[6].mxu0 %vm281_vm1, %v205_v18 }
  0x20   : > { %1307 = vmatprep.mubr.msk.f32.mxu0 %vm281_vm1, %v206_v23 }
  0x22   : > { %1273 = vmatmul.mubr.msk.f32.gmra.mrb[6].mxu1 %vm281_vm1, %v258_v31 }
  0x23   : > { %1275 = vmatprep.mubr.msk.f32.mxu1 %vm281_vm1, %v260_v33  ;;  %1308 = vmatmul.mubr.msk.f32.gmra.mrb[8].mxu0 %vm281_vm1, %v207_v24 }
  0x24   : > { %1310 = vmatprep.mubr.msk.f32.mxu0 %vm281_vm1, %v208_v29 }
  0x26   : > { %1276 = vmatmul.mubr.msk.f32.gmra.mrb[8].mxu1 %vm281_vm1, %v262_v37 }
  0x27   : > { %1278 = vmatprep.mubr.msk.f32.mxu1 %vm281_vm1, %v264_v39  ;;  %1311 = vmatmul.mubr.msk.f32.gmra.mrb[10].mxu0 %vm281_vm1, %v209_v30 }
  0x28   : > { %1313 = vmatprep.mubr.msk.f32.mxu0 %vm281_vm1, %v210_v35 }
  0x2a   : > { %1279 = vmatmul.mubr.msk.f32.gmra.mrb[10].mxu1 %vm281_vm1, %v266_v43 }
  0x2b   : > { %1281 = vmatprep.mubr.msk.f32.mxu1 %vm281_vm1, %v268_v45  ;;  %1314 = vmatmul.mubr.msk.f32.gmra.mrb[12].mxu0 %vm281_vm1, %v211_v36 }
  0x2c   : > { %1316 = vmatprep.mubr.msk.f32.mxu0 %vm281_vm1, %v212_v41 }
  0x2e   : > { %1282 = vmatmul.mubr.msk.f32.gmra.mrb[12].mxu1 %vm281_vm1, %v270_v49 }
  0x2f   : > { %1284 = vmatprep.mubr.msk.f32.mxu1 %vm281_vm1, %v272_v51  ;;  %1317 = vmatmul.mubr.msk.f32.gmra.mrb[14].mxu0 %vm281_vm1, %v213_v42 }
  0x30   : > { %1319 = vmatprep.mubr.msk.f32.mxu0 %vm281_vm1, %v214_v47 }
  0x32   : > { %1285 = vmatmul.mubr.msk.f32.gmra.mrb[14].mxu1 %vm281_vm1, %v274_v55 }
  0x33   : > { %1287 = vmatprep.mubr.msk.f32.mxu1 %vm281_vm1, %v276_v57  ;;  %1320 = vmatmul.mubr.msk.f32.gmra.mrb[16].mxu0 %vm281_vm1, %v215_v48 }
  0x34   : > { %1322 = vmatprep.mubr.msk.f32.mxu0 %vm281_vm1, %v216_v53 }
  0x36   : > { %1288 = vmatmul.mubr.msk.f32.gmra.mrb[16].mxu1 %vm281_vm1, %v278_v59 }
  0x37   : > { %1290 = vmatprep.mubr.msk.f32.mxu1 %vm281_vm1, %v280_v60  ;;  %1323 = vmatmul.mubr.msk.f32.gmra.mrb[18].mxu0 %vm281_vm1, %v217_v54 }
  0x3a   : > { %1291 = vmatmul.mubr.msk.f32.gmra.mrb[18].mxu1 %vm281_vm1, %v279_v58 }
  0xe6   : > { %v1297_v61 = vpop.f32.mrb[0].mxu0 }
  0xe7   : > { %v600_v62 = vpop.f32.mrb[1].mxu0 }
  0xe9   : > { %v1265_v63 = vpop.f32.mrb[0].mxu1 }
  0xea   : > { %v1532_v0 = vadd.f32 %v1297_v61, %v1265_v63  ;;  %v392_v1 = vpop.f32.mrb[1].mxu1  ;;  %v1300_v2 = vpop.f32.mrb[2].mxu0 }
  0xeb   : > { %v1534_v3 = vadd.f32 %v600_v62, %v392_v1  ;;  %v610_v4 = vpop.f32.mrb[3].mxu0 }
  0xec   : > { %v701_v5 = vsel %vm699_vm3, %v1532_v0, 0.0 }
  0xed   : > { %v700_v6 = vsel %vm699_vm3, %v1534_v3, 0.0  ;;  %v1268_v7 = vpop.f32.mrb[2].mxu1 }
  0xee   : > { %v702_v8 = vadd.f32 %v701_v5, %v700_v6  ;;  %v1540_v9 = vadd.f32 %v1300_v2, %v1268_v7  ;;  %v402_v10 = vpop.f32.mrb[3].mxu1  ;;  %v1303_v11 = vpop.f32.mrb[4].mxu0 }
  0xef   : > { %v1542_v12 = vadd.f32 %v610_v4, %v402_v10  ;;  %v620_v13 = vpop.f32.mrb[5].mxu0 }
  0xf0   : > { %v705_v20 = vsel %vm699_vm3, %v1540_v9, 0.0 }
  0xf1   : > { %v703_v14 = vsel %vm699_vm3, %v1542_v12, 0.0  ;;  %v1271_v15 = vpop.f32.mrb[4].mxu1 }
  0xf2   : > { %v704_v16 = vadd.f32 %v703_v14, %v702_v8  ;;  %v1546_v17 = vadd.f32 %v1303_v11, %v1271_v15  ;;  %v412_v18 = vpop.f32.mrb[5].mxu1  ;;  %v1306_v19 = vpop.f32.mrb[6].mxu0 }
  0xf3   : > { %v1550_v21 = vadd.f32 %v620_v13, %v412_v18  ;;  %v630_v22 = vpop.f32.mrb[7].mxu0 }
  0xf4   : > { %v706_v23 = vadd.f32 %v705_v20, %v704_v16  ;;  %v709_v30 = vsel %vm699_vm3, %v1546_v17, 0.0 }
  0xf5   : > { %v707_v24 = vsel %vm699_vm3, %v1550_v21, 0.0  ;;  %v1274_v25 = vpop.f32.mrb[6].mxu1 }
  0xf6   : > { %v708_v26 = vadd.f32 %v707_v24, %v706_v23  ;;  %v1554_v27 = vadd.f32 %v1306_v19, %v1274_v25  ;;  %v422_v28 = vpop.f32.mrb[7].mxu1  ;;  %v1309_v29 = vpop.f32.mrb[8].mxu0 }
  0xf7   : > { %v1558_v31 = vadd.f32 %v630_v22, %v422_v28  ;;  %v640_v32 = vpop.f32.mrb[9].mxu0 }
  0xf8   : > { %v710_v33 = vadd.f32 %v709_v30, %v708_v26  ;;  %v713_v40 = vsel %vm699_vm3, %v1554_v27, 0.0 }
  0xf9   : > { %v711_v34 = vsel %vm699_vm3, %v1558_v31, 0.0  ;;  %v1277_v35 = vpop.f32.mrb[8].mxu1 }
  0xfa   : > { %v712_v36 = vadd.f32 %v711_v34, %v710_v33  ;;  %v1562_v37 = vadd.f32 %v1309_v29, %v1277_v35  ;;  %v432_v38 = vpop.f32.mrb[9].mxu1  ;;  %v1312_v39 = vpop.f32.mrb[10].mxu0 }
  0xfb   : > { %v1566_v41 = vadd.f32 %v640_v32, %v432_v38  ;;  %v650_v42 = vpop.f32.mrb[11].mxu0 }
  0xfc   : > { %v714_v43 = vadd.f32 %v713_v40, %v712_v36  ;;  %v717_v50 = vsel %vm699_vm3, %v1562_v37, 0.0 }
  0xfd   : > { %v715_v44 = vsel %vm699_vm3, %v1566_v41, 0.0  ;;  %v1280_v45 = vpop.f32.mrb[10].mxu1 }
  0xfe   : > { %v716_v46 = vadd.f32 %v715_v44, %v714_v43  ;;  %v1570_v47 = vadd.f32 %v1312_v39, %v1280_v45  ;;  %v442_v48 = vpop.f32.mrb[11].mxu1  ;;  %v1315_v49 = vpop.f32.mrb[12].mxu0 }
  0xff   : > { %v1574_v51 = vadd.f32 %v650_v42, %v442_v48  ;;  %v660_v52 = vpop.f32.mrb[13].mxu0 }
 0x100   : > { %v718_v53 = vadd.f32 %v717_v50, %v716_v46  ;;  %v721_v60 = vsel %vm699_vm3, %v1570_v47, 0.0 }
 0x101   : > { %v719_v54 = vsel %vm699_vm3, %v1574_v51, 0.0  ;;  %v1283_v55 = vpop.f32.mrb[12].mxu1 }
 0x102   : > { %v720_v56 = vadd.f32 %v719_v54, %v718_v53  ;;  %v666_v57 = vadd.f32 %v1315_v49, %v1283_v55  ;;  %v452_v58 = vpop.f32.mrb[13].mxu1  ;;  %v1318_v59 = vpop.f32.mrb[14].mxu0 }
 0x103   : > { %v661_v61 = vadd.f32 %v660_v52, %v452_v58  ;;  %v670_v62 = vpop.f32.mrb[15].mxu0 }
 0x104   : > { %v722_v63 = vadd.f32 %v721_v60, %v720_v56  ;;  %v725_v8 = vsel %vm699_vm3, %v666_v57, 0.0 }
 0x105   : > { %v723_v1 = vsel %vm699_vm3, %v661_v61, 0.0  ;;  %v1286_v2 = vpop.f32.mrb[14].mxu1 }
 0x106   : > { %v724_v4 = vadd.f32 %v723_v1, %v722_v63  ;;  %v676_v5 = vadd.f32 %v1318_v59, %v1286_v2  ;;  %v462_v6 = vpop.f32.mrb[15].mxu1  ;;  %v1321_v7 = vpop.f32.mrb[16].mxu0 }
 0x107   : > { %v671_v10 = vadd.f32 %v670_v62, %v462_v6  ;;  %v680_v11 = vpop.f32.mrb[17].mxu0 }
 0x108   : > { %v726_v13 = vadd.f32 %v725_v8, %v724_v4  ;;  %v729_v22 = vsel %vm699_vm3, %v676_v5, 0.0 }
 0x109   : > { %v727_v14 = vsel %vm699_vm3, %v671_v10, 0.0  ;;  %v1289_v15 = vpop.f32.mrb[16].mxu1 }
 0x10a   : > { %v728_v16 = vadd.f32 %v727_v14, %v726_v13  ;;  %v686_v18 = vadd.f32 %v1321_v7, %v1289_v15  ;;  %v472_v19 = vpop.f32.mrb[17].mxu1  ;;  %v1324_v20 = vpop.f32.mrb[18].mxu0 }
 0x10b   : > { %v681_v23 = vadd.f32 %v680_v11, %v472_v19  ;;  %v690_v24 = vpop.f32.mrb[19].mxu0 }
 0x10c   : > { %v730_v25 = vadd.f32 %v729_v22, %v728_v16  ;;  %v733_v33 = vsel %vm699_vm3, %v686_v18, 0.0 }
 0x10d   : > { %v731_v26 = vsel %vm699_vm3, %v681_v23, 0.0  ;;  %v1292_v28 = vpop.f32.mrb[18].mxu1 }
 0x10e   : > { %v732_v29 = vadd.f32 %v731_v26, %v730_v25  ;;  %v696_v30 = vadd.f32 %v1324_v20, %v1292_v28  ;;  %v482_v32 = vpop.f32.mrb[19].mxu1 }
 0x10f   : > { %v691_v34 = vadd.f32 %v690_v24, %v482_v32 }
 0x110   : > { %v734_v35 = vadd.f32 %v733_v33, %v732_v29  ;;  %v738_v39 = vsel %vm737_vm4, %v696_v30, 0.0 }
 0x111   : > { %v735_v36 = vsel %vm699_vm3, %v691_v34, 0.0 }
 0x112   : > { %v736_v38 = vadd.f32 %v735_v36, %v734_v35 }
 0x114   : > { %v739_v40 = vadd.f32 %v738_v39, %v736_v38 }
 0x116   : > { %v740_v42 = vrot.slane %v739_v40, 4 }
 0x118   : > { %v741_v43 = vadd.f32 %v740_v42, %v739_v40 }
 0x11a   : > { %v742_v44 = vrot.slane %v741_v43, 2 }
 0x11c   : > { %v743_v45 = vadd.f32 %v742_v44, %v741_v43 }
 0x11e   : > { %v744_v46 = vrot.slane %v743_v45, 1 }
 0x120   : > { %v745_v48 = vadd.f32 %v744_v46, %v743_v45 }
 0x122   : > { %v747_v49 = vmul.f32 0.006289308, %v745_v48 }
 0x124   : > { %v1589_v50 = vsub.f32 %v1534_v3, %v747_v49  ;;  %v1592_v52 = vsub.f32 %v1532_v0, %v747_v49  ;;  %v1595_v53 = vsub.f32 %v1542_v12, %v747_v49  ;;  %v1598_v54 = vsub.f32 %v1540_v9, %v747_v49 }
 0x125   : > { %v1601_v55 = vsub.f32 %v1550_v21, %v747_v49  ;;  %v1604_v56 = vsub.f32 %v1546_v17, %v747_v49  ;;  %v1607_v58 = vsub.f32 %v1558_v31, %v747_v49  ;;  %v1610_v3 = vsub.f32 %v1554_v27, %v747_v49 }
 0x126   : > { %v1613_v0 = vsub.f32 %v1566_v41, %v747_v49  ;;  %v1616_v12 = vsub.f32 %v1562_v37, %v747_v49  ;;  %v1619_v9 = vsub.f32 %v1574_v51, %v747_v49  ;;  %v1622_v21 = vsub.f32 %v1570_v47, %v747_v49 }
 0x127   : > { %v1624_v17 = vsub.f32 %v661_v61, %v747_v49  ;;  %v1626_v59 = vsub.f32 %v666_v57, %v747_v49  ;;  %v1628_v31 = vsub.f32 %v671_v10, %v747_v49  ;;  %v1630_v27 = vsub.f32 %v676_v5, %v747_v49 }
 0x128   : > { %v1632_v60 = vsub.f32 %v681_v23, %v747_v49  ;;  %v1634_v41 = vsub.f32 %v686_v18, %v747_v49  ;;  %v1636_v37 = vsub.f32 %v691_v34, %v747_v49  ;;  %v1638_v62 = vsub.f32 %v696_v30, %v747_v49 }
 0x129   : > { %v768_v47 = vmul.f32 %v1589_v50, %v1589_v50  ;;  %v769_v51 = vmul.f32 %v1592_v52, %v1592_v52  ;;  %v770_v57 = vmul.f32 %v1595_v53, %v1595_v53  ;;  %v771_v61 = vmul.f32 %v1598_v54, %v1598_v54 }
 0x12a   : > { %v772_v4 = vmul.f32 %v1601_v55, %v1601_v55  ;;  %v773_v7 = vmul.f32 %v1604_v56, %v1604_v56  ;;  %v774_v11 = vmul.f32 %v1607_v58, %v1607_v58  ;;  %v775_v15 = vmul.f32 %v1610_v3, %v1610_v3 }
 0x12b   : > { %v788_v63 = vsel %vm699_vm3, %v768_v47, 0.0  ;;  %v789_v1 = vsel %vm699_vm3, %v769_v51, 0.0  ;;  %v791_v5 = vsel %vm699_vm3, %v770_v57, 0.0  ;;  %v793_v8 = vsel %vm699_vm3, %v771_v61, 0.0 }
 0x12c   : > { %v790_v2 = vadd.f32 %v789_v1, %v788_v63  ;;  %v795_v13 = vsel %vm699_vm3, %v772_v4, 0.0  ;;  %v797_v16 = vsel %vm699_vm3, %v773_v7, 0.0  ;;  %v776_v19 = vmul.f32 %v1613_v0, %v1613_v0 }
 0x12d   : > { %v799_v20 = vsel %vm699_vm3, %v774_v11, 0.0  ;;  %v777_v23 = vmul.f32 %v1616_v12, %v1616_v12  ;;  %v801_v24 = vsel %vm699_vm3, %v775_v15, 0.0  ;;  %v778_v26 = vmul.f32 %v1619_v9, %v1619_v9 }
 0x12e   : > { %v792_v6 = vadd.f32 %v791_v5, %v790_v2  ;;  %v803_v28 = vsel %vm699_vm3, %v776_v19, 0.0  ;;  %v779_v30 = vmul.f32 %v1622_v21, %v1622_v21  ;;  %v780_v34 = vmul.f32 %v1624_v17, %v1624_v17 }
 0x12f   : > { %v805_v32 = vsel %vm699_vm3, %v777_v23, 0.0  ;;  %v807_v35 = vsel %vm699_vm3, %v778_v26, 0.0  ;;  %v781_v38 = vmul.f32 %v1626_v59, %v1626_v59  ;;  %v782_v42 = vmul.f32 %v1628_v31, %v1628_v31 }
 0x130   : > { %v794_v10 = vadd.f32 %v793_v8, %v792_v6  ;;  %v809_v39 = vsel %vm699_vm3, %v779_v30, 0.0  ;;  %v811_v43 = vsel %vm699_vm3, %v780_v34, 0.0  ;;  %v783_v45 = vmul.f32 %v1630_v27, %v1630_v27 }
 0x131   : > { %v813_v46 = vsel %vm699_vm3, %v781_v38, 0.0  ;;  %v784_v49 = vmul.f32 %v1632_v60, %v1632_v60  ;;  %v815_v47 = vsel %vm699_vm3, %v782_v42, 0.0  ;;  %v785_v57 = vmul.f32 %v1634_v41, %v1634_v41 }
 0x132   : > { %v796_v14 = vadd.f32 %v795_v13, %v794_v10  ;;  %v817_v61 = vsel %vm699_vm3, %v783_v45, 0.0  ;;  %v786_v1 = vmul.f32 %v1636_v37, %v1636_v37  ;;  %v787_v5 = vmul.f32 %v1638_v62, %v1638_v62 }
 0x133   : > { %v819_v2 = vsel %vm699_vm3, %v784_v49, 0.0  ;;  %v821_v6 = vsel %vm699_vm3, %v785_v57, 0.0 }
 0x134   : > { %v798_v18 = vadd.f32 %v797_v16, %v796_v14  ;;  %v823_v8 = vsel %vm699_vm3, %v786_v1, 0.0  ;;  %v825_v11 = vsel %vm737_vm4, %v787_v5, 0.0 }
 0x136   : > { %v800_v22 = vadd.f32 %v799_v20, %v798_v18 }
 0x138   : > { %v802_v25 = vadd.f32 %v801_v24, %v800_v22 }
 0x13a   : > { %v804_v29 = vadd.f32 %v803_v28, %v802_v25 }
 0x13c   : > { %v806_v33 = vadd.f32 %v805_v32, %v804_v29 }
 0x13e   : > { %v808_v36 = vadd.f32 %v807_v35, %v806_v33 }
 0x140   : > { %v810_v40 = vadd.f32 %v809_v39, %v808_v36 }
 0x142   : > { %v812_v44 = vadd.f32 %v811_v43, %v810_v40 }
 0x144   : > { %v814_v48 = vadd.f32 %v813_v46, %v812_v44 }
 0x146   : > { %v816_v51 = vadd.f32 %v815_v47, %v814_v48 }
 0x148   : > { %v818_v63 = vadd.f32 %v817_v61, %v816_v51 }
 0x14a   : > { %v820_v4 = vadd.f32 %v819_v2, %v818_v63 }
 0x14c   : > { %v822_v7 = vadd.f32 %v821_v6, %v820_v4 }
 0x14e   : > { %v824_v10 = vadd.f32 %v823_v8, %v822_v7 }
 0x150   : > { %v826_v13 = vadd.f32 %v825_v11, %v824_v10 }
 0x152   : > { %v827_v14 = vrot.slane %v826_v13, 4 }
 0x154   : > { %v828_v15 = vadd.f32 %v827_v14, %v826_v13 }
 0x156   : > { %v829_v16 = vrot.slane %v828_v15, 2 }
 0x158   : > { %v830_v18 = vadd.f32 %v829_v16, %v828_v15 }
 0x15a   : > { %v831_v19 = vrot.slane %v830_v18, 1 }
 0x15c   : > { %v832_v20 = vadd.f32 %v831_v19, %v830_v18 }
 0x15e   : > { %v833_v22 = vmul.f32 0.006289308, %v832_v20 }
 0x160   : > { %v834_v23 = vadd.f32 1e-05, %v833_v22 }
 0x162   : > { %1354 = vrsqrt.f32 %v834_v23 }
 0x16c   : > { %v1355_v24 = vpop.eup %1354 }
 0x16d   : > { %v842_v25 = vmul.f32 %v1355_v24, %v1607_v58  ;;  %v843_v26 = vmul.f32 %v1355_v24, %v1610_v3  ;;  %v844_v28 = vmul.f32 %v1355_v24, %v1613_v0  ;;  %v845_v29 = vmul.f32 %v1355_v24, %v1616_v12 }
 0x16e   : > { %v846_v30 = vmul.f32 %v1355_v24, %v1619_v9  ;;  %v847_v32 = vmul.f32 %v1355_v24, %v1622_v21  ;;  %v848_v33 = vmul.f32 %v1355_v24, %v1624_v17  ;;  %v849_v34 = vmul.f32 %v1355_v24, %v1626_v59 }
 0x16f   : > { %v850_v35 = vmul.f32 %v1355_v24, %v1628_v31  ;;  %v851_v36 = vmul.f32 %v1355_v24, %v1630_v27  ;;  %v852_v58 = vmul.f32 %v1355_v24, %v1632_v60  ;;  %v853_v3 = vmul.f32 %v1355_v24, %v1634_v41  ;;  %v1215_v27 = vld [vmem:[%s1918_s2] ss:$0 sm:$0xff] }
 0x170   : > { %v854_v0 = vmul.f32 %v1355_v24, %v1636_v37  ;;  %v855_v12 = vmul.f32 %v1355_v24, %v1638_v62  ;;  %v836_v9 = vmul.f32 %v1355_v24, %v1589_v50  ;;  %v837_v21 = vmul.f32 %v1355_v24, %v1592_v52 }
 0x171   : > { %v838_v17 = vmul.f32 %v1355_v24, %v1595_v53  ;;  %v839_v59 = vmul.f32 %v1355_v24, %v1598_v54  ;;  %v840_v31 = vmul.f32 %v1355_v24, %v1601_v55  ;;  %v841_v60 = vmul.f32 %v1355_v24, %v1604_v56  ;;  %v1216_v53 = vld [vmem:[%s1919_s3] ss:$0 sm:$0xff] }
 0x172   : > { %v863_v41 = vmul.f32 %v1215_v27, %v836_v9  ;;  %v864_v37 = vmul.f32 %v1215_v27, %v837_v21  ;;  %v869_v40 = vmul.f32 %v1215_v27, %v842_v25  ;;  %v870_v52 = vmul.f32 %v1215_v27, %v843_v26 }
 0x173   : > { %v865_v38 = vmul.f32 %v1215_v27, %v838_v17  ;;  %v866_v62 = vmul.f32 %v1215_v27, %v839_v59  ;;  %v867_v39 = vmul.f32 %v1215_v27, %v840_v31  ;;  %v868_v50 = vmul.f32 %v1215_v27, %v841_v60 }
 0x174   : > { %v871_v42 = vmul.f32 %v1215_v27, %v844_v28  ;;  %v872_v54 = vmul.f32 %v1215_v27, %v845_v29  ;;  %v873_v55 = vmul.f32 %v1215_v27, %v846_v30  ;;  %v874_v43 = vmul.f32 %v1215_v27, %v847_v32 }
 0x175   : > { %v875_v44 = vmul.f32 %v1215_v27, %v848_v33  ;;  %v876_v45 = vmul.f32 %v1215_v27, %v849_v34  ;;  %v877_v46 = vmul.f32 %v1215_v27, %v850_v35  ;;  %v878_v56 = vmul.f32 %v1215_v27, %v851_v36 }
 0x176   : > { %v879_v48 = vmul.f32 %v1215_v27, %v852_v58  ;;  %v880_v49 = vmul.f32 %v1215_v27, %v853_v3  ;;  %v881_v47 = vmul.f32 %v1215_v27, %v854_v0  ;;  %v1726_v51 = vadd.f32 %v1216_v53, %v863_v41 }
 0x177   : > { %v1728_v57 = vadd.f32 %v1216_v53, %v864_v37  ;;  %v882_v61 = vmul.f32 %v1215_v27, %v855_v12  ;;  %v1730_v63 = vadd.f32 %v1216_v53, %v865_v38  ;;  %v1732_v1 = vadd.f32 %v1216_v53, %v866_v62 }
 0x178   : > { %v1734_v2 = vadd.f32 %v1216_v53, %v867_v39  ;;  %v1736_v4 = vadd.f32 %v1216_v53, %v868_v50  ;;  %v1738_v5 = vadd.f32 %v1216_v53, %v869_v40  ;;  %v1740_v6 = vadd.f32 %v1216_v53, %v870_v52 }
 0x179   : > { %v1742_v7 = vadd.f32 %v1216_v53, %v871_v42  ;;  %v1744_v8 = vadd.f32 %v1216_v53, %v872_v54  ;;  %v1746_v10 = vadd.f32 %v1216_v53, %v873_v55  ;;  %v1748_v11 = vadd.f32 %v1216_v53, %v874_v43 }
 0x17a   : > { %v1750_v13 = vadd.f32 %v1216_v53, %v875_v44  ;;  %v1752_v14 = vadd.f32 %v1216_v53, %v876_v45  ;;  %v1754_v15 = vadd.f32 %v1216_v53, %v877_v46  ;;  %v910_v16 = vmul.f32 %v1726_v51, %v1726_v51 }
 0x17b   : > { %v911_v18 = vmul.f32 %v1728_v57, %v1728_v57  ;;  %v1760_v19 = vadd.f32 %v1216_v53, %v878_v56  ;;  %v1762_v20 = vadd.f32 %v1216_v53, %v879_v48  ;;  %v912_v22 = vmul.f32 %v1730_v63, %v1730_v63 }
 0x17c   : > { %v913_v23 = vmul.f32 %v1732_v1, %v1732_v1  ;;  %v1768_v24 = vadd.f32 %v1216_v53, %v880_v49  ;;  %v1770_v25 = vadd.f32 %v1216_v53, %v881_v47  ;;  %v1772_v26 = vadd.f32 %v1216_v53, %v882_v61 }
 0x17d   : > { %v914_v28 = vmul.f32 %v1734_v2, %v1734_v2  ;;  %v915_v29 = vmul.f32 %v1736_v4, %v1736_v4  ;;  %v916_v30 = vmul.f32 %v1738_v5, %v1738_v5  ;;  %v917_v32 = vmul.f32 %v1740_v6, %v1740_v6 }
 0x17e   : > { %v918_v33 = vmul.f32 %v1742_v7, %v1742_v7  ;;  %v919_v34 = vmul.f32 %v1744_v8, %v1744_v8  ;;  %v920_v35 = vmul.f32 %v1746_v10, %v1746_v10  ;;  %v930_v36 = vmul.f32 %v910_v16, %v1726_v51 }
 0x17f   : > { %v931_v58 = vmul.f32 %v911_v18, %v1728_v57  ;;  %v921_v3 = vmul.f32 %v1748_v11, %v1748_v11  ;;  %v922_v0 = vmul.f32 %v1750_v13, %v1750_v13  ;;  %v932_v12 = vmul.f32 %v912_v22, %v1730_v63 }
 0x180   : > { %v933_v9 = vmul.f32 %v913_v23, %v1732_v1  ;;  %v923_v21 = vmul.f32 %v1752_v14, %v1752_v14  ;;  %v924_v17 = vmul.f32 %v1754_v15, %v1754_v15  ;;  %v925_v59 = vmul.f32 %v1760_v19, %v1760_v19 }
 0x181   : > { %v934_v31 = vmul.f32 %v914_v28, %v1734_v2  ;;  %v926_v27 = vmul.f32 %v1762_v20, %v1762_v20  ;;  %v927_v60 = vmul.f32 %v1768_v24, %v1768_v24  ;;  %v928_v41 = vmul.f32 %v1770_v25, %v1770_v25 }
 0x182   : > { %v935_v37 = vmul.f32 %v915_v29, %v1736_v4  ;;  %v929_v38 = vmul.f32 %v1772_v26, %v1772_v26  ;;  %v936_v62 = vmul.f32 %v916_v30, %v1738_v5  ;;  %v950_v39 = vmul.f32 0.044715, %v930_v36 }
 0x183   : > { %v951_v50 = vmul.f32 0.044715, %v931_v58  ;;  %v937_v40 = vmul.f32 %v917_v32, %v1740_v6  ;;  %v938_v52 = vmul.f32 %v918_v33, %v1742_v7  ;;  %v952_v42 = vmul.f32 0.044715, %v932_v12 }
 0x184   : > { %v953_v53 = vmul.f32 0.044715, %v933_v9  ;;  %v939_v54 = vmul.f32 %v919_v34, %v1744_v8  ;;  %v940_v55 = vmul.f32 %v920_v35, %v1746_v10  ;;  %v941_v43 = vmul.f32 %v921_v3, %v1748_v11 }
 0x185   : > { %v954_v44 = vmul.f32 0.044715, %v934_v31  ;;  %v942_v45 = vmul.f32 %v922_v0, %v1750_v13  ;;  %v943_v46 = vmul.f32 %v923_v21, %v1752_v14  ;;  %v944_v56 = vmul.f32 %v924_v17, %v1754_v15 }
 0x186   : > { %v955_v48 = vmul.f32 0.044715, %v935_v37  ;;  %v945_v49 = vmul.f32 %v925_v59, %v1760_v19  ;;  %v956_v47 = vmul.f32 0.044715, %v936_v62  ;;  %v970_v61 = vadd.f32 %v950_v39, %v1726_v51 }
 0x187   : > { %v971_v16 = vadd.f32 %v951_v50, %v1728_v57  ;;  %v946_v18 = vmul.f32 %v926_v27, %v1762_v20  ;;  %v957_v22 = vmul.f32 0.044715, %v937_v40  ;;  %v972_v23 = vadd.f32 %v952_v42, %v1730_v63 }
 0x188   : > { %v973_v28 = vadd.f32 %v953_v53, %v1732_v1  ;;  %v947_v29 = vmul.f32 %v927_v60, %v1768_v24  ;;  %v948_v30 = vmul.f32 %v928_v41, %v1770_v25  ;;  %v958_v32 = vmul.f32 0.044715, %v938_v52 }
 0x189   : > { %v974_v33 = vadd.f32 %v954_v44, %v1734_v2  ;;  %v949_v34 = vmul.f32 %v929_v38, %v1772_v26  ;;  %v959_v35 = vmul.f32 0.044715, %v939_v54  ;;  %v960_v36 = vmul.f32 0.044715, %v940_v55 }
 0x18a   : > { %v975_v58 = vadd.f32 %v955_v48, %v1736_v4  ;;  %v961_v3 = vmul.f32 0.044715, %v941_v43  ;;  %v976_v0 = vadd.f32 %v956_v47, %v1738_v5  ;;  %v990_v12 = vmul.f32 0.7978846, %v970_v61 }
 0x18b   : > { %v991_v9 = vmul.f32 0.7978846, %v971_v16  ;;  %v962_v21 = vmul.f32 0.044715, %v942_v45  ;;  %v977_v17 = vadd.f32 %v957_v22, %v1740_v6  ;;  %v992_v59 = vmul.f32 0.7978846, %v972_v23 }
 0x18c   : > { %v993_v31 = vmul.f32 0.7978846, %v973_v28  ;;  %v963_v27 = vmul.f32 0.044715, %v943_v46  ;;  %v978_v60 = vadd.f32 %v958_v32, %v1742_v7  ;;  %v994_v41 = vmul.f32 0.7978846, %v974_v33 }
 0x18d   : > { %1356 = vtanh.f32 %v990_v12  ;;  %v964_v37 = vmul.f32 0.044715, %v944_v56  ;;  %v979_v38 = vadd.f32 %v959_v35, %v1744_v8  ;;  %v995_v62 = vmul.f32 0.7978846, %v975_v58 }
 0x18e   : > { %1358 = vtanh.f32 %v991_v9  ;;  %v965_v39 = vmul.f32 0.044715, %v945_v49  ;;  %v980_v50 = vadd.f32 %v960_v36, %v1746_v10  ;;  %v996_v40 = vmul.f32 0.7978846, %v976_v0 }
 0x18f   : > { %1360 = vtanh.f32 %v992_v59  ;;  %v966_v52 = vmul.f32 0.044715, %v946_v18  ;;  %v981_v42 = vadd.f32 %v961_v3, %v1748_v11  ;;  %v997_v53 = vmul.f32 0.7978846, %v977_v17 }
 0x190   : > { %1362 = vtanh.f32 %v993_v31  ;;  %v967_v54 = vmul.f32 0.044715, %v947_v29  ;;  %v982_v55 = vadd.f32 %v962_v21, %v1750_v13  ;;  %v998_v43 = vmul.f32 0.7978846, %v978_v60 }
 0x191   : > { %1364 = vtanh.f32 %v994_v41  ;;  %v968_v44 = vmul.f32 0.044715, %v948_v30  ;;  %v983_v45 = vadd.f32 %v963_v27, %v1752_v14  ;;  %v999_v46 = vmul.f32 0.7978846, %v979_v38 }
 0x192   : > { %1366 = vtanh.f32 %v995_v62  ;;  %v969_v56 = vmul.f32 0.044715, %v949_v34  ;;  %v984_v48 = vadd.f32 %v964_v37, %v1754_v15  ;;  %v1000_v49 = vmul.f32 0.7978846, %v980_v50 }
 0x193   : > { %1368 = vtanh.f32 %v996_v40  ;;  %v985_v47 = vadd.f32 %v965_v39, %v1760_v19  ;;  %v1001_v61 = vmul.f32 0.7978846, %v981_v42  ;;  %v986_v16 = vadd.f32 %v966_v52, %v1762_v20 }
 0x194   : > { %1370 = vtanh.f32 %v997_v53  ;;  %v987_v18 = vadd.f32 %v967_v54, %v1768_v24  ;;  %v1002_v22 = vmul.f32 0.7978846, %v982_v55  ;;  %v988_v23 = vadd.f32 %v968_v44, %v1770_v25 }
 0x195   : > { %1372 = vtanh.f32 %v998_v43  ;;  %v1003_v28 = vmul.f32 0.7978846, %v983_v45  ;;  %v989_v30 = vadd.f32 %v969_v56, %v1772_v26  ;;  %v1004_v32 = vmul.f32 0.7978846, %v984_v48 }
 0x196   : > { %1374 = vtanh.f32 %v999_v46  ;;  %v1005_v34 = vmul.f32 0.7978846, %v985_v47  ;;  %v1006_v58 = vmul.f32 0.7978846, %v986_v16  ;;  %v1007_v3 = vmul.f32 0.7978846, %v987_v18 }
 0x197   : > { %v1357_v29 = vpop.eup %1356  ;;  %1376 = vtanh.f32 %v1000_v49  ;;  %v1008_v9 = vmul.f32 0.7978846, %v988_v23  ;;  %v1009_v31 = vmul.f32 0.7978846, %v989_v30 }
 0x198   : > { %v1359_v33 = vpop.eup %1358  ;;  %1378 = vtanh.f32 %v1001_v61  ;;  %v1030_v35 = vadd.f32 1.0, %v1357_v29 }
 0x199   : > { %v1361_v36 = vpop.eup %1360  ;;  %1380 = vtanh.f32 %v1002_v22  ;;  %v1031_v0 = vadd.f32 1.0, %v1359_v33 }
 0x19a   : > { %v1363_v12 = vpop.eup %1362  ;;  %1382 = vtanh.f32 %v1003_v28  ;;  %v1032_v21 = vadd.f32 1.0, %v1361_v36  ;;  %v1050_v17 = vmul.f32 0.5, %v1030_v35 }
 0x19b   : > { %v1365_v59 = vpop.eup %1364  ;;  %1384 = vtanh.f32 %v1004_v32  ;;  %v1033_v27 = vadd.f32 1.0, %v1363_v12  ;;  %v1051_v60 = vmul.f32 0.5, %v1031_v0 }
 0x19c   : > { %v1367_v41 = vpop.eup %1366  ;;  %1386 = vtanh.f32 %v1005_v34  ;;  %v1034_v37 = vadd.f32 1.0, %v1365_v59  ;;  %v1052_v38 = vmul.f32 0.5, %v1032_v21  ;;  %v1070_v62 = vmul.f32 %v1050_v17, %v1726_v51 }
 0x19d   : > { %v1369_v39 = vpop.eup %1368  ;;  %1388 = vtanh.f32 %v1006_v58  ;;  %v1035_v50 = vadd.f32 1.0, %v1367_v41  ;;  %v1053_v40 = vmul.f32 0.5, %v1033_v27  ;;  %v1071_v52 = vmul.f32 %v1051_v60, %v1728_v57 }
 0x19e   : > { %v1371_v42 = vpop.eup %1370  ;;  %1390 = vtanh.f32 %v1007_v3  ;;  %v1036_v53 = vadd.f32 1.0, %v1369_v39  ;;  %v1054_v54 = vmul.f32 0.5, %v1034_v37  ;;  %v1072_v55 = vmul.f32 %v1052_v38, %v1730_v63  ;;  %1090 = vst.msk [vmem:[%s1851_s5] sm:$0xff] %vm699_vm3, %v1070_v62 }
 0x19f   : > { %v1373_v43 = vpop.eup %1372  ;;  %1392 = vtanh.f32 %v1008_v9  ;;  %v1037_v51 = vadd.f32 1.0, %v1371_v42  ;;  %v1055_v44 = vmul.f32 0.5, %v1035_v50  ;;  %v1073_v45 = vmul.f32 %v1053_v40, %v1732_v1  ;;  %1091 = vst.msk [vmem:[%s1851_s5 + $0x8] sm:$0xff] %vm699_vm3, %v1071_v52 }
 0x1a0   : > { %v1375_v57 = vpop.eup %1374  ;;  %1394 = vtanh.f32 %v1009_v31  ;;  %v1038_v46 = vadd.f32 1.0, %v1373_v43  ;;  %v1056_v56 = vmul.f32 0.5, %v1036_v53  ;;  %v1074_v48 = vmul.f32 %v1054_v54, %v1734_v2  ;;  %1092 = vst.msk [vmem:[%s1851_s5 + $0x10] sm:$0xff] %vm699_vm3, %v1072_v55 }
 0x1a1   : > { %v1377_v63 = vpop.eup %1376  ;;  %v1039_v49 = vadd.f32 1.0, %v1375_v57  ;;  %v1057_v47 = vmul.f32 0.5, %v1037_v51  ;;  %v1075_v61 = vmul.f32 %v1055_v44, %v1736_v4  ;;  %1093 = vst.msk [vmem:[%s1851_s5 + $0x18] sm:$0xff] %vm699_vm3, %v1073_v45 }
 0x1a2   : > { %v1379_v1 = vpop.eup %1378  ;;  %v1040_v16 = vadd.f32 1.0, %v1377_v63  ;;  %v1058_v18 = vmul.f32 0.5, %v1038_v46  ;;  %v1076_v22 = vmul.f32 %v1056_v56, %v1738_v5  ;;  %1094 = vst.msk [vmem:[%s1851_s5 + $0x20] sm:$0xff] %vm699_vm3, %v1074_v48 }
 0x1a3   : > { %v1381_v2 = vpop.eup %1380  ;;  %v1041_v23 = vadd.f32 1.0, %v1379_v1  ;;  %v1059_v28 = vmul.f32 0.5, %v1039_v49  ;;  %v1077_v29 = vmul.f32 %v1057_v47, %v1740_v6  ;;  %1095 = vst.msk [vmem:[%s1851_s5 + $0x28] sm:$0xff] %vm699_vm3, %v1075_v61 }
 0x1a4   : > { %v1383_v4 = vpop.eup %1382  ;;  %v1042_v30 = vadd.f32 1.0, %v1381_v2  ;;  %v1060_v32 = vmul.f32 0.5, %v1040_v16  ;;  %v1078_v33 = vmul.f32 %v1058_v18, %v1742_v7  ;;  %1096 = vst.msk [vmem:[%s1851_s5 + $0x30] sm:$0xff] %vm699_vm3, %v1076_v22 }
 0x1a5   : > { %v1385_v5 = vpop.eup %1384  ;;  %v1043_v34 = vadd.f32 1.0, %v1383_v4  ;;  %v1061_v35 = vmul.f32 0.5, %v1041_v23  ;;  %v1079_v36 = vmul.f32 %v1059_v28, %v1744_v8  ;;  %1097 = vst.msk [vmem:[%s1851_s5 + $0x38] sm:$0xff] %vm699_vm3, %v1077_v29 }
 0x1a6   : > { %v1387_v6 = vpop.eup %1386  ;;  %v1044_v58 = vadd.f32 1.0, %v1385_v5  ;;  %v1062_v3 = vmul.f32 0.5, %v1042_v30  ;;  %v1080_v0 = vmul.f32 %v1060_v32, %v1746_v10  ;;  %1098 = vst.msk [vmem:[%s1851_s5 + $0x40] sm:$0xff] %vm699_vm3, %v1078_v33 }
 0x1a7   : > { %v1389_v7 = vpop.eup %1388  ;;  %v1045_v12 = vadd.f32 1.0, %v1387_v6  ;;  %v1063_v9 = vmul.f32 0.5, %v1043_v34  ;;  %v1081_v21 = vmul.f32 %v1061_v35, %v1748_v11  ;;  %1099 = vst.msk [vmem:[%s1851_s5 + $0x48] sm:$0xff] %vm699_vm3, %v1079_v36 }
 0x1a8   : > { %v1391_v8 = vpop.eup %1390  ;;  %v1046_v17 = vadd.f32 1.0, %v1389_v7  ;;  %v1064_v59 = vmul.f32 0.5, %v1044_v58  ;;  %v1082_v31 = vmul.f32 %v1062_v3, %v1750_v13  ;;  %1100 = vst.msk [vmem:[%s1851_s5 + $0x50] sm:$0xff] %vm699_vm3, %v1080_v0 }
 0x1a9   : > { %v1393_v10 = vpop.eup %1392  ;;  %v1047_v27 = vadd.f32 1.0, %v1391_v8  ;;  %v1065_v60 = vmul.f32 0.5, %v1045_v12  ;;  %v1083_v41 = vmul.f32 %v1063_v9, %v1752_v14  ;;  %1101 = vst.msk [vmem:[%s1851_s5 + $0x58] sm:$0xff] %vm699_vm3, %v1081_v21 }
 0x1aa   : > { %v1395_v11 = vpop.eup %1394  ;;  %v1048_v37 = vadd.f32 1.0, %v1393_v10  ;;  %v1066_v38 = vmul.f32 0.5, %v1046_v17  ;;  %v1084_v62 = vmul.f32 %v1064_v59, %v1754_v15  ;;  %1102 = vst.msk [vmem:[%s1851_s5 + $0x60] sm:$0xff] %vm699_vm3, %v1082_v31 }
 0x1ab   : > { %v1049_v13 = vadd.f32 1.0, %v1395_v11  ;;  %v1067_v39 = vmul.f32 0.5, %v1047_v27  ;;  %v1085_v50 = vmul.f32 %v1065_v60, %v1760_v19  ;;  %1103 = vst.msk [vmem:[%s1851_s5 + $0x68] sm:$0xff] %vm699_vm3, %v1083_v41 }
 0x1ac   : > { %v1068_v14 = vmul.f32 0.5, %v1048_v37  ;;  %v1086_v40 = vmul.f32 %v1066_v38, %v1762_v20  ;;  %1104 = vst.msk [vmem:[%s1851_s5 + $0x70] sm:$0xff] %vm699_vm3, %v1084_v62 }
 0x1ad   : > { %v1069_v52 = vmul.f32 0.5, %v1049_v13  ;;  %v1087_v42 = vmul.f32 %v1067_v39, %v1768_v24  ;;  %1105 = vst.msk [vmem:[%s1851_s5 + $0x78] sm:$0xff] %vm699_vm3, %v1085_v50 }
 0x1ae   : > { %v1088_v15 = vmul.f32 %v1068_v14, %v1770_v25  ;;  %1106 = vst.msk [vmem:[%s1851_s5 + $0x80] sm:$0xff] %vm699_vm3, %v1086_v40 }
 0x1af   : > { %v1089_v53 = vmul.f32 %v1069_v52, %v1772_v26  ;;  %1107 = vst.msk [vmem:[%s1851_s5 + $0x88] sm:$0xff] %vm699_vm3, %v1087_v42 }
 0x1b0   : > { %1108 = vst.msk [vmem:[%s1851_s5 + $0x90] sm:$0xff] %vm699_vm3, %v1088_v15 }
 0x1b1   : > { %1109 = vst.msk [vmem:[%s1851_s5 + $0x98] sm:$0x7f] %vm737_vm4, %v1089_v53 }
 0x1b2 PF: > { %s14_s15 = sadd.s32 1, %s1402_s15  }
 0x1b3   : > { %p11_p4 = scmp.ge.s32.totalorder %s14_s15, 4  }
 0x1b5   :  { %13 = sbr.rel (!%p11_p4) target bundleno = 1 (0x1), region = 67 }

// kernel: wavlm_classifier_forward.5
= control target key start
LH: loop header
LB: loop body
LE: loop exit
PB: predicated region body
PF: predicated region fallthrough
CT: control target
= control target key end

     0   :  { %s1116_s21 = smov 0   ;;  %s1349_s0 = inlined_call_operand.vmem [shape: f32[2,79,48], index: 0, kind: input, shape index: {}]   ;;  %s1350_s1 = inlined_call_operand.vmem [shape: f32[48,32], index: 1, kind: input, shape index: {}]   ;;  %s1351_s2 = inlined_call_operand.vmem [shape: f32[1,32], index: 2, kind: input, shape index: {}]   ;;  %s1352_s3 = inlined_call_operand.vmem [shape: f32[1,32], index: 3, kind: input, shape index: {}]   ;;  %s1353_s4 = inlined_call_operand.vmem [shape: f32[32,32], index: 4, kind: input, shape index: {}]   ;;  %s1354_s5 = inlined_call_operand.vmem [shape: f32[1,32], index: 5, kind: input, shape index: {}]   ;;  %s1355_s6 = inlined_call_operand.vmem [shape: f32[2,79,32], index: 6, kind: output, shape index: {}]  }
   0x1 LB: > { %s892_s22 = sadd.s32 4294967295, %s1079_s21   ;;  %p896_p0 = scmp.ge.s32.totalorder %s1079_s21, 1  ;;  %s1079_s21 = sphi %s1116_s21, %s16_s21  }
   0x2   : > { %p212_p1 = scmp.lt.s32.totalorder %s1079_s21, 3 }
   0x4   : > { %p213_p2 = pnand %p896_p0, %p212_p1 }
   0x5   : > { %v262_v0 = vld [vmem:[%s1350_s1] sm:$0xff] (!%p213_p2)  ;;  %v263_v1 = vld [vmem:[%s1350_s1 + $0x8] sm:$0xff] (!%p213_p2)  ;;  %v264_v2 = vld [vmem:[%s1350_s1 + $0x10] sm:$0xff] (!%p213_p2)  ;;  %p242_p3 = scmp.lt.s32.totalorder (!%p213_p2), %s892_s22, 1  ;;  %vm268_vm0 = vcmask (!%p213_p2), 392192   ;;  %vm504_vm1 = vcmask (!%p213_p2), 261120  }
   0x6   : > { %216 = sbr.rel (%p213_p2) target bundleno = 809 (0x329), region = 44  ;;  %v1004_v3 = vpack.c.bf16 (!%p213_p2), %v263_v1, %v262_v0  ;;  %v265_v4 = vld [vmem:[%s1350_s1 + $0x18] sm:$0xff] (!%p213_p2)  ;;  %v266_v6 = vld [vmem:[%s1350_s1 + $0x20] sm:$0xff] (!%p213_p2)  ;;  %v267_v7 = vld [vmem:[%s1350_s1 + $0x28] sm:$0xff] (!%p213_p2)  ;;  %vm532_vm2 = vcmask (!%p213_p2), 260096  }
   0x7   : > { %v1008_v5 = vpack.c.bf16 (!%p213_p2), %v265_v4, %v264_v2  ;;  %v1012_v8 = vpack.c.bf16 (!%p213_p2), %v267_v7, %v266_v6 }
   0x8   : > { %1005 = vmatprep.subr.bf16.mxu0 (!%p213_p2), %v1004_v3 }
   0x9   : > { %1007 = vmatpush3.bf16.msra.mxu0 (!%p213_p2), %v1004_v3 }
   0xa   : > { %1009 = vmatprep.subr.bf16.mxu0 (!%p213_p2), %v1008_v5 }
   0xd   : > { %s1357_s22 = smov (!%p242_p3, %s892_s22), 1  ;;  %1011 = vmatpush3.bf16.msra.mxu0 %v1008_v5 }
   0xe   : > { %s1024_s11 = smul.u32 80, %s1357_s22  ;;  %1013 = vmatprep.subr.bf16.mxu0 %v1012_v8 }
  0x10   : > { %s246_s14 = scalar_lea.vmem %s1349_s0, %s1024_s11  ;;  %s251_s9 = scalar_lea.vmem %s1355_s6, %s1024_s11 }
  0x11   : > { %v252_v9 = vld [vmem:[%s246_s14] sm:$0xff]  ;;  %1015 = vmatpush3.bf16.msra.mxu0 %v1012_v8  ;;  %v253_v10 = vld [vmem:[%s246_s14 + $0x8] sm:$0xff]  ;;  %v254_v11 = vld [vmem:[%s246_s14 + $0x10] sm:$0xff] }
  0x12   : > { %966 = vmatprep.mubr.msk.f32.mxu0 %vm268_vm0, %v252_v9  ;;  %v255_v12 = vld [vmem:[%s246_s14 + $0x18] sm:$0xff]  ;;  %v256_v13 = vld [vmem:[%s246_s14 + $0x20] sm:$0xff]  ;;  %v257_v14 = vld [vmem:[%s246_s14 + $0x28] sm:$0xff] }
  0x13   : > { %v258_v15 = vld [vmem:[%s246_s14 + $0x30] sm:$0xff]  ;;  %v259_v16 = vld [vmem:[%s246_s14 + $0x38] sm:$0xff]  ;;  %v260_v17 = vld [vmem:[%s246_s14 + $0x40] sm:$0xff] }
  0x14   : > { %967 = vmatmul.mubr.msk.f32.vlgmr.msra.gmra.mrb[0].mxu0 %vm268_vm0, %v253_v10  ;;  %v261_v18 = vld [vmem:[%s246_s14 + $0x48] sm:$0x7f] }
  0x15   : > { %969 = vmatprep.mubr.msk.f32.mxu0 %vm268_vm0, %v254_v11 }
  0x18   : > { %970 = vmatmul.mubr.msk.f32.gmra.mrb[2].mxu0 %vm268_vm0, %v255_v12 }
  0x19   : > { %972 = vmatprep.mubr.msk.f32.mxu0 %vm268_vm0, %v256_v13 }
  0x1c   : > { %973 = vmatmul.mubr.msk.f32.gmra.mrb[4].mxu0 %vm268_vm0, %v257_v14 }
  0x1d   : > { %975 = vmatprep.mubr.msk.f32.mxu0 %vm268_vm0, %v258_v15 }
  0x20   : > { %976 = vmatmul.mubr.msk.f32.gmra.mrb[6].mxu0 %vm268_vm0, %v259_v16 }
  0x21   : > { %978 = vmatprep.mubr.msk.f32.mxu0 %vm268_vm0, %v260_v17 }
  0x24   : > { %979 = vmatmul.mubr.msk.f32.gmra.mrb[8].mxu0 %vm268_vm0, %v261_v18 }
  0xe7   : > { %v1160_v19 = vpop.f32.mrb[0].mxu0 }
  0xe8   : > { %v415_v20 = vmul.f32 %v1160_v19, %v1160_v19  ;;  %v1164_v21 = vpop.f32.mrb[1].mxu0 }
  0xe9   : > { %v414_v22 = vmul.f32 %v1164_v21, %v1164_v21 }
  0xea   : > { %v425_v23 = vmul.f32 %v1160_v19, %v415_v20 }
  0xeb   : > { %v424_v24 = vmul.f32 %v414_v22, %v1164_v21  ;;  %v1170_v25 = vpop.f32.mrb[2].mxu0 }
  0xec   : > { %v435_v26 = vmul.f32 0.044715, %v425_v23  ;;  %v417_v27 = vmul.f32 %v1170_v25, %v1170_v25  ;;  %v1174_v28 = vpop.f32.mrb[3].mxu0 }
  0xed   : > { %v434_v29 = vmul.f32 0.044715, %v424_v24  ;;  %v416_v30 = vmul.f32 %v1174_v28, %v1174_v28 }
  0xee   : > { %v445_v31 = vadd.f32 %v1160_v19, %v435_v26  ;;  %v427_v32 = vmul.f32 %v1170_v25, %v417_v27 }
  0xef   : > { %v444_v33 = vadd.f32 %v434_v29, %v1164_v21  ;;  %v426_v34 = vmul.f32 %v416_v30, %v1174_v28  ;;  %v1182_v35 = vpop.f32.mrb[4].mxu0 }
  0xf0   : > { %v455_v36 = vmul.f32 0.7978846, %v445_v31  ;;  %v437_v37 = vmul.f32 0.044715, %v427_v32  ;;  %v419_v38 = vmul.f32 %v1182_v35, %v1182_v35  ;;  %v1186_v39 = vpop.f32.mrb[5].mxu0 }
  0xf1   : > { %v454_v40 = vmul.f32 0.7978846, %v444_v33  ;;  %v436_v41 = vmul.f32 0.044715, %v426_v34  ;;  %v418_v42 = vmul.f32 %v1186_v39, %v1186_v39 }
  0xf2   : > { %1033 = vtanh.f32 %v455_v36  ;;  %v447_v43 = vadd.f32 %v1170_v25, %v437_v37  ;;  %v429_v44 = vmul.f32 %v1182_v35, %v419_v38 }
  0xf3   : > { %1035 = vtanh.f32 %v454_v40  ;;  %v446_v45 = vadd.f32 %v436_v41, %v1174_v28  ;;  %v428_v46 = vmul.f32 %v418_v42, %v1186_v39  ;;  %v1194_v47 = vpop.f32.mrb[6].mxu0 }
  0xf4   : > { %v457_v48 = vmul.f32 0.7978846, %v447_v43  ;;  %v439_v49 = vmul.f32 0.044715, %v429_v44  ;;  %v421_v50 = vmul.f32 %v1194_v47, %v1194_v47  ;;  %v1198_v51 = vpop.f32.mrb[7].mxu0 }
  0xf5   : > { %v456_v52 = vmul.f32 0.7978846, %v446_v45  ;;  %v438_v53 = vmul.f32 0.044715, %v428_v46  ;;  %v420_v54 = vmul.f32 %v1198_v51, %v1198_v51 }
  0xf6   : > { %1037 = vtanh.f32 %v457_v48  ;;  %v449_v55 = vadd.f32 %v1182_v35, %v439_v49  ;;  %v431_v56 = vmul.f32 %v1194_v47, %v421_v50 }
  0xf7   : > { %1039 = vtanh.f32 %v456_v52  ;;  %v448_v57 = vadd.f32 %v438_v53, %v1186_v39  ;;  %v430_v58 = vmul.f32 %v420_v54, %v1198_v51  ;;  %v1206_v59 = vpop.f32.mrb[8].mxu0 }
  0xf8   : > { %v459_v60 = vmul.f32 0.7978846, %v449_v55  ;;  %v441_v61 = vmul.f32 0.044715, %v431_v56  ;;  %v423_v62 = vmul.f32 %v1206_v59, %v1206_v59  ;;  %v1210_v63 = vpop.f32.mrb[9].mxu0 }
  0xf9   : > { %v458_v0 = vmul.f32 0.7978846, %v448_v57  ;;  %v440_v1 = vmul.f32 0.044715, %v430_v58  ;;  %v422_v2 = vmul.f32 %v1210_v63, %v1210_v63 }
  0xfa   : > { %1041 = vtanh.f32 %v459_v60  ;;  %v451_v3 = vadd.f32 %v1194_v47, %v441_v61  ;;  %v433_v4 = vmul.f32 %v1206_v59, %v423_v62 }
  0xfb   : > { %1043 = vtanh.f32 %v458_v0  ;;  %v450_v5 = vadd.f32 %v440_v1, %v1198_v51  ;;  %v432_v6 = vmul.f32 %v422_v2, %v1210_v63 }
  0xfc   : > { %v1034_v7 = vpop.eup %1033  ;;  %v461_v8 = vmul.f32 0.7978846, %v451_v3  ;;  %v443_v9 = vmul.f32 0.044715, %v433_v4 }
  0xfd   : > { %v1036_v10 = vpop.eup %1035  ;;  %v460_v11 = vmul.f32 0.7978846, %v450_v5  ;;  %v442_v12 = vmul.f32 0.044715, %v432_v6  ;;  %v475_v13 = vadd.f32 1.0, %v1034_v7 }
  0xfe   : > { %1045 = vtanh.f32 %v461_v8  ;;  %v453_v14 = vadd.f32 %v1206_v59, %v443_v9  ;;  %v474_v15 = vadd.f32 1.0, %v1036_v10 }
  0xff   : > { %1047 = vtanh.f32 %v460_v11  ;;  %v452_v16 = vadd.f32 %v442_v12, %v1210_v63  ;;  %v485_v22 = vmul.f32 0.5, %v475_v13 }
 0x100   : > { %v1038_v17 = vpop.eup %1037  ;;  %v463_v18 = vmul.f32 0.7978846, %v453_v14  ;;  %v484_v20 = vmul.f32 0.5, %v474_v15 }
 0x101   : > { %v1040_v23 = vpop.eup %1039  ;;  %v462_v24 = vmul.f32 0.7978846, %v452_v16  ;;  %v477_v26 = vadd.f32 1.0, %v1038_v17  ;;  %v495_v32 = vmul.f32 %v1160_v19, %v485_v22 }
 0x102   : > { %1049 = vtanh.f32 %v463_v18  ;;  %v494_v27 = vmul.f32 %v484_v20, %v1164_v21  ;;  %v476_v29 = vadd.f32 1.0, %v1040_v23 }
 0x103   : > { %1051 = vtanh.f32 %v462_v24  ;;  %v487_v34 = vmul.f32 0.5, %v477_v26  ;;  %v508_v43 = vsel %vm504_vm1, %v495_v32, 0.0 }
 0x104   : > { %v1042_v30 = vpop.eup %1041  ;;  %v505_v31 = vsel %vm504_vm1, %v494_v27, 0.0  ;;  %v486_v33 = vmul.f32 0.5, %v476_v29 }
 0x105   : > { %v1044_v36 = vpop.eup %1043  ;;  %506 = vadd.xlane.f32.xlu0 %v505_v31  ;;  %v479_v37 = vadd.f32 1.0, %v1042_v30  ;;  %v497_v44 = vmul.f32 %v1170_v25, %v487_v34 }
 0x106   : > { %v496_v38 = vmul.f32 %v486_v33, %v1174_v28  ;;  %v478_v40 = vadd.f32 1.0, %v1044_v36 }
 0x107   : > { %v489_v41 = vmul.f32 0.5, %v479_v37  ;;  %v514_v52 = vsel %vm504_vm1, %v497_v44, 0.0 }
 0x108   : > { %v1046_v42 = vpop.eup %1045  ;;  %v511_v21 = vsel %vm504_vm1, %v496_v38, 0.0  ;;  %v488_v45 = vmul.f32 0.5, %v478_v40 }
 0x109   : > { %v1048_v46 = vpop.eup %1047  ;;  %509 = vadd.xlane.f32.xlu0 %v508_v43  ;;  %512 = vadd.xlane.f32.xlu1 %v511_v21  ;;  %v481_v19 = vadd.f32 1.0, %v1046_v42  ;;  %v499_v50 = vmul.f32 %v1182_v35, %v489_v41 }
 0x10a   : > { %v498_v48 = vmul.f32 %v488_v45, %v1186_v39  ;;  %v480_v49 = vadd.f32 1.0, %v1048_v46 }
 0x10b   : > { %v491_v55 = vmul.f32 0.5, %v481_v19  ;;  %v520_v60 = vsel %vm504_vm1, %v499_v50, 0.0 }
 0x10c   : > { %v1050_v28 = vpop.eup %1049  ;;  %v517_v53 = vsel %vm504_vm1, %v498_v48, 0.0  ;;  %v490_v54 = vmul.f32 0.5, %v480_v49 }
 0x10d   : > { %v1052_v56 = vpop.eup %1051  ;;  %515 = vadd.xlane.f32.xlu1 %v514_v52  ;;  %518 = vadd.xlane.f32.xlu0 %v517_v53  ;;  %v483_v25 = vadd.f32 1.0, %v1050_v28  ;;  %v501_v35 = vmul.f32 %v1194_v47, %v491_v55 }
 0x10e   : > { %v500_v57 = vmul.f32 %v490_v54, %v1198_v51  ;;  %v482_v58 = vadd.f32 1.0, %v1052_v56  ;;  %v671_v56 = vld [vmem:[%s1353_s4] sm:$0xff] }
 0x10f   : > { %v493_v62 = vmul.f32 0.5, %v483_v25  ;;  %v526_v1 = vsel %vm504_vm1, %v501_v35, 0.0  ;;  %v672_v25 = vld [vmem:[%s1353_s4 + $0x8] sm:$0xff] }
 0x110   : > { %v523_v39 = vsel %vm504_vm1, %v500_v57, 0.0  ;;  %v492_v61 = vmul.f32 0.5, %v482_v58  ;;  %v673_v58 = vld [vmem:[%s1353_s4 + $0x10] sm:$0xff] }
 0x111   : > { %521 = vadd.xlane.f32.xlu1 %v520_v60  ;;  %524 = vadd.xlane.f32.xlu0 %v523_v39  ;;  %v503_v3 = vmul.f32 %v1206_v59, %v493_v62  ;;  %v674_v60 = vld [vmem:[%s1353_s4 + $0x18] sm:$0xff] }
 0x112   : > { %v502_v0 = vmul.f32 %v492_v61, %v1210_v63  ;;  %v1020_v39 = vpack.c.bf16 %v674_v60, %v673_v58 }
 0x113   : > { %v533_v51 = vsel %vm532_vm2, %v503_v3, 0.0 }
 0x114   : > { %v529_v2 = vsel %vm504_vm1, %v502_v0, 0.0 }
 0x115   : > { %527 = vadd.xlane.f32.xlu1 %v526_v1  ;;  %530 = vadd.xlane.f32.xlu0 %v529_v2 }
 0x119   : > { %534 = vadd.xlane.f32.xlu1 %v533_v51 }
 0x192   : > { %v507_v4 = vpop.xlane.xlu0 %506 }
 0x193   : > { %v537_v47 = vmul.f32 0.03125, %v507_v4 }
 0x195   : > { %v1240_v5 = vsub.f32 %v494_v27, %v537_v47 }
 0x196   : > { %v510_v6 = vpop.xlane.xlu0 %509  ;;  %v513_v7 = vpop.xlane.xlu1 %512 }
 0x197   : > { %v538_v8 = vmul.f32 0.03125, %v510_v6  ;;  %v539_v63 = vmul.f32 0.03125, %v513_v7  ;;  %v557_v9 = vmul.f32 %v1240_v5, %v1240_v5 }
 0x199   : > { %v1244_v10 = vsub.f32 %v495_v32, %v538_v8  ;;  %v1246_v59 = vsub.f32 %v496_v38, %v539_v63  ;;  %v567_v11 = vsel %vm504_vm1, %v557_v9, 0.0 }
 0x19a   : > { %v516_v12 = vpop.xlane.xlu1 %515  ;;  %v519_v13 = vpop.xlane.xlu0 %518  ;;  %568 = vadd.xlane.f32.xlu0 %v567_v11 }
 0x19b   : > { %v540_v14 = vmul.f32 0.03125, %v516_v12  ;;  %v541_v15 = vmul.f32 0.03125, %v519_v13  ;;  %v558_v16 = vmul.f32 %v1244_v10, %v1244_v10  ;;  %v559_v17 = vmul.f32 %v1246_v59, %v1246_v59 }
 0x19d   : > { %v1253_v18 = vsub.f32 %v497_v44, %v540_v14  ;;  %v1255_v20 = vsub.f32 %v498_v48, %v541_v15  ;;  %v570_v22 = vsel %vm504_vm1, %v558_v16, 0.0  ;;  %v573_v23 = vsel %vm504_vm1, %v559_v17, 0.0 }
 0x19e   : > { %v522_v24 = vpop.xlane.xlu1 %521  ;;  %v525_v26 = vpop.xlane.xlu0 %524  ;;  %571 = vadd.xlane.f32.xlu1 %v570_v22  ;;  %574 = vadd.xlane.f32.xlu0 %v573_v23  ;;  %v909_v22 = vld [vmem:[%s1351_s2] ss:$0 sm:$0xff] }
 0x19f   : > { %v542_v27 = vmul.f32 0.03125, %v522_v24  ;;  %v543_v29 = vmul.f32 0.03125, %v525_v26  ;;  %v560_v30 = vmul.f32 %v1253_v18, %v1253_v18  ;;  %v561_v31 = vmul.f32 %v1255_v20, %v1255_v20 }
 0x1a1   : > { %v1263_v32 = vsub.f32 %v499_v50, %v542_v27  ;;  %v1265_v33 = vsub.f32 %v500_v57, %v543_v29  ;;  %v576_v34 = vsel %vm504_vm1, %v560_v30, 0.0  ;;  %v579_v36 = vsel %vm504_vm1, %v561_v31, 0.0  ;;  %v910_v30 = vld [vmem:[%s1352_s3] ss:$0 sm:$0xff] }
 0x1a2   : > { %v528_v37 = vpop.xlane.xlu1 %527  ;;  %577 = vadd.xlane.f32.xlu1 %v576_v34  ;;  %580 = vadd.xlane.f32.xlu0 %v579_v36  ;;  %v531_v38 = vpop.xlane.xlu0 %530  ;;  %v1016_v57 = vpack.c.bf16 %v672_v25, %v671_v56 }
 0x1a3   : > { %v544_v40 = vmul.f32 0.03125, %v528_v37  ;;  %v545_v41 = vmul.f32 0.03125, %v531_v38  ;;  %v562_v42 = vmul.f32 %v1263_v32, %v1263_v32  ;;  %v563_v43 = vmul.f32 %v1265_v33, %v1265_v33 }
 0x1a4   : > { %1017 = vmatprep.subr.bf16.mxu1 %v1016_v57 }
 0x1a5   : > { %v1273_v21 = vsub.f32 %v501_v35, %v544_v40  ;;  %v1275_v44 = vsub.f32 %v502_v0, %v545_v41  ;;  %v582_v45 = vsel %vm504_vm1, %v562_v42, 0.0  ;;  %v585_v46 = vsel %vm504_vm1, %v563_v43, 0.0  ;;  %1019 = vmatpush3.bf16.msra.mxu1 %v1016_v57 }
 0x1a6   : > { %583 = vadd.xlane.f32.xlu1 %v582_v45  ;;  %v535_v19 = vpop.xlane.xlu1 %534  ;;  %586 = vadd.xlane.f32.xlu0 %v585_v46 }
 0x1a7   : > { %v546_v48 = vmul.f32 0.03125, %v535_v19  ;;  %v564_v49 = vmul.f32 %v1273_v21, %v1273_v21  ;;  %v565_v50 = vmul.f32 %v1275_v44, %v1275_v44  ;;  %1021 = vmatprep.subr.bf16.mxu1 %v1020_v39 }
 0x1a9   : > { %v1283_v28 = vsub.f32 %v503_v3, %v546_v48  ;;  %v588_v52 = vsel %vm504_vm1, %v564_v49, 0.0  ;;  %v591_v53 = vsel %vm504_vm1, %v565_v50, 0.0  ;;  %1023 = vmatpush3.bf16.msra.mxu1 %v1020_v39 }
 0x1aa   : > { %589 = vadd.xlane.f32.xlu1 %v588_v52  ;;  %592 = vadd.xlane.f32.xlu0 %v591_v53 }
 0x1ab   : > { %v566_v54 = vmul.f32 %v1283_v28, %v1283_v28 }
 0x1ad   : > { %v594_v55 = vsel %vm532_vm2, %v566_v54, 0.0 }
 0x1ae   : > { %595 = vadd.xlane.f32.xlu1 %v594_v55 }
 0x227   : > { %v569_v35 = vpop.xlane.xlu0 %568 }
 0x228   : > { %v597_v61 = vmul.f32 0.03125, %v569_v35 }
 0x22a   : > { %v607_v62 = vadd.f32 1e-05, %v597_v61 }
 0x22b   : > { %v572_v0 = vpop.xlane.xlu1 %571  ;;  %v575_v1 = vpop.xlane.xlu0 %574 }
 0x22c   : > { %1053 = vrsqrt.f32 %v607_v62  ;;  %v598_v2 = vmul.f32 0.03125, %v572_v0  ;;  %v599_v3 = vmul.f32 0.03125, %v575_v1 }
 0x22e   : > { %v608_v51 = vadd.f32 1e-05, %v598_v2  ;;  %v609_v4 = vadd.f32 1e-05, %v599_v3 }
 0x22f   : > { %v578_v47 = vpop.xlane.xlu1 %577  ;;  %v581_v6 = vpop.xlane.xlu0 %580 }
 0x230   : > { %1055 = vrsqrt.f32 %v608_v51  ;;  %v600_v7 = vmul.f32 0.03125, %v578_v47  ;;  %v601_v8 = vmul.f32 0.03125, %v581_v6 }
 0x231   : > { %1057 = vrsqrt.f32 %v609_v4 }
 0x232   : > { %v610_v63 = vadd.f32 1e-05, %v600_v7  ;;  %v611_v9 = vadd.f32 1e-05, %v601_v8 }
 0x233   : > { %v584_v11 = vpop.xlane.xlu1 %583  ;;  %v587_v12 = vpop.xlane.xlu0 %586 }
 0x234   : > { %1059 = vrsqrt.f32 %v610_v63  ;;  %v602_v13 = vmul.f32 0.03125, %v584_v11  ;;  %v603_v14 = vmul.f32 0.03125, %v587_v12 }
 0x235   : > { %1061 = vrsqrt.f32 %v611_v9 }
 0x236   : > { %v1054_v15 = vpop.eup %1053  ;;  %v612_v16 = vadd.f32 1e-05, %v602_v13  ;;  %v613_v17 = vadd.f32 1e-05, %v603_v14 }
 0x237   : > { %v590_v23 = vpop.xlane.xlu1 %589  ;;  %v593_v24 = vpop.xlane.xlu0 %592  ;;  %v627_v26 = vmul.f32 %v1054_v15, %v1240_v5 }
 0x238   : > { %1063 = vrsqrt.f32 %v612_v16  ;;  %v604_v27 = vmul.f32 0.03125, %v590_v23  ;;  %v605_v29 = vmul.f32 0.03125, %v593_v24 }
 0x239   : > { %1065 = vrsqrt.f32 %v613_v17  ;;  %v644_v31 = vmul.f32 %v909_v22, %v627_v26 }
 0x23a   : > { %v1056_v34 = vpop.eup %1055  ;;  %v614_v36 = vadd.f32 1e-05, %v604_v27  ;;  %v615_v37 = vadd.f32 1e-05, %v605_v29 }
 0x23b   : > { %v1058_v38 = vpop.eup %1057  ;;  %v596_v40 = vpop.xlane.xlu1 %595  ;;  %v661_v41 = vadd.f32 %v910_v30, %v644_v31  ;;  %v628_v42 = vmul.f32 %v1056_v34, %v1244_v10 }
 0x23c   : > { %1067 = vrsqrt.f32 %v614_v36  ;;  %v606_v43 = vmul.f32 0.03125, %v596_v40  ;;  %v629_v5 = vmul.f32 %v1058_v38, %v1246_v59 }
 0x23d   : > { %1069 = vrsqrt.f32 %v615_v37  ;;  %989 = vmatprep.mubr.msk.f32.mxu1 %vm504_vm1, %v661_v41  ;;  %v645_v45 = vmul.f32 %v909_v22, %v628_v42 }
 0x23e   : > { %v1060_v46 = vpop.eup %1059  ;;  %v616_v19 = vadd.f32 1e-05, %v606_v43  ;;  %v646_v48 = vmul.f32 %v909_v22, %v629_v5 }
 0x23f   : > { %v1062_v49 = vpop.eup %1061  ;;  %v662_v50 = vadd.f32 %v910_v30, %v645_v45  ;;  %v630_v52 = vmul.f32 %v1060_v46, %v1253_v18 }
 0x240   : > { %1071 = vrsqrt.f32 %v616_v19  ;;  %v663_v53 = vadd.f32 %v910_v30, %v646_v48  ;;  %v631_v54 = vmul.f32 %v1062_v49, %v1255_v20 }
 0x241   : > { %990 = vmatmul.mubr.msk.f32.vlgmr.msra.gmra.mrb[0].mxu1 %vm504_vm1, %v662_v50  ;;  %v647_v10 = vmul.f32 %v909_v22, %v630_v52 }
 0x242   : > { %v1064_v55 = vpop.eup %1063  ;;  %992 = vmatprep.mubr.msk.f32.mxu1 %vm504_vm1, %v663_v53  ;;  %v648_v59 = vmul.f32 %v909_v22, %v631_v54 }
 0x243   : > { %v1066_v56 = vpop.eup %1065  ;;  %v664_v25 = vadd.f32 %v910_v30, %v647_v10  ;;  %v632_v57 = vmul.f32 %v1064_v55, %v1263_v32 }
 0x244   : > { %v665_v58 = vadd.f32 %v910_v30, %v648_v59  ;;  %v633_v60 = vmul.f32 %v1066_v56, %v1265_v33 }
 0x245   : > { %993 = vmatmul.mubr.msk.f32.gmra.mrb[2].mxu1 %vm504_vm1, %v664_v25  ;;  %v649_v18 = vmul.f32 %v909_v22, %v632_v57 }
 0x246   : > { %v1068_v39 = vpop.eup %1067  ;;  %995 = vmatprep.mubr.msk.f32.mxu1 %vm504_vm1, %v665_v58  ;;  %v650_v20 = vmul.f32 %v909_v22, %v633_v60 }
 0x247   : > { %v1070_v35 = vpop.eup %1069  ;;  %v666_v61 = vadd.f32 %v910_v30, %v649_v18  ;;  %v634_v62 = vmul.f32 %v1068_v39, %v1273_v21 }
 0x248   : > { %v667_v0 = vadd.f32 %v910_v30, %v650_v20  ;;  %v635_v1 = vmul.f32 %v1070_v35, %v1275_v44  ;;  %v911_v44 = vld [vmem:[%s1354_s5] ss:$0 sm:$0xff] }
 0x249   : > { %996 = vmatmul.mubr.msk.f32.gmra.mrb[4].mxu1 %vm504_vm1, %v666_v61  ;;  %v651_v32 = vmul.f32 %v909_v22, %v634_v62 }
 0x24a   : > { %v1072_v2 = vpop.eup %1071  ;;  %998 = vmatprep.mubr.msk.f32.mxu1 %vm504_vm1, %v667_v0  ;;  %v652_v33 = vmul.f32 %v909_v22, %v635_v1 }
 0x24b   : > { %v668_v3 = vadd.f32 %v910_v30, %v651_v32  ;;  %v636_v51 = vmul.f32 %v1072_v2, %v1283_v28 }
 0x24c   : > { %v669_v4 = vadd.f32 %v910_v30, %v652_v33 }
 0x24d   : > { %999 = vmatmul.mubr.msk.f32.gmra.mrb[6].mxu1 %vm504_vm1, %v668_v3  ;;  %v653_v47 = vmul.f32 %v909_v22, %v636_v51 }
 0x24e   : > { %1001 = vmatprep.mubr.msk.f32.mxu1 %vm504_vm1, %v669_v4 }
 0x24f   : > { %v670_v21 = vadd.f32 %v910_v30, %v653_v47 }
 0x251   : > { %1002 = vmatmul.mubr.msk.f32.gmra.mrb[8].mxu1 %vm504_vm1, %v670_v21 }
 0x314   : > { %v991_v6 = vpop.f32.mrb[0].mxu1 }
 0x315   : > { %v784_v28 = vadd.f32 %v991_v6, %v911_v44  ;;  %v778_v7 = vpop.f32.mrb[1].mxu1 }
 0x316   : > { %v779_v8 = vadd.f32 %v911_v44, %v778_v7 }
 0x317   : > { %828 = vst.msk [vmem:[%s251_s9 + $0x8] sm:$0xff] %vm504_vm1, %v784_v28 }
 0x318   : > { %827 = vst.msk [vmem:[%s251_s9] sm:$0xff] %vm504_vm1, %v779_v8  ;;  %v994_v63 = vpop.f32.mrb[2].mxu1 }
 0x319   : > { %v794_v9 = vadd.f32 %v994_v63, %v911_v44  ;;  %v788_v11 = vpop.f32.mrb[3].mxu1 }
 0x31a   : > { %v789_v12 = vadd.f32 %v911_v44, %v788_v11 }
 0x31b   : > { %830 = vst.msk [vmem:[%s251_s9 + $0x18] sm:$0xff] %vm504_vm1, %v794_v9 }
 0x31c   : > { %829 = vst.msk [vmem:[%s251_s9 + $0x10] sm:$0xff] %vm504_vm1, %v789_v12  ;;  %v997_v13 = vpop.f32.mrb[4].mxu1 }
 0x31d   : > { %v804_v14 = vadd.f32 %v997_v13, %v911_v44  ;;  %v798_v15 = vpop.f32.mrb[5].mxu1 }
 0x31e   : > { %v799_v16 = vadd.f32 %v911_v44, %v798_v15 }
 0x31f   : > { %832 = vst.msk [vmem:[%s251_s9 + $0x28] sm:$0xff] %vm504_vm1, %v804_v14 }
 0x320   : > { %831 = vst.msk [vmem:[%s251_s9 + $0x20] sm:$0xff] %vm504_vm1, %v799_v16  ;;  %v1000_v17 = vpop.f32.mrb[6].mxu1 }
 0x321   : > { %v814_v22 = vadd.f32 %v1000_v17, %v911_v44  ;;  %v808_v23 = vpop.f32.mrb[7].mxu1 }
 0x322   : > { %v809_v24 = vadd.f32 %v911_v44, %v808_v23 }
 0x323   : > { %834 = vst.msk [vmem:[%s251_s9 + $0x38] sm:$0xff] %vm504_vm1, %v814_v22 }
 0x324   : > { %833 = vst.msk [vmem:[%s251_s9 + $0x30] sm:$0xff] %vm504_vm1, %v809_v24  ;;  %v1003_v26 = vpop.f32.mrb[8].mxu1 }
 0x325   : > { %v824_v27 = vadd.f32 %v1003_v26, %v911_v44  ;;  %v818_v29 = vpop.f32.mrb[9].mxu1 }
 0x326   : > { %v819_v30 = vadd.f32 %v911_v44, %v818_v29 }
 0x327   : > { %836 = vst.msk [vmem:[%s251_s9 + $0x48] sm:$0x7f] %vm532_vm2, %v824_v27 }
 0x328   : > { %835 = vst.msk [vmem:[%s251_s9 + $0x40] sm:$0xff] %vm504_vm1, %v819_v30 }
 0x329 PF: > { %s16_s21 = sadd.s32 1, %s1079_s21  }
 0x32a   : > { %p13_p4 = scmp.ge.s32.totalorder %s16_s21, 4  }
 0x32c   :  { %15 = sbr.rel (!%p13_p4) target bundleno = 1 (0x1), region = 74 }

// kernel: wavlm_classifier_forward.6
= control target key start
LH: loop header
LB: loop body
LE: loop exit
PB: predicated region body
PF: predicated region fallthrough
CT: control target
= control target key end

     0   :  { %s1662_s18 = smov 0   ;;  %s2139_s0 = inlined_call_operand.vmem [shape: f32[2,83,32], index: 0, kind: input, shape index: {}]   ;;  %s2140_s1 = inlined_call_operand.vmem [shape: f32[4,32,32], index: 1, kind: input, shape index: {}]   ;;  %s2141_s2 = inlined_call_operand.vmem [shape: f32[1,32], index: 2, kind: input, shape index: {}]   ;;  %s2142_s3 = inlined_call_operand.vmem [shape: f32[1,32], index: 3, kind: input, shape index: {}]   ;;  %s2143_s4 = inlined_call_operand.vmem [shape: f32[1,32], index: 4, kind: input, shape index: {}]   ;;  %s2144_s5 = inlined_call_operand.vmem [shape: f32[2,79,32], index: 5, kind: output, shape index: {}]  }
   0x1 LB: > { %s1298_s19 = sadd.s32 4294967295, %s1630_s18   ;;  %p1302_p0 = scmp.ge.s32.totalorder %s1630_s18, 1  ;;  %s1630_s18 = sphi %s1662_s18, %s15_s18  }
   0x2   : > { %p187_p1 = scmp.lt.s32.totalorder %s1630_s18, 3 }
   0x4   : > { %p188_p2 = pnand %p1302_p0, %p187_p1 }
   0x5   : > { %v1305_v0 = vld [vmem:[%s2140_s1 + $0x20] sm:$0xff] (!%p188_p2)  ;;  %v1306_v1 = vld [vmem:[%s2140_s1 + $0x28] sm:$0xff] (!%p188_p2)  ;;  %p215_p3 = scmp.lt.s32.totalorder (!%p188_p2), %s1298_s19, 1  ;;  %v1307_v5 = vld [vmem:[%s2140_s1 + $0x30] sm:$0xff] (!%p188_p2)  ;;  %vm255_vm0 = vcmask (!%p188_p2), 1046528   ;;  %vm275_vm1 = vcmask (!%p188_p2), 261120  }
   0x6   : > { %191 = sbr.rel (%p188_p2) target bundleno = 626 (0x272), region = 40  ;;  %v1329_v2 = vld [vmem:[%s2140_s1 + $0x40] sm:$0xff] (!%p188_p2)  ;;  %v1510_v3 = vpack.c.bf16 (!%p188_p2), %v1306_v1, %v1305_v0  ;;  %v1330_v4 = vld [vmem:[%s2140_s1 + $0x48] sm:$0xff] (!%p188_p2)  ;;  %v1308_v6 = vld [vmem:[%s2140_s1 + $0x38] sm:$0xff] (!%p188_p2)  ;;  %vm552_vm2 = vcmask (!%p188_p2), 1045504   ;;  %vm724_vm3 = vcmask (!%p188_p2), 1044480  }
   0x7   : > { %v1526_v7 = vpack.c.bf16 (!%p188_p2), %v1330_v4, %v1329_v2  ;;  %v1514_v8 = vpack.c.bf16 (!%p188_p2), %v1308_v6, %v1307_v5  ;;  %v1331_v9 = vld [vmem:[%s2140_s1 + $0x50] sm:$0xff] (!%p188_p2)  ;;  %v1332_v10 = vld [vmem:[%s2140_s1 + $0x58] sm:$0xff] (!%p188_p2)  ;;  %v236_v11 = vld [vmem:[%s2140_s1] sm:$0xff] (!%p188_p2)  ;;  %vm1008_vm4 = vcmask (!%p188_p2), 1041408   ;;  %vm1050_vm5 = vcmask (!%p188_p2), 261122  }
   0x8   : > { %1511 = vmatprep.subr.bf16.mxu1 (!%p188_p2), %v1510_v3  ;;  %v1530_v12 = vpack.c.bf16 (!%p188_p2), %v1332_v10, %v1331_v9  ;;  %v237_v13 = vld [vmem:[%s2140_s1 + $0x8] sm:$0xff] (!%p188_p2)  ;;  %v1343_v14 = vld [vmem:[%s2140_s1 + $0x60] sm:$0xff] (!%p188_p2)  ;;  %v238_v16 = vld [vmem:[%s2140_s1 + $0x10] sm:$0xff] (!%p188_p2)  ;;  %vm1081_vm6 = vcmask (!%p188_p2), 253952  }
   0x9   : > { %v1344_v15 = vld [vmem:[%s2140_s1 + $0x68] sm:$0xff] (!%p188_p2)  ;;  %1527 = vmatprep.subr.bf16.mxu0 (!%p188_p2), %v1526_v7  ;;  %1513 = vmatpush3.bf16.msra.mxu1 (!%p188_p2), %v1510_v3  ;;  %v239_v17 = vld [vmem:[%s2140_s1 + $0x18] sm:$0xff] (!%p188_p2)  ;;  %v1345_v18 = vld [vmem:[%s2140_s1 + $0x70] sm:$0xff] (!%p188_p2)  ;;  %v1518_v19 = vpack.c.bf16 (!%p188_p2), %v237_v13, %v236_v11 }
   0xa   : > { %1529 = vmatpush3.bf16.msra.mxu0 (!%p188_p2), %v1526_v7  ;;  %1515 = vmatprep.subr.bf16.mxu1 (!%p188_p2), %v1514_v8  ;;  %v1346_v20 = vld [vmem:[%s2140_s1 + $0x78] sm:$0xff] (!%p188_p2)  ;;  %v1534_v21 = vpack.c.bf16 (!%p188_p2), %v1344_v15, %v1343_v14  ;;  %v1522_v25 = vpack.c.bf16 (!%p188_p2), %v239_v17, %v238_v16 }
   0xb   : > { %1531 = vmatprep.subr.bf16.mxu0 (!%p188_p2), %v1530_v12  ;;  %v1538_v26 = vpack.c.bf16 (!%p188_p2), %v1346_v20, %v1345_v18 }
   0xd   : > { %s2146_s19 = smov (!%p215_p3, %s1298_s19), 1  ;;  %1517 = vmatpush3.bf16.msra.mxu1 %v1514_v8 }
   0xe   : > { %s1572_s21 = smul.u32 88, %s2146_s19  ;;  %1533 = vmatpush3.bf16.msra.mxu0 %v1530_v12  ;;  %1519 = vmatprep.subr.bf16.mxu1 %v1518_v19 }
   0xf   : > { %1535 = vmatprep.subr.bf16.mxu0 %v1534_v21  ;;  %s1573_s10 = smul.u32 80, %s2146_s19 }
  0x10   : > { %s1724_s7 = scalar_lea.vmem %s2139_s0, %s1572_s21 }
  0x11   : > { %v1727_v22 = vld [vmem:[%s1724_s7] sm:$0xff]  ;;  %v1730_v23 = vld [vmem:[%s1724_s7 + $0x8] sm:$0xff]  ;;  %v1733_v24 = vld [vmem:[%s1724_s7 + $0x10] sm:$0xff]  ;;  %s2081_s16 = scalar_lea.vmem %s2144_s5, %s1573_s10 }
  0x12   : > { %v256_v27 = vrot.slane %v1727_v22, 1  ;;  %v257_v28 = vrot.slane %v1730_v23, 1  ;;  %v553_v29 = vrot.slane %v1727_v22, 2  ;;  %v554_v30 = vrot.slane %v1730_v23, 2  ;;  %v1740_v31 = vld [vmem:[%s1724_s7 + $0x18] sm:$0xff]  ;;  %v1743_v32 = vld [vmem:[%s1724_s7 + $0x20] sm:$0xff] }
  0x13   : > { %v259_v33 = vrot.slane %v1733_v24, 1  ;;  %v556_v34 = vrot.slane %v1733_v24, 2  ;;  %v261_v35 = vrot.slane %v1740_v31, 1  ;;  %v558_v36 = vrot.slane %v1740_v31, 2  ;;  %v1750_v37 = vld [vmem:[%s1724_s7 + $0x28] sm:$0xff]  ;;  %v1757_v42 = vld [vmem:[%s1724_s7 + $0x30] sm:$0xff] }
  0x14   : > { %v258_v38 = vsel %vm255_vm0, %v256_v27, %v257_v28  ;;  %v555_v39 = vsel %vm552_vm2, %v553_v29, %v554_v30  ;;  %v263_v40 = vrot.slane %v1743_v32, 1  ;;  %v560_v41 = vrot.slane %v1743_v32, 2  ;;  %v1766_v47 = vld [vmem:[%s1724_s7 + $0x38] sm:$0xff]  ;;  %v1783_v58 = vld [vmem:[%s1724_s7 + $0x40] sm:$0xff]  ;;  %v1786_v59 = vld [vmem:[%s1724_s7 + $0x48] sm:$0xff] }
  0x15   : > { %1426 = vmatprep.mubr.msk.f32.mxu1 %vm275_vm1, %v258_v38  ;;  %1472 = vmatprep.mubr.msk.f32.mxu0 %vm275_vm1, %v555_v39  ;;  %v260_v43 = vsel %vm255_vm0, %v257_v28, %v259_v33  ;;  %v557_v44 = vsel %vm552_vm2, %v554_v30, %v556_v34  ;;  %v262_v45 = vsel %vm255_vm0, %v259_v33, %v261_v35  ;;  %v265_v46 = vrot.slane %v1750_v37, 1  ;;  %v1801_v4 = vld [vmem:[%s1724_s7 + $0x50] sm:$0x7] }
  0x16   : > { %1427 = vmatmul.mubr.msk.f32.vlgmr.msra.gmra.mrb[0].mxu1 %vm275_vm1, %v260_v43  ;;  %1473 = vmatmul.mubr.msk.f32.vlgmr.msra.gmra.mrb[0].mxu0 %vm275_vm1, %v557_v44  ;;  %v559_v48 = vsel %vm552_vm2, %v556_v34, %v558_v36  ;;  %v562_v49 = vrot.slane %v1750_v37, 2  ;;  %v264_v50 = vsel %vm255_vm0, %v261_v35, %v263_v40  ;;  %v561_v51 = vsel %vm552_vm2, %v558_v36, %v560_v41 }
  0x17   : > { %1521 = vmatpush3.bf16.msra.mxu1 %v1518_v19  ;;  %1537 = vmatpush3.bf16.msra.mxu0 %v1534_v21  ;;  %v267_v52 = vrot.slane %v1757_v42, 1  ;;  %v564_v53 = vrot.slane %v1757_v42, 2  ;;  %v266_v54 = vsel %vm255_vm0, %v263_v40, %v265_v46  ;;  %v269_v56 = vrot.slane %v1766_v47, 1  ;;  %v1873_v40 = vld [vmem:[%s2141_s2] ss:$0 sm:$0xff] }
  0x18   : > { %1429 = vmatprep.mubr.msk.f32.mxu1 %vm275_vm1, %v262_v45  ;;  %1475 = vmatprep.mubr.msk.f32.mxu0 %vm275_vm1, %v559_v48  ;;  %v563_v55 = vsel %vm552_vm2, %v560_v41, %v562_v49  ;;  %v566_v57 = vrot.slane %v1766_v47, 2  ;;  %v271_v62 = vrot.slane %v1783_v58, 1  ;;  %v568_v63 = vrot.slane %v1783_v58, 2 }
  0x19   : > { %1523 = vmatprep.subr.bf16.mxu1 %v1522_v25  ;;  %1539 = vmatprep.subr.bf16.mxu0 %v1538_v26  ;;  %v268_v60 = vsel %vm255_vm0, %v265_v46, %v267_v52  ;;  %v565_v61 = vsel %vm552_vm2, %v562_v49, %v564_v53  ;;  %v270_v0 = vsel %vm255_vm0, %v267_v52, %v269_v56  ;;  %v273_v2 = vrot.slane %v1786_v59, 1 }
  0x1a   : > { %1430 = vmatmul.mubr.msk.f32.gmra.mrb[2].mxu1 %vm275_vm1, %v264_v50  ;;  %1476 = vmatmul.mubr.msk.f32.gmra.mrb[2].mxu0 %vm275_vm1, %v561_v51  ;;  %v567_v1 = vsel %vm552_vm2, %v564_v53, %v566_v57  ;;  %v570_v3 = vrot.slane %v1786_v59, 2  ;;  %v272_v5 = vsel %vm255_vm0, %v269_v56, %v271_v62  ;;  %v569_v6 = vsel %vm552_vm2, %v566_v57, %v568_v63 }
  0x1b   : > { %1432 = vmatprep.mubr.msk.f32.mxu1 %vm275_vm1, %v266_v54  ;;  %1478 = vmatprep.mubr.msk.f32.mxu0 %vm275_vm1, %v563_v55  ;;  %v572_v7 = vrot.slane %v1801_v4, 2  ;;  %v274_v8 = vsel %vm255_vm0, %v271_v62, %v273_v2  ;;  %v725_v10 = vrot.slane %v1727_v22, 3  ;;  %v726_v11 = vrot.slane %v1730_v23, 3 }
  0x1c   : > { %1525 = vmatpush3.bf16.msra.mxu1 %v1522_v25  ;;  %1541 = vmatpush3.bf16.msra.mxu0 %v1538_v26  ;;  %v571_v9 = vsel %vm552_vm2, %v568_v63, %v570_v3  ;;  %v728_v13 = vrot.slane %v1733_v24, 3  ;;  %v730_v15 = vrot.slane %v1740_v31, 3  ;;  %v732_v17 = vrot.slane %v1743_v32, 3 }
  0x1d   : > { %v573_v12 = vsel %vm552_vm2, %v570_v3, %v572_v7  ;;  %v727_v14 = vsel %vm724_vm3, %v725_v10, %v726_v11  ;;  %v734_v19 = vrot.slane %v1750_v37, 3  ;;  %v736_v21 = vrot.slane %v1757_v42, 3 }
  0x1e   : > { %1433 = vmatmul.mubr.msk.f32.gmra.mrb[4].mxu1 %vm275_vm1, %v268_v60  ;;  %1479 = vmatmul.mubr.msk.f32.gmra.mrb[4].mxu0 %vm275_vm1, %v565_v61  ;;  %v729_v16 = vsel %vm724_vm3, %v726_v11, %v728_v13  ;;  %v731_v18 = vsel %vm724_vm3, %v728_v13, %v730_v15  ;;  %v733_v20 = vsel %vm724_vm3, %v730_v15, %v732_v17  ;;  %v738_v26 = vrot.slane %v1766_v47, 3 }
  0x1f   : > { %1435 = vmatprep.mubr.msk.f32.mxu1 %vm275_vm1, %v270_v0  ;;  %1481 = vmatprep.mubr.msk.f32.mxu0 %vm275_vm1, %v567_v1  ;;  %v735_v25 = vsel %vm724_vm3, %v732_v17, %v734_v19  ;;  %v737_v27 = vsel %vm724_vm3, %v734_v19, %v736_v21  ;;  %v740_v28 = vrot.slane %v1783_v58, 3  ;;  %v742_v30 = vrot.slane %v1786_v59, 3 }
  0x20   : > { %v739_v29 = vsel %vm724_vm3, %v736_v21, %v738_v26  ;;  %v744_v34 = vrot.slane %v1801_v4, 3 }
  0x21   : > { %v741_v33 = vsel %vm724_vm3, %v738_v26, %v740_v28  ;;  %v743_v35 = vsel %vm724_vm3, %v740_v28, %v742_v30 }
  0x22   : > { %1436 = vmatmul.mubr.msk.f32.gmra.mrb[6].mxu1 %vm275_vm1, %v272_v5  ;;  %1482 = vmatmul.mubr.msk.f32.gmra.mrb[6].mxu0 %vm275_vm1, %v569_v6  ;;  %v745_v36 = vsel %vm724_vm3, %v742_v30, %v744_v34 }
  0x23   : > { %1438 = vmatprep.mubr.msk.f32.mxu1 %vm275_vm1, %v274_v8  ;;  %1484 = vmatprep.mubr.msk.f32.mxu0 %vm275_vm1, %v571_v9 }
  0x26   : > { %1439 = vmatmul.mubr.msk.f32.gmra.mrb[8].mxu1 %vm275_vm1, %v273_v2  ;;  %1485 = vmatmul.mubr.msk.f32.gmra.mrb[8].mxu0 %vm275_vm1, %v573_v12 }
  0x27   : > { %1449 = vmatprep.mubr.msk.f32.mxu1 %vm275_vm1, %v1727_v22  ;;  %1495 = vmatprep.mubr.msk.f32.mxu0 %vm275_vm1, %v727_v14 }
  0x2a   : > { %1450 = vmatmul.mubr.msk.f32.vlgmr.msra.gmra.mrb[0].mxu1 %vm275_vm1, %v1730_v23  ;;  %1496 = vmatmul.mubr.msk.f32.vlgmr.msra.gmra.mrb[0].mxu0 %vm275_vm1, %v729_v16 }
  0x2b   : > { %1452 = vmatprep.mubr.msk.f32.mxu1 %vm275_vm1, %v1733_v24  ;;  %1498 = vmatprep.mubr.msk.f32.mxu0 %vm275_vm1, %v731_v18 }
  0x2e   : > { %1453 = vmatmul.mubr.msk.f32.gmra.mrb[2].mxu1 %vm275_vm1, %v1740_v31  ;;  %1499 = vmatmul.mubr.msk.f32.gmra.mrb[2].mxu0 %vm275_vm1, %v733_v20 }
  0x2f   : > { %1455 = vmatprep.mubr.msk.f32.mxu1 %vm275_vm1, %v1743_v32  ;;  %1501 = vmatprep.mubr.msk.f32.mxu0 %vm275_vm1, %v735_v25 }
  0x32   : > { %1456 = vmatmul.mubr.msk.f32.gmra.mrb[4].mxu1 %vm275_vm1, %v1750_v37  ;;  %1502 = vmatmul.mubr.msk.f32.gmra.mrb[4].mxu0 %vm275_vm1, %v737_v27 }
  0x33   : > { %1458 = vmatprep.mubr.msk.f32.mxu1 %vm275_vm1, %v1757_v42  ;;  %1504 = vmatprep.mubr.msk.f32.mxu0 %vm275_vm1, %v739_v29 }
  0x36   : > { %1459 = vmatmul.mubr.msk.f32.gmra.mrb[6].mxu1 %vm275_vm1, %v1766_v47  ;;  %1505 = vmatmul.mubr.msk.f32.gmra.mrb[6].mxu0 %vm275_vm1, %v741_v33 }
  0x37   : > { %1461 = vmatprep.mubr.msk.f32.mxu1 %vm275_vm1, %v1783_v58  ;;  %1507 = vmatprep.mubr.msk.f32.mxu0 %vm275_vm1, %v743_v35 }
  0x3a   : > { %1462 = vmatmul.mubr.msk.f32.gmra.mrb[8].mxu1 %vm275_vm1, %v1786_v59  ;;  %1508 = vmatmul.mubr.msk.f32.gmra.mrb[8].mxu0 %vm275_vm1, %v745_v36 }
  0xfd   : > { %v1451_v38 = vpop.f32.mrb[0].mxu1  ;;  %v1497_v39 = vpop.f32.mrb[0].mxu0 }
  0xfe   : > { %v1542_v41 = vadd.f32 %v1497_v39, %v1451_v38  ;;  %v497_v43 = vpop.f32.mrb[1].mxu1  ;;  %v832_v44 = vpop.f32.mrb[1].mxu0 }
  0xff   : > { %v1543_v45 = vadd.f32 %v832_v44, %v497_v43 }
 0x100   : > { %v1876_v46 = vadd.f32 %v1542_v41, %v1873_v40 }
 0x101   : > { %v1879_v48 = vadd.f32 %v1543_v45, %v1873_v40  ;;  %v1454_v49 = vpop.f32.mrb[2].mxu1  ;;  %v1500_v50 = vpop.f32.mrb[2].mxu0 }
 0x102   : > { %v909_v51 = vmul.f32 %v1876_v46, %v1876_v46  ;;  %v1544_v52 = vadd.f32 %v1500_v50, %v1454_v49  ;;  %v507_v53 = vpop.f32.mrb[3].mxu1  ;;  %v842_v54 = vpop.f32.mrb[3].mxu0 }
 0x103   : > { %v908_v55 = vmul.f32 %v1879_v48, %v1879_v48  ;;  %v1545_v56 = vadd.f32 %v842_v54, %v507_v53 }
 0x104   : > { %v919_v57 = vmul.f32 %v909_v51, %v1876_v46  ;;  %v1887_v60 = vadd.f32 %v1544_v52, %v1873_v40 }
 0x105   : > { %v918_v61 = vmul.f32 %v908_v55, %v1879_v48  ;;  %v1891_v62 = vadd.f32 %v1545_v56, %v1873_v40  ;;  %v1457_v63 = vpop.f32.mrb[4].mxu1  ;;  %v1503_v0 = vpop.f32.mrb[4].mxu0 }
 0x106   : > { %v929_v1 = vmul.f32 0.044715, %v919_v57  ;;  %v911_v2 = vmul.f32 %v1887_v60, %v1887_v60  ;;  %v1546_v3 = vadd.f32 %v1503_v0, %v1457_v63  ;;  %v517_v5 = vpop.f32.mrb[5].mxu1  ;;  %v852_v6 = vpop.f32.mrb[5].mxu0 }
 0x107   : > { %v928_v7 = vmul.f32 0.044715, %v918_v61  ;;  %v910_v8 = vmul.f32 %v1891_v62, %v1891_v62  ;;  %v1547_v9 = vadd.f32 %v852_v6, %v517_v5 }
 0x108   : > { %v939_v10 = vadd.f32 %v929_v1, %v1876_v46  ;;  %v921_v11 = vmul.f32 %v911_v2, %v1887_v60  ;;  %v1900_v12 = vadd.f32 %v1546_v3, %v1873_v40 }
 0x109   : > { %v920_v13 = vmul.f32 %v910_v8, %v1891_v62  ;;  %v1904_v14 = vadd.f32 %v1547_v9, %v1873_v40  ;;  %v1460_v15 = vpop.f32.mrb[6].mxu1  ;;  %v1506_v16 = vpop.f32.mrb[6].mxu0  ;;  %v938_v17 = vadd.f32 %v928_v7, %v1879_v48 }
 0x10a   : > { %v949_v18 = vmul.f32 0.7978846, %v939_v10  ;;  %v931_v19 = vmul.f32 0.044715, %v921_v11  ;;  %v913_v20 = vmul.f32 %v1900_v12, %v1900_v12  ;;  %v1548_v21 = vadd.f32 %v1506_v16, %v1460_v15  ;;  %v527_v25 = vpop.f32.mrb[7].mxu1  ;;  %v862_v26 = vpop.f32.mrb[7].mxu0 }
 0x10b   : > { %v930_v27 = vmul.f32 0.044715, %v920_v13  ;;  %v912_v28 = vmul.f32 %v1904_v14, %v1904_v14  ;;  %v1549_v29 = vadd.f32 %v862_v26, %v527_v25  ;;  %v948_v30 = vmul.f32 0.7978846, %v938_v17 }
 0x10c   : > { %1582 = vtanh.f32 %v949_v18  ;;  %v941_v33 = vadd.f32 %v931_v19, %v1887_v60  ;;  %v923_v34 = vmul.f32 %v913_v20, %v1900_v12  ;;  %v1914_v35 = vadd.f32 %v1548_v21, %v1873_v40 }
 0x10d   : > { %v940_v36 = vadd.f32 %v930_v27, %v1891_v62  ;;  %v922_v38 = vmul.f32 %v912_v28, %v1904_v14  ;;  %v1919_v39 = vadd.f32 %v1549_v29, %v1873_v40  ;;  %v1463_v41 = vpop.f32.mrb[8].mxu1  ;;  %v1509_v43 = vpop.f32.mrb[8].mxu0  ;;  %1584 = vtanh.f32 %v948_v30 }
 0x10e   : > { %v951_v44 = vmul.f32 0.7978846, %v941_v33  ;;  %v933_v45 = vmul.f32 0.044715, %v923_v34  ;;  %v915_v49 = vmul.f32 %v1914_v35, %v1914_v35  ;;  %v1550_v50 = vadd.f32 %v1509_v43, %v1463_v41  ;;  %v537_v51 = vpop.f32.mrb[9].mxu1  ;;  %v872_v52 = vpop.f32.mrb[9].mxu0 }
 0x10f   : > { %v950_v53 = vmul.f32 0.7978846, %v940_v36  ;;  %v932_v54 = vmul.f32 0.044715, %v922_v38  ;;  %v914_v55 = vmul.f32 %v1919_v39, %v1919_v39  ;;  %v1551_v56 = vadd.f32 %v872_v52, %v537_v51 }
 0x110   : > { %1586 = vtanh.f32 %v951_v44  ;;  %v943_v57 = vadd.f32 %v933_v45, %v1900_v12  ;;  %v925_v61 = vmul.f32 %v915_v49, %v1914_v35  ;;  %v1928_v63 = vadd.f32 %v1550_v50, %v1873_v40 }
 0x111   : > { %1588 = vtanh.f32 %v950_v53  ;;  %v942_v0 = vadd.f32 %v932_v54, %v1904_v14  ;;  %v924_v1 = vmul.f32 %v914_v55, %v1919_v39  ;;  %v1933_v2 = vadd.f32 %v1551_v56, %v1873_v40 }
 0x112   : > { %v953_v3 = vmul.f32 0.7978846, %v943_v57  ;;  %v935_v5 = vmul.f32 0.044715, %v925_v61  ;;  %v917_v6 = vmul.f32 %v1928_v63, %v1928_v63 }
 0x113   : > { %v952_v7 = vmul.f32 0.7978846, %v942_v0  ;;  %v934_v8 = vmul.f32 0.044715, %v924_v1  ;;  %v916_v9 = vmul.f32 %v1933_v2, %v1933_v2 }
 0x114   : > { %1590 = vtanh.f32 %v953_v3  ;;  %v945_v10 = vadd.f32 %v935_v5, %v1914_v35  ;;  %v927_v11 = vmul.f32 %v917_v6, %v1928_v63 }
 0x115   : > { %1592 = vtanh.f32 %v952_v7  ;;  %v944_v13 = vadd.f32 %v934_v8, %v1919_v39  ;;  %v926_v40 = vmul.f32 %v916_v9, %v1933_v2 }
 0x116   : > { %v1583_v15 = vpop.eup %1582  ;;  %v955_v16 = vmul.f32 0.7978846, %v945_v10  ;;  %v937_v17 = vmul.f32 0.044715, %v927_v11 }
 0x117   : > { %v1585_v18 = vpop.eup %1584  ;;  %v954_v19 = vmul.f32 0.7978846, %v944_v13  ;;  %v936_v20 = vmul.f32 0.044715, %v926_v40  ;;  %v969_v21 = vadd.f32 1.0, %v1583_v15 }
 0x118   : > { %1594 = vtanh.f32 %v955_v16  ;;  %v947_v25 = vadd.f32 %v937_v17, %v1928_v63  ;;  %v968_v26 = vadd.f32 1.0, %v1585_v18 }
 0x119   : > { %1596 = vtanh.f32 %v954_v19  ;;  %v946_v27 = vadd.f32 %v936_v20, %v1933_v2  ;;  %v979_v28 = vmul.f32 0.5, %v969_v21 }
 0x11a   : > { %v1587_v29 = vpop.eup %1586  ;;  %v957_v30 = vmul.f32 0.7978846, %v947_v25  ;;  %v978_v33 = vmul.f32 0.5, %v968_v26 }
 0x11b   : > { %v1589_v34 = vpop.eup %1588  ;;  %v956_v36 = vmul.f32 0.7978846, %v946_v27  ;;  %v989_v38 = vmul.f32 %v979_v28, %v1876_v46  ;;  %v971_v41 = vadd.f32 1.0, %v1587_v29 }
 0x11c   : > { %1598 = vtanh.f32 %v957_v30  ;;  %v988_v43 = vmul.f32 %v978_v33, %v1879_v48  ;;  %v970_v44 = vadd.f32 1.0, %v1589_v34 }
 0x11d   : > { %1600 = vtanh.f32 %v956_v36  ;;  %v1010_v45 = vrot.slane %v989_v38, 6  ;;  %v981_v49 = vmul.f32 0.5, %v971_v41 }
 0x11e   : > { %v1591_v50 = vpop.eup %1590  ;;  %v1009_v51 = vrot.slane %v988_v43, 6  ;;  %v980_v52 = vmul.f32 0.5, %v970_v44 }
 0x11f   : > { %v1593_v53 = vpop.eup %1592  ;;  %v991_v54 = vmul.f32 %v981_v49, %v1887_v60  ;;  %v973_v55 = vadd.f32 1.0, %v1591_v50 }
 0x120   : > { %v1949_v56 = vadd.f32 %v1009_v51, %v1727_v22  ;;  %v1011_v46 = vsel %vm1008_vm4, %v1009_v51, %v1010_v45  ;;  %v990_v48 = vmul.f32 %v980_v52, %v1891_v62  ;;  %v972_v57 = vadd.f32 1.0, %v1593_v53 }
 0x121   : > { %v1014_v61 = vrot.slane %v991_v54, 6  ;;  %v983_v0 = vmul.f32 0.5, %v973_v55  ;;  %v1956_v5 = vadd.f32 %v1011_v46, %v1730_v23 }
 0x122   : > { %v1595_v1 = vpop.eup %1594  ;;  %v1051_v3 = vsel %vm1050_vm5, %v1949_v56, 0.0  ;;  %v1012_v6 = vrot.slane %v990_v48, 6  ;;  %v982_v60 = vmul.f32 0.5, %v972_v57 }
 0x123   : > { %v1597_v7 = vpop.eup %1596  ;;  %1052 = vadd.xlane.f32.xlu0 %v1051_v3  ;;  %v993_v22 = vmul.f32 %v983_v0, %v1900_v12  ;;  %v975_v8 = vadd.f32 1.0, %v1595_v1  ;;  %v1054_v16 = vsel %vm275_vm1, %v1956_v5, 0.0 }
 0x124   : > { %v1013_v9 = vsel %vm1008_vm4, %v1010_v45, %v1012_v6  ;;  %v1015_v62 = vsel %vm1008_vm4, %v1012_v6, %v1014_v61  ;;  %v992_v10 = vmul.f32 %v982_v60, %v1904_v14  ;;  %v974_v11 = vadd.f32 1.0, %v1597_v7 }
 0x125   : > { %v1963_v13 = vadd.f32 %v1013_v9, %v1733_v24  ;;  %v1018_v40 = vrot.slane %v993_v22, 6  ;;  %v985_v23 = vmul.f32 0.5, %v975_v8  ;;  %v1970_v20 = vadd.f32 %v1015_v62, %v1740_v31 }
 0x126   : > { %v1599_v15 = vpop.eup %1598  ;;  %v1016_v17 = vrot.slane %v992_v10, 6  ;;  %v984_v18 = vmul.f32 0.5, %v974_v11 }
 0x127   : > { %v1601_v12 = vpop.eup %1600  ;;  %1055 = vadd.xlane.f32.xlu0 %v1054_v16  ;;  %v1057_v19 = vsel %vm275_vm1, %v1963_v13, 0.0  ;;  %v995_v14 = vmul.f32 %v985_v23, %v1914_v35  ;;  %v977_v24 = vadd.f32 1.0, %v1599_v15  ;;  %v1060_v31 = vsel %vm275_vm1, %v1970_v20, 0.0 }
 0x128   : > { %1058 = vadd.xlane.f32.xlu1 %v1057_v19  ;;  %v1017_v21 = vsel %vm1008_vm4, %v1014_v61, %v1016_v17  ;;  %v1019_v25 = vsel %vm1008_vm4, %v1016_v17, %v1018_v40  ;;  %v994_v26 = vmul.f32 %v984_v18, %v1919_v39  ;;  %v976_v27 = vadd.f32 1.0, %v1601_v12 }
 0x129   : > { %v1043_v28 = vadd.f32 %v1017_v21, %v1743_v32  ;;  %v1022_v29 = vrot.slane %v995_v14, 6  ;;  %v987_v30 = vmul.f32 0.5, %v977_v24  ;;  %v1044_v36 = vadd.f32 %v1019_v25, %v1750_v37 }
 0x12a   : > { %v1020_v33 = vrot.slane %v994_v26, 6  ;;  %v986_v34 = vmul.f32 0.5, %v976_v27 }
 0x12b   : > { %v1063_v35 = vsel %vm275_vm1, %v1043_v28, 0.0  ;;  %v997_v38 = vmul.f32 %v987_v30, %v1928_v63  ;;  %v1066_v49 = vsel %vm275_vm1, %v1044_v36, 0.0 }
 0x12c   : > { %1061 = vadd.xlane.f32.xlu1 %v1060_v31  ;;  %1064 = vadd.xlane.f32.xlu0 %v1063_v35  ;;  %v1021_v39 = vsel %vm1008_vm4, %v1018_v40, %v1020_v33  ;;  %v1023_v41 = vsel %vm1008_vm4, %v1020_v33, %v1022_v29  ;;  %v996_v32 = vmul.f32 %v986_v34, %v1933_v2 }
 0x12d   : > { %v1045_v43 = vadd.f32 %v1021_v39, %v1757_v42  ;;  %v1026_v44 = vrot.slane %v997_v38, 6  ;;  %v1046_v37 = vadd.f32 %v1023_v41, %v1766_v47 }
 0x12e   : > { %v1024_v45 = vrot.slane %v996_v32, 6 }
 0x12f   : > { %v1069_v50 = vsel %vm275_vm1, %v1045_v43, 0.0  ;;  %v1072_v2 = vsel %vm275_vm1, %v1046_v37, 0.0  ;;  %v1998_v54 = vadd.f32 %v1026_v44, %v1801_v4 }
 0x130   : > { %1067 = vadd.xlane.f32.xlu1 %v1066_v49  ;;  %1070 = vadd.xlane.f32.xlu0 %v1069_v50  ;;  %v1025_v63 = vsel %vm1008_vm4, %v1022_v29, %v1024_v45  ;;  %v1027_v51 = vsel %vm1008_vm4, %v1024_v45, %v1026_v44 }
 0x131   : > { %v1047_v52 = vadd.f32 %v1025_v63, %v1783_v58  ;;  %v1995_v53 = vadd.f32 %v1027_v51, %v1786_v59  ;;  %v1082_v55 = vsel %vm1081_vm6, %v1998_v54, 0.0 }
 0x133   : > { %v1075_v42 = vsel %vm275_vm1, %v1047_v52, 0.0  ;;  %v1078_v47 = vsel %vm275_vm1, %v1995_v53, 0.0 }
 0x134   : > { %1073 = vadd.xlane.f32.xlu1 %v1072_v2  ;;  %1076 = vadd.xlane.f32.xlu0 %v1075_v42 }
 0x138   : > { %1079 = vadd.xlane.f32.xlu1 %v1078_v47  ;;  %1083 = vadd.xlane.f32.xlu0 %v1082_v55 }
 0x1b0   : > { %v1053_v58 = vpop.xlane.xlu0 %1052 }
 0x1b1   : > { %v1086_v46 = vmul.f32 0.03125, %v1053_v58 }
 0x1b3   : > { %v2005_v48 = vsub.f32 %v1949_v56, %v1086_v46 }
 0x1b4   : > { %v1056_v59 = vpop.xlane.xlu0 %1055 }
 0x1b5   : > { %v1087_v57 = vmul.f32 0.03125, %v1056_v59  ;;  %v1059_v4 = vpop.xlane.xlu1 %1058  ;;  %v1108_v61 = vmul.f32 %v2005_v48, %v2005_v48 }
 0x1b6   : > { %v1088_v0 = vmul.f32 0.03125, %v1059_v4 }
 0x1b7   : > { %v2010_v1 = vsub.f32 %v1956_v5, %v1087_v57  ;;  %v1119_v3 = vsel %vm1050_vm5, %v1108_v61, 0.0 }
 0x1b8   : > { %v2014_v6 = vsub.f32 %v1963_v13, %v1088_v0  ;;  %1120 = vadd.xlane.f32.xlu1 %v1119_v3 }
 0x1b9   : > { %v1062_v60 = vpop.xlane.xlu1 %1061  ;;  %v1065_v7 = vpop.xlane.xlu0 %1064  ;;  %v1109_v56 = vmul.f32 %v2010_v1, %v2010_v1 }
 0x1ba   : > { %v1089_v22 = vmul.f32 0.03125, %v1062_v60  ;;  %v1090_v8 = vmul.f32 0.03125, %v1065_v7  ;;  %v1110_v9 = vmul.f32 %v2014_v6, %v2014_v6 }
 0x1bb   : > { %v1122_v62 = vsel %vm275_vm1, %v1109_v56, 0.0 }
 0x1bc   : > { %v2022_v5 = vsub.f32 %v1970_v20, %v1089_v22  ;;  %v2024_v10 = vsub.f32 %v1043_v28, %v1090_v8  ;;  %1123 = vadd.xlane.f32.xlu0 %v1122_v62  ;;  %v1125_v11 = vsel %vm275_vm1, %v1110_v9, 0.0  ;;  %v2069_v22 = vld [vmem:[%s2142_s3] ss:$0 sm:$0xff] }
 0x1bd   : > { %v1068_v13 = vpop.xlane.xlu1 %1067  ;;  %v1071_v40 = vpop.xlane.xlu0 %1070  ;;  %1126 = vadd.xlane.f32.xlu1 %v1125_v11  ;;  %v2075_v11 = vld [vmem:[%s2143_s4] ss:$0 sm:$0xff] }
 0x1be   : > { %v1091_v23 = vmul.f32 0.03125, %v1068_v13  ;;  %v1092_v15 = vmul.f32 0.03125, %v1071_v40  ;;  %v1112_v16 = vmul.f32 %v2024_v10, %v2024_v10  ;;  %v1111_v17 = vmul.f32 %v2022_v5, %v2022_v5 }
 0x1c0   : > { %v2031_v18 = vsub.f32 %v1044_v36, %v1091_v23  ;;  %v2033_v12 = vsub.f32 %v1045_v43, %v1092_v15  ;;  %v1131_v19 = vsel %vm275_vm1, %v1112_v16, 0.0  ;;  %v1128_v20 = vsel %vm275_vm1, %v1111_v17, 0.0 }
 0x1c1   : > { %v1074_v14 = vpop.xlane.xlu1 %1073  ;;  %1132 = vadd.xlane.f32.xlu1 %v1131_v19  ;;  %1129 = vadd.xlane.f32.xlu0 %v1128_v20  ;;  %v1077_v24 = vpop.xlane.xlu0 %1076 }
 0x1c2   : > { %v1093_v21 = vmul.f32 0.03125, %v1074_v14  ;;  %v1094_v25 = vmul.f32 0.03125, %v1077_v24  ;;  %v1114_v26 = vmul.f32 %v2033_v12, %v2033_v12  ;;  %v1113_v27 = vmul.f32 %v2031_v18, %v2031_v18 }
 0x1c4   : > { %v2041_v28 = vsub.f32 %v1046_v37, %v1093_v21  ;;  %v2043_v29 = vsub.f32 %v1047_v52, %v1094_v25  ;;  %v1137_v30 = vsel %vm275_vm1, %v1114_v26, 0.0  ;;  %v1134_v33 = vsel %vm275_vm1, %v1113_v27, 0.0 }
 0x1c5   : > { %1138 = vadd.xlane.f32.xlu1 %v1137_v30  ;;  %v1080_v34 = vpop.xlane.xlu1 %1079  ;;  %1135 = vadd.xlane.f32.xlu0 %v1134_v33  ;;  %v1084_v31 = vpop.xlane.xlu0 %1083 }
 0x1c6   : > { %v1095_v35 = vmul.f32 0.03125, %v1080_v34  ;;  %v1096_v36 = vmul.f32 0.03125, %v1084_v31  ;;  %v1115_v38 = vmul.f32 %v2041_v28, %v2041_v28  ;;  %v1116_v39 = vmul.f32 %v2043_v29, %v2043_v29 }
 0x1c8   : > { %v2052_v41 = vsub.f32 %v1995_v53, %v1095_v35  ;;  %v2055_v32 = vsub.f32 %v1998_v54, %v1096_v36  ;;  %v1140_v43 = vsel %vm275_vm1, %v1115_v38, 0.0  ;;  %v1143_v44 = vsel %vm275_vm1, %v1116_v39, 0.0 }
 0x1c9   : > { %1141 = vadd.xlane.f32.xlu0 %v1140_v43  ;;  %1144 = vadd.xlane.f32.xlu1 %v1143_v44 }
 0x1ca   : > { %v1117_v45 = vmul.f32 %v2052_v41, %v2052_v41  ;;  %v1118_v49 = vmul.f32 %v2055_v32, %v2055_v32 }
 0x1cc   : > { %v1146_v50 = vsel %vm275_vm1, %v1117_v45, 0.0  ;;  %v1149_v37 = vsel %vm1081_vm6, %v1118_v49, 0.0 }
 0x1cd   : > { %1147 = vadd.xlane.f32.xlu0 %v1146_v50  ;;  %1150 = vadd.xlane.f32.xlu1 %v1149_v37 }
 0x245   : > { %v1121_v63 = vpop.xlane.xlu1 %1120 }
 0x246   : > { %v1152_v51 = vmul.f32 0.03125, %v1121_v63 }
 0x248   : > { %v1163_v52 = vadd.f32 1e-05, %v1152_v51 }
 0x249   : > { %v1124_v2 = vpop.xlane.xlu0 %1123 }
 0x24a   : > { %1602 = vrsqrt.f32 %v1163_v52  ;;  %v1153_v42 = vmul.f32 0.03125, %v1124_v2  ;;  %v1127_v53 = vpop.xlane.xlu1 %1126 }
 0x24b   : > { %v1154_v54 = vmul.f32 0.03125, %v1127_v53 }
 0x24c   : > { %v1164_v47 = vadd.f32 1e-05, %v1153_v42 }
 0x24d   : > { %v1165_v55 = vadd.f32 1e-05, %v1154_v54 }
 0x24e   : > { %1604 = vrsqrt.f32 %v1164_v47  ;;  %v1133_v58 = vpop.xlane.xlu1 %1132  ;;  %v1130_v46 = vpop.xlane.xlu0 %1129 }
 0x24f   : > { %1606 = vrsqrt.f32 %v1165_v55  ;;  %v1156_v59 = vmul.f32 0.03125, %v1133_v58  ;;  %v1155_v57 = vmul.f32 0.03125, %v1130_v46 }
 0x251   : > { %v1167_v4 = vadd.f32 1e-05, %v1156_v59  ;;  %v1166_v61 = vadd.f32 1e-05, %v1155_v57 }
 0x252   : > { %v1139_v0 = vpop.xlane.xlu1 %1138  ;;  %v1136_v3 = vpop.xlane.xlu0 %1135 }
 0x253   : > { %1608 = vrsqrt.f32 %v1167_v4  ;;  %v1158_v60 = vmul.f32 0.03125, %v1139_v0  ;;  %v1157_v7 = vmul.f32 0.03125, %v1136_v3 }
 0x254   : > { %v1603_v56 = vpop.eup %1602  ;;  %1610 = vrsqrt.f32 %v1166_v61 }
 0x255   : > { %v1185_v8 = vmul.f32 %v1603_v56, %v2005_v48  ;;  %v1169_v9 = vadd.f32 1e-05, %v1158_v60  ;;  %v1168_v62 = vadd.f32 1e-05, %v1157_v7 }
 0x256   : > { %v1145_v13 = vpop.xlane.xlu1 %1144  ;;  %v1142_v40 = vpop.xlane.xlu0 %1141 }
 0x257   : > { %v1203_v23 = vmul.f32 %v2069_v22, %v1185_v8  ;;  %1612 = vrsqrt.f32 %v1169_v9  ;;  %v1160_v15 = vmul.f32 0.03125, %v1145_v13  ;;  %v1159_v16 = vmul.f32 0.03125, %v1142_v40 }
 0x258   : > { %v1605_v17 = vpop.eup %1604  ;;  %1614 = vrsqrt.f32 %v1168_v62 }
 0x259   : > { %v1607_v48 = vpop.eup %1606  ;;  %v1221_v19 = vadd.f32 %v2075_v11, %v1203_v23  ;;  %v1186_v20 = vmul.f32 %v1605_v17, %v2010_v1  ;;  %v1171_v14 = vadd.f32 1e-05, %v1160_v15  ;;  %v1170_v24 = vadd.f32 1e-05, %v1159_v16 }
 0x25a   : > { %v1187_v21 = vmul.f32 %v1607_v48, %v2014_v6  ;;  %v1151_v25 = vpop.xlane.xlu1 %1150  ;;  %v1148_v26 = vpop.xlane.xlu0 %1147 }
 0x25b   : > { %1232 = vst.msk [vmem:[%s2081_s16 - $0x2] sm:$0xfc] %vm1050_vm5, %v1221_v19  ;;  %v1204_v27 = vmul.f32 %v2069_v22, %v1186_v20  ;;  %1616 = vrsqrt.f32 %v1171_v14  ;;  %v1162_v30 = vmul.f32 0.03125, %v1151_v25  ;;  %v1161_v33 = vmul.f32 0.03125, %v1148_v26 }
 0x25c   : > { %v1205_v34 = vmul.f32 %v2069_v22, %v1187_v21  ;;  %1618 = vrsqrt.f32 %v1170_v24 }
 0x25d   : > { %v1609_v31 = vpop.eup %1608  ;;  %v1222_v1 = vadd.f32 %v2075_v11, %v1204_v27  ;;  %v1173_v35 = vadd.f32 1e-05, %v1162_v30  ;;  %v1172_v36 = vadd.f32 1e-05, %v1161_v33 }
 0x25e   : > { %v1611_v6 = vpop.eup %1610  ;;  %v1223_v38 = vadd.f32 %v2075_v11, %v1205_v34  ;;  %v1189_v39 = vmul.f32 %v1609_v31, %v2024_v10 }
 0x25f   : > { %1233 = vst.msk [vmem:[%s2081_s16 + $0x6] sm:$0xff] %vm275_vm1, %v1222_v1  ;;  %v1188_v43 = vmul.f32 %v1611_v6, %v2022_v5  ;;  %1620 = vrsqrt.f32 %v1173_v35 }
 0x260   : > { %1234 = vst.msk [vmem:[%s2081_s16 + $0xe] sm:$0xff] %vm275_vm1, %v1223_v38  ;;  %v1207_v44 = vmul.f32 %v2069_v22, %v1189_v39  ;;  %1622 = vrsqrt.f32 %v1172_v36 }
 0x261   : > { %v1613_v45 = vpop.eup %1612  ;;  %v1206_v49 = vmul.f32 %v2069_v22, %v1188_v43 }
 0x262   : > { %v1615_v50 = vpop.eup %1614  ;;  %v1225_v37 = vadd.f32 %v2075_v11, %v1207_v44  ;;  %v1191_v10 = vmul.f32 %v1613_v45, %v2033_v12 }
 0x263   : > { %v1224_v63 = vadd.f32 %v2075_v11, %v1206_v49  ;;  %v1190_v5 = vmul.f32 %v1615_v50, %v2031_v18 }
 0x264   : > { %1236 = vst.msk [vmem:[%s2081_s16 + $0x1e] sm:$0xff] %vm275_vm1, %v1225_v37  ;;  %v1209_v51 = vmul.f32 %v2069_v22, %v1191_v10 }
 0x265   : > { %v1617_v52 = vpop.eup %1616  ;;  %1235 = vst.msk [vmem:[%s2081_s16 + $0x16] sm:$0xff] %vm275_vm1, %v1224_v63  ;;  %v1208_v2 = vmul.f32 %v2069_v22, %v1190_v5 }
 0x266   : > { %v1619_v42 = vpop.eup %1618  ;;  %v1227_v53 = vadd.f32 %v2075_v11, %v1209_v51  ;;  %v1193_v12 = vmul.f32 %v1617_v52, %v2043_v29 }
 0x267   : > { %v1226_v54 = vadd.f32 %v2075_v11, %v1208_v2  ;;  %v1192_v18 = vmul.f32 %v1619_v42, %v2041_v28 }
 0x268   : > { %1238 = vst.msk [vmem:[%s2081_s16 + $0x2e] sm:$0xff] %vm275_vm1, %v1227_v53  ;;  %v1211_v47 = vmul.f32 %v2069_v22, %v1193_v12 }
 0x269   : > { %v1621_v55 = vpop.eup %1620  ;;  %1237 = vst.msk [vmem:[%s2081_s16 + $0x26] sm:$0xff] %vm275_vm1, %v1226_v54  ;;  %v1210_v58 = vmul.f32 %v2069_v22, %v1192_v18 }
 0x26a   : > { %v1623_v46 = vpop.eup %1622  ;;  %v1229_v59 = vadd.f32 %v2075_v11, %v1211_v47  ;;  %v1195_v29 = vmul.f32 %v1621_v55, %v2055_v32 }
 0x26b   : > { %v1228_v57 = vadd.f32 %v2075_v11, %v1210_v58  ;;  %v1194_v28 = vmul.f32 %v1623_v46, %v2052_v41 }
 0x26c   : > { %1240 = vst.msk [vmem:[%s2081_s16 + $0x3e] sm:$0xff] %vm275_vm1, %v1229_v59  ;;  %v1213_v4 = vmul.f32 %v2069_v22, %v1195_v29 }
 0x26d   : > { %1239 = vst.msk [vmem:[%s2081_s16 + $0x36] sm:$0xff] %vm275_vm1, %v1228_v57  ;;  %v1212_v61 = vmul.f32 %v2069_v22, %v1194_v28 }
 0x26e   : > { %v1231_v0 = vadd.f32 %v2075_v11, %v1213_v4 }
 0x26f   : > { %v1230_v3 = vadd.f32 %v2075_v11, %v1212_v61 }
 0x270   : > { %1242 = vst.msk [vmem:[%s2081_s16 + $0x4e] sm:$0x1] %vm1081_vm6, %v1231_v0 }
 0x271   : > { %1241 = vst.msk [vmem:[%s2081_s16 + $0x46] sm:$0xff] %vm275_vm1, %v1230_v3 }
 0x272 PF: > { %s15_s18 = sadd.s32 1, %s1630_s18  }
 0x273   : > { %p12_p4 = scmp.ge.s32.totalorder %s15_s18, 4  }
 0x275   :  { %14 = sbr.rel (!%p12_p4) target bundleno = 1 (0x1), region = 73 }

// kernel: wavlm_classifier_forward.7
= control target key start
LH: loop header
LB: loop body
LE: loop exit
PB: predicated region body
PF: predicated region fallthrough
CT: control target
= control target key end

     0   :  { %s14199_s0 = inlined_call_operand.vmem [shape: f32[2,79,32], index: 0, kind: input, shape index: {}]   ;;  %s14200_s1 = inlined_call_operand.vmem [shape: f32[2,32,96], index: 1, kind: input, shape index: {}]   ;;  %s14201_s2 = inlined_call_operand.vmem [shape: f32[2,1,96], index: 2, kind: input, shape index: {}]   ;;  %s14202_s3 = inlined_call_operand.vmem [shape: f32[2,32,32], index: 3, kind: input, shape index: {}]   ;;  %s14203_s4 = inlined_call_operand.vmem [shape: f32[2,1,32], index: 4, kind: input, shape index: {}]   ;;  %s14204_s5 = inlined_call_operand.vmem [shape: f32[2,1,32], index: 5, kind: input, shape index: {}]   ;;  %s14205_s6 = inlined_call_operand.vmem [shape: f32[2,1,32], index: 6, kind: input, shape index: {}]   ;;  %s14206_s7 = inlined_call_operand.vmem [shape: f32[2,32,64], index: 7, kind: input, shape index: {}]   ;;  %s14207_s8 = inlined_call_operand.vmem [shape: f32[2,1,64], index: 8, kind: input, shape index: {}]   ;;  %s14208_s9 = inlined_call_operand.vmem [shape: f32[2,64,32], index: 9, kind: input, shape index: {}]   ;;  %s14209_s10 = inlined_call_operand.vmem [shape: f32[2,1,32], index: 10, kind: input, shape index: {}]   ;;  %s14210_s11 = inlined_call_operand.vmem [shape: f32[2,1,32], index: 11, kind: input, shape index: {}]   ;;  %s14211_s12 = inlined_call_operand.vmem [shape: f32[2,1,32], index: 12, kind: input, shape index: {}]   ;;  %s14212_s13 = inlined_call_operand.vmem [shape: f32[32,16], index: 13, kind: input, shape index: {}]   ;;  %s14213_s14 = inlined_call_operand.vmem [shape: f32[1,16], index: 14, kind: input, shape index: {}]   ;;  %s14214_s15 = inlined_call_operand.vmem [shape: f32[16,2], index: 15, kind: input, shape index: {}]   ;;  %s14215_s16 = inlined_call_operand.vmem [shape: f32[1,2], index: 16, kind: input, shape index: {}]   ;;  %s14216_s17 = inlined_call_operand.hbm [shape: f32[2,2], index: 17, kind: output, shape index: {}]  }
   0x1   :  { %14231 = sst [smem:[#allocation26_spill]] %s14199_s0 }
   0x2   :  { %14232 = sst [smem:[#allocation27_spill]] %s14200_s1 }
   0x3   :  { %14233 = sst [smem:[#allocation28_spill]] %s14201_s2 }
   0x4   :  { %14234 = sst [smem:[#allocation29_spill]] %s14202_s3 }
   0x5   :  { %14235 = sst [smem:[#allocation30_spill]] %s14203_s4 }
   0x6   :  { %14236 = sst [smem:[#allocation31_spill]] %s14204_s5 }
   0x7   :  { %14237 = sst [smem:[#allocation32_spill]] %s14205_s6 }
   0x8   :  { %14238 = sst [smem:[#allocation33_spill]] %s14206_s7 }
   0x9   :  { %14239 = sst [smem:[#allocation34_spill]] %s14213_s14 }
   0xa   :  { %14240 = sst [smem:[#allocation35_spill]] %s14214_s15 }
   0xb   :  { %14241 = sst [smem:[#allocation36_spill]] %s14215_s16 }
   0xc   :  { %14242 = sst [smem:[#allocation37_spill]] %s14216_s17 }
   0xd   :  { %22 = vsyncpa [#allocation4], 0  ;;  %s11491_s24 = smov 0  }
   0xe LB: > { %14243 = sst [smem:[#allocation6_spill]] %s11383_s24  ;;  %s11497_s25 = sadd.s32 4294967295, %s11383_s24   ;;  %s11383_s24 = sphi %s11491_s24, %s28_s24  }
   0xf   : > { %p8082_p0 = scmp.ge.s32.totalorder %s11383_s24, 1  ;;  %p577_p1 = scmp.lt.s32.totalorder %s11383_s24, 3 }
  0x11   : > { %p578_p2 = pnand %p8082_p0, %p577_p1 }
  0x13   : > { %581 = sbr.rel (%p578_p2) target bundleno = 6421 (0x1915), region = 88 }
  0x1a   : > { %p663_p3 = scmp.lt.s32.totalorder %s11497_s25, 1  ;;  %s14244_s2 = sld [smem:[#allocation28_spill]] }
  0x1b   : > { %s14245_s19 = sld [smem:[#allocation27_spill]]  ;;  %s14246_s3 = sld [smem:[#allocation29_spill]] }
  0x1c   : > { %s11503_s26 = scalar_select %p663_p3, %s11497_s25, 1 }
  0x1d   : > { %s14247_s4 = sld [smem:[#allocation30_spill]]  ;;  %s14248_s5 = sld [smem:[#allocation31_spill]] }
  0x1e   : > { %s8497_s27 = sshll.u32 %s11503_s26, 5  ;;  %s14249_s6 = sld [smem:[#allocation32_spill]] }
  0x1f   : > { %s14250_s7 = sld [smem:[#allocation33_spill]]  ;;  %s11549_s24 = scalar_lea.vmem %s14207_s8, %s11503_s26 }
  0x20   : > { %s11510_s0 = scalar_lea.vmem %s14244_s2, %s11503_s26  ;;  %s8500_s23 = sshll.u32 %s11503_s26, 6 }
  0x21   : > { %s11515_s1 = scalar_lea.vmem %s14245_s19, %s8497_s27  ;;  %s11520_s22 = scalar_lea.vmem %s14246_s3, %s8497_s27 }
  0x22   : > { %s11555_s16 = scalar_lea.vmem %s14208_s9, %s8500_s23  ;;  %s700_s29 = scalar_lea.vmem %s14209_s10, %s11503_s26 }
  0x23   : > { %s11526_s17 = scalar_lea.vmem %s14247_s4, %s11503_s26  ;;  %s11532_s28 = scalar_lea.vmem %s14248_s5, %s11503_s26 }
  0x24   : > { %s11538_s30 = scalar_lea.vmem %s14249_s6, %s11503_s26  ;;  %s706_s3 = scalar_lea.vmem %s14211_s12, %s11503_s26 }
  0x25   : > { %s11543_s20 = scalar_lea.vmem %s14250_s7, %s8497_s27  ;;  %s703_s27 = scalar_lea.vmem %s14210_s11, %s11503_s26 }
  0x26   : > { %p8091_p4 = scmp.ne.s32.totalorder %s11497_s25, 0 }
  0x27   : > { %s14251_s4 = sld [smem:[#allocation26_spill]] (!%p8091_p4)  ;;  %vm731_vm0 = vcmask (!%p8091_p4), 261120   ;;  %vm741_vm1 = vcmask (!%p8091_p4), 260096  }
  0x28   : > { %710 = sbr.rel (%p8091_p4) target bundleno = 57 (0x39), region = 92 }
  0x2d   : > { %v711_v0 = vld [vmem:[%s14251_s4] sm:$0xff] (!%p8091_p4)  ;;  %v712_v1 = vld [vmem:[%s14251_s4 + $0x8] sm:$0xff] (!%p8091_p4)  ;;  %v713_v2 = vld [vmem:[%s14251_s4 + $0x10] sm:$0xff] (!%p8091_p4) }
  0x2e   : > { %732 = vst.msk [vmem:[#allocation2] sm:$0xff] (!%p8091_p4), %vm731_vm0, %v711_v0  ;;  %733 = vst.msk [vmem:[#allocation2 + $0x8] sm:$0xff] (!%p8091_p4), %vm731_vm0, %v712_v1  ;;  %v714_v3 = vld [vmem:[%s14251_s4 + $0x18] sm:$0xff] (!%p8091_p4)  ;;  %v715_v4 = vld [vmem:[%s14251_s4 + $0x20] sm:$0xff] (!%p8091_p4) }
  0x2f   : > { %734 = vst.msk [vmem:[#allocation2 + $0x10] sm:$0xff] %vm731_vm0, %v713_v2  ;;  %v716_v5 = vld [vmem:[%s14251_s4 + $0x28] sm:$0xff]  ;;  %735 = vst.msk [vmem:[#allocation2 + $0x18] sm:$0xff] %vm731_vm0, %v714_v3  ;;  %v717_v6 = vld [vmem:[%s14251_s4 + $0x30] sm:$0xff] }
  0x30   : > { %736 = vst.msk [vmem:[#allocation2 + $0x20] sm:$0xff] %vm731_vm0, %v715_v4  ;;  %737 = vst.msk [vmem:[#allocation2 + $0x28] sm:$0xff] %vm731_vm0, %v716_v5  ;;  %v718_v7 = vld [vmem:[%s14251_s4 + $0x38] sm:$0xff]  ;;  %v719_v8 = vld [vmem:[%s14251_s4 + $0x40] sm:$0xff] }
  0x31   : > { %738 = vst.msk [vmem:[#allocation2 + $0x30] sm:$0xff] %vm731_vm0, %v717_v6  ;;  %739 = vst.msk [vmem:[#allocation2 + $0x38] sm:$0xff] %vm731_vm0, %v718_v7  ;;  %v720_v9 = vld [vmem:[%s14251_s4 + $0x48] sm:$0x7f]  ;;  %v721_v10 = vld [vmem:[%s14251_s4 + $0x50] sm:$0xff] }
  0x32   : > { %740 = vst.msk [vmem:[#allocation2 + $0x40] sm:$0xff] %vm731_vm0, %v719_v8  ;;  %v722_v11 = vld [vmem:[%s14251_s4 + $0x58] sm:$0xff]  ;;  %743 = vst.msk [vmem:[#allocation2 + $0x50] sm:$0xff] %vm731_vm0, %v721_v10  ;;  %v723_v12 = vld [vmem:[%s14251_s4 + $0x60] sm:$0xff] }
  0x33   : > { %742 = vst.msk [vmem:[#allocation2 + $0x48] sm:$0x7f] %vm741_vm1, %v720_v9  ;;  %v724_v13 = vld [vmem:[%s14251_s4 + $0x68] sm:$0xff]  ;;  %v725_v14 = vld [vmem:[%s14251_s4 + $0x70] sm:$0xff]  ;;  %v726_v15 = vld [vmem:[%s14251_s4 + $0x78] sm:$0xff] }
  0x34   : > { %744 = vst.msk [vmem:[#allocation2 + $0x58] sm:$0xff] %vm731_vm0, %v722_v11  ;;  %745 = vst.msk [vmem:[#allocation2 + $0x60] sm:$0xff] %vm731_vm0, %v723_v12  ;;  %v727_v16 = vld [vmem:[%s14251_s4 + $0x80] sm:$0xff]  ;;  %v728_v17 = vld [vmem:[%s14251_s4 + $0x88] sm:$0xff] }
  0x35   : > { %746 = vst.msk [vmem:[#allocation2 + $0x68] sm:$0xff] %vm731_vm0, %v724_v13  ;;  %747 = vst.msk [vmem:[#allocation2 + $0x70] sm:$0xff] %vm731_vm0, %v725_v14  ;;  %v729_v18 = vld [vmem:[%s14251_s4 + $0x90] sm:$0xff]  ;;  %v730_v19 = vld [vmem:[%s14251_s4 + $0x98] sm:$0x7f] }
  0x36   : > { %748 = vst.msk [vmem:[#allocation2 + $0x78] sm:$0xff] %vm731_vm0, %v726_v15  ;;  %749 = vst.msk [vmem:[#allocation2 + $0x80] sm:$0xff] %vm731_vm0, %v727_v16 }
  0x37   : > { %750 = vst.msk [vmem:[#allocation2 + $0x88] sm:$0xff] %vm731_vm0, %v728_v17  ;;  %751 = vst.msk [vmem:[#allocation2 + $0x90] sm:$0xff] %vm731_vm0, %v729_v18 }
  0x38   : > { %752 = vst.msk [vmem:[#allocation2 + $0x98] sm:$0x7f] %vm741_vm1, %v730_v19 }
  0x39 PF: > { %v753_v20 = vld [vmem:[%s11515_s1] sm:$0xff]  ;;  %v754_v21 = vld [vmem:[%s11515_s1 + $0x8] sm:$0xff]  ;;  %v755_v22 = vld [vmem:[%s11515_s1 + $0x10] sm:$0xff]  ;;  %vm797_vm2 = vcmask 261120   ;;  %vm983_vm3 = vcmask 64512   ;;  %s11386_s19 = smov 88  }
  0x3a   : > { %v11653_v23 = vpack.c.bf16 %v754_v21, %v753_v20  ;;  %v756_v24 = vld [vmem:[%s11515_s1 + $0x18] sm:$0xff]  ;;  %v785_v30 = vld [vmem:[#allocation2 + $0x20] sm:$0xff]  ;;  %v786_v31 = vld [vmem:[#allocation2 + $0x28] sm:$0xff]  ;;  %s11385_s1 = smov 96   ;;  %s11387_s21 = smov 120   ;;  %vm1149_vm5 = vcmask 646144  }
  0x3b   : > { %v11656_v26 = vpack.c.bf16 %v756_v24, %v755_v22  ;;  %v787_v32 = vld [vmem:[#allocation2 + $0x30] sm:$0xff]  ;;  %v788_v33 = vld [vmem:[#allocation2 + $0x38] sm:$0xff]  ;;  %v789_v34 = vld [vmem:[#allocation2 + $0x40] sm:$0xff]  ;;  %s11388_s23 = smov 64   ;;  %vm1177_vm6 = vcmask 645120   ;;  %s11389_s14 = smov 80  }
  0x3c   : > { %9878 = vmatprep.subr.bf16.mxu0 %v11653_v23  ;;  %v790_v35 = vld [vmem:[#allocation2 + $0x48] sm:$0x7f]  ;;  %v8092_v36 = vld [vmem:[%s11510_s0] ss:$0 sm:$0xff]  ;;  %vm11749_vm4 = vmpackc.low %vm983_vm3, %vm983_vm3  ;;  %s11390_s5 = smov 112   ;;  %s11391_s2 = smov 56  }
  0x3d   : > { %9880 = vmatpush3.bf16.msra.mxu0 %v11653_v23  ;;  %vm1320_vm7 = vcmask 1046528   ;;  %vm11392_vm8 = vmmov 1   ;;  %s11393_s6 = smov 72   ;;  %s11394_s15 = smov 104   ;;  %vm3544_vm10 = vcmask 260096   ;;  %vm3928_vm11 = vcmask 523264  }
  0x3e   : > { %9882 = vmatprep.subr.bf16.mxu0 %v11656_v26  ;;  %vm11975_vm9 = vmpackc.low %vm1320_vm7, %vm11392_vm8  ;;  %s11395_s7 = smov 48   ;;  %s11396_s18 = smov 40  }
  0x3f   : > { %v781_v25 = vld [vmem:[#allocation2] sm:$0xff]  ;;  %v782_v27 = vld [vmem:[#allocation2 + $0x8] sm:$0xff]  ;;  %p8488_p5 = scmp.ne.s32.totalorder %s11497_s25, 1 }
  0x40   : > { %9017 = vmatprep.mubr.msk.f32.mxu0 %vm797_vm2, %v781_v25  ;;  %v783_v28 = vld [vmem:[#allocation2 + $0x10] sm:$0xff]  ;;  %v784_v29 = vld [vmem:[#allocation2 + $0x18] sm:$0xff]  ;;  %vm11398_vm12 = vmmov (!%p8488_p5), 0   ;;  %vm7766_vm13 = vcmask (!%p8488_p5), 1041409   ;;  %vm7849_vm14 = vcmask (!%p8488_p5), 130048   ;;  %vm7923_vm15 = vcmask (!%p8488_p5), 9216  }
  0x41   : > { %9884 = vmatpush3.bf16.msra.mxu0 %v11656_v26 }
  0x44   : > { %9018 = vmatmul.mubr.msk.f32.vlgmr.msra.gmra.mrb[0].mxu0 %vm797_vm2, %v782_v27 }
  0x45   : > { %9020 = vmatprep.mubr.msk.f32.mxu0 %vm797_vm2, %v783_v28 }
  0x48   : > { %9021 = vmatmul.mubr.msk.f32.gmra.mrb[2].mxu0 %vm797_vm2, %v784_v29 }
  0x49   : > { %9023 = vmatprep.mubr.msk.f32.mxu0 %vm797_vm2, %v785_v30 }
  0x4c   : > { %9024 = vmatmul.mubr.msk.f32.gmra.mrb[4].mxu0 %vm797_vm2, %v786_v31 }
  0x4d   : > { %9026 = vmatprep.mubr.msk.f32.mxu0 %vm797_vm2, %v787_v32 }
  0x50   : > { %9027 = vmatmul.mubr.msk.f32.gmra.mrb[6].mxu0 %vm797_vm2, %v788_v33 }
  0x51   : > { %9029 = vmatprep.mubr.msk.f32.mxu0 %vm797_vm2, %v789_v34 }
  0x54   : > { %9030 = vmatmul.mubr.msk.f32.gmra.mrb[8].mxu0 %vm797_vm2, %v790_v35 }
 0x117   : > { %v9019_v37 = vpop.f32.mrb[0].mxu0 }
 0x118   : > { %v900_v38 = vadd.f32 %v9019_v37, %v8092_v36  ;;  %v894_v39 = vpop.f32.mrb[1].mxu0 }
 0x119   : > { %v895_v40 = vadd.f32 %v8092_v36, %v894_v39 }
 0x11a   : > { %v11707_v63 = vmul.f32 0.35355338, %v900_v38 }
 0x11b   : > { %v9022_v41 = vpop.f32.mrb[2].mxu0  ;;  %v11673_v42 = vpack.i.bf16 %v900_v38, %v895_v40  ;;  %v11675_v43 = vmul.f32 0.35355338, %v895_v40 }
 0x11c   : > { %v910_v44 = vadd.f32 %v9022_v41, %v8092_v36  ;;  %v904_v45 = vpop.f32.mrb[3].mxu0 }
 0x11d   : > { %10479 = vrot.lane.b32.xlu0 %v11673_v42, %s11385_s1  ;;  %9052 = vmatprep.mubr.msk.f32.mxu1 %vm983_vm3, %v11675_v43  ;;  %v905_v46 = vadd.f32 %v8092_v36, %v904_v45 }
 0x11e   : > { %v11713_v0 = vmul.f32 0.35355338, %v910_v44 }
 0x11f   : > { %v9025_v47 = vpop.f32.mrb[4].mxu0  ;;  %v11681_v48 = vpack.i.bf16 %v910_v44, %v905_v46  ;;  %v11715_v1 = vmul.f32 0.35355338, %v905_v46 }
 0x120   : > { %v920_v49 = vadd.f32 %v9025_v47, %v8092_v36  ;;  %v914_v50 = vpop.f32.mrb[5].mxu0 }
 0x121   : > { %v915_v51 = vadd.f32 %v8092_v36, %v914_v50  ;;  %10484 = vrot.lane.b32.xlu0 %v11681_v48, %s11385_s1 }
 0x122   : > { %v11721_v2 = vmul.f32 0.35355338, %v920_v49 }
 0x123   : > { %v9028_v52 = vpop.f32.mrb[6].mxu0  ;;  %v11685_v53 = vpack.i.bf16 %v920_v49, %v915_v51  ;;  %v11723_v3 = vmul.f32 0.35355338, %v915_v51 }
 0x124   : > { %v930_v54 = vadd.f32 %v9028_v52, %v8092_v36  ;;  %v924_v55 = vpop.f32.mrb[7].mxu0 }
 0x125   : > { %v925_v56 = vadd.f32 %v8092_v36, %v924_v55  ;;  %10489 = vrot.lane.b32.xlu1 %v11685_v53, %s11385_s1 }
 0x126   : > { %v11729_v4 = vmul.f32 0.35355338, %v930_v54 }
 0x127   : > { %v9031_v57 = vpop.f32.mrb[8].mxu0  ;;  %v11689_v58 = vpack.i.bf16 %v930_v54, %v925_v56  ;;  %v11731_v5 = vmul.f32 0.35355338, %v925_v56 }
 0x128   : > { %v940_v59 = vadd.f32 %v9031_v57, %v8092_v36  ;;  %v934_v60 = vpop.f32.mrb[9].mxu0 }
 0x129   : > { %v935_v61 = vadd.f32 %v8092_v36, %v934_v60  ;;  %10494 = vrot.lane.b32.xlu1 %v11689_v58, %s11385_s1 }
 0x12a   : > { %v11737_v6 = vmul.f32 0.35355338, %v940_v59 }
 0x12b   : > { %v11693_v62 = vpack.i.bf16 %v940_v59, %v935_v61  ;;  %v11739_v7 = vmul.f32 0.35355338, %v935_v61 }
 0x12d   : > { %10504 = vrot.lane.b32.xlu1 %v11673_v42, %s11386_s19  ;;  %10499 = vrot.lane.b32.xlu0 %v11693_v62, %s11385_s1 }
 0x131   : > { %10514 = vrot.lane.b32.xlu1 %v11685_v53, %s11386_s19  ;;  %10509 = vrot.lane.b32.xlu0 %v11681_v48, %s11386_s19 }
 0x135   : > { %10524 = vrot.lane.b32.xlu1 %v11693_v62, %s11386_s19  ;;  %10519 = vrot.lane.b32.xlu0 %v11689_v58, %s11386_s19 }
 0x139   : > { %1601 = vrot.lane.b32.xlu1 %v11707_v63, %s11387_s21  ;;  %1599 = vrot.lane.b32.xlu0 %v11675_v43, %s11387_s21 }
 0x13d   : > { %1605 = vrot.lane.b32.xlu1 %v11713_v0, %s11387_s21  ;;  %1603 = vrot.lane.b32.xlu0 %v11715_v1, %s11387_s21 }
 0x141   : > { %1609 = vrot.lane.b32.xlu1 %v11721_v2, %s11387_s21  ;;  %1607 = vrot.lane.b32.xlu0 %v11723_v3, %s11387_s21 }
 0x145   : > { %1613 = vrot.lane.b32.xlu1 %v11729_v4, %s11387_s21  ;;  %1611 = vrot.lane.b32.xlu0 %v11731_v5, %s11387_s21 }
 0x149   : > { %1617 = vrot.lane.b32.xlu1 %v11737_v6, %s11387_s21  ;;  %1615 = vrot.lane.b32.xlu0 %v11739_v7, %s11387_s21 }
 0x14d   : > { %10529 = vrot.lane.b32.xlu1 %v11673_v42, %s11388_s23 }
 0x18f   : > { %v10480_v8 = vpop.permute.xlu0 %10479 }
 0x190   : > { %v10482_v9 = vunpack.i.h.bf16 %v10480_v8  ;;  %v10481_v10 = vunpack.i.l.bf16 %v10480_v8 }
 0x192   : > { %v9885_v12 = vpack.c.bf16 %v10482_v9, %v10481_v10 }
 0x193   : > { %v10485_v13 = vpop.permute.xlu0 %10484 }
 0x194   : > { %9887 = vmatprep.subr.msk.bf16.mxu1 %vm11749_vm4, %v9885_v12  ;;  %v10487_v14 = vunpack.i.h.bf16 %v10485_v13  ;;  %v10486_v15 = vunpack.i.l.bf16 %v10485_v13 }
 0x195   : > { %9890 = vmatpush3.bf16.xpose.msk.msra.mxu1 %vm11749_vm4, %v9885_v12 }
 0x196   : > { %v9891_v16 = vpack.c.bf16 %v10487_v14, %v10486_v15 }
 0x197   : > { %v10490_v17 = vpop.permute.xlu1 %10489 }
 0x198   : > { %v10492_v18 = vunpack.i.h.bf16 %v10490_v17  ;;  %v10491_v19 = vunpack.i.l.bf16 %v10490_v17  ;;  %9893 = vmatprep.subr.msk.bf16.mxu1 %vm11749_vm4, %v9891_v16 }
 0x19a   : > { %v9897_v20 = vpack.c.bf16 %v10492_v18, %v10491_v19 }
 0x19b   : > { %v10495_v21 = vpop.permute.xlu1 %10494 }
 0x19c   : > { %v10497_v22 = vunpack.i.h.bf16 %v10495_v21  ;;  %v10496_v24 = vunpack.i.l.bf16 %v10495_v21 }
 0x19d   : > { %9896 = vmatpush3.bf16.xpose.msk.msra.mxu1 %vm11749_vm4, %v9891_v16 }
 0x19e   : > { %9899 = vmatprep.subr.msk.bf16.mxu1 %vm11749_vm4, %v9897_v20  ;;  %v9903_v27 = vpack.c.bf16 %v10497_v22, %v10496_v24 }
 0x19f   : > { %v10505_v25 = vpop.permute.xlu1 %10504  ;;  %v10500_v29 = vpop.permute.xlu0 %10499 }
 0x1a0   : > { %v10502_v30 = vunpack.i.h.bf16 %v10500_v29  ;;  %v10501_v31 = vunpack.i.l.bf16 %v10500_v29  ;;  %v10507_v36 = vunpack.i.h.bf16 %v10505_v25  ;;  %v10506_v37 = vunpack.i.l.bf16 %v10505_v25 }
 0x1a2   : > { %v9909_v33 = vpack.c.bf16 %v10502_v30, %v10501_v31  ;;  %v9937_v39 = vpack.c.bf16 %v10507_v36, %v10506_v37 }
 0x1a3   : > { %v10515_v28 = vpop.permute.xlu1 %10514  ;;  %v10510_v40 = vpop.permute.xlu0 %10509 }
 0x1a4   : > { %v10512_v44 = vunpack.i.h.bf16 %v10510_v40  ;;  %v10511_v45 = vunpack.i.l.bf16 %v10510_v40  ;;  %v10517_v52 = vunpack.i.h.bf16 %v10515_v28  ;;  %v10516_v54 = vunpack.i.l.bf16 %v10515_v28 }
 0x1a5   : > { %9902 = vmatpush3.bf16.xpose.msk.msra.mxu1 %vm11749_vm4, %v9897_v20 }
 0x1a6   : > { %9905 = vmatprep.subr.msk.bf16.mxu1 %vm11749_vm4, %v9903_v27  ;;  %v9943_v47 = vpack.c.bf16 %v10512_v44, %v10511_v45  ;;  %v9949_v56 = vpack.c.bf16 %v10517_v52, %v10516_v54 }
 0x1a7   : > { %v10525_v32 = vpop.permute.xlu1 %10524  ;;  %v10520_v57 = vpop.permute.xlu0 %10519 }
 0x1a8   : > { %v10522_v59 = vunpack.i.h.bf16 %v10520_v57  ;;  %v10521_v60 = vunpack.i.l.bf16 %v10520_v57  ;;  %v10527_v9 = vunpack.i.h.bf16 %v10525_v32  ;;  %v10526_v10 = vunpack.i.l.bf16 %v10525_v32 }
 0x1aa   : > { %v9955_v8 = vpack.c.bf16 %v10522_v59, %v10521_v60  ;;  %v9961_v12 = vpack.c.bf16 %v10527_v9, %v10526_v10 }
 0x1ab   : > { %v1602_v34 = vpop.permute.xlu1 %1601  ;;  %v1600_v61 = vpop.permute.xlu0 %1599 }
 0x1ad   : > { %9908 = vmatpush3.bf16.xpose.msk.msra.mxu1 %vm11749_vm4, %v9903_v27 }
 0x1ae   : > { %9911 = vmatprep.subr.msk.bf16.mxu1 %vm11749_vm4, %v9909_v33 }
 0x1af   : > { %v1606_v35 = vpop.permute.xlu1 %1605  ;;  %v1604_v13 = vpop.permute.xlu0 %1603 }
 0x1b3   : > { %v1610_v38 = vpop.permute.xlu1 %1609  ;;  %v1608_v14 = vpop.permute.xlu0 %1607 }
 0x1b5   : > { %9914 = vmatpush3.bf16.xpose.msk.msra.mxu1 %vm11749_vm4, %v9909_v33 }
 0x1b6   : > { %9939 = vmatprep.subr.msk.bf16.mxu1 %vm11749_vm4, %v9937_v39 }
 0x1b7   : > { %v1614_v41 = vpop.permute.xlu1 %1613  ;;  %v1612_v15 = vpop.permute.xlu0 %1611 }
 0x1bb   : > { %v1618_v46 = vpop.permute.xlu1 %1617  ;;  %v1616_v16 = vpop.permute.xlu0 %1615 }
 0x1bc   : > { %9053 = vmatmul.mubr.msk.f32.vlgmr.msra.gmra.mrb[0].mxu1 %vm983_vm3, %v11707_v63 }
 0x1bd   : > { %9055 = vmatprep.mubr.msk.f32.mxu1 %vm983_vm3, %v11715_v1  ;;  %9942 = vmatpush3.bf16.xpose.msk.msra.mxu1 %vm11749_vm4, %v9937_v39 }
 0x1be   : > { %9945 = vmatprep.subr.msk.bf16.mxu1 %vm11749_vm4, %v9943_v47 }
 0x1bf   : > { %v10530_v49 = vpop.permute.xlu1 %10529 }
 0x1c0   : > { %v10532_v50 = vunpack.i.h.bf16 %v10530_v49  ;;  %v10531_v51 = vunpack.i.l.bf16 %v10530_v49  ;;  %9056 = vmatmul.mubr.msk.f32.gmra.mrb[2].mxu1 %vm983_vm3, %v11713_v0 }
 0x1c1   : > { %9058 = vmatprep.mubr.msk.f32.mxu1 %vm983_vm3, %v11723_v3 }
 0x1c2   : > { %v9915_v55 = vpack.c.bf16 %v10532_v50, %v10531_v51 }
 0x1c4   : > { %9059 = vmatmul.mubr.msk.f32.gmra.mrb[4].mxu1 %vm983_vm3, %v11721_v2  ;;  %9916 = vmatprep.subr.bf16.mxu0 %v9915_v55 }
 0x1c5   : > { %9061 = vmatprep.mubr.msk.f32.mxu1 %vm983_vm3, %v11731_v5  ;;  %9918 = vmatpush3.bf16.msra.mxu0 %v9915_v55 }
 0x1c6   : > { %9948 = vmatpush3.bf16.xpose.msk.msra.mxu1 %vm11749_vm4, %v9943_v47 }
 0x1c7   : > { %9951 = vmatprep.subr.msk.bf16.mxu1 %vm11749_vm4, %v9949_v56 }
 0x1c8   : > { %9062 = vmatmul.mubr.msk.f32.gmra.mrb[6].mxu1 %vm983_vm3, %v11729_v4 }
 0x1c9   : > { %9064 = vmatprep.mubr.msk.f32.mxu1 %vm983_vm3, %v11739_v7 }
 0x1cc   : > { %9065 = vmatmul.mubr.msk.f32.gmra.mrb[8].mxu1 %vm983_vm3, %v11737_v6 }
 0x1cd   : > { %9139 = vmatprep.mubr.msk.f32.mxu1 %vm983_vm3, %v1600_v61 }
 0x1ce   : > { %9954 = vmatpush3.bf16.xpose.msk.msra.mxu1 %vm11749_vm4, %v9949_v56 }
 0x1cf   : > { %9957 = vmatprep.subr.msk.bf16.mxu1 %vm11749_vm4, %v9955_v8 }
 0x1d6   : > { %9960 = vmatpush3.bf16.xpose.msk.msra.mxu1 %vm11749_vm4, %v9955_v8 }
 0x1d7   : > { %9963 = vmatprep.subr.msk.bf16.mxu1 %vm11749_vm4, %v9961_v12 }
 0x1de   : > { %9966 = vmatpush3.bf16.xpose.msk.msra.mxu1 %vm11749_vm4, %v9961_v12 }
 0x1e5   : > { %9140 = vmatmul.mubr.msk.f32.vlgmr.msra.gmra.mrb[10].mxu1 %vm983_vm3, %v1602_v34 }
 0x1e6   : > { %9142 = vmatprep.mubr.msk.f32.mxu1 %vm983_vm3, %v1604_v13 }
 0x1e9   : > { %9143 = vmatmul.mubr.msk.f32.gmra.mrb[12].mxu1 %vm983_vm3, %v1606_v35 }
 0x1ea   : > { %9145 = vmatprep.mubr.msk.f32.mxu1 %vm983_vm3, %v1608_v14 }
 0x1ed   : > { %9146 = vmatmul.mubr.msk.f32.gmra.mrb[14].mxu1 %vm983_vm3, %v1610_v38 }
 0x1ee   : > { %9148 = vmatprep.mubr.msk.f32.mxu1 %vm983_vm3, %v1612_v15 }
 0x1f1   : > { %9149 = vmatmul.mubr.msk.f32.gmra.mrb[16].mxu1 %vm983_vm3, %v1614_v41 }
 0x1f2   : > { %9151 = vmatprep.mubr.msk.f32.mxu1 %vm983_vm3, %v1616_v16 }
 0x1f5   : > { %9152 = vmatmul.mubr.msk.f32.gmra.mrb[18].mxu1 %vm983_vm3, %v1618_v46 }
 0x28f   : > { %v9054_v17 = vpop.f32.mrb[0].mxu1 }
 0x290   : > { %v1100_v18 = vpop.f32.mrb[1].mxu1  ;;  %v1153_v19 = vsel %vm1149_vm5, %v9054_v17, -inf }
 0x291   : > { %1154 = vmax.xlane.f32.xlu1 %v1153_v19  ;;  %v1150_v20 = vsel %vm1149_vm5, %v1100_v18, -inf }
 0x292   : > { %1151 = vmax.xlane.f32.xlu0 %v1150_v20 }
 0x293   : > { %v9057_v21 = vpop.f32.mrb[2].mxu1 }
 0x294   : > { %v1110_v22 = vpop.f32.mrb[3].mxu1  ;;  %v1159_v24 = vsel %vm1149_vm5, %v9057_v21, -inf }
 0x295   : > { %v1156_v28 = vsel %vm1149_vm5, %v1110_v22, -inf }
 0x296   : > { %1160 = vmax.xlane.f32.xlu0 %v1159_v24 }
 0x297   : > { %v9060_v25 = vpop.f32.mrb[4].mxu1 }
 0x298   : > { %v1120_v27 = vpop.f32.mrb[5].mxu1  ;;  %v1165_v32 = vsel %vm1149_vm5, %v9060_v25, -inf }
 0x299   : > { %v1162_v29 = vsel %vm1149_vm5, %v1120_v27, -inf }
 0x29a   : > { %1157 = vmax.xlane.f32.xlu0 %v1156_v28  ;;  %1163 = vmax.xlane.f32.xlu1 %v1162_v29 }
 0x29b   : > { %v11826_v30 = vpop.f32.mrb[6].mxu1 }
 0x29c   : > { %v1130_v31 = vpop.f32.mrb[7].mxu1  ;;  %v1171_v36 = vsel %vm1149_vm5, %v11826_v30, -inf }
 0x29d   : > { %v1168_v33 = vsel %vm1149_vm5, %v1130_v31, -inf }
 0x29e   : > { %1166 = vmax.xlane.f32.xlu0 %v1165_v32  ;;  %1169 = vmax.xlane.f32.xlu1 %v1168_v33 }
 0x29f   : > { %v11830_v34 = vpop.f32.mrb[8].mxu1 }
 0x2a0   : > { %v11832_v35 = vpop.f32.mrb[9].mxu1  ;;  %v1178_v38 = vsel %vm1177_vm6, %v11830_v34, -inf }
 0x2a1   : > { %v1174_v37 = vsel %vm1149_vm5, %v11832_v35, -inf }
 0x2a2   : > { %1172 = vmax.xlane.f32.xlu0 %v1171_v36  ;;  %1175 = vmax.xlane.f32.xlu1 %v1174_v37 }
 0x2a6   : > { %1179 = vmax.xlane.f32.xlu0 %v1178_v38 }
 0x2b3   : > { %10539 = vrot.lane.b32.xlu1 %v11685_v53, %s11388_s23 }
 0x2b8   : > { %v11842_v39 = vpop.f32.mrb[10].mxu1 }
 0x2b9   : > { %v11844_v40 = vpop.f32.mrb[11].mxu1 }
 0x2bc   : > { %v11846_v41 = vpop.f32.mrb[12].mxu1  ;;  %10534 = vrot.lane.b32.xlu0 %v11681_v48, %s11388_s23 }
 0x2bd   : > { %v11850_v44 = vpop.f32.mrb[13].mxu1 }
 0x2c0   : > { %v11852_v45 = vpop.f32.mrb[14].mxu1 }
 0x2c1   : > { %v11854_v46 = vpop.f32.mrb[15].mxu1 }
 0x2c4   : > { %v11856_v47 = vpop.f32.mrb[16].mxu1 }
 0x2c5   : > { %v11858_v49 = vpop.f32.mrb[17].mxu1 }
 0x2c8   : > { %v11860_v50 = vpop.f32.mrb[18].mxu1 }
 0x2c9   : > { %v11862_v51 = vpop.f32.mrb[19].mxu1 }
 0x31e   : > { %v1155_v52 = vpop.xlane.xlu1 %1154 }
 0x31f   : > { %v1182_v54 = vsub.f32 %v9054_v17, %v1155_v52  ;;  %v1152_v55 = vpop.xlane.xlu0 %1151 }
 0x320   : > { %v1181_v56 = vsub.f32 %v1100_v18, %v1152_v55 }
 0x321   : > { %v1193_v57 = vmul.f32 1.442695, %v1182_v54 }
 0x322   : > { %v1191_v59 = vmul.f32 1.442695, %v1181_v56 }
 0x323   : > { %10878 = vpow2.f32 %v1193_v57  ;;  %v1161_v60 = vpop.xlane.xlu0 %1160 }
 0x324   : > { %10880 = vpow2.f32 %v1191_v59  ;;  %v1184_v61 = vsub.f32 %v9057_v21, %v1161_v60 }
 0x326   : > { %v1197_v8 = vmul.f32 1.442695, %v1184_v61 }
 0x327   : > { %v1158_v9 = vpop.xlane.xlu0 %1157  ;;  %v1164_v10 = vpop.xlane.xlu1 %1163 }
 0x328   : > { %10882 = vpow2.f32 %v1197_v8  ;;  %v1183_v12 = vsub.f32 %v1110_v22, %v1158_v9  ;;  %v1185_v13 = vsub.f32 %v1120_v27, %v1164_v10 }
 0x32a   : > { %v1195_v14 = vmul.f32 1.442695, %v1183_v12  ;;  %v1199_v18 = vmul.f32 1.442695, %v1185_v13 }
 0x32b   : > { %v1167_v15 = vpop.xlane.xlu0 %1166  ;;  %v1170_v16 = vpop.xlane.xlu1 %1169 }
 0x32c   : > { %10884 = vpow2.f32 %v1195_v14  ;;  %v1186_v19 = vsub.f32 %v9060_v25, %v1167_v15  ;;  %v1187_v17 = vsub.f32 %v1130_v31, %v1170_v16 }
 0x32d   : > { %v11864_v20 = vpop.eup %10878 }
 0x32e   : > { %v11866_v24 = vpop.eup %10880  ;;  %v1201_v28 = vmul.f32 1.442695, %v1186_v19  ;;  %v1203_v29 = vmul.f32 1.442695, %v1187_v17  ;;  %v1214_v21 = vsel %vm1149_vm5, %v11864_v20, 0.0 }
 0x32f   : > { %v1173_v32 = vpop.xlane.xlu0 %1172  ;;  %1215 = vadd.xlane.f32.xlu0 %v1214_v21  ;;  %v1176_v22 = vpop.xlane.xlu1 %1175  ;;  %v1211_v27 = vsel %vm1149_vm5, %v11866_v24, 0.0 }
 0x330   : > { %10886 = vpow2.f32 %v1201_v28  ;;  %v1188_v25 = vsub.f32 %v11826_v30, %v1173_v32  ;;  %1212 = vadd.xlane.f32.xlu1 %v1211_v27  ;;  %v1189_v55 = vsub.f32 %v11832_v35, %v1176_v22  ;;  %v1794_v32 = vsel %vm1149_vm5, %v11844_v40, -inf }
 0x331   : > { %10888 = vpow2.f32 %v1203_v29  ;;  %v1800_v22 = vsel %vm1149_vm5, %v11850_v44, -inf  ;;  %v1797_v27 = vsel %vm1149_vm5, %v11842_v39, -inf }
 0x332   : > { %v11873_v31 = vpop.eup %10882  ;;  %10890 = vpow2.f32 %v1199_v18  ;;  %v1205_v33 = vmul.f32 1.442695, %v1188_v25  ;;  %v1803_v25 = vsel %vm1149_vm5, %v11846_v41, -inf }
 0x333   : > { %v1180_v36 = vpop.xlane.xlu0 %1179  ;;  %v1220_v37 = vsel %vm1149_vm5, %v11873_v31, 0.0  ;;  %v10540_v52 = vpop.permute.xlu1 %10539 }
 0x334   : > { %v1190_v38 = vsub.f32 %v11830_v34, %v1180_v36  ;;  %1221 = vadd.xlane.f32.xlu0 %v1220_v37  ;;  %10892 = vpow2.f32 %v1205_v33  ;;  %v10542_v59 = vunpack.i.h.bf16 %v10540_v52  ;;  %v10541_v60 = vunpack.i.l.bf16 %v10540_v52 }
 0x335   : > { %v1207_v34 = vmul.f32 1.442695, %v1189_v55  ;;  %v1806_v33 = vsel %vm1149_vm5, %v11854_v46, -inf  ;;  %v1809_v36 = vsel %vm1149_vm5, %v11852_v45, -inf  ;;  %v1812_v37 = vsel %vm1149_vm5, %v11858_v49, -inf }
 0x336   : > { %v11878_v54 = vpop.eup %10884  ;;  %v1209_v30 = vmul.f32 1.442695, %v1190_v38  ;;  %v9923_v15 = vpack.c.bf16 %v10542_v59, %v10541_v60  ;;  %v1815_v38 = vsel %vm1149_vm5, %v11856_v47, -inf  ;;  %v1818_v52 = vsel %vm1149_vm5, %v11862_v51, -inf }
 0x337   : > { %v10535_v56 = vpop.permute.xlu0 %10534  ;;  %v1217_v57 = vsel %vm1149_vm5, %v11878_v54, 0.0  ;;  %v1821_v55 = vsel %vm1177_vm6, %v11860_v50, -inf }
 0x338   : > { %v10537_v61 = vunpack.i.h.bf16 %v10535_v56  ;;  %v10536_v8 = vunpack.i.l.bf16 %v10535_v56  ;;  %1218 = vadd.xlane.f32.xlu1 %v1217_v57  ;;  %10894 = vpow2.f32 %v1209_v30 }
 0x339   : > { %10896 = vpow2.f32 %v1207_v34 }
 0x33a   : > { %v11883_v9 = vpop.eup %10886  ;;  %v9919_v10 = vpack.c.bf16 %v10537_v61, %v10536_v8 }
 0x33b   : > { %v11885_v12 = vpop.eup %10888  ;;  %v1226_v35 = vsel %vm1149_vm5, %v11883_v9, 0.0 }
 0x33c   : > { %v11889_v13 = vpop.eup %10890  ;;  %1227 = vadd.xlane.f32.xlu0 %v1226_v35  ;;  %9920 = vmatprep.subr.bf16.mxu0 %v9919_v10  ;;  %v1229_v14 = vsel %vm1149_vm5, %v11885_v12, 0.0 }
 0x33d   : > { %1230 = vadd.xlane.f32.xlu1 %v1229_v14  ;;  %9922 = vmatpush3.bf16.msra.mxu0 %v9919_v10  ;;  %v1223_v16 = vsel %vm1149_vm5, %v11889_v13, 0.0 }
 0x33e   : > { %9924 = vmatprep.subr.bf16.mxu0 %v9923_v15  ;;  %v11895_v19 = vpop.eup %10892 }
 0x33f   : > { %v1232_v17 = vsel %vm1149_vm5, %v11895_v19, 0.0 }
 0x340   : > { %1224 = vadd.xlane.f32.xlu0 %v1223_v16 }
 0x341   : > { %9926 = vmatpush3.bf16.msra.mxu0 %v9923_v15 }
 0x342   : > { %v11899_v18 = vpop.eup %10894 }
 0x343   : > { %v1238_v28 = vsel %vm1177_vm6, %v11899_v18, 0.0  ;;  %v11903_v29 = vpop.eup %10896 }
 0x344   : > { %1233 = vadd.xlane.f32.xlu0 %v1232_v17  ;;  %v1235_v21 = vsel %vm1149_vm5, %v11903_v29, 0.0 }
 0x348   : > { %1239 = vadd.xlane.f32.xlu0 %v1238_v28 }
 0x34c   : > { %1236 = vadd.xlane.f32.xlu0 %v1235_v21 }
 0x34e   : > { %10544 = vrot.lane.b32.xlu1 %v11689_v58, %s11388_s23 }
 0x352   : > { %10554 = vrot.lane.b32.xlu1 %v11673_v42, %s11389_s14 }
 0x356   : > { %10559 = vrot.lane.b32.xlu1 %v11681_v48, %s11389_s14 }
 0x35a   : > { %10564 = vrot.lane.b32.xlu1 %v11685_v53, %s11389_s14 }
 0x35e   : > { %10569 = vrot.lane.b32.xlu1 %v11689_v58, %s11389_s14 }
 0x362   : > { %10574 = vrot.lane.b32.xlu1 %v11693_v62, %s11389_s14  ;;  %10549 = vrot.lane.b32.xlu0 %v11693_v62, %s11388_s23 }
 0x366   : > { %2237 = vrot.lane.b32.xlu1 %v11707_v63, %s11390_s5  ;;  %2235 = vrot.lane.b32.xlu0 %v11675_v43, %s11390_s5 }
 0x36a   : > { %2241 = vrot.lane.b32.xlu1 %v11713_v0, %s11390_s5  ;;  %2239 = vrot.lane.b32.xlu0 %v11715_v1, %s11390_s5 }
 0x36e   : > { %2245 = vrot.lane.b32.xlu1 %v11721_v2, %s11390_s5  ;;  %2243 = vrot.lane.b32.xlu0 %v11723_v3, %s11390_s5 }
 0x372   : > { %2249 = vrot.lane.b32.xlu1 %v11729_v4, %s11390_s5  ;;  %2247 = vrot.lane.b32.xlu0 %v11731_v5, %s11390_s5 }
 0x376   : > { %2253 = vrot.lane.b32.xlu1 %v11737_v6, %s11390_s5  ;;  %2251 = vrot.lane.b32.xlu0 %v11739_v7, %s11390_s5 }
 0x395   : > { %1795 = vmax.xlane.f32.xlu0 %v1794_v32 }
 0x399   : > { %1801 = vmax.xlane.f32.xlu0 %v1800_v22 }
 0x39a   : > { %1798 = vmax.xlane.f32.xlu1 %v1797_v27 }
 0x39d   : > { %1804 = vmax.xlane.f32.xlu0 %v1803_v25 }
 0x39e   : > { %1807 = vmax.xlane.f32.xlu1 %v1806_v33 }
 0x3a1   : > { %1810 = vmax.xlane.f32.xlu0 %v1809_v36 }
 0x3a2   : > { %1813 = vmax.xlane.f32.xlu1 %v1812_v37 }
 0x3a5   : > { %1816 = vmax.xlane.f32.xlu0 %v1815_v38 }
 0x3a6   : > { %1819 = vmax.xlane.f32.xlu1 %v1818_v52 }
 0x3a9   : > { %1822 = vmax.xlane.f32.xlu0 %v1821_v55 }
 0x3b7   : > { %10579 = vrot.lane.b32.xlu1 %v11673_v42, %s11391_s2 }
 0x3bb   : > { %10589 = vrot.lane.b32.xlu1 %v11685_v53, %s11391_s2 }
 0x3bc   : > { %v1216_v56 = vpop.xlane.xlu0 %1215 }
 0x3bd   : > { %v1213_v30 = vpop.xlane.xlu1 %1212 }
 0x3be   : > { %10898 = vrcp.f32 %v1213_v30 }
 0x3bf   : > { %10584 = vrot.lane.b32.xlu0 %v11681_v48, %s11391_s2  ;;  %10900 = vrcp.f32 %v1216_v56 }
 0x3c1   : > { %v1222_v57 = vpop.xlane.xlu0 %1221 }
 0x3c5   : > { %v1219_v59 = vpop.xlane.xlu1 %1218 }
 0x3c6   : > { %10902 = vrcp.f32 %v1219_v59 }
 0x3c7   : > { %10904 = vrcp.f32 %v1222_v57 }
 0x3c8   : > { %v10899_v60 = vpop.eup %10898 }
 0x3c9   : > { %v1228_v61 = vpop.xlane.xlu0 %1227  ;;  %v1251_v8 = vmul.f32 %v10899_v60, %v11866_v24 }
 0x3ca   : > { %v1231_v34 = vpop.xlane.xlu1 %1230 }
 0x3cb   : > { %9087 = vmatprep.mubr.msk.f32.mxu0 %vm1149_vm5, %v1251_v8 }
 0x3cd   : > { %v1225_v10 = vpop.xlane.xlu0 %1224 }
 0x3ce   : > { %v10545_v35 = vpop.permute.xlu1 %10544  ;;  %10906 = vrcp.f32 %v1225_v10 }
 0x3cf   : > { %v10547_v14 = vunpack.i.h.bf16 %v10545_v35  ;;  %v10546_v15 = vunpack.i.l.bf16 %v10545_v35  ;;  %10908 = vrcp.f32 %v1228_v61 }
 0x3d0   : > { %10910 = vrcp.f32 %v1231_v34 }
 0x3d1   : > { %v1234_v16 = vpop.xlane.xlu0 %1233  ;;  %v9927_v17 = vpack.c.bf16 %v10547_v14, %v10546_v15  ;;  %v10901_v14 = vpop.eup %10900  ;;  %v758_v15 = vld [vmem:[%s11520_s22] sm:$0xff] }
 0x3d2   : > { %v10555_v28 = vpop.permute.xlu1 %10554  ;;  %10912 = vrcp.f32 %v1234_v16 }
 0x3d3   : > { %v10557_v21 = vunpack.i.h.bf16 %v10555_v28  ;;  %v10556_v32 = vunpack.i.l.bf16 %v10555_v28  ;;  %9928 = vmatprep.subr.bf16.mxu0 %v9927_v17  ;;  %v1252_v28 = vmul.f32 %v10901_v14, %v11864_v20 }
 0x3d4   : > { %9930 = vmatpush3.bf16.msra.mxu0 %v9927_v17  ;;  %v10903_v17 = vpop.eup %10902 }
 0x3d5   : > { %v9989_v22 = vpack.c.bf16 %v10557_v21, %v10556_v32  ;;  %v1240_v27 = vpop.xlane.xlu0 %1239  ;;  %v10905_v21 = vpop.eup %10904  ;;  %v1253_v32 = vmul.f32 %v10903_v17, %v11878_v54 }
 0x3d6   : > { %v10560_v25 = vpop.permute.xlu1 %10559 }
 0x3d7   : > { %v10562_v33 = vunpack.i.h.bf16 %v10560_v25  ;;  %v10561_v24 = vunpack.i.l.bf16 %v10560_v25  ;;  %9991 = vmatprep.subr.msk.bf16.mxu1 %vm11749_vm4, %v9989_v22 }
 0x3d8   : > { %9994 = vmatpush3.bf16.xpose.msk.msra.mxu1 %vm11749_vm4, %v9989_v22  ;;  %v10907_v22 = vpop.eup %10906 }
 0x3d9   : > { %v9995_v36 = vpack.c.bf16 %v10562_v33, %v10561_v24  ;;  %v1237_v37 = vpop.xlane.xlu0 %1236  ;;  %v1254_v33 = vmul.f32 %v10905_v21, %v11873_v31  ;;  %v10909_v20 = vpop.eup %10908  ;;  %v1255_v54 = vmul.f32 %v10907_v22, %v11889_v13 }
 0x3da   : > { %v10565_v38 = vpop.permute.xlu1 %10564  ;;  %10914 = vrcp.f32 %v1237_v37  ;;  %v10911_v24 = vpop.eup %10910  ;;  %v1256_v37 = vmul.f32 %v10909_v20, %v11883_v9 }
 0x3db   : > { %v10567_v52 = vunpack.i.h.bf16 %v10565_v38  ;;  %v10566_v55 = vunpack.i.l.bf16 %v10565_v38  ;;  %9997 = vmatprep.subr.msk.bf16.mxu1 %vm11749_vm4, %v9995_v36  ;;  %10916 = vrcp.f32 %v1240_v27 }
 0x3dc   : > { %v10913_v38 = vpop.eup %10912 }
 0x3dd   : > { %v10550_v30 = vpop.permute.xlu0 %10549  ;;  %v10001_v59 = vpack.c.bf16 %v10567_v52, %v10566_v55  ;;  %v1257_v52 = vmul.f32 %v10911_v24, %v11885_v12  ;;  %v1258_v13 = vmul.f32 %v10913_v38, %v11895_v19 }
 0x3de   : > { %v10552_v56 = vunpack.i.h.bf16 %v10550_v30  ;;  %v10551_v60 = vunpack.i.l.bf16 %v10550_v30  ;;  %v10570_v35 = vpop.permute.xlu1 %10569 }
 0x3df   : > { %v10572_v61 = vunpack.i.h.bf16 %v10570_v35  ;;  %v10571_v34 = vunpack.i.l.bf16 %v10570_v35 }
 0x3e0   : > { %v9931_v57 = vpack.c.bf16 %v10552_v56, %v10551_v60  ;;  %10000 = vmatpush3.bf16.xpose.msk.msra.mxu1 %vm11749_vm4, %v9995_v36 }
 0x3e1   : > { %10003 = vmatprep.subr.msk.bf16.mxu1 %vm11749_vm4, %v10001_v59  ;;  %v2236_v10 = vpop.permute.xlu0 %2235  ;;  %v10007_v25 = vpack.c.bf16 %v10572_v61, %v10571_v34 }
 0x3e2   : > { %9933 = vmatprep.subr.msk.bf16.mxu0 %vm11975_vm9, %v9931_v57  ;;  %9226 = vmatprep.mubr.msk.f32.mxu1 %vm983_vm3, %v2236_v10  ;;  %v10575_v16 = vpop.permute.xlu1 %10574 }
 0x3e3   : > { %9936 = vmatpush3.bf16.msk.msra.mxu0 %vm11975_vm9, %v9931_v57  ;;  %v10577_v27 = vunpack.i.h.bf16 %v10575_v16  ;;  %v10576_v36 = vunpack.i.l.bf16 %v10575_v16 }
 0x3e4   : > { %9102 = vmatprep.subr.mxu0 %v758_v15  ;;  %v10915_v55 = vpop.eup %10914 }
 0x3e5   : > { %v10013_v31 = vpack.c.bf16 %v10577_v27, %v10576_v36  ;;  %v10917_v30 = vpop.eup %10916  ;;  %v1259_v9 = vmul.f32 %v10915_v55, %v11903_v29  ;;  %v2240_v60 = vpop.permute.xlu0 %2239 }
 0x3e6   : > { %9088 = vmatmul.mubr.msk.f32.vlgmr.msra.gmra.mrb[10].mxu0 %vm1149_vm5, %v1252_v28  ;;  %v1260_v12 = vmul.f32 %v10917_v30, %v11899_v18  ;;  %v2238_v56 = vpop.permute.xlu1 %2237 }
 0x3e7   : > { %9090 = vmatprep.mubr.msk.f32.mxu0 %vm1149_vm5, %v1253_v32  ;;  %9103 = vmatpush3.msra.mxu0 %v758_v15 }
 0x3e8   : > { %10006 = vmatpush3.bf16.xpose.msk.msra.mxu1 %vm11749_vm4, %v10001_v59 }
 0x3e9   : > { %10009 = vmatprep.subr.msk.bf16.mxu1 %vm11749_vm4, %v10007_v25  ;;  %v2244_v59 = vpop.permute.xlu0 %2243 }
 0x3ea   : > { %9091 = vmatmul.mubr.msk.f32.gmra.mrb[12].mxu0 %vm1149_vm5, %v1254_v33  ;;  %v2242_v19 = vpop.permute.xlu1 %2241 }
 0x3eb   : > { %9093 = vmatprep.mubr.msk.f32.mxu0 %vm1149_vm5, %v1255_v54 }
 0x3ed   : > { %v2248_v57 = vpop.permute.xlu0 %2247 }
 0x3ee   : > { %9094 = vmatmul.mubr.msk.f32.gmra.mrb[14].mxu0 %vm1149_vm5, %v1256_v37  ;;  %v2246_v29 = vpop.permute.xlu1 %2245 }
 0x3ef   : > { %9096 = vmatprep.mubr.msk.f32.mxu0 %vm1149_vm5, %v1257_v52 }
 0x3f0   : > { %10012 = vmatpush3.bf16.xpose.msk.msra.mxu1 %vm11749_vm4, %v10007_v25 }
 0x3f1   : > { %10015 = vmatprep.subr.msk.bf16.mxu1 %vm11749_vm4, %v10013_v31  ;;  %v2252_v35 = vpop.permute.xlu0 %2251 }
 0x3f2   : > { %9097 = vmatmul.mubr.msk.f32.gmra.mrb[16].mxu0 %vm1149_vm5, %v1258_v13  ;;  %v2250_v18 = vpop.permute.xlu1 %2249 }
 0x3f3   : > { %9099 = vmatprep.mubr.msk.f32.mxu0 %vm1149_vm5, %v1259_v9 }
 0x3f6   : > { %9100 = vmatmul.mubr.msk.f32.gmra.mrb[18].mxu0 %vm1149_vm5, %v1260_v12  ;;  %v2254_v14 = vpop.permute.xlu1 %2253 }
 0x3f8   : > { %10018 = vmatpush3.bf16.xpose.msk.msra.mxu1 %vm11749_vm4, %v10013_v31 }
 0x3ff   : > { %9227 = vmatmul.mubr.msk.f32.vlgmr.msra.gmra.mrb[20].mxu1 %vm983_vm3, %v2238_v56 }
 0x400   : > { %9229 = vmatprep.mubr.msk.f32.mxu1 %vm983_vm3, %v2240_v60 }
 0x403   : > { %9230 = vmatmul.mubr.msk.f32.gmra.mrb[22].mxu1 %vm983_vm3, %v2242_v19 }
 0x404   : > { %9232 = vmatprep.mubr.msk.f32.mxu1 %vm983_vm3, %v2244_v59 }
 0x407   : > { %9233 = vmatmul.mubr.msk.f32.gmra.mrb[24].mxu1 %vm983_vm3, %v2246_v29 }
 0x408   : > { %9235 = vmatprep.mubr.msk.f32.mxu1 %vm983_vm3, %v2248_v57 }
 0x40b   : > { %9236 = vmatmul.mubr.msk.f32.gmra.mrb[26].mxu1 %vm983_vm3, %v2250_v18 }
 0x40c   : > { %9238 = vmatprep.mubr.msk.f32.mxu1 %vm983_vm3, %v2252_v35 }
 0x40f   : > { %9239 = vmatmul.mubr.msk.f32.gmra.mrb[28].mxu1 %vm983_vm3, %v2254_v14 }
 0x422   : > { %v1796_v10 = vpop.xlane.xlu0 %1795 }
 0x423   : > { %v1824_v15 = vsub.f32 %v11844_v40, %v1796_v10 }
 0x425   : > { %v1834_v17 = vmul.f32 1.442695, %v1824_v15 }
 0x426   : > { %v1802_v61 = vpop.xlane.xlu0 %1801 }
 0x427   : > { %10918 = vpow2.f32 %v1834_v17  ;;  %v1826_v34 = vsub.f32 %v11850_v44, %v1802_v61  ;;  %v1799_v28 = vpop.xlane.xlu1 %1798 }
 0x428   : > { %v1825_v21 = vsub.f32 %v11842_v39, %v1799_v28 }
 0x429   : > { %v1838_v32 = vmul.f32 1.442695, %v1826_v34 }
 0x42a   : > { %v1836_v22 = vmul.f32 1.442695, %v1825_v21  ;;  %v1805_v25 = vpop.xlane.xlu0 %1804 }
 0x42b   : > { %10920 = vpow2.f32 %v1838_v32  ;;  %v1827_v16 = vsub.f32 %v11846_v41, %v1805_v25  ;;  %v1808_v33 = vpop.xlane.xlu1 %1807 }
 0x42c   : > { %10922 = vpow2.f32 %v1836_v22  ;;  %v1828_v54 = vsub.f32 %v11854_v46, %v1808_v33 }
 0x42d   : > { %v1840_v20 = vmul.f32 1.442695, %v1827_v16 }
 0x42e   : > { %v1811_v40 = vpop.xlane.xlu0 %1810  ;;  %v1842_v37 = vmul.f32 1.442695, %v1828_v54 }
 0x42f   : > { %10924 = vpow2.f32 %v1840_v20  ;;  %v1829_v24 = vsub.f32 %v11852_v45, %v1811_v40  ;;  %v1814_v27 = vpop.xlane.xlu1 %1813 }
 0x430   : > { %v1830_v44 = vsub.f32 %v11858_v49, %v1814_v27 }
 0x431   : > { %v12033_v36 = vpop.eup %10918  ;;  %v1844_v39 = vmul.f32 1.442695, %v1829_v24 }
 0x432   : > { %v1846_v38 = vmul.f32 1.442695, %v1830_v44  ;;  %v1817_v52 = vpop.xlane.xlu0 %1816  ;;  %v1854_v41 = vsel %vm1149_vm5, %v12033_v36, 0.0 }
 0x433   : > { %10926 = vpow2.f32 %v1844_v39  ;;  %v1831_v55 = vsub.f32 %v11856_v47, %v1817_v52  ;;  %v1820_v46 = vpop.xlane.xlu1 %1819  ;;  %1855 = vadd.xlane.f32.xlu1 %v1854_v41 }
 0x434   : > { %10928 = vpow2.f32 %v1846_v38  ;;  %v1832_v59 = vsub.f32 %v11862_v51, %v1820_v46 }
 0x435   : > { %v12038_v31 = vpop.eup %10920  ;;  %10930 = vpow2.f32 %v1842_v37  ;;  %v1848_v49 = vmul.f32 1.442695, %v1831_v55 }
 0x436   : > { %v12040_v45 = vpop.eup %10922  ;;  %v1823_v13 = vpop.xlane.xlu0 %1822  ;;  %v1860_v30 = vsel %vm1149_vm5, %v12038_v31, 0.0  ;;  %v1850_v14 = vmul.f32 1.442695, %v1832_v59 }
 0x437   : > { %v1833_v9 = vsub.f32 %v11860_v50, %v1823_v13  ;;  %v10580_v12 = vpop.permute.xlu1 %10579  ;;  %1861 = vadd.xlane.f32.xlu1 %v1860_v30  ;;  %v1857_v47 = vsel %vm1149_vm5, %v12040_v45, 0.0  ;;  %10932 = vpow2.f32 %v1848_v49 }
 0x438   : > { %v10582_v56 = vunpack.i.h.bf16 %v10580_v12  ;;  %v10581_v60 = vunpack.i.l.bf16 %v10580_v12  ;;  %1858 = vadd.xlane.f32.xlu0 %v1857_v47 }
 0x439   : > { %v12047_v19 = vpop.eup %10924  ;;  %v1852_v29 = vmul.f32 1.442695, %v1833_v9 }
 0x43a   : > { %v1863_v57 = vsel %vm1149_vm5, %v12047_v19, 0.0  ;;  %v9967_v18 = vpack.c.bf16 %v10582_v56, %v10581_v60 }
 0x43b   : > { %10934 = vpow2.f32 %v1852_v29 }
 0x43c   : > { %1864 = vadd.xlane.f32.xlu0 %v1863_v57  ;;  %9968 = vmatprep.subr.bf16.mxu0 %v9967_v18  ;;  %10936 = vpow2.f32 %v1850_v14 }
 0x43d   : > { %v12052_v50 = vpop.eup %10926 }
 0x43e   : > { %v12054_v35 = vpop.eup %10928  ;;  %v1869_v10 = vsel %vm1149_vm5, %v12052_v50, 0.0 }
 0x43f   : > { %v1872_v51 = vsel %vm1149_vm5, %v12054_v35, 0.0  ;;  %v12060_v15 = vpop.eup %10930 }
 0x440   : > { %1870 = vadd.xlane.f32.xlu0 %v1869_v10  ;;  %1873 = vadd.xlane.f32.xlu1 %v1872_v51  ;;  %v1866_v17 = vsel %vm1149_vm5, %v12060_v15, 0.0 }
 0x441   : > { %v12064_v61 = vpop.eup %10932 }
 0x442   : > { %v1875_v34 = vsel %vm1149_vm5, %v12064_v61, 0.0 }
 0x444   : > { %1867 = vadd.xlane.f32.xlu0 %v1866_v17 }
 0x445   : > { %v12068_v28 = vpop.eup %10934 }
 0x446   : > { %v1881_v21 = vsel %vm1177_vm6, %v12068_v28, 0.0  ;;  %v12072_v32 = vpop.eup %10936 }
 0x447   : > { %v1878_v22 = vsel %vm1149_vm5, %v12072_v32, 0.0 }
 0x448   : > { %1876 = vadd.xlane.f32.xlu0 %v1875_v34 }
 0x44c   : > { %1882 = vadd.xlane.f32.xlu0 %v1881_v21 }
 0x450   : > { %1879 = vadd.xlane.f32.xlu0 %v1878_v22 }
 0x451   : > { %10594 = vrot.lane.b32.xlu1 %v11689_v58, %s11391_s2 }
 0x455   : > { %10604 = vrot.lane.b32.xlu1 %v11673_v42, %s11393_s6 }
 0x459   : > { %10609 = vrot.lane.b32.xlu1 %v11681_v48, %s11393_s6 }
 0x45d   : > { %10614 = vrot.lane.b32.xlu1 %v11685_v53, %s11393_s6 }
 0x461   : > { %10619 = vrot.lane.b32.xlu1 %v11689_v58, %s11393_s6 }
 0x465   : > { %10624 = vrot.lane.b32.xlu1 %v11693_v62, %s11393_s6 }
 0x466   : > { %10599 = vrot.lane.b32.xlu0 %v11693_v62, %s11391_s2 }
 0x469   : > { %2873 = vrot.lane.b32.xlu1 %v11707_v63, %s11394_s15 }
 0x46a   : > { %2871 = vrot.lane.b32.xlu0 %v11675_v43, %s11394_s15  ;;  %v10585_v43 = vpop.permute.xlu0 %10584 }
 0x46b   : > { %v10587_v63 = vunpack.i.h.bf16 %v10585_v43 }
 0x46d   : > { %2877 = vrot.lane.b32.xlu1 %v11713_v0, %s11394_s15  ;;  %v10586_v0 = vunpack.i.l.bf16 %v10585_v43 }
 0x46e   : > { %2875 = vrot.lane.b32.xlu0 %v11715_v1, %s11394_s15  ;;  %v10590_v1 = vpop.permute.xlu1 %10589 }
 0x46f   : > { %v10591_v16 = vunpack.i.l.bf16 %v10590_v1 }
 0x471   : > { %2881 = vrot.lane.b32.xlu1 %v11721_v2, %s11394_s15 }
 0x472   : > { %2879 = vrot.lane.b32.xlu0 %v11723_v3, %s11394_s15  ;;  %v10592_v3 = vunpack.i.h.bf16 %v10590_v1 }
 0x474   : > { %v9975_v33 = vpack.c.bf16 %v10592_v3, %v10591_v16 }
 0x475   : > { %2885 = vrot.lane.b32.xlu1 %v11729_v4, %s11394_s15  ;;  %v9971_v4 = vpack.c.bf16 %v10587_v63, %v10586_v0 }
 0x476   : > { %2883 = vrot.lane.b32.xlu0 %v11731_v5, %s11394_s15 }
 0x479   : > { %2889 = vrot.lane.b32.xlu1 %v11737_v6, %s11394_s15 }
 0x47a   : > { %2887 = vrot.lane.b32.xlu0 %v11739_v7, %s11394_s15 }
 0x4b9   : > { %v9089_v2 = vpop.f32.mrb[10].mxu0 }
 0x4ba   : > { %v1389_v25 = vpop.f32.mrb[11].mxu0 }
 0x4bb   : > { %9104 = vmatprep.mubr.msk.f32.mxu0 %vm983_vm3, %v1389_v25 }
 0x4bc   : > { %9105 = vmatmul.mubr.msk.f32.vlgmr.msra.gmra.mrb[20].mxu0 %vm983_vm3, %v9089_v2 }
 0x4bd   : > { %9970 = vmatpush3.bf16.msra.mxu0 %v9967_v18  ;;  %v9092_v5 = vpop.f32.mrb[12].mxu0 }
 0x4be   : > { %9972 = vmatprep.subr.bf16.mxu0 %v9971_v4  ;;  %v1399_v6 = vpop.f32.mrb[13].mxu0 }
 0x4bf   : > { %9107 = vmatprep.mubr.msk.f32.mxu0 %vm983_vm3, %v1399_v6 }
 0x4c0   : > { %v1856_v7 = vpop.xlane.xlu1 %1855  ;;  %9108 = vmatmul.mubr.msk.f32.gmra.mrb[22].mxu0 %vm983_vm3, %v9092_v5 }
 0x4c1   : > { %10938 = vrcp.f32 %v1856_v7  ;;  %9974 = vmatpush3.bf16.msra.mxu0 %v9971_v4  ;;  %v9095_v20 = vpop.f32.mrb[14].mxu0 }
 0x4c2   : > { %9976 = vmatprep.subr.bf16.mxu0 %v9975_v33  ;;  %v1409_v54 = vpop.f32.mrb[15].mxu0 }
 0x4c3   : > { %9110 = vmatprep.mubr.msk.f32.mxu0 %vm983_vm3, %v1409_v54 }
 0x4c4   : > { %9111 = vmatmul.mubr.msk.f32.gmra.mrb[24].mxu0 %vm983_vm3, %v9095_v20  ;;  %v1862_v44 = vpop.xlane.xlu1 %1861 }
 0x4c5   : > { %v1859_v40 = vpop.xlane.xlu0 %1858  ;;  %9978 = vmatpush3.bf16.msra.mxu0 %v9975_v33  ;;  %v9098_v24 = vpop.f32.mrb[16].mxu0 }
 0x4c6   : > { %v1419_v27 = vpop.f32.mrb[17].mxu0  ;;  %10940 = vrcp.f32 %v1859_v40 }
 0x4c7   : > { %9113 = vmatprep.mubr.msk.f32.mxu0 %vm983_vm3, %v1419_v27  ;;  %10942 = vrcp.f32 %v1862_v44 }
 0x4c8   : > { %9114 = vmatmul.mubr.msk.f32.gmra.mrb[26].mxu0 %vm983_vm3, %v9098_v24 }
 0x4c9   : > { %v1865_v39 = vpop.xlane.xlu0 %1864  ;;  %v9101_v37 = vpop.f32.mrb[18].mxu0 }
 0x4ca   : > { %v1429_v38 = vpop.f32.mrb[19].mxu0  ;;  %10944 = vrcp.f32 %v1865_v39 }
 0x4cb   : > { %v10939_v52 = vpop.eup %10938  ;;  %9116 = vmatprep.mubr.msk.f32.mxu0 %vm983_vm3, %v1429_v38 }
 0x4cc   : > { %9117 = vmatmul.mubr.msk.f32.gmra.mrb[28].mxu0 %vm983_vm3, %v9101_v37  ;;  %v1894_v41 = vmul.f32 %v10939_v52, %v12033_v36 }
 0x4cd   : > { %v1871_v55 = vpop.xlane.xlu0 %1870  ;;  %v1874_v46 = vpop.xlane.xlu1 %1873 }
 0x4ce   : > { %9174 = vmatprep.mubr.msk.f32.mxu0 %vm1149_vm5, %v1894_v41 }
 0x4d1   : > { %v1868_v49 = vpop.xlane.xlu0 %1867  ;;  %v10595_v13 = vpop.permute.xlu1 %10594 }
 0x4d2   : > { %v10597_v30 = vunpack.i.h.bf16 %v10595_v13  ;;  %v10596_v9 = vunpack.i.l.bf16 %v10595_v13  ;;  %v12122_v12 = vpop.f32.mrb[20].mxu1  ;;  %10946 = vrcp.f32 %v1868_v49  ;;  %v10941_v49 = vpop.eup %10940 }
 0x4d3   : > { %v12124_v47 = vpop.f32.mrb[21].mxu1  ;;  %v2433_v56 = vsel %vm1149_vm5, %v12122_v12, -inf  ;;  %10948 = vrcp.f32 %v1871_v55  ;;  %v10943_v55 = vpop.eup %10942 }
 0x4d4   : > { %2434 = vmax.xlane.f32.xlu1 %v2433_v56  ;;  %v2430_v60 = vsel %vm1149_vm5, %v12124_v47, -inf  ;;  %v9979_v36 = vpack.c.bf16 %v10597_v30, %v10596_v9  ;;  %10950 = vrcp.f32 %v1874_v46  ;;  %v1895_v46 = vmul.f32 %v10941_v49, %v12040_v45 }
 0x4d5   : > { %v12130_v59 = vpop.xlane.xlu0 %1876  ;;  %v10605_v29 = vpop.permute.xlu1 %10604  ;;  %2431 = vmax.xlane.f32.xlu0 %v2430_v60 }
 0x4d6   : > { %v10607_v57 = vunpack.i.h.bf16 %v10605_v29  ;;  %v10606_v18 = vunpack.i.l.bf16 %v10605_v29  ;;  %9980 = vmatprep.subr.bf16.mxu0 %v9979_v36  ;;  %v12132_v14 = vpop.f32.mrb[22].mxu1  ;;  %10952 = vrcp.f32 %v12130_v59  ;;  %v10945_v60 = vpop.eup %10944 }
 0x4d7   : > { %9982 = vmatpush3.bf16.msra.mxu0 %v9979_v36  ;;  %v12134_v10 = vpop.f32.mrb[23].mxu1  ;;  %v2439_v2 = vsel %vm1149_vm5, %v12132_v14, -inf  ;;  %v1896_v36 = vmul.f32 %v10943_v55, %v12038_v31  ;;  %v1897_v45 = vmul.f32 %v10945_v60, %v12047_v19 }
 0x4d8   : > { %v10041_v51 = vpack.c.bf16 %v10607_v57, %v10606_v18  ;;  %v2436_v17 = vsel %vm1149_vm5, %v12134_v10, -inf }
 0x4d9   : > { %v12138_v34 = vpop.xlane.xlu0 %1882  ;;  %v10610_v21 = vpop.permute.xlu1 %10609  ;;  %2437 = vmax.xlane.f32.xlu0 %v2436_v17 }
 0x4da   : > { %v10612_v22 = vunpack.i.h.bf16 %v10610_v21  ;;  %v10611_v43 = vunpack.i.l.bf16 %v10610_v21  ;;  %v12140_v63 = vpop.f32.mrb[24].mxu1  ;;  %10043 = vmatprep.subr.msk.bf16.mxu1 %vm11749_vm4, %v10041_v51 }
 0x4db   : > { %v12144_v0 = vpop.f32.mrb[25].mxu1  ;;  %10046 = vmatpush3.bf16.xpose.msk.msra.mxu1 %vm11749_vm4, %v10041_v51  ;;  %v2445_v33 = vsel %vm1149_vm5, %v12140_v63, -inf }
 0x4dc   : > { %v10047_v1 = vpack.c.bf16 %v10612_v22, %v10611_v43  ;;  %v2442_v25 = vsel %vm1149_vm5, %v12144_v0, -inf  ;;  %v10947_v29 = vpop.eup %10946 }
 0x4dd   : > { %v1880_v3 = vpop.xlane.xlu0 %1879  ;;  %v10615_v16 = vpop.permute.xlu1 %10614  ;;  %2440 = vmax.xlane.f32.xlu0 %v2439_v2  ;;  %2443 = vmax.xlane.f32.xlu1 %v2442_v25  ;;  %v1898_v31 = vmul.f32 %v10947_v29, %v12060_v15 }
 0x4de   : > { %v10617_v4 = vunpack.i.h.bf16 %v10615_v16  ;;  %v10616_v5 = vunpack.i.l.bf16 %v10615_v16  ;;  %v12152_v6 = vpop.f32.mrb[26].mxu1  ;;  %10049 = vmatprep.subr.msk.bf16.mxu1 %vm11749_vm4, %v10047_v1  ;;  %10954 = vrcp.f32 %v1880_v3  ;;  %v10949_v18 = vpop.eup %10948  ;;  %v759_v3 = vld [vmem:[%s11520_s22 + $0x8] sm:$0xff] }
 0x4df   : > { %v12156_v7 = vpop.f32.mrb[27].mxu1  ;;  %v2451_v52 = vsel %vm1149_vm5, %v12152_v6, -inf  ;;  %10956 = vrcp.f32 %v12138_v34  ;;  %v10951_v51 = vpop.eup %10950  ;;  %v1899_v34 = vmul.f32 %v10949_v18, %v12052_v50 }
 0x4e0   : > { %v2448_v20 = vsel %vm1149_vm5, %v12156_v7, -inf  ;;  %v10053_v40 = vpack.c.bf16 %v10617_v4, %v10616_v5  ;;  %v10953_v22 = vpop.eup %10952  ;;  %v1900_v43 = vmul.f32 %v10951_v51, %v12054_v35 }
 0x4e1   : > { %v10600_v54 = vpop.permute.xlu0 %10599  ;;  %2446 = vmax.xlane.f32.xlu0 %v2445_v33  ;;  %2449 = vmax.xlane.f32.xlu1 %v2448_v20  ;;  %v10620_v37 = vpop.permute.xlu1 %10619  ;;  %v1901_v19 = vmul.f32 %v10953_v22, %v12064_v61 }
 0x4e2   : > { %v10602_v24 = vunpack.i.h.bf16 %v10600_v54  ;;  %v10601_v27 = vunpack.i.l.bf16 %v10600_v54  ;;  %v12162_v44 = vpop.f32.mrb[28].mxu1  ;;  %v10622_v30 = vunpack.i.h.bf16 %v10620_v37  ;;  %v10621_v9 = vunpack.i.l.bf16 %v10620_v37 }
 0x4e3   : > { %v12164_v39 = vpop.f32.mrb[29].mxu1  ;;  %10052 = vmatpush3.bf16.xpose.msk.msra.mxu1 %vm11749_vm4, %v10047_v1  ;;  %v2457_v56 = vsel %vm1177_vm6, %v12162_v44, -inf }
 0x4e4   : > { %v9983_v38 = vpack.c.bf16 %v10602_v24, %v10601_v27  ;;  %10055 = vmatprep.subr.msk.bf16.mxu1 %vm11749_vm4, %v10053_v40  ;;  %v2454_v41 = vsel %vm1149_vm5, %v12164_v39, -inf  ;;  %v10059_v57 = vpack.c.bf16 %v10622_v30, %v10621_v9 }
 0x4e5   : > { %v2872_v13 = vpop.permute.xlu0 %2871  ;;  %2452 = vmax.xlane.f32.xlu0 %v2451_v52  ;;  %2455 = vmax.xlane.f32.xlu1 %v2454_v41  ;;  %v10625_v59 = vpop.permute.xlu1 %10624 }
 0x4e6   : > { %9985 = vmatprep.subr.msk.bf16.mxu0 %vm11975_vm9, %v9983_v38  ;;  %9313 = vmatprep.mubr.msk.f32.mxu1 %vm983_vm3, %v2872_v13  ;;  %v10627_v17 = vunpack.i.h.bf16 %v10625_v59  ;;  %v10626_v21 = vunpack.i.l.bf16 %v10625_v59 }
 0x4e7   : > { %9988 = vmatpush3.bf16.msk.msra.mxu0 %vm11975_vm9, %v9983_v38 }
 0x4e8   : > { %v10955_v1 = vpop.eup %10954  ;;  %v10065_v2 = vpack.c.bf16 %v10627_v17, %v10626_v21  ;;  %9189 = vmatprep.subr.mxu0 %v759_v3 }
 0x4e9   : > { %2458 = vmax.xlane.f32.xlu0 %v2457_v56  ;;  %v10957_v15 = vpop.eup %10956  ;;  %v1902_v50 = vmul.f32 %v10955_v1, %v12072_v32  ;;  %v2874_v25 = vpop.permute.xlu1 %2873 }
 0x4ea   : > { %9175 = vmatmul.mubr.msk.f32.vlgmr.msra.gmra.mrb[30].mxu0 %vm1149_vm5, %v1895_v46  ;;  %v1903_v35 = vmul.f32 %v10957_v15, %v12068_v28  ;;  %v2876_v61 = vpop.permute.xlu0 %2875 }
 0x4eb   : > { %9177 = vmatprep.mubr.msk.f32.mxu0 %vm1149_vm5, %v1896_v36  ;;  %10058 = vmatpush3.bf16.xpose.msk.msra.mxu1 %vm11749_vm4, %v10053_v40 }
 0x4ec   : > { %10061 = vmatprep.subr.msk.bf16.mxu1 %vm11749_vm4, %v10059_v57  ;;  %9190 = vmatpush3.msra.mxu0 %v759_v3 }
 0x4ed   : > { %v2878_v32 = vpop.permute.xlu1 %2877 }
 0x4ee   : > { %9178 = vmatmul.mubr.msk.f32.gmra.mrb[32].mxu0 %vm1149_vm5, %v1897_v45  ;;  %v2880_v16 = vpop.permute.xlu0 %2879 }
 0x4ef   : > { %9180 = vmatprep.mubr.msk.f32.mxu0 %vm1149_vm5, %v1898_v31 }
 0x4f1   : > { %v2882_v28 = vpop.permute.xlu1 %2881 }
 0x4f2   : > { %9181 = vmatmul.mubr.msk.f32.gmra.mrb[34].mxu0 %vm1149_vm5, %v1899_v34  ;;  %v2884_v4 = vpop.permute.xlu0 %2883 }
 0x4f3   : > { %9183 = vmatprep.mubr.msk.f32.mxu0 %vm1149_vm5, %v1900_v43  ;;  %10064 = vmatpush3.bf16.xpose.msk.msra.mxu1 %vm11749_vm4, %v10059_v57 }
 0x4f4   : > { %10067 = vmatprep.subr.msk.bf16.mxu1 %vm11749_vm4, %v10065_v2 }
 0x4f5   : > { %v2886_v5 = vpop.permute.xlu1 %2885 }
 0x4f6   : > { %10629 = vrot.lane.b32.xlu1 %v11673_v42, %s11395_s7  ;;  %9184 = vmatmul.mubr.msk.f32.gmra.mrb[36].mxu0 %vm1149_vm5, %v1901_v19  ;;  %v2888_v33 = vpop.permute.xlu0 %2887 }
 0x4f7   : > { %9186 = vmatprep.mubr.msk.f32.mxu0 %vm1149_vm5, %v1902_v50 }
 0x4f9   : > { %v2890_v20 = vpop.permute.xlu1 %2889 }
 0x4fa   : > { %10639 = vrot.lane.b32.xlu1 %v11685_v53, %s11395_s7  ;;  %9187 = vmatmul.mubr.msk.f32.gmra.mrb[38].mxu0 %vm1149_vm5, %v1903_v35 }
 0x4fb   : > { %10070 = vmatpush3.bf16.xpose.msk.msra.mxu1 %vm11749_vm4, %v10065_v2 }
 0x4ff   : > { %10634 = vrot.lane.b32.xlu0 %v11681_v48, %s11395_s7 }
 0x502   : > { %9314 = vmatmul.mubr.msk.f32.vlgmr.msra.gmra.mrb[30].mxu1 %vm983_vm3, %v2874_v25 }
 0x503   : > { %9316 = vmatprep.mubr.msk.f32.mxu1 %vm983_vm3, %v2876_v61 }
 0x506   : > { %9317 = vmatmul.mubr.msk.f32.gmra.mrb[32].mxu1 %vm983_vm3, %v2878_v32 }
 0x507   : > { %9319 = vmatprep.mubr.msk.f32.mxu1 %vm983_vm3, %v2880_v16 }
 0x50a   : > { %9320 = vmatmul.mubr.msk.f32.gmra.mrb[34].mxu1 %vm983_vm3, %v2882_v28 }
 0x50b   : > { %9322 = vmatprep.mubr.msk.f32.mxu1 %vm983_vm3, %v2884_v4 }
 0x50e   : > { %9323 = vmatmul.mubr.msk.f32.gmra.mrb[36].mxu1 %vm983_vm3, %v2886_v5 }
 0x50f   : > { %9325 = vmatprep.mubr.msk.f32.mxu1 %vm983_vm3, %v2888_v33 }
 0x512   : > { %9326 = vmatmul.mubr.msk.f32.gmra.mrb[38].mxu1 %vm983_vm3, %v2890_v20 }
 0x561   : > { %v2435_v54 = vpop.xlane.xlu1 %2434 }
 0x562   : > { %v2461_v40 = vsub.f32 %v12122_v12, %v2435_v54  ;;  %v2432_v24 = vpop.xlane.xlu0 %2431 }
 0x563   : > { %v2460_v27 = vsub.f32 %v12124_v47, %v2432_v24 }
 0x564   : > { %v2472_v37 = vmul.f32 1.442695, %v2461_v40 }
 0x565   : > { %v2470_v38 = vmul.f32 1.442695, %v2460_v27 }
 0x566   : > { %10958 = vpow2.f32 %v2472_v37  ;;  %v2438_v52 = vpop.xlane.xlu0 %2437 }
 0x567   : > { %10960 = vpow2.f32 %v2470_v38  ;;  %v2462_v41 = vsub.f32 %v12134_v10, %v2438_v52 }
 0x569   : > { %v2474_v49 = vmul.f32 1.442695, %v2462_v41 }
 0x56a   : > { %v2441_v13 = vpop.xlane.xlu0 %2440  ;;  %v2444_v55 = vpop.xlane.xlu1 %2443 }
 0x56b   : > { %10962 = vpow2.f32 %v2474_v49  ;;  %v2463_v30 = vsub.f32 %v12132_v14, %v2441_v13  ;;  %v2464_v9 = vsub.f32 %v12144_v0, %v2444_v55 }
 0x56d   : > { %v2476_v46 = vmul.f32 1.442695, %v2463_v30  ;;  %v2478_v29 = vmul.f32 1.442695, %v2464_v9 }
 0x56e   : > { %v2447_v12 = vpop.xlane.xlu0 %2446  ;;  %v2450_v56 = vpop.xlane.xlu1 %2449 }
 0x56f   : > { %10964 = vpow2.f32 %v2476_v46  ;;  %v2465_v47 = vsub.f32 %v12140_v63, %v2447_v12  ;;  %v2466_v60 = vsub.f32 %v12156_v7, %v2450_v56 }
 0x570   : > { %v12234_v36 = vpop.eup %10958 }
 0x571   : > { %v12236_v10 = vpop.eup %10960  ;;  %v2480_v57 = vmul.f32 1.442695, %v2465_v47  ;;  %v2482_v59 = vmul.f32 1.442695, %v2466_v60  ;;  %v2493_v14 = vsel %vm1149_vm5, %v12234_v36, 0.0 }
 0x572   : > { %v2453_v45 = vpop.xlane.xlu0 %2452  ;;  %2494 = vadd.xlane.f32.xlu0 %v2493_v14  ;;  %v2456_v0 = vpop.xlane.xlu1 %2455  ;;  %v2490_v18 = vsel %vm1149_vm5, %v12236_v10, 0.0 }
 0x573   : > { %10966 = vpow2.f32 %v2480_v57  ;;  %v2467_v63 = vsub.f32 %v12152_v6, %v2453_v45  ;;  %2491 = vadd.xlane.f32.xlu1 %v2490_v18  ;;  %v2468_v6 = vsub.f32 %v12164_v39, %v2456_v0 }
 0x574   : > { %10968 = vpow2.f32 %v2482_v59 }
 0x575   : > { %v12243_v7 = vpop.eup %10962  ;;  %10970 = vpow2.f32 %v2478_v29  ;;  %v2484_v31 = vmul.f32 1.442695, %v2467_v63  ;;  %v2486_v35 = vmul.f32 1.442695, %v2468_v6 }
 0x576   : > { %v2459_v51 = vpop.xlane.xlu0 %2458  ;;  %v10630_v17 = vpop.permute.xlu1 %10629  ;;  %v2496_v21 = vsel %vm1149_vm5, %v12243_v7, 0.0 }
 0x577   : > { %v2469_v34 = vsub.f32 %v12162_v44, %v2459_v51  ;;  %v10632_v22 = vunpack.i.h.bf16 %v10630_v17  ;;  %v10631_v43 = vunpack.i.l.bf16 %v10630_v17  ;;  %2497 = vadd.xlane.f32.xlu1 %v2496_v21  ;;  %10972 = vpow2.f32 %v2484_v31 }
 0x579   : > { %v12248_v1 = vpop.eup %10964  ;;  %v2488_v2 = vmul.f32 1.442695, %v2469_v34  ;;  %v10019_v19 = vpack.c.bf16 %v10632_v22, %v10631_v43 }
 0x57a   : > { %v2499_v15 = vsel %vm1149_vm5, %v12248_v1, 0.0  ;;  %v10635_v20 = vpop.permute.xlu0 %10634  ;;  %v10640_v24 = vpop.permute.xlu1 %10639 }
 0x57b   : > { %2500 = vadd.xlane.f32.xlu0 %v2499_v15  ;;  %10020 = vmatprep.subr.bf16.mxu0 %v10019_v19  ;;  %10974 = vpow2.f32 %v2488_v2  ;;  %v10637_v54 = vunpack.i.h.bf16 %v10635_v20  ;;  %v10636_v40 = vunpack.i.l.bf16 %v10635_v20  ;;  %v10642_v38 = vunpack.i.h.bf16 %v10640_v24 }
 0x57c   : > { %10976 = vpow2.f32 %v2486_v35  ;;  %v10641_v52 = vunpack.i.l.bf16 %v10640_v24 }
 0x57d   : > { %v12253_v50 = vpop.eup %10966  ;;  %v10023_v41 = vpack.c.bf16 %v10637_v54, %v10636_v40 }
 0x57e   : > { %v12255_v44 = vpop.eup %10968  ;;  %v2505_v25 = vsel %vm1149_vm5, %v12253_v50, 0.0  ;;  %v10027_v55 = vpack.c.bf16 %v10642_v38, %v10641_v52 }
 0x57f   : > { %v12259_v3 = vpop.eup %10970  ;;  %2506 = vadd.xlane.f32.xlu0 %v2505_v25  ;;  %v2508_v39 = vsel %vm1149_vm5, %v12255_v44, 0.0 }
 0x580   : > { %2509 = vadd.xlane.f32.xlu1 %v2508_v39  ;;  %v2502_v61 = vsel %vm1149_vm5, %v12259_v3, 0.0 }
 0x581   : > { %v12265_v32 = vpop.eup %10972 }
 0x582   : > { %v2511_v16 = vsel %vm1149_vm5, %v12265_v32, 0.0 }
 0x583   : > { %2503 = vadd.xlane.f32.xlu0 %v2502_v61 }
 0x585   : > { %v12269_v28 = vpop.eup %10974 }
 0x586   : > { %v2517_v4 = vsel %vm1177_vm6, %v12269_v28, 0.0  ;;  %v12273_v5 = vpop.eup %10976 }
 0x587   : > { %2512 = vadd.xlane.f32.xlu0 %v2511_v16  ;;  %v2514_v33 = vsel %vm1149_vm5, %v12273_v5, 0.0 }
 0x58b   : > { %2518 = vadd.xlane.f32.xlu0 %v2517_v4 }
 0x58f   : > { %2515 = vadd.xlane.f32.xlu0 %v2514_v33 }
 0x591   : > { %10644 = vrot.lane.b32.xlu1 %v11689_v58, %s11395_s7 }
 0x5a5   : > { %10649 = vrot.lane.b32.xlu0 %v11693_v62, %s11395_s7 }
 0x5bd   : > { %v9176_v27 = vpop.f32.mrb[30].mxu0 }
 0x5be   : > { %v2031_v37 = vpop.f32.mrb[31].mxu0 }
 0x5bf   : > { %9191 = vmatprep.mubr.msk.f32.mxu0 %vm983_vm3, %v2031_v37 }
 0x5c0   : > { %9192 = vmatmul.mubr.msk.f32.vlgmr.msra.gmra.mrb[20].mxu0 %vm983_vm3, %v9176_v27 }
 0x5c1   : > { %10022 = vmatpush3.bf16.msra.mxu0 %v10019_v19  ;;  %v9179_v49 = vpop.f32.mrb[32].mxu0 }
 0x5c2   : > { %10024 = vmatprep.subr.bf16.mxu0 %v10023_v41  ;;  %v2041_v13 = vpop.f32.mrb[33].mxu0 }
 0x5c3   : > { %9194 = vmatprep.mubr.msk.f32.mxu0 %vm983_vm3, %v2041_v13  ;;  %v760_v13 = vld [vmem:[%s11520_s22 + $0x10] sm:$0xff] }
 0x5c4   : > { %9195 = vmatmul.mubr.msk.f32.gmra.mrb[22].mxu0 %vm983_vm3, %v9179_v49 }
 0x5c5   : > { %10026 = vmatpush3.bf16.msra.mxu0 %v10023_v41  ;;  %v9182_v30 = vpop.f32.mrb[34].mxu0 }
 0x5c6   : > { %10028 = vmatprep.subr.bf16.mxu0 %v10027_v55  ;;  %v2051_v9 = vpop.f32.mrb[35].mxu0 }
 0x5c7   : > { %9197 = vmatprep.mubr.msk.f32.mxu0 %vm983_vm3, %v2051_v9 }
 0x5c8   : > { %9198 = vmatmul.mubr.msk.f32.gmra.mrb[24].mxu0 %vm983_vm3, %v9182_v30 }
 0x5c9   : > { %10030 = vmatpush3.bf16.msra.mxu0 %v10027_v55  ;;  %v9185_v46 = vpop.f32.mrb[36].mxu0 }
 0x5ca   : > { %v2061_v12 = vpop.f32.mrb[37].mxu0 }
 0x5cb   : > { %9200 = vmatprep.mubr.msk.f32.mxu0 %vm983_vm3, %v2061_v12 }
 0x5cc   : > { %9201 = vmatmul.mubr.msk.f32.gmra.mrb[26].mxu0 %vm983_vm3, %v9185_v46 }
 0x5cd   : > { %v9188_v56 = vpop.f32.mrb[38].mxu0 }
 0x5ce   : > { %v2071_v47 = vpop.f32.mrb[39].mxu0 }
 0x5cf   : > { %9203 = vmatprep.mubr.msk.f32.mxu0 %vm983_vm3, %v2071_v47 }
 0x5d0   : > { %9204 = vmatmul.mubr.msk.f32.gmra.mrb[28].mxu0 %vm983_vm3, %v9188_v56 }
 0x5d5   : > { %v12291_v60 = vpop.f32.mrb[30].mxu1 }
 0x5d6   : > { %v12293_v29 = vpop.f32.mrb[31].mxu1  ;;  %v3069_v57 = vsel %vm1149_vm5, %v12291_v60, -inf }
 0x5d7   : > { %3070 = vmax.xlane.f32.xlu0 %v3069_v57  ;;  %v3066_v59 = vsel %vm1149_vm5, %v12293_v29, -inf }
 0x5d8   : > { %3067 = vmax.xlane.f32.xlu1 %v3066_v59 }
 0x5d9   : > { %v12299_v14 = vpop.f32.mrb[32].mxu1 }
 0x5da   : > { %v12301_v45 = vpop.f32.mrb[33].mxu1  ;;  %v3075_v31 = vsel %vm1149_vm5, %v12299_v14, -inf }
 0x5db   : > { %v3072_v0 = vsel %vm1149_vm5, %v12301_v45, -inf }
 0x5dc   : > { %3073 = vmax.xlane.f32.xlu1 %v3072_v0 }
 0x5dd   : > { %v12305_v18 = vpop.f32.mrb[34].mxu1 }
 0x5de   : > { %v12307_v63 = vpop.f32.mrb[35].mxu1  ;;  %v3081_v6 = vsel %vm1149_vm5, %v12305_v18, -inf }
 0x5df   : > { %v3078_v21 = vsel %vm1149_vm5, %v12307_v63, -inf }
 0x5e0   : > { %3076 = vmax.xlane.f32.xlu1 %v3075_v31 }
 0x5e1   : > { %v12311_v51 = vpop.f32.mrb[36].mxu1 }
 0x5e2   : > { %v12313_v17 = vpop.f32.mrb[37].mxu1  ;;  %v3087_v19 = vsel %vm1149_vm5, %v12311_v51, -inf }
 0x5e3   : > { %v3084_v34 = vsel %vm1149_vm5, %v12313_v17, -inf }
 0x5e4   : > { %3079 = vmax.xlane.f32.xlu1 %v3078_v21  ;;  %3085 = vmax.xlane.f32.xlu0 %v3084_v34 }
 0x5e5   : > { %v12319_v22 = vpop.f32.mrb[38].mxu1 }
 0x5e6   : > { %v12321_v43 = vpop.f32.mrb[39].mxu1  ;;  %v3093_v15 = vsel %vm1177_vm6, %v12319_v22, -inf }
 0x5e7   : > { %v3090_v2 = vsel %vm1149_vm5, %v12321_v43, -inf }
 0x5e8   : > { %3082 = vmax.xlane.f32.xlu1 %v3081_v6  ;;  %3091 = vmax.xlane.f32.xlu0 %v3090_v2 }
 0x5ec   : > { %3088 = vmax.xlane.f32.xlu1 %v3087_v19 }
 0x5f0   : > { %3094 = vmax.xlane.f32.xlu1 %v3093_v15 }
 0x5fe   : > { %10654 = vrot.lane.b32.xlu0 %v11673_v42, %s11396_s18 }
 0x5ff   : > { %v2495_v25 = vpop.xlane.xlu0 %2494 }
 0x600   : > { %v2492_v35 = vpop.xlane.xlu1 %2491 }
 0x601   : > { %10978 = vrcp.f32 %v2492_v35  ;;  %10659 = vrot.lane.b32.xlu1 %v11681_v48, %s11396_s18 }
 0x602   : > { %10664 = vrot.lane.b32.xlu0 %v11685_v53, %s11396_s18  ;;  %10980 = vrcp.f32 %v2495_v25 }
 0x604   : > { %v2498_v61 = vpop.xlane.xlu1 %2497 }
 0x605   : > { %10982 = vrcp.f32 %v2498_v61 }
 0x608   : > { %v2501_v39 = vpop.xlane.xlu0 %2500 }
 0x609   : > { %10984 = vrcp.f32 %v2501_v39 }
 0x60b   : > { %v10979_v16 = vpop.eup %10978 }
 0x60c   : > { %v2507_v4 = vpop.xlane.xlu0 %2506  ;;  %v2530_v33 = vmul.f32 %v10979_v16, %v12236_v10  ;;  %v10981_v49 = vpop.eup %10980 }
 0x60d   : > { %v2510_v20 = vpop.xlane.xlu1 %2509  ;;  %v2531_v30 = vmul.f32 %v10981_v49, %v12234_v36 }
 0x60e   : > { %9261 = vmatprep.mubr.msk.f32.mxu0 %vm1149_vm5, %v2530_v33 }
 0x60f   : > { %v10983_v55 = vpop.eup %10982 }
 0x610   : > { %v2504_v54 = vpop.xlane.xlu0 %2503  ;;  %v2532_v46 = vmul.f32 %v10983_v55, %v12243_v7 }
 0x611   : > { %v10645_v42 = vpop.permute.xlu1 %10644  ;;  %10986 = vrcp.f32 %v2504_v54 }
 0x612   : > { %v10647_v40 = vunpack.i.h.bf16 %v10645_v42  ;;  %v10646_v24 = vunpack.i.l.bf16 %v10645_v42  ;;  %10988 = vrcp.f32 %v2507_v4 }
 0x613   : > { %10990 = vrcp.f32 %v2510_v20  ;;  %v10985_v9 = vpop.eup %10984 }
 0x614   : > { %v2513_v27 = vpop.xlane.xlu0 %2512  ;;  %v10031_v37 = vpack.c.bf16 %v10647_v40, %v10646_v24  ;;  %v2533_v56 = vmul.f32 %v10985_v9, %v12248_v1 }
 0x615   : > { %10992 = vrcp.f32 %v2513_v27 }
 0x616   : > { %10032 = vmatprep.subr.bf16.mxu0 %v10031_v37 }
 0x617   : > { %10034 = vmatpush3.bf16.msra.mxu0 %v10031_v37 }
 0x618   : > { %v2519_v48 = vpop.xlane.xlu0 %2518 }
 0x61b   : > { %v10987_v12 = vpop.eup %10986 }
 0x61c   : > { %v2516_v53 = vpop.xlane.xlu0 %2515  ;;  %v10989_v47 = vpop.eup %10988  ;;  %v2534_v57 = vmul.f32 %v10987_v12, %v12259_v3 }
 0x61d   : > { %10994 = vrcp.f32 %v2516_v53  ;;  %v10991_v59 = vpop.eup %10990  ;;  %v2535_v36 = vmul.f32 %v10989_v47, %v12253_v50 }
 0x61e   : > { %10996 = vrcp.f32 %v2519_v48  ;;  %v2536_v0 = vmul.f32 %v10991_v59, %v12255_v44 }
 0x61f   : > { %v10993_v7 = vpop.eup %10992 }
 0x620   : > { %v10650_v38 = vpop.permute.xlu0 %10649  ;;  %v2537_v1 = vmul.f32 %v10993_v7, %v12265_v32 }
 0x621   : > { %v10652_v10 = vunpack.i.h.bf16 %v10650_v38  ;;  %v10651_v52 = vunpack.i.l.bf16 %v10650_v38 }
 0x623   : > { %v10035_v41 = vpack.c.bf16 %v10652_v10, %v10651_v52 }
 0x625   : > { %10037 = vmatprep.subr.msk.bf16.mxu0 %vm11975_vm9, %v10035_v41 }
 0x626   : > { %10040 = vmatpush3.bf16.msk.msra.mxu0 %vm11975_vm9, %v10035_v41 }
 0x627   : > { %9276 = vmatprep.subr.mxu0 %v760_v13  ;;  %v10995_v31 = vpop.eup %10994 }
 0x628   : > { %v10997_v21 = vpop.eup %10996  ;;  %v2538_v3 = vmul.f32 %v10995_v31, %v12273_v5 }
 0x629   : > { %9262 = vmatmul.mubr.msk.f32.vlgmr.msra.gmra.mrb[40].mxu0 %vm1149_vm5, %v2531_v30  ;;  %v2539_v34 = vmul.f32 %v10997_v21, %v12269_v28 }
 0x62a   : > { %9264 = vmatprep.mubr.msk.f32.mxu0 %vm1149_vm5, %v2532_v46  ;;  %9277 = vmatpush3.msra.mxu0 %v760_v13 }
 0x62d   : > { %9265 = vmatmul.mubr.msk.f32.gmra.mrb[42].mxu0 %vm1149_vm5, %v2533_v56 }
 0x62e   : > { %9267 = vmatprep.mubr.msk.f32.mxu0 %vm1149_vm5, %v2534_v57 }
 0x631   : > { %9268 = vmatmul.mubr.msk.f32.gmra.mrb[44].mxu0 %vm1149_vm5, %v2535_v36 }
 0x632   : > { %9270 = vmatprep.mubr.msk.f32.mxu0 %vm1149_vm5, %v2536_v0 }
 0x635   : > { %9271 = vmatmul.mubr.msk.f32.gmra.mrb[46].mxu0 %vm1149_vm5, %v2537_v1 }
 0x636   : > { %9273 = vmatprep.mubr.msk.f32.mxu0 %vm1149_vm5, %v2538_v3 }
 0x639   : > { %9274 = vmatmul.mubr.msk.f32.gmra.mrb[48].mxu0 %vm1149_vm5, %v2539_v34 }
 0x664   : > { %v3071_v50 = vpop.xlane.xlu0 %3070 }
 0x665   : > { %v3097_v44 = vsub.f32 %v12291_v60, %v3071_v50  ;;  %v3068_v6 = vpop.xlane.xlu1 %3067 }
 0x666   : > { %v3096_v2 = vsub.f32 %v12293_v29, %v3068_v6 }
 0x667   : > { %v3108_v19 = vmul.f32 1.442695, %v3097_v44 }
 0x668   : > { %v3106_v15 = vmul.f32 1.442695, %v3096_v2 }
 0x669   : > { %10998 = vpow2.f32 %v3108_v19  ;;  %v3074_v32 = vpop.xlane.xlu1 %3073 }
 0x66a   : > { %11000 = vpow2.f32 %v3106_v15  ;;  %v3098_v5 = vsub.f32 %v12301_v45, %v3074_v32 }
 0x66c   : > { %v3110_v35 = vmul.f32 1.442695, %v3098_v5 }
 0x66d   : > { %v3077_v25 = vpop.xlane.xlu1 %3076 }
 0x66e   : > { %11002 = vpow2.f32 %v3110_v35  ;;  %v3099_v28 = vsub.f32 %v12299_v14, %v3077_v25 }
 0x670   : > { %v3112_v39 = vmul.f32 1.442695, %v3099_v28 }
 0x671   : > { %v3086_v61 = vpop.xlane.xlu0 %3085  ;;  %v3080_v16 = vpop.xlane.xlu1 %3079 }
 0x672   : > { %11004 = vpow2.f32 %v3112_v39  ;;  %v3102_v60 = vsub.f32 %v12313_v17, %v3086_v61  ;;  %v3100_v45 = vsub.f32 %v12307_v63, %v3080_v16 }
 0x673   : > { %v12367_v4 = vpop.eup %10998 }
 0x674   : > { %v12369_v29 = vpop.eup %11000  ;;  %v3118_v33 = vmul.f32 1.442695, %v3102_v60  ;;  %v3129_v20 = vsel %vm1149_vm5, %v12367_v4, 0.0  ;;  %v3114_v27 = vmul.f32 1.442695, %v3100_v45 }
 0x675   : > { %3130 = vadd.xlane.f32.xlu1 %v3129_v20  ;;  %v3092_v54 = vpop.xlane.xlu0 %3091  ;;  %v3083_v42 = vpop.xlane.xlu1 %3082  ;;  %v3126_v14 = vsel %vm1149_vm5, %v12369_v29, 0.0 }
 0x676   : > { %11006 = vpow2.f32 %v3118_v33  ;;  %v3101_v40 = vsub.f32 %v12305_v18, %v3083_v42  ;;  %3127 = vadd.xlane.f32.xlu0 %v3126_v14  ;;  %v3104_v9 = vsub.f32 %v12321_v43, %v3092_v54 }
 0x678   : > { %v12377_v17 = vpop.eup %11002  ;;  %v3116_v24 = vmul.f32 1.442695, %v3101_v40  ;;  %v3122_v56 = vmul.f32 1.442695, %v3104_v9 }
 0x679   : > { %v10655_v37 = vpop.permute.xlu0 %10654  ;;  %v3089_v48 = vpop.xlane.xlu1 %3088  ;;  %v3132_v53 = vsel %vm1149_vm5, %v12377_v17, 0.0 }
 0x67a   : > { %v10657_v63 = vunpack.i.h.bf16 %v10655_v37  ;;  %v10656_v38 = vunpack.i.l.bf16 %v10655_v37  ;;  %v3103_v10 = vsub.f32 %v12311_v51, %v3089_v48  ;;  %3133 = vadd.xlane.f32.xlu0 %v3132_v53  ;;  %11008 = vpow2.f32 %v3116_v24 }
 0x67b   : > { %11010 = vpow2.f32 %v3114_v27 }
 0x67c   : > { %v12382_v52 = vpop.eup %11004  ;;  %v10071_v41 = vpack.c.bf16 %v10657_v63, %v10656_v38  ;;  %v3120_v18 = vmul.f32 1.442695, %v3103_v10 }
 0x67d   : > { %v3095_v49 = vpop.xlane.xlu1 %3094  ;;  %v3135_v13 = vsel %vm1149_vm5, %v12382_v52, 0.0  ;;  %v10665_v34 = vpop.permute.xlu0 %10664 }
 0x67e   : > { %v3105_v55 = vsub.f32 %v12319_v22, %v3095_v49  ;;  %3136 = vadd.xlane.f32.xlu1 %v3135_v13  ;;  %10072 = vmatprep.subr.bf16.mxu0 %v10071_v41  ;;  %11012 = vpow2.f32 %v3120_v18  ;;  %v10667_v6 = vunpack.i.h.bf16 %v10665_v34  ;;  %v10666_v2 = vunpack.i.l.bf16 %v10665_v34  ;;  %v761_v49 = vld [vmem:[%s11520_s22 + $0x18] sm:$0xff] }
 0x680   : > { %v12387_v30 = vpop.eup %11006  ;;  %v3124_v51 = vmul.f32 1.442695, %v3105_v55  ;;  %v10079_v32 = vpack.c.bf16 %v10667_v6, %v10666_v2  ;;  %v8144_v2 = vld [vmem:[%s11526_s17] ss:$0 sm:$0xff] }
 0x681   : > { %v3144_v46 = vsel %vm1149_vm5, %v12387_v30, 0.0  ;;  %v10660_v1 = vpop.permute.xlu1 %10659 }
 0x682   : > { %3145 = vadd.xlane.f32.xlu0 %v3144_v46  ;;  %11014 = vpow2.f32 %v3124_v51  ;;  %v10662_v21 = vunpack.i.h.bf16 %v10660_v1  ;;  %v10661_v3 = vunpack.i.l.bf16 %v10660_v1 }
 0x683   : > { %11016 = vpow2.f32 %v3122_v56 }
 0x684   : > { %v12392_v12 = vpop.eup %11008  ;;  %v10075_v19 = vpack.c.bf16 %v10662_v21, %v10661_v3 }
 0x685   : > { %v3141_v47 = vsel %vm1149_vm5, %v12392_v12, 0.0  ;;  %v12396_v22 = vpop.eup %11010 }
 0x686   : > { %3142 = vadd.xlane.f32.xlu1 %v3141_v47  ;;  %v3138_v43 = vsel %vm1149_vm5, %v12396_v22, 0.0 }
 0x688   : > { %v12400_v57 = vpop.eup %11012 }
 0x689   : > { %v3147_v59 = vsel %vm1149_vm5, %v12400_v57, 0.0 }
 0x68a   : > { %3139 = vadd.xlane.f32.xlu1 %v3138_v43 }
 0x68c   : > { %v12404_v36 = vpop.eup %11014 }
 0x68d   : > { %v3153_v7 = vsel %vm1177_vm6, %v12404_v36, 0.0  ;;  %v12408_v0 = vpop.eup %11016 }
 0x68e   : > { %3148 = vadd.xlane.f32.xlu1 %v3147_v59  ;;  %v3150_v31 = vsel %vm1149_vm5, %v12408_v0, 0.0 }
 0x692   : > { %3154 = vadd.xlane.f32.xlu1 %v3153_v7 }
 0x696   : > { %3151 = vadd.xlane.f32.xlu1 %v3150_v31 }
 0x698   : > { %10674 = vrot.lane.b32.xlu0 %v11693_v62, %s11396_s18 }
 0x6a7   : > { %10669 = vrot.lane.b32.xlu1 %v11689_v58, %s11396_s18 }
 0x6fc   : > { %v9263_v50 = vpop.f32.mrb[40].mxu0 }
 0x6fd   : > { %v2667_v44 = vpop.f32.mrb[41].mxu0 }
 0x6fe   : > { %9278 = vmatprep.mubr.msk.f32.mxu0 %vm983_vm3, %v2667_v44 }
 0x6ff   : > { %9279 = vmatmul.mubr.msk.f32.vlgmr.msra.gmra.mrb[20].mxu0 %vm983_vm3, %v9263_v50 }
 0x700   : > { %10074 = vmatpush3.bf16.msra.mxu0 %v10071_v41  ;;  %v9266_v15 = vpop.f32.mrb[42].mxu0 }
 0x701   : > { %10076 = vmatprep.subr.bf16.mxu0 %v10075_v19  ;;  %v2677_v62 = vpop.f32.mrb[43].mxu0 }
 0x702   : > { %9281 = vmatprep.mubr.msk.f32.mxu0 %vm983_vm3, %v2677_v62  ;;  %v3131_v39 = vpop.xlane.xlu1 %3130 }
 0x703   : > { %v3128_v58 = vpop.xlane.xlu0 %3127  ;;  %9282 = vmatmul.mubr.msk.f32.gmra.mrb[22].mxu0 %vm983_vm3, %v9266_v15 }
 0x704   : > { %11018 = vrcp.f32 %v3128_v58  ;;  %10078 = vmatpush3.bf16.msra.mxu0 %v10075_v19  ;;  %v9269_v5 = vpop.f32.mrb[44].mxu0 }
 0x705   : > { %10080 = vmatprep.subr.bf16.mxu0 %v10079_v32  ;;  %v2687_v35 = vpop.f32.mrb[45].mxu0  ;;  %11020 = vrcp.f32 %v3131_v39 }
 0x706   : > { %9284 = vmatprep.mubr.msk.f32.mxu0 %vm983_vm3, %v2687_v35  ;;  %v11319_v35 = vld [vmem:[#allocation2] sm:$0xff] }
 0x707   : > { %9285 = vmatmul.mubr.msk.f32.gmra.mrb[24].mxu0 %vm983_vm3, %v9269_v5  ;;  %v3134_v42 = vpop.xlane.xlu0 %3133 }
 0x708   : > { %10082 = vmatpush3.bf16.msra.mxu0 %v10079_v32  ;;  %v9272_v25 = vpop.f32.mrb[46].mxu0  ;;  %11022 = vrcp.f32 %v3134_v42  ;;  %v11318_v32 = vld [vmem:[#allocation2 + $0x8] sm:$0xff] }
 0x709   : > { %v2697_v28 = vpop.f32.mrb[47].mxu0 }
 0x70a   : > { %9287 = vmatprep.mubr.msk.f32.mxu0 %vm983_vm3, %v2697_v28 }
 0x70b   : > { %9288 = vmatmul.mubr.msk.f32.gmra.mrb[26].mxu0 %vm983_vm3, %v9272_v25  ;;  %v3137_v20 = vpop.xlane.xlu1 %3136 }
 0x70c   : > { %v9275_v61 = vpop.f32.mrb[48].mxu0  ;;  %11024 = vrcp.f32 %v3137_v20  ;;  %v11320_v20 = vld [vmem:[#allocation2 + $0x18] sm:$0xff] }
 0x70d   : > { %v2707_v16 = vpop.f32.mrb[49].mxu0 }
 0x70e   : > { %v11019_v60 = vpop.eup %11018  ;;  %9290 = vmatprep.mubr.msk.f32.mxu0 %vm983_vm3, %v2707_v16 }
 0x70f   : > { %9291 = vmatmul.mubr.msk.f32.gmra.mrb[28].mxu0 %vm983_vm3, %v9275_v61  ;;  %v3166_v33 = vmul.f32 %v11019_v60, %v12369_v29  ;;  %v3146_v40 = vpop.xlane.xlu0 %3145  ;;  %v11021_v18 = vpop.eup %11020 }
 0x710   : > { %v3167_v55 = vmul.f32 %v11021_v18, %v12367_v4 }
 0x711   : > { %9348 = vmatprep.mubr.msk.f32.mxu0 %vm1149_vm5, %v3166_v33 }
 0x712   : > { %v11023_v13 = vpop.eup %11022 }
 0x713   : > { %v3143_v45 = vpop.xlane.xlu1 %3142  ;;  %v10675_v37 = vpop.permute.xlu0 %10674  ;;  %v3168_v51 = vmul.f32 %v11023_v13, %v12377_v17  ;;  %v11324_v13 = vld [vmem:[#allocation2 + $0x28] sm:$0xff] }
 0x714   : > { %v10677_v53 = vunpack.i.h.bf16 %v10675_v37  ;;  %v10676_v63 = vunpack.i.l.bf16 %v10675_v37 }
 0x716   : > { %v10087_v41 = vpack.c.bf16 %v10677_v53, %v10676_v63  ;;  %v11025_v9 = vpop.eup %11024  ;;  %v11322_v63 = vld [vmem:[#allocation2 + $0x20] sm:$0xff] }
 0x717   : > { %v3140_v54 = vpop.xlane.xlu1 %3139  ;;  %v3169_v56 = vmul.f32 %v11025_v9, %v12382_v52 }
 0x718   : > { %11026 = vrcp.f32 %v3140_v54 }
 0x719   : > { %11028 = vrcp.f32 %v3143_v45 }
 0x71a   : > { %11030 = vrcp.f32 %v3146_v40  ;;  %v11321_v40 = vld [vmem:[#allocation2 + $0x10] sm:$0xff] }
 0x71b   : > { %v3149_v14 = vpop.xlane.xlu1 %3148 }
 0x71c   : > { %11032 = vrcp.f32 %v3149_v14 }
 0x71f   : > { %v3155_v24 = vpop.xlane.xlu1 %3154 }
 0x722   : > { %v11027_v46 = vpop.eup %11026 }
 0x723   : > { %v3152_v27 = vpop.xlane.xlu1 %3151  ;;  %v11029_v47 = vpop.eup %11028  ;;  %v3170_v43 = vmul.f32 %v11027_v46, %v12396_v22 }
 0x724   : > { %11034 = vrcp.f32 %v3152_v27  ;;  %v11031_v59 = vpop.eup %11030  ;;  %v3171_v4 = vmul.f32 %v11029_v47, %v12392_v12 }
 0x725   : > { %11036 = vrcp.f32 %v3155_v24  ;;  %v3172_v7 = vmul.f32 %v11031_v59, %v12387_v30 }
 0x726   : > { %v11033_v17 = vpop.eup %11032 }
 0x727   : > { %v10670_v48 = vpop.permute.xlu1 %10669  ;;  %v3173_v52 = vmul.f32 %v11033_v17, %v12400_v57 }
 0x728   : > { %v10672_v38 = vunpack.i.h.bf16 %v10670_v48  ;;  %v10671_v10 = vunpack.i.l.bf16 %v10670_v48 }
 0x72a   : > { %v10083_v29 = vpack.c.bf16 %v10672_v38, %v10671_v10 }
 0x72c   : > { %10084 = vmatprep.subr.bf16.mxu0 %v10083_v29 }
 0x72d   : > { %10086 = vmatpush3.bf16.msra.mxu0 %v10083_v29 }
 0x72e   : > { %10089 = vmatprep.subr.msk.bf16.mxu0 %vm11975_vm9, %v10087_v41  ;;  %v11035_v31 = vpop.eup %11034 }
 0x72f   : > { %v11037_v1 = vpop.eup %11036  ;;  %v3174_v22 = vmul.f32 %v11035_v31, %v12408_v0 }
 0x730   : > { %v3175_v21 = vmul.f32 %v11037_v1, %v12404_v36  ;;  %v11327_v1 = vld [vmem:[#allocation2 + $0x48] sm:$0x7f] }
 0x731   : > { %10092 = vmatpush3.bf16.msk.msra.mxu0 %vm11975_vm9, %v10087_v41  ;;  %v11323_v41 = vld [vmem:[#allocation2 + $0x30] sm:$0xff] }
 0x732   : > { %9363 = vmatprep.subr.mxu0 %v761_v49 }
 0x734   : > { %9349 = vmatmul.mubr.msk.f32.vlgmr.msra.gmra.mrb[50].mxu0 %vm1149_vm5, %v3167_v55 }
 0x735   : > { %9351 = vmatprep.mubr.msk.f32.mxu0 %vm1149_vm5, %v3168_v51  ;;  %9364 = vmatpush3.msra.mxu0 %v761_v49 }
 0x738   : > { %9352 = vmatmul.mubr.msk.f32.gmra.mrb[52].mxu0 %vm1149_vm5, %v3169_v56 }
 0x739   : > { %9354 = vmatprep.mubr.msk.f32.mxu0 %vm1149_vm5, %v3170_v43  ;;  %v11325_v43 = vld [vmem:[#allocation2 + $0x40] sm:$0xff] }
 0x73c   : > { %9355 = vmatmul.mubr.msk.f32.gmra.mrb[54].mxu0 %vm1149_vm5, %v3171_v4  ;;  %v11326_v4 = vld [vmem:[#allocation2 + $0x38] sm:$0xff] }
 0x73d   : > { %9357 = vmatprep.mubr.msk.f32.mxu0 %vm1149_vm5, %v3172_v7 }
 0x740   : > { %9358 = vmatmul.mubr.msk.f32.gmra.mrb[56].mxu0 %vm1149_vm5, %v3173_v52 }
 0x741   : > { %9360 = vmatprep.mubr.msk.f32.mxu0 %vm1149_vm5, %v3174_v22 }
 0x744   : > { %9361 = vmatmul.mubr.msk.f32.gmra.mrb[58].mxu0 %vm1149_vm5, %v3175_v21 }
 0x807   : > { %v9350_v12 = vpop.f32.mrb[50].mxu0 }
 0x808   : > { %v3303_v30 = vpop.f32.mrb[51].mxu0 }
 0x809   : > { %9365 = vmatprep.mubr.msk.f32.mxu0 %vm983_vm3, %v3303_v30 }
 0x80a   : > { %9366 = vmatmul.mubr.msk.f32.vlgmr.msra.gmra.mrb[20].mxu0 %vm983_vm3, %v9350_v12 }
 0x80b   : > { %v9353_v3 = vpop.f32.mrb[52].mxu0 }
 0x80c   : > { %v3313_v57 = vpop.f32.mrb[53].mxu0 }
 0x80d   : > { %9368 = vmatprep.mubr.msk.f32.mxu0 %vm983_vm3, %v3313_v57 }
 0x80e   : > { %9369 = vmatmul.mubr.msk.f32.gmra.mrb[22].mxu0 %vm983_vm3, %v9353_v3 }
 0x80f   : > { %v9356_v0 = vpop.f32.mrb[54].mxu0 }
 0x810   : > { %v3323_v34 = vpop.f32.mrb[55].mxu0 }
 0x811   : > { %9371 = vmatprep.mubr.msk.f32.mxu0 %vm983_vm3, %v3323_v34 }
 0x812   : > { %9372 = vmatmul.mubr.msk.f32.gmra.mrb[24].mxu0 %vm983_vm3, %v9356_v0 }
 0x813   : > { %v9359_v36 = vpop.f32.mrb[56].mxu0 }
 0x814   : > { %v3333_v50 = vpop.f32.mrb[57].mxu0 }
 0x815   : > { %9374 = vmatprep.mubr.msk.f32.mxu0 %vm983_vm3, %v3333_v50 }
 0x816   : > { %9375 = vmatmul.mubr.msk.f32.gmra.mrb[26].mxu0 %vm983_vm3, %v9359_v36 }
 0x817   : > { %v9362_v44 = vpop.f32.mrb[58].mxu0 }
 0x818   : > { %v3343_v6 = vpop.f32.mrb[59].mxu0 }
 0x819   : > { %9377 = vmatprep.mubr.msk.f32.mxu0 %vm983_vm3, %v3343_v6 }
 0x81a   : > { %9378 = vmatmul.mubr.msk.f32.gmra.mrb[28].mxu0 %vm983_vm3, %v9362_v44 }
 0x8dd   : > { %v9367_v19 = vpop.f32.mrb[20].mxu0 }
 0x8de   : > { %v10368_v15 = vadd.f32 %v9367_v19, %v8144_v2  ;;  %v3448_v62 = vpop.f32.mrb[21].mxu0 }
 0x8df   : > { %v10369_v58 = vadd.f32 %v8144_v2, %v3448_v62 }
 0x8e0   : > { %v3508_v5 = vadd.f32 %v11318_v32, %v10368_v15 }
 0x8e1   : > { %v3507_v25 = vadd.f32 %v11319_v35, %v10369_v58  ;;  %v9370_v28 = vpop.f32.mrb[22].mxu0 }
 0x8e2   : > { %v10370_v39 = vadd.f32 %v9370_v28, %v8144_v2  ;;  %v3458_v61 = vpop.f32.mrb[23].mxu0  ;;  %v3520_v16 = vsel %vm797_vm2, %v3508_v5, 0.0 }
 0x8e3   : > { %v10371_v60 = vadd.f32 %v8144_v2, %v3458_v61  ;;  %3521 = vadd.xlane.f32.xlu1 %v3520_v16  ;;  %v3517_v33 = vsel %vm797_vm2, %v3507_v25, 0.0 }
 0x8e4   : > { %v3510_v45 = vadd.f32 %v11320_v20, %v10370_v39  ;;  %3518 = vadd.xlane.f32.xlu0 %v3517_v33 }
 0x8e5   : > { %v9373_v54 = vpop.f32.mrb[24].mxu0  ;;  %v3509_v24 = vadd.f32 %v11321_v40, %v10371_v60 }
 0x8e6   : > { %v3468_v42 = vpop.f32.mrb[25].mxu0  ;;  %v3526_v14 = vsel %vm797_vm2, %v3510_v45, 0.0  ;;  %v10372_v48 = vadd.f32 %v9373_v54, %v8144_v2 }
 0x8e7   : > { %v10373_v27 = vadd.f32 %v8144_v2, %v3468_v42  ;;  %v3523_v29 = vsel %vm797_vm2, %v3509_v24, 0.0 }
 0x8e8   : > { %3527 = vadd.xlane.f32.xlu0 %v3526_v14  ;;  %v3512_v55 = vadd.f32 %v11324_v13, %v10372_v48 }
 0x8e9   : > { %v9376_v37 = vpop.f32.mrb[26].mxu0  ;;  %v3511_v38 = vadd.f32 %v11322_v63, %v10373_v27 }
 0x8ea   : > { %v3478_v53 = vpop.f32.mrb[27].mxu0  ;;  %v10374_v51 = vadd.f32 %v9376_v37, %v8144_v2  ;;  %v3532_v31 = vsel %vm797_vm2, %v3512_v55, 0.0 }
 0x8eb   : > { %v10375_v10 = vadd.f32 %v8144_v2, %v3478_v53  ;;  %v3529_v56 = vsel %vm797_vm2, %v3511_v38, 0.0 }
 0x8ec   : > { %3524 = vadd.xlane.f32.xlu0 %v3523_v29  ;;  %v3514_v17 = vadd.f32 %v11326_v4, %v10374_v51  ;;  %v766_v4 = vld [vmem:[%s11543_s20 + $0x8] sm:$0xff] }
 0x8ed   : > { %v3513_v18 = vadd.f32 %v11323_v41, %v10375_v10  ;;  %v9379_v49 = vpop.f32.mrb[28].mxu0 }
 0x8ee   : > { %v3488_v9 = vpop.f32.mrb[29].mxu0  ;;  %v10376_v7 = vadd.f32 %v9379_v49, %v8144_v2  ;;  %v3538_v21 = vsel %vm797_vm2, %v3514_v17, 0.0 }
 0x8ef   : > { %v10377_v46 = vadd.f32 %v8144_v2, %v3488_v9  ;;  %v3535_v47 = vsel %vm797_vm2, %v3513_v18, 0.0 }
 0x8f0   : > { %3530 = vadd.xlane.f32.xlu0 %v3529_v56  ;;  %3536 = vadd.xlane.f32.xlu1 %v3535_v47  ;;  %v3516_v22 = vadd.f32 %v11327_v1, %v10376_v7  ;;  %v767_v7 = vld [vmem:[%s11543_s20 + $0x10] sm:$0xff] }
 0x8f1   : > { %v3515_v59 = vadd.f32 %v11325_v43, %v10377_v46 }
 0x8f2   : > { %v3545_v12 = vsel %vm3544_vm10, %v3516_v22, 0.0 }
 0x8f3   : > { %v3541_v52 = vsel %vm797_vm2, %v3515_v59, 0.0 }
 0x8f4   : > { %3533 = vadd.xlane.f32.xlu0 %v3532_v31  ;;  %3542 = vadd.xlane.f32.xlu1 %v3541_v52  ;;  %v768_v31 = vld [vmem:[%s11543_s20 + $0x18] sm:$0xff] }
 0x8f5   : > { %v12530_v52 = vpack.c.bf16 %v768_v31, %v767_v7 }
 0x8f8   : > { %3539 = vadd.xlane.f32.xlu0 %v3538_v21 }
 0x8fc   : > { %3546 = vadd.xlane.f32.xlu0 %v3545_v12 }
 0x970   : > { %v3522_v30 = vpop.xlane.xlu1 %3521 }
 0x971   : > { %v3550_v3 = vmul.f32 0.03125, %v3522_v30  ;;  %v3519_v57 = vpop.xlane.xlu0 %3518 }
 0x972   : > { %v3549_v0 = vmul.f32 0.03125, %v3519_v57 }
 0x973   : > { %v12472_v34 = vsub.f32 %v3508_v5, %v3550_v3 }
 0x974   : > { %v12474_v36 = vsub.f32 %v3507_v25, %v3549_v0 }
 0x975   : > { %v3528_v50 = vpop.xlane.xlu0 %3527  ;;  %v3570_v44 = vmul.f32 %v12472_v34, %v12472_v34 }
 0x976   : > { %v3552_v6 = vmul.f32 0.03125, %v3528_v50  ;;  %v3569_v2 = vmul.f32 %v12474_v36, %v12474_v36 }
 0x977   : > { %v3582_v19 = vsel %vm797_vm2, %v3570_v44, 0.0 }
 0x978   : > { %v12481_v15 = vsub.f32 %v3510_v45, %v3552_v6  ;;  %3583 = vadd.xlane.f32.xlu0 %v3582_v19  ;;  %v3579_v62 = vsel %vm797_vm2, %v3569_v2, 0.0 }
 0x979   : > { %v3525_v58 = vpop.xlane.xlu0 %3524  ;;  %3580 = vadd.xlane.f32.xlu1 %v3579_v62 }
 0x97a   : > { %v3551_v32 = vmul.f32 0.03125, %v3525_v58  ;;  %v3572_v5 = vmul.f32 %v12481_v15, %v12481_v15 }
 0x97c   : > { %v12486_v35 = vsub.f32 %v3509_v24, %v3551_v32  ;;  %v3588_v25 = vsel %vm797_vm2, %v3572_v5, 0.0  ;;  %v12536_v32 = vld [vmem:[%s11532_s28] ss:$0 sm:$0xff] }
 0x97d   : > { %v3531_v28 = vpop.xlane.xlu0 %3530  ;;  %v3537_v39 = vpop.xlane.xlu1 %3536  ;;  %3589 = vadd.xlane.f32.xlu0 %v3588_v25 }
 0x97e   : > { %v3553_v61 = vmul.f32 0.03125, %v3531_v28  ;;  %v3555_v16 = vmul.f32 0.03125, %v3537_v39  ;;  %v3571_v60 = vmul.f32 %v12486_v35, %v12486_v35 }
 0x980   : > { %v12491_v33 = vsub.f32 %v3511_v38, %v3553_v61  ;;  %v12493_v20 = vsub.f32 %v3513_v18, %v3555_v16  ;;  %v3585_v45 = vsel %vm797_vm2, %v3571_v60, 0.0 }
 0x981   : > { %v3534_v54 = vpop.xlane.xlu0 %3533  ;;  %3586 = vadd.xlane.f32.xlu1 %v3585_v45  ;;  %v3543_v42 = vpop.xlane.xlu1 %3542 }
 0x982   : > { %v3554_v14 = vmul.f32 0.03125, %v3534_v54  ;;  %v3557_v40 = vmul.f32 0.03125, %v3543_v42  ;;  %v3573_v24 = vmul.f32 %v12491_v33, %v12491_v33  ;;  %v3575_v53 = vmul.f32 %v12493_v20, %v12493_v20  ;;  %v12542_v42 = vld [vmem:[%s11538_s30] ss:$0 sm:$0xff] }
 0x984   : > { %v12498_v27 = vsub.f32 %v3512_v55, %v3554_v14  ;;  %v12500_v37 = vsub.f32 %v3515_v59, %v3557_v40  ;;  %v3591_v48 = vsel %vm797_vm2, %v3573_v24, 0.0  ;;  %v3597_v18 = vsel %vm797_vm2, %v3575_v53, 0.0  ;;  %v765_v59 = vld [vmem:[%s11543_s20] sm:$0xff] }
 0x985   : > { %v3540_v63 = vpop.xlane.xlu0 %3539  ;;  %3592 = vadd.xlane.f32.xlu1 %v3591_v48 }
 0x986   : > { %v3556_v38 = vmul.f32 0.03125, %v3540_v63  ;;  %v3574_v10 = vmul.f32 %v12498_v27, %v12498_v27  ;;  %v3577_v49 = vmul.f32 %v12500_v37, %v12500_v37 }
 0x988   : > { %v12507_v29 = vsub.f32 %v3514_v17, %v3556_v38  ;;  %v3594_v41 = vsel %vm797_vm2, %v3574_v10, 0.0  ;;  %v3603_v56 = vsel %vm797_vm2, %v3577_v49, 0.0  ;;  %v12524_v17 = vpack.c.bf16 %v766_v4, %v765_v59 }
 0x989   : > { %3595 = vadd.xlane.f32.xlu0 %v3594_v41  ;;  %v3547_v13 = vpop.xlane.xlu0 %3546  ;;  %3598 = vadd.xlane.f32.xlu1 %v3597_v18 }
 0x98a   : > { %v3558_v55 = vmul.f32 0.03125, %v3547_v13  ;;  %v3576_v9 = vmul.f32 %v12507_v29, %v12507_v29  ;;  %10094 = vmatprep.subr.bf16.mxu1 %v12524_v17 }
 0x98b   : > { %10096 = vmatpush3.bf16.msra.mxu1 %v12524_v17 }
 0x98c   : > { %v12515_v51 = vsub.f32 %v3516_v22, %v3558_v55  ;;  %v3600_v46 = vsel %vm797_vm2, %v3576_v9, 0.0  ;;  %10098 = vmatprep.subr.bf16.mxu1 %v12530_v52 }
 0x98d   : > { %3601 = vadd.xlane.f32.xlu0 %v3600_v46  ;;  %3604 = vadd.xlane.f32.xlu1 %v3603_v56 }
 0x98e   : > { %v3578_v47 = vmul.f32 %v12515_v51, %v12515_v51 }
 0x98f   : > { %10100 = vmatpush3.bf16.msra.mxu1 %v12530_v52 }
 0x990   : > { %v3606_v43 = vsel %vm3544_vm10, %v3578_v47, 0.0  ;;  %10118 = vmatprep.subr.bf16.mxu1 %v11653_v23 }
 0x991   : > { %3607 = vadd.xlane.f32.xlu0 %v3606_v43 }
 0xa05   : > { %v3584_v1 = vpop.xlane.xlu0 %3583 }
 0xa06   : > { %v3610_v22 = vmul.f32 0.03125, %v3584_v1  ;;  %v3581_v21 = vpop.xlane.xlu1 %3580 }
 0xa07   : > { %v3609_v12 = vmul.f32 0.03125, %v3581_v21 }
 0xa08   : > { %v3620_v30 = vadd.f32 1e-05, %v3610_v22 }
 0xa09   : > { %v3619_v3 = vadd.f32 1e-05, %v3609_v12 }
 0xa0a   : > { %11038 = vrsqrt.f32 %v3620_v30  ;;  %v3590_v57 = vpop.xlane.xlu0 %3589 }
 0xa0b   : > { %11040 = vrsqrt.f32 %v3619_v3  ;;  %v3612_v0 = vmul.f32 0.03125, %v3590_v57 }
 0xa0d   : > { %v3622_v50 = vadd.f32 1e-05, %v3612_v0 }
 0xa0e   : > { %v3587_v44 = vpop.xlane.xlu1 %3586 }
 0xa0f   : > { %11042 = vrsqrt.f32 %v3622_v50  ;;  %v3611_v6 = vmul.f32 0.03125, %v3587_v44 }
 0xa11   : > { %v3621_v2 = vadd.f32 1e-05, %v3611_v6 }
 0xa12   : > { %v3593_v19 = vpop.xlane.xlu1 %3592 }
 0xa13   : > { %11044 = vrsqrt.f32 %v3621_v2  ;;  %v3613_v62 = vmul.f32 0.03125, %v3593_v19 }
 0xa14   : > { %v11039_v58 = vpop.eup %11038 }
 0xa15   : > { %v11041_v5 = vpop.eup %11040  ;;  %v3640_v25 = vmul.f32 %v11039_v58, %v12472_v34  ;;  %v3623_v28 = vadd.f32 1e-05, %v3613_v62  ;;  %v4257_v62 = vld [vmem:[#allocation2 + $0x50] sm:$0xff]  ;;  %v4259_v58 = vld [vmem:[#allocation2 + $0x60] sm:$0xff] }
 0xa16   : > { %v3596_v39 = vpop.xlane.xlu0 %3595  ;;  %v3599_v61 = vpop.xlane.xlu1 %3598  ;;  %v3639_v16 = vmul.f32 %v11041_v5, %v12474_v36  ;;  %v4261_v5 = vld [vmem:[#allocation2 + $0x70] sm:$0xff] }
 0xa17   : > { %v3656_v60 = vmul.f32 %v12536_v32, %v3640_v25  ;;  %11046 = vrsqrt.f32 %v3623_v28  ;;  %v3614_v45 = vmul.f32 0.03125, %v3596_v39  ;;  %v3615_v54 = vmul.f32 0.03125, %v3599_v61  ;;  %v4262_v25 = vld [vmem:[#allocation2 + $0x78] sm:$0xff]  ;;  %v4263_v28 = vld [vmem:[#allocation2 + $0x80] sm:$0xff]  ;;  %v4264_v39 = vld [vmem:[#allocation2 + $0x88] sm:$0xff] }
 0xa18   : > { %v3655_v14 = vmul.f32 %v12536_v32, %v3639_v16  ;;  %v4265_v61 = vld [vmem:[#allocation2 + $0x90] sm:$0xff]  ;;  %v4266_v16 = vld [vmem:[#allocation2 + $0x98] sm:$0x7f] }
 0xa19   : > { %v11043_v40 = vpop.eup %11042  ;;  %v3624_v24 = vadd.f32 1e-05, %v3614_v45  ;;  %v3625_v48 = vadd.f32 1e-05, %v3615_v54  ;;  %v12549_v38 = vadd.f32 %v12542_v42, %v3656_v60  ;;  %v770_v60 = vld [vmem:[%s11555_s16] sm:$0xff]  ;;  %v771_v45 = vld [vmem:[%s11555_s16 + $0x8] sm:$0xff] }
 0xa1a   : > { %v3602_v53 = vpop.xlane.xlu0 %3601  ;;  %v3605_v63 = vpop.xlane.xlu1 %3604  ;;  %v12546_v34 = vadd.f32 %v12542_v42, %v3655_v14  ;;  %v3642_v41 = vmul.f32 %v11043_v40, %v12481_v15  ;;  %v12626_v54 = vpack.c.bf16 %v771_v45, %v770_v60  ;;  %v773_v14 = vld [vmem:[%s11555_s16 + $0x18] sm:$0xff] }
 0xa1b   : > { %14257 = vst [vmem:[#allocation8_spill] sm:$0xff] %v12549_v38  ;;  %11048 = vrsqrt.f32 %v3624_v24  ;;  %v3616_v36 = vmul.f32 0.03125, %v3602_v53  ;;  %v3617_v10 = vmul.f32 0.03125, %v3605_v63  ;;  %v774_v24 = vld [vmem:[%s11555_s16 + $0x20] sm:$0xff]  ;;  %v776_v63 = vld [vmem:[%s11555_s16 + $0x30] sm:$0xff] }
 0xa1c   : > { %14256 = vst [vmem:[#allocation7_spill] sm:$0xff] %v12546_v34  ;;  %11050 = vrsqrt.f32 %v3625_v48  ;;  %9388 = vmatprep.mubr.msk.f32.mxu1 %vm797_vm2, %v12546_v34  ;;  %v3658_v56 = vmul.f32 %v12536_v32, %v3642_v41  ;;  %10102 = vmatprep.subr.bf16.mxu0 %v12626_v54  ;;  %v775_v48 = vld [vmem:[%s11555_s16 + $0x28] sm:$0xff]  ;;  %v8270_v41 = vld [vmem:[%s11549_s24] ss:$0 sm:$0xff] }
 0xa1d   : > { %v11045_v18 = vpop.eup %11044  ;;  %v3626_v49 = vadd.f32 1e-05, %v3616_v36  ;;  %v3627_v13 = vadd.f32 1e-05, %v3617_v10  ;;  %9389 = vmatmul.mubr.msk.f32.vlgmr.msra.gmra.mrb[40].mxu1 %vm797_vm2, %v12549_v38  ;;  %10104 = vmatpush3.bf16.msra.mxu0 %v12626_v54  ;;  %v12638_v53 = vpack.c.bf16 %v775_v48, %v774_v24  ;;  %v777_v36 = vld [vmem:[%s11555_s16 + $0x38] sm:$0xff] }
 0xa1e   : > { %v3608_v55 = vpop.xlane.xlu0 %3607  ;;  %v3641_v9 = vmul.f32 %v11045_v18, %v12486_v35  ;;  %10120 = vmatpush3.bf16.msra.mxu1 %v11653_v23  ;;  %v12567_v23 = vadd.f32 %v12542_v42, %v3658_v56  ;;  %v12644_v10 = vpack.c.bf16 %v777_v36, %v776_v63 }
 0xa1f   : > { %11052 = vrsqrt.f32 %v3626_v49  ;;  %v3618_v46 = vmul.f32 0.03125, %v3608_v55  ;;  %10122 = vmatprep.subr.bf16.mxu1 %v11656_v26 }
 0xa20   : > { %11054 = vrsqrt.f32 %v3627_v13  ;;  %v3657_v15 = vmul.f32 %v12536_v32, %v3641_v9  ;;  %14259 = vst [vmem:[#allocation10_spill] sm:$0xff] %v12567_v23 }
 0xa21   : > { %v11047_v47 = vpop.eup %11046  ;;  %v3628_v43 = vadd.f32 1e-05, %v3618_v46 }
 0xa22   : > { %v12562_v59 = vadd.f32 %v12542_v42, %v3657_v15  ;;  %v3643_v4 = vmul.f32 %v11047_v47, %v12491_v33  ;;  %10124 = vmatpush3.bf16.msra.mxu1 %v11656_v26 }
 0xa23   : > { %11056 = vrsqrt.f32 %v3628_v43 }
 0xa24   : > { %14258 = vst [vmem:[#allocation9_spill] sm:$0xff] %v12562_v59  ;;  %9391 = vmatprep.mubr.msk.f32.mxu1 %vm797_vm2, %v12562_v59  ;;  %v3659_v35 = vmul.f32 %v12536_v32, %v3643_v4 }
 0xa25   : > { %v11049_v7 = vpop.eup %11048  ;;  %9392 = vmatmul.mubr.msk.f32.gmra.mrb[42].mxu1 %vm797_vm2, %v12567_v23 }
 0xa26   : > { %v11051_v31 = vpop.eup %11050  ;;  %v12575_v1 = vadd.f32 %v12542_v42, %v3659_v35  ;;  %v3644_v33 = vmul.f32 %v11049_v7, %v12498_v27 }
 0xa27   : > { %v3645_v26 = vmul.f32 %v11051_v31, %v12493_v20 }
 0xa28   : > { %14260 = vst [vmem:[#allocation11_spill] sm:$0xff] %v12575_v1  ;;  %9394 = vmatprep.mubr.msk.f32.mxu1 %vm797_vm2, %v12575_v1  ;;  %v3660_v22 = vmul.f32 %v12536_v32, %v3644_v33 }
 0xa29   : > { %v11053_v21 = vpop.eup %11052  ;;  %v3661_v12 = vmul.f32 %v12536_v32, %v3645_v26 }
 0xa2a   : > { %v11055_v30 = vpop.eup %11054  ;;  %v12584_v3 = vadd.f32 %v12542_v42, %v3660_v22  ;;  %v3646_v57 = vmul.f32 %v11053_v21, %v12507_v29 }
 0xa2b   : > { %v12588_v0 = vadd.f32 %v12542_v42, %v3661_v12  ;;  %v3647_v27 = vmul.f32 %v11055_v30, %v12500_v37 }
 0xa2c   : > { %14261 = vst [vmem:[#allocation12_spill] sm:$0xff] %v12584_v3  ;;  %9395 = vmatmul.mubr.msk.f32.gmra.mrb[44].mxu1 %vm797_vm2, %v12584_v3  ;;  %v3662_v20 = vmul.f32 %v12536_v32, %v3646_v57 }
 0xa2d   : > { %14262 = vst [vmem:[#allocation13_spill] sm:$0xff] %v12588_v0  ;;  %v11057_v50 = vpop.eup %11056  ;;  %9397 = vmatprep.mubr.msk.f32.mxu1 %vm797_vm2, %v12588_v0  ;;  %v3663_v44 = vmul.f32 %v12536_v32, %v3647_v27 }
 0xa2e   : > { %v12598_v6 = vadd.f32 %v12542_v42, %v3662_v20  ;;  %v3648_v29 = vmul.f32 %v11057_v50, %v12515_v51  ;;  %v4258_v51 = vld [vmem:[#allocation2 + $0x58] sm:$0xff] }
 0xa2f   : > { %v12602_v2 = vadd.f32 %v12542_v42, %v3663_v44 }
 0xa30   : > { %14263 = vst [vmem:[#allocation14_spill] sm:$0xff] %v12598_v6  ;;  %9398 = vmatmul.mubr.msk.f32.gmra.mrb[46].mxu1 %vm797_vm2, %v12598_v6  ;;  %v3664_v37 = vmul.f32 %v12536_v32, %v3648_v29  ;;  %v4260_v32 = vld [vmem:[#allocation2 + $0x68] sm:$0xff] }
 0xa31   : > { %14264 = vst [vmem:[#allocation15_spill] sm:$0xff] %v12602_v2  ;;  %9400 = vmatprep.mubr.msk.f32.mxu1 %vm797_vm2, %v12602_v2 }
 0xa32   : > { %v12610_v19 = vadd.f32 %v12542_v42, %v3664_v37  ;;  %v772_v42 = vld [vmem:[%s11555_s16 + $0x10] sm:$0xff] }
 0xa33   : > { %v12632_v40 = vpack.c.bf16 %v773_v14, %v772_v42 }
 0xa34   : > { %14265 = vst [vmem:[#allocation16_spill] sm:$0xff] %v12610_v19  ;;  %9401 = vmatmul.mubr.msk.f32.gmra.mrb[48].mxu1 %vm797_vm2, %v12610_v19 }
 0xa35   : > { %9442 = vmatprep.mubr.msk.f32.mxu1 %vm797_vm2, %v4257_v62  ;;  %10106 = vmatprep.subr.bf16.mxu0 %v12632_v40 }
 0xa36   : > { %10108 = vmatpush3.bf16.msra.mxu0 %v12632_v40 }
 0xa37   : > { %10110 = vmatprep.subr.bf16.mxu0 %v12638_v53 }
 0xa38   : > { %9443 = vmatmul.mubr.msk.f32.vlgmr.msra.gmra.mrb[50].mxu1 %vm797_vm2, %v4258_v51 }
 0xa39   : > { %9445 = vmatprep.mubr.msk.f32.mxu1 %vm797_vm2, %v4259_v58 }
 0xa3a   : > { %10112 = vmatpush3.bf16.msra.mxu0 %v12638_v53 }
 0xa3b   : > { %10114 = vmatprep.subr.bf16.mxu0 %v12644_v10 }
 0xa3c   : > { %9446 = vmatmul.mubr.msk.f32.gmra.mrb[52].mxu1 %vm797_vm2, %v4260_v32 }
 0xa3d   : > { %9448 = vmatprep.mubr.msk.f32.mxu1 %vm797_vm2, %v4261_v5 }
 0xa3e   : > { %10116 = vmatpush3.bf16.msra.mxu0 %v12644_v10 }
 0xa40   : > { %9449 = vmatmul.mubr.msk.f32.gmra.mrb[54].mxu1 %vm797_vm2, %v4262_v25 }
 0xa41   : > { %9451 = vmatprep.mubr.msk.f32.mxu1 %vm797_vm2, %v4263_v28 }
 0xa44   : > { %9452 = vmatmul.mubr.msk.f32.gmra.mrb[56].mxu1 %vm797_vm2, %v4264_v39 }
 0xa45   : > { %9454 = vmatprep.mubr.msk.f32.mxu1 %vm797_vm2, %v4265_v61 }
 0xa48   : > { %9455 = vmatmul.mubr.msk.f32.gmra.mrb[58].mxu1 %vm797_vm2, %v4266_v16 }
 0xaf0   : > { %v9390_v18 = vpop.f32.mrb[40].mxu1 }
 0xaf1   : > { %v12649_v49 = vadd.f32 %v9390_v18, %v8270_v41  ;;  %v3783_v13 = vpop.f32.mrb[41].mxu1 }
 0xaf2   : > { %v12651_v55 = vadd.f32 %v8270_v41, %v3783_v13 }
 0xaf3   : > { %v3833_v9 = vmul.f32 %v12649_v49, %v12649_v49 }
 0xaf4   : > { %v3832_v46 = vmul.f32 %v12651_v55, %v12651_v55 }
 0xaf5   : > { %v3843_v56 = vmul.f32 %v3833_v9, %v12649_v49 }
 0xaf6   : > { %v3842_v15 = vmul.f32 %v3832_v46, %v12651_v55 }
 0xaf7   : > { %v3853_v47 = vmul.f32 0.044715, %v3843_v56 }
 0xaf8   : > { %v3852_v43 = vmul.f32 0.044715, %v3842_v15  ;;  %v9393_v4 = vpop.f32.mrb[42].mxu1 }
 0xaf9   : > { %v3863_v35 = vadd.f32 %v3853_v47, %v12649_v49  ;;  %v12660_v7 = vadd.f32 %v9393_v4, %v8270_v41  ;;  %v3793_v31 = vpop.f32.mrb[43].mxu1 }
 0xafa   : > { %v3862_v33 = vadd.f32 %v3852_v43, %v12651_v55  ;;  %v12663_v26 = vadd.f32 %v8270_v41, %v3793_v31 }
 0xafb   : > { %v3873_v22 = vmul.f32 0.7978846, %v3863_v35  ;;  %v3835_v21 = vmul.f32 %v12660_v7, %v12660_v7 }
 0xafc   : > { %v3872_v12 = vmul.f32 0.7978846, %v3862_v33  ;;  %v3834_v30 = vmul.f32 %v12663_v26, %v12663_v26 }
 0xafd   : > { %11058 = vtanh.f32 %v3873_v22  ;;  %v3845_v57 = vmul.f32 %v3835_v21, %v12660_v7 }
 0xafe   : > { %11060 = vtanh.f32 %v3872_v12  ;;  %v3844_v27 = vmul.f32 %v3834_v30, %v12663_v26 }
 0xaff   : > { %v3855_v20 = vmul.f32 0.044715, %v3845_v57  ;;  %v9396_v50 = vpop.f32.mrb[44].mxu1 }
 0xb00   : > { %v3854_v44 = vmul.f32 0.044715, %v3844_v27  ;;  %v12671_v29 = vadd.f32 %v9396_v50, %v8270_v41  ;;  %v3803_v37 = vpop.f32.mrb[45].mxu1 }
 0xb01   : > { %v3865_v62 = vadd.f32 %v3855_v20, %v12660_v7  ;;  %v12674_v51 = vadd.f32 %v8270_v41, %v3803_v37 }
 0xb02   : > { %v3864_v58 = vadd.f32 %v3854_v44, %v12663_v26  ;;  %v3837_v32 = vmul.f32 %v12671_v29, %v12671_v29 }
 0xb03   : > { %v3875_v5 = vmul.f32 0.7978846, %v3865_v62  ;;  %v3836_v25 = vmul.f32 %v12674_v51, %v12674_v51  ;;  %v9399_v28 = vpop.f32.mrb[46].mxu1 }
 0xb04   : > { %v3874_v39 = vmul.f32 0.7978846, %v3864_v58  ;;  %v3847_v61 = vmul.f32 %v3837_v32, %v12671_v29  ;;  %v12682_v16 = vadd.f32 %v9399_v28, %v8270_v41  ;;  %v3813_v60 = vpop.f32.mrb[47].mxu1  ;;  %v12708_v32 = vld [vmem:[%s11510_s0] ss:$0 sm:$0xff]  ;;  %s14296_s0 = sld [smem:[#allocation36_spill]] (!%p8488_p5) }
 0xb05   : > { %11062 = vtanh.f32 %v3875_v5  ;;  %v3846_v45 = vmul.f32 %v3836_v25, %v12674_v51  ;;  %v12685_v42 = vadd.f32 %v8270_v41, %v3813_v60 }
 0xb06   : > { %11064 = vtanh.f32 %v3874_v39  ;;  %v3857_v14 = vmul.f32 0.044715, %v3847_v61  ;;  %v3839_v24 = vmul.f32 %v12682_v16, %v12682_v16 }
 0xb07   : > { %v11059_v48 = vpop.eup %11058  ;;  %v3856_v63 = vmul.f32 0.044715, %v3846_v45  ;;  %v3838_v36 = vmul.f32 %v12685_v42, %v12685_v42  ;;  %v9402_v18 = vpop.f32.mrb[48].mxu1 }
 0xb08   : > { %v11061_v13 = vpop.eup %11060  ;;  %v3893_v9 = vadd.f32 1.0, %v11059_v48  ;;  %v3867_v46 = vadd.f32 %v3857_v14, %v12671_v29  ;;  %v3849_v56 = vmul.f32 %v3839_v24, %v12682_v16  ;;  %v12693_v15 = vadd.f32 %v9402_v18, %v8270_v41  ;;  %v3823_v47 = vpop.f32.mrb[49].mxu1 }
 0xb09   : > { %v3866_v43 = vadd.f32 %v3856_v63, %v12674_v51  ;;  %v3848_v4 = vmul.f32 %v3838_v36, %v12685_v42  ;;  %v12697_v35 = vadd.f32 %v8270_v41, %v3823_v47  ;;  %v3892_v31 = vadd.f32 1.0, %v11061_v13 }
 0xb0a   : > { %v3903_v33 = vmul.f32 0.5, %v3893_v9  ;;  %v3877_v22 = vmul.f32 0.7978846, %v3867_v46  ;;  %v3859_v21 = vmul.f32 0.044715, %v3849_v56  ;;  %v3841_v12 = vmul.f32 %v12693_v15, %v12693_v15 }
 0xb0b   : > { %v3876_v30 = vmul.f32 0.7978846, %v3866_v43  ;;  %v3858_v57 = vmul.f32 0.044715, %v3848_v4  ;;  %v3840_v27 = vmul.f32 %v12697_v35, %v12697_v35  ;;  %v9444_v20 = vpop.f32.mrb[50].mxu1  ;;  %v3902_v50 = vmul.f32 0.5, %v3892_v31 }
 0xb0c   : > { %11066 = vtanh.f32 %v3877_v22  ;;  %v3869_v44 = vadd.f32 %v3859_v21, %v12682_v16  ;;  %v3851_v41 = vmul.f32 %v3841_v12, %v12693_v15  ;;  %v4363_v37 = vpop.f32.mrb[51].mxu1  ;;  %v12711_v5 = vadd.f32 %v12708_v32, %v9444_v20 }
 0xb0d   : > { %11068 = vtanh.f32 %v3876_v30  ;;  %v3868_v62 = vadd.f32 %v3858_v57, %v12685_v42  ;;  %v3850_v58 = vmul.f32 %v3840_v27, %v12697_v35  ;;  %v12714_v39 = vadd.f32 %v12708_v32, %v4363_v37 }
 0xb0e   : > { %v3879_v25 = vmul.f32 0.7978846, %v3869_v44  ;;  %v3861_v28 = vmul.f32 0.044715, %v3851_v41  ;;  %v3912_v61 = vmul.f32 %v3902_v50, %v12651_v55  ;;  %v3913_v45 = vmul.f32 %v3903_v33, %v12649_v49 }
 0xb0f   : > { %v11063_v60 = vpop.eup %11062  ;;  %v3878_v14 = vmul.f32 0.7978846, %v3868_v62  ;;  %v3860_v24 = vmul.f32 0.044715, %v3850_v58  ;;  %v9447_v48 = vpop.f32.mrb[52].mxu1  ;;  %v12725_v13 = vpack.i.bf16 %v12711_v5, %v12714_v39 }
 0xb10   : > { %v11065_v63 = vpop.eup %11064  ;;  %11070 = vtanh.f32 %v3879_v25  ;;  %v3871_v36 = vadd.f32 %v3861_v28, %v12693_v15  ;;  %9419 = vmatprep.mubr.msk.f32.mxu0 %vm3928_vm11, %v3912_v61  ;;  %v12721_v18 = vadd.f32 %v12708_v32, %v9447_v48  ;;  %v4373_v55 = vpop.f32.mrb[53].mxu1  ;;  %v3895_v47 = vadd.f32 1.0, %v11063_v60 }
 0xb11   : > { %11072 = vtanh.f32 %v3878_v14  ;;  %v3870_v49 = vadd.f32 %v3860_v24, %v12697_v35  ;;  %9420 = vmatmul.mubr.msk.f32.vlgmr.msra.gmra.mrb[60].mxu0 %vm3928_vm11, %v3913_v45  ;;  %v12730_v9 = vadd.f32 %v12708_v32, %v4373_v55  ;;  %v3894_v46 = vadd.f32 1.0, %v11065_v63  ;;  %10679 = vrot.lane.b32.xlu1 %v12725_v13, %s11385_s1 }
 0xb12   : > { %v3881_v56 = vmul.f32 0.7978846, %v3871_v36  ;;  %v3905_v12 = vmul.f32 0.5, %v3895_v47 }
 0xb13   : > { %v3880_v43 = vmul.f32 0.7978846, %v3870_v49  ;;  %v9450_v4 = vpop.f32.mrb[54].mxu1  ;;  %v3904_v31 = vmul.f32 0.5, %v3894_v46  ;;  %v12736_v33 = vpack.i.bf16 %v12721_v18, %v12730_v9 }
 0xb14   : > { %11074 = vtanh.f32 %v3881_v56  ;;  %v12739_v22 = vadd.f32 %v12708_v32, %v9450_v4  ;;  %v4383_v21 = vpop.f32.mrb[55].mxu1  ;;  %v3915_v20 = vmul.f32 %v3905_v12, %v12660_v7 }
 0xb15   : > { %11076 = vtanh.f32 %v3880_v43  ;;  %v12742_v30 = vadd.f32 %v12708_v32, %v4383_v21  ;;  %v3914_v57 = vmul.f32 %v3904_v31, %v12663_v26  ;;  %10684 = vrot.lane.b32.xlu0 %v12736_v33, %s11385_s1 }
 0xb16   : > { %v11067_v27 = vpop.eup %11066 }
 0xb17   : > { %v11069_v50 = vpop.eup %11068  ;;  %9422 = vmatprep.mubr.msk.f32.mxu0 %vm3928_vm11, %v3914_v57  ;;  %v9453_v44 = vpop.f32.mrb[56].mxu1  ;;  %v12751_v41 = vpack.i.bf16 %v12739_v22, %v12742_v30  ;;  %v3897_v37 = vadd.f32 1.0, %v11067_v27 }
 0xb18   : > { %v4399_v62 = vadd.f32 %v12708_v32, %v9453_v44  ;;  %9423 = vmatmul.mubr.msk.f32.gmra.mrb[62].mxu0 %vm3928_vm11, %v3915_v20  ;;  %v4393_v26 = vpop.f32.mrb[57].mxu1  ;;  %v3896_v58 = vadd.f32 1.0, %v11069_v50 }
 0xb19   : > { %v4394_v25 = vadd.f32 %v12708_v32, %v4393_v26  ;;  %10689 = vrot.lane.b32.xlu1 %v12751_v41, %s11385_s1  ;;  %v3907_v7 = vmul.f32 0.5, %v3897_v37 }
 0xb1a   : > { %v11071_v28 = vpop.eup %11070  ;;  %v3906_v61 = vmul.f32 0.5, %v3896_v58 }
 0xb1b   : > { %v11073_v60 = vpop.eup %11072  ;;  %v9456_v45 = vpop.f32.mrb[58].mxu1  ;;  %v12758_v14 = vpack.i.bf16 %v4399_v62, %v4394_v25  ;;  %v3899_v24 = vadd.f32 1.0, %v11071_v28  ;;  %v3917_v55 = vmul.f32 %v3907_v7, %v12671_v29 }
 0xb1c   : > { %v4409_v48 = vadd.f32 %v12708_v32, %v9456_v45  ;;  %v4403_v63 = vpop.f32.mrb[59].mxu1  ;;  %v3916_v36 = vmul.f32 %v3906_v61, %v12674_v51  ;;  %v3898_v49 = vadd.f32 1.0, %v11073_v60 }
 0xb1d   : > { %v4404_v46 = vadd.f32 %v12708_v32, %v4403_v63  ;;  %10694 = vrot.lane.b32.xlu1 %v12758_v14, %s11385_s1  ;;  %v3909_v56 = vmul.f32 0.5, %v3899_v24 }
 0xb1e   : > { %v11075_v47 = vpop.eup %11074  ;;  %9425 = vmatprep.mubr.msk.f32.mxu0 %vm3928_vm11, %v3916_v36  ;;  %v3908_v43 = vmul.f32 0.5, %v3898_v49 }
 0xb1f   : > { %v11077_v4 = vpop.eup %11076  ;;  %9426 = vmatmul.mubr.msk.f32.gmra.mrb[64].mxu0 %vm3928_vm11, %v3917_v55  ;;  %v12768_v31 = vpack.i.bf16 %v4409_v48, %v4404_v46  ;;  %v3901_v21 = vadd.f32 1.0, %v11075_v47  ;;  %v3919_v29 = vmul.f32 %v3909_v56, %v12682_v16  ;;  %v12786_v16 = vmul.f32 0.35355338, %v12714_v39 }
 0xb20   : > { %v3918_v51 = vmul.f32 %v3908_v43, %v12685_v42  ;;  %v3900_v12 = vadd.f32 1.0, %v11077_v4  ;;  %v12796_v42 = vmul.f32 0.35355338, %v12711_v5  ;;  %v12813_v5 = vmul.f32 0.35355338, %v12739_v22 }
 0xb21   : > { %10699 = vrot.lane.b32.xlu0 %v12768_v31, %s11385_s1  ;;  %10704 = vrot.lane.b32.xlu1 %v12725_v13, %s11386_s19  ;;  %v3911_v32 = vmul.f32 0.5, %v3901_v21  ;;  %v12816_v39 = vmul.f32 0.35355338, %v12742_v30  ;;  %v12830_v22 = vmul.f32 0.35355338, %v4409_v48 }
 0xb22   : > { %9428 = vmatprep.mubr.msk.f32.mxu0 %vm3928_vm11, %v3918_v51  ;;  %v3910_v57 = vmul.f32 0.5, %v3900_v12  ;;  %v12832_v30 = vmul.f32 0.35355338, %v4404_v46 }
 0xb23   : > { %9429 = vmatmul.mubr.msk.f32.gmra.mrb[66].mxu0 %vm3928_vm11, %v3919_v29  ;;  %v3921_v27 = vmul.f32 %v3911_v32, %v12693_v15  ;;  %v12803_v15 = vmul.f32 0.35355338, %v12721_v18  ;;  %v12822_v18 = vmul.f32 0.35355338, %v4399_v62 }
 0xb24   : > { %v3920_v20 = vmul.f32 %v3910_v57, %v12697_v35  ;;  %v12806_v35 = vmul.f32 0.35355338, %v12730_v9  ;;  %v12824_v9 = vmul.f32 0.35355338, %v4394_v25 }
 0xb25   : > { %10709 = vrot.lane.b32.xlu0 %v12736_v33, %s11386_s19  ;;  %10714 = vrot.lane.b32.xlu1 %v12751_v41, %s11386_s19 }
 0xb26   : > { %9431 = vmatprep.mubr.msk.f32.mxu0 %vm3928_vm11, %v3920_v20 }
 0xb27   : > { %9432 = vmatmul.mubr.msk.f32.gmra.mrb[68].mxu0 %vm3928_vm11, %v3921_v27 }
 0xb28   : > { %9477 = vmatprep.mubr.msk.f32.mxu0 %vm983_vm3, %v12786_v16 }
 0xb29   : > { %10719 = vrot.lane.b32.xlu0 %v12758_v14, %s11386_s19  ;;  %10724 = vrot.lane.b32.xlu1 %v12768_v31, %s11386_s19 }
 0xb2d   : > { %5060 = vrot.lane.b32.xlu1 %v12796_v42, %s11387_s21  ;;  %5058 = vrot.lane.b32.xlu0 %v12786_v16, %s11387_s21 }
 0xb31   : > { %5064 = vrot.lane.b32.xlu1 %v12803_v15, %s11387_s21  ;;  %5062 = vrot.lane.b32.xlu0 %v12806_v35, %s11387_s21 }
 0xb35   : > { %5068 = vrot.lane.b32.xlu1 %v12813_v5, %s11387_s21  ;;  %5066 = vrot.lane.b32.xlu0 %v12816_v39, %s11387_s21 }
 0xb39   : > { %5072 = vrot.lane.b32.xlu1 %v12822_v18, %s11387_s21  ;;  %5070 = vrot.lane.b32.xlu0 %v12824_v9, %s11387_s21 }
 0xb3d   : > { %5076 = vrot.lane.b32.xlu1 %v12830_v22, %s11387_s21  ;;  %5074 = vrot.lane.b32.xlu0 %v12832_v30, %s11387_s21 }
 0xb41   : > { %10729 = vrot.lane.b32.xlu1 %v12725_v13, %s11388_s23 }
 0xb83   : > { %v10680_v50 = vpop.permute.xlu1 %10679 }
 0xb84   : > { %v10682_v44 = vunpack.i.h.bf16 %v10680_v50  ;;  %v10681_v37 = vunpack.i.l.bf16 %v10680_v50 }
 0xb86   : > { %v10125_v62 = vpack.c.bf16 %v10682_v44, %v10681_v37 }
 0xb87   : > { %v10685_v26 = vpop.permute.xlu0 %10684 }
 0xb88   : > { %v10687_v58 = vunpack.i.h.bf16 %v10685_v26  ;;  %v10686_v25 = vunpack.i.l.bf16 %v10685_v26  ;;  %10127 = vmatprep.subr.msk.bf16.mxu0 %vm11749_vm4, %v10125_v62 }
 0xb89   : > { %10130 = vmatpush3.bf16.xpose.msk.msra.mxu0 %vm11749_vm4, %v10125_v62 }
 0xb8a   : > { %v10131_v7 = vpack.c.bf16 %v10687_v58, %v10686_v25 }
 0xb8b   : > { %v10690_v28 = vpop.permute.xlu1 %10689 }
 0xb8c   : > { %v10692_v61 = vunpack.i.h.bf16 %v10690_v28  ;;  %v10691_v60 = vunpack.i.l.bf16 %v10690_v28  ;;  %10133 = vmatprep.subr.msk.bf16.mxu0 %vm11749_vm4, %v10131_v7 }
 0xb8e   : > { %v10137_v45 = vpack.c.bf16 %v10692_v61, %v10691_v60 }
 0xb8f   : > { %v10695_v24 = vpop.permute.xlu1 %10694 }
 0xb90   : > { %v10697_v48 = vunpack.i.h.bf16 %v10695_v24  ;;  %v10696_v63 = vunpack.i.l.bf16 %v10695_v24 }
 0xb91   : > { %10136 = vmatpush3.bf16.xpose.msk.msra.mxu0 %vm11749_vm4, %v10131_v7 }
 0xb92   : > { %10139 = vmatprep.subr.msk.bf16.mxu0 %vm11749_vm4, %v10137_v45  ;;  %v10143_v55 = vpack.c.bf16 %v10697_v48, %v10696_v63 }
 0xb93   : > { %v10705_v36 = vpop.permute.xlu1 %10704  ;;  %v10700_v46 = vpop.permute.xlu0 %10699 }
 0xb94   : > { %v10702_v56 = vunpack.i.h.bf16 %v10700_v46  ;;  %v10701_v47 = vunpack.i.l.bf16 %v10700_v46  ;;  %v10707_v29 = vunpack.i.h.bf16 %v10705_v36  ;;  %v10706_v12 = vunpack.i.l.bf16 %v10705_v36 }
 0xb96   : > { %v10149_v4 = vpack.c.bf16 %v10702_v56, %v10701_v47  ;;  %v10177_v57 = vpack.c.bf16 %v10707_v29, %v10706_v12 }
 0xb97   : > { %v10715_v49 = vpop.permute.xlu1 %10714  ;;  %v10710_v27 = vpop.permute.xlu0 %10709 }
 0xb98   : > { %v10712_v50 = vunpack.i.h.bf16 %v10710_v27  ;;  %v10711_v44 = vunpack.i.l.bf16 %v10710_v27  ;;  %v10717_v7 = vunpack.i.h.bf16 %v10715_v49  ;;  %v10716_v28 = vunpack.i.l.bf16 %v10715_v49 }
 0xb99   : > { %10142 = vmatpush3.bf16.xpose.msk.msra.mxu0 %vm11749_vm4, %v10137_v45 }
 0xb9a   : > { %10145 = vmatprep.subr.msk.bf16.mxu0 %vm11749_vm4, %v10143_v55  ;;  %v10183_v62 = vpack.c.bf16 %v10712_v50, %v10711_v44  ;;  %v10189_v60 = vpack.c.bf16 %v10717_v7, %v10716_v28 }
 0xb9b   : > { %v10725_v43 = vpop.permute.xlu1 %10724  ;;  %v10720_v45 = vpop.permute.xlu0 %10719 }
 0xb9c   : > { %v10722_v24 = vunpack.i.h.bf16 %v10720_v45  ;;  %v10721_v48 = vunpack.i.l.bf16 %v10720_v45  ;;  %v10726_v49 = vunpack.i.l.bf16 %v10725_v43 }
 0xb9e   : > { %v10195_v63 = vpack.c.bf16 %v10722_v24, %v10721_v48 }
 0xb9f   : > { %v5061_v21 = vpop.permute.xlu1 %5060  ;;  %v5059_v36 = vpop.permute.xlu0 %5058 }
 0xba1   : > { %10148 = vmatpush3.bf16.xpose.msk.msra.mxu0 %vm11749_vm4, %v10143_v55  ;;  %v10727_v55 = vunpack.i.h.bf16 %v10725_v43 }
 0xba2   : > { %10151 = vmatprep.subr.msk.bf16.mxu0 %vm11749_vm4, %v10149_v4 }
 0xba3   : > { %v5065_v51 = vpop.permute.xlu1 %5064  ;;  %v10201_v46 = vpack.c.bf16 %v10727_v55, %v10726_v49  ;;  %v5063_v56 = vpop.permute.xlu0 %5062 }
 0xba7   : > { %v5069_v32 = vpop.permute.xlu1 %5068  ;;  %v5067_v47 = vpop.permute.xlu0 %5066 }
 0xba9   : > { %10154 = vmatpush3.bf16.xpose.msk.msra.mxu0 %vm11749_vm4, %v10149_v4 }
 0xbaa   : > { %10179 = vmatprep.subr.msk.bf16.mxu0 %vm11749_vm4, %v10177_v57 }
 0xbab   : > { %v5073_v20 = vpop.permute.xlu1 %5072  ;;  %v5071_v43 = vpop.permute.xlu0 %5070 }
 0xbaf   : > { %v5077_v37 = vpop.permute.xlu1 %5076  ;;  %v5075_v29 = vpop.permute.xlu0 %5074 }
 0xbb0   : > { %9478 = vmatmul.mubr.msk.f32.vlgmr.msra.gmra.mrb[70].mxu0 %vm983_vm3, %v12796_v42 }
 0xbb1   : > { %9480 = vmatprep.mubr.msk.f32.mxu0 %vm983_vm3, %v12806_v35  ;;  %10182 = vmatpush3.bf16.xpose.msk.msra.mxu0 %vm11749_vm4, %v10177_v57 }
 0xbb2   : > { %10185 = vmatprep.subr.msk.bf16.mxu0 %vm11749_vm4, %v10183_v62 }
 0xbb3   : > { %v10730_v26 = vpop.permute.xlu1 %10729 }
 0xbb4   : > { %v10732_v58 = vunpack.i.h.bf16 %v10730_v26  ;;  %v10731_v25 = vunpack.i.l.bf16 %v10730_v26  ;;  %9481 = vmatmul.mubr.msk.f32.gmra.mrb[72].mxu0 %vm983_vm3, %v12803_v15 }
 0xbb5   : > { %9483 = vmatprep.mubr.msk.f32.mxu0 %vm983_vm3, %v12816_v39 }
 0xbb6   : > { %v10155_v61 = vpack.c.bf16 %v10732_v58, %v10731_v25 }
 0xbb8   : > { %10156 = vmatprep.subr.bf16.mxu1 %v10155_v61  ;;  %9484 = vmatmul.mubr.msk.f32.gmra.mrb[74].mxu0 %vm983_vm3, %v12813_v5 }
 0xbb9   : > { %10158 = vmatpush3.bf16.msra.mxu1 %v10155_v61  ;;  %9486 = vmatprep.mubr.msk.f32.mxu0 %vm983_vm3, %v12824_v9 }
 0xbba   : > { %10188 = vmatpush3.bf16.xpose.msk.msra.mxu0 %vm11749_vm4, %v10183_v62 }
 0xbbb   : > { %10191 = vmatprep.subr.msk.bf16.mxu0 %vm11749_vm4, %v10189_v60 }
 0xbbc   : > { %9487 = vmatmul.mubr.msk.f32.gmra.mrb[76].mxu0 %vm983_vm3, %v12822_v18 }
 0xbbd   : > { %9489 = vmatprep.mubr.msk.f32.mxu0 %vm983_vm3, %v12832_v30 }
 0xbc0   : > { %9490 = vmatmul.mubr.msk.f32.gmra.mrb[78].mxu0 %vm983_vm3, %v12830_v22 }
 0xbc1   : > { %9564 = vmatprep.mubr.msk.f32.mxu0 %vm983_vm3, %v5059_v36 }
 0xbc2   : > { %10194 = vmatpush3.bf16.xpose.msk.msra.mxu0 %vm11749_vm4, %v10189_v60 }
 0xbc3   : > { %10197 = vmatprep.subr.msk.bf16.mxu0 %vm11749_vm4, %v10195_v63 }
 0xbca   : > { %10200 = vmatpush3.bf16.xpose.msk.msra.mxu0 %vm11749_vm4, %v10195_v63 }
 0xbcb   : > { %10203 = vmatprep.subr.msk.bf16.mxu0 %vm11749_vm4, %v10201_v46 }
 0xbd2   : > { %10206 = vmatpush3.bf16.xpose.msk.msra.mxu0 %vm11749_vm4, %v10201_v46 }
 0xbd9   : > { %9565 = vmatmul.mubr.msk.f32.vlgmr.msra.gmra.mrb[80].mxu0 %vm983_vm3, %v5061_v21 }
 0xbda   : > { %9567 = vmatprep.mubr.msk.f32.mxu0 %vm983_vm3, %v5063_v56 }
 0xbdd   : > { %9568 = vmatmul.mubr.msk.f32.gmra.mrb[82].mxu0 %vm983_vm3, %v5065_v51 }
 0xbde   : > { %9570 = vmatprep.mubr.msk.f32.mxu0 %vm983_vm3, %v5067_v47 }
 0xbe1   : > { %9571 = vmatmul.mubr.msk.f32.gmra.mrb[84].mxu0 %vm983_vm3, %v5069_v32 }
 0xbe2   : > { %9573 = vmatprep.mubr.msk.f32.mxu0 %vm983_vm3, %v5071_v43 }
 0xbe4   : > { %v12905_v4 = vpop.f32.mrb[60].mxu0 }
 0xbe5   : > { %14266 = vst [vmem:[#allocation17_spill] sm:$0xff] %v12905_v4  ;;  %v12907_v12 = vpop.f32.mrb[61].mxu0  ;;  %9574 = vmatmul.mubr.msk.f32.gmra.mrb[86].mxu0 %vm983_vm3, %v5073_v20 }
 0xbe6   : > { %9576 = vmatprep.mubr.msk.f32.mxu0 %vm983_vm3, %v5075_v29 }
 0xbe9   : > { %9577 = vmatmul.mubr.msk.f32.gmra.mrb[88].mxu0 %vm983_vm3, %v5077_v37 }
 0xbeb   : > { %v12912_v21 = vpop.f32.mrb[62].mxu0 }
 0xbec   : > { %14267 = vst [vmem:[#allocation18_spill] sm:$0xff] %v12912_v21  ;;  %v12914_v51 = vpop.f32.mrb[63].mxu0 }
 0xbed   : > { %14268 = vst [vmem:[#allocation19_spill] sm:$0xff] %v12914_v51 }
 0xbf2   : > { %v12916_v57 = vpop.f32.mrb[64].mxu0 }
 0xbf3   : > { %14269 = vst [vmem:[#allocation20_spill] sm:$0xff] %v12916_v57  ;;  %v12918_v32 = vpop.f32.mrb[65].mxu0 }
 0xbf4   : > { %14270 = vst [vmem:[#allocation21_spill] sm:$0xff] %v12918_v32 }
 0xbf6   : > { %v12920_v27 = vpop.f32.mrb[66].mxu0 }
 0xbf7   : > { %14271 = vst [vmem:[#allocation22_spill] sm:$0xff] %v12920_v27  ;;  %v12922_v50 = vpop.f32.mrb[67].mxu0 }
 0xbf8   : > { %14272 = vst [vmem:[#allocation23_spill] sm:$0xff] %v12922_v50 }
 0xbfa   : > { %v12924_v44 = vpop.f32.mrb[68].mxu0 }
 0xbfb   : > { %14273 = vst [vmem:[#allocation24_spill] sm:$0xff] %v12924_v44  ;;  %v12926_v62 = vpop.f32.mrb[69].mxu0 }
 0xbfc   : > { %14274 = vst [vmem:[#allocation25_spill] sm:$0xff] %v12926_v62 }
 0xc83   : > { %v9479_v20 = vpop.f32.mrb[70].mxu0 }
 0xc84   : > { %v4568_v26 = vpop.f32.mrb[71].mxu0  ;;  %v4620_v37 = vsel %vm1149_vm5, %v9479_v20, -inf }
 0xc85   : > { %4621 = vmax.xlane.f32.xlu1 %v4620_v37  ;;  %v4617_v58 = vsel %vm1149_vm5, %v4568_v26, -inf }
 0xc86   : > { %4618 = vmax.xlane.f32.xlu0 %v4617_v58 }
 0xc87   : > { %v9482_v25 = vpop.f32.mrb[72].mxu0 }
 0xc88   : > { %v4578_v7 = vpop.f32.mrb[73].mxu0  ;;  %v4626_v28 = vsel %vm1149_vm5, %v9482_v25, -inf }
 0xc89   : > { %v4623_v45 = vsel %vm1149_vm5, %v4578_v7, -inf }
 0xc8a   : > { %4627 = vmax.xlane.f32.xlu0 %v4626_v28 }
 0xc8b   : > { %v9485_v61 = vpop.f32.mrb[74].mxu0 }
 0xc8c   : > { %v4588_v60 = vpop.f32.mrb[75].mxu0  ;;  %v4632_v36 = vsel %vm1149_vm5, %v9485_v61, -inf }
 0xc8d   : > { %v4629_v24 = vsel %vm1149_vm5, %v4588_v60, -inf }
 0xc8e   : > { %4624 = vmax.xlane.f32.xlu0 %v4623_v45  ;;  %4630 = vmax.xlane.f32.xlu1 %v4629_v24 }
 0xc8f   : > { %v12933_v48 = vpop.f32.mrb[76].mxu0 }
 0xc90   : > { %v4598_v63 = vpop.f32.mrb[77].mxu0  ;;  %v4638_v56 = vsel %vm1149_vm5, %v12933_v48, -inf }
 0xc91   : > { %v4635_v55 = vsel %vm1149_vm5, %v4598_v63, -inf }
 0xc92   : > { %4633 = vmax.xlane.f32.xlu0 %v4632_v36  ;;  %4636 = vmax.xlane.f32.xlu1 %v4635_v55 }
 0xc93   : > { %v12937_v49 = vpop.f32.mrb[78].mxu0 }
 0xc94   : > { %v12939_v46 = vpop.f32.mrb[79].mxu0  ;;  %v4644_v43 = vsel %vm1177_vm6, %v12937_v49, -inf }
 0xc95   : > { %v4641_v47 = vsel %vm1149_vm5, %v12939_v46, -inf }
 0xc96   : > { %4639 = vmax.xlane.f32.xlu0 %v4638_v56  ;;  %4642 = vmax.xlane.f32.xlu1 %v4641_v47 }
 0xc9a   : > { %4645 = vmax.xlane.f32.xlu0 %v4644_v43 }
 0xca7   : > { %10739 = vrot.lane.b32.xlu1 %v12751_v41, %s11388_s23 }
 0xcac   : > { %v12949_v29 = vpop.f32.mrb[80].mxu0 }
 0xcad   : > { %v12951_v37 = vpop.f32.mrb[81].mxu0 }
 0xcb0   : > { %v12953_v58 = vpop.f32.mrb[82].mxu0  ;;  %10734 = vrot.lane.b32.xlu0 %v12736_v33, %s11388_s23 }
 0xcb1   : > { %v12957_v28 = vpop.f32.mrb[83].mxu0 }
 0xcb4   : > { %v12959_v45 = vpop.f32.mrb[84].mxu0 }
 0xcb5   : > { %v12961_v24 = vpop.f32.mrb[85].mxu0 }
 0xcb8   : > { %v12963_v36 = vpop.f32.mrb[86].mxu0 }
 0xcb9   : > { %v12965_v55 = vpop.f32.mrb[87].mxu0 }
 0xcbc   : > { %v12967_v56 = vpop.f32.mrb[88].mxu0 }
 0xcbd   : > { %v12969_v47 = vpop.f32.mrb[89].mxu0 }
 0xd12   : > { %v4622_v43 = vpop.xlane.xlu1 %4621 }
 0xd13   : > { %v4648_v19 = vsub.f32 %v9479_v20, %v4622_v43  ;;  %v4619_v2 = vpop.xlane.xlu0 %4618 }
 0xd14   : > { %v4647_v44 = vsub.f32 %v4568_v26, %v4619_v2 }
 0xd15   : > { %v4659_v6 = vmul.f32 1.442695, %v4648_v19 }
 0xd16   : > { %v4657_v62 = vmul.f32 1.442695, %v4647_v44 }
 0xd17   : > { %11078 = vpow2.f32 %v4659_v6  ;;  %v4628_v0 = vpop.xlane.xlu0 %4627 }
 0xd18   : > { %11080 = vpow2.f32 %v4657_v62  ;;  %v4650_v27 = vsub.f32 %v9482_v25, %v4628_v0 }
 0xd1a   : > { %v4663_v3 = vmul.f32 1.442695, %v4650_v27 }
 0xd1b   : > { %v4625_v50 = vpop.xlane.xlu0 %4624  ;;  %v4631_v1 = vpop.xlane.xlu1 %4630 }
 0xd1c   : > { %11082 = vpow2.f32 %v4663_v3  ;;  %v4649_v57 = vsub.f32 %v4578_v7, %v4625_v50  ;;  %v4651_v23 = vsub.f32 %v4588_v60, %v4631_v1 }
 0xd1e   : > { %v4661_v32 = vmul.f32 1.442695, %v4649_v57  ;;  %v4665_v2 = vmul.f32 1.442695, %v4651_v23 }
 0xd1f   : > { %v4634_v59 = vpop.xlane.xlu0 %4633  ;;  %v4637_v21 = vpop.xlane.xlu1 %4636 }
 0xd20   : > { %11084 = vpow2.f32 %v4661_v32  ;;  %v4652_v38 = vsub.f32 %v9485_v61, %v4634_v59  ;;  %v4653_v20 = vsub.f32 %v4598_v63, %v4637_v21 }
 0xd21   : > { %v12971_v43 = vpop.eup %11078 }
 0xd22   : > { %v12973_v19 = vpop.eup %11080  ;;  %v4667_v6 = vmul.f32 1.442695, %v4652_v38  ;;  %v4669_v44 = vmul.f32 1.442695, %v4653_v20  ;;  %v4680_v0 = vsel %vm1149_vm5, %v12971_v43, 0.0 }
 0xd23   : > { %v4640_v27 = vpop.xlane.xlu0 %4639  ;;  %4681 = vadd.xlane.f32.xlu0 %v4680_v0  ;;  %v4643_v3 = vpop.xlane.xlu1 %4642  ;;  %v4677_v1 = vsel %vm1149_vm5, %v12973_v19, 0.0 }
 0xd24   : > { %11086 = vpow2.f32 %v4667_v6  ;;  %v4654_v59 = vsub.f32 %v12933_v48, %v4640_v27  ;;  %4678 = vadd.xlane.f32.xlu1 %v4677_v1  ;;  %v4655_v26 = vsub.f32 %v12939_v46, %v4643_v3 }
 0xd25   : > { %11088 = vpow2.f32 %v4669_v44 }
 0xd26   : > { %v12980_v21 = vpop.eup %11082  ;;  %11090 = vpow2.f32 %v4665_v2  ;;  %v4671_v23 = vmul.f32 1.442695, %v4654_v59 }
 0xd27   : > { %v4646_v38 = vpop.xlane.xlu0 %4645  ;;  %v4686_v57 = vsel %vm1149_vm5, %v12980_v21, 0.0  ;;  %v10740_v50 = vpop.permute.xlu1 %10739 }
 0xd28   : > { %v4656_v32 = vsub.f32 %v12937_v49, %v4646_v38  ;;  %4687 = vadd.xlane.f32.xlu0 %v4686_v57  ;;  %11092 = vpow2.f32 %v4671_v23  ;;  %v10742_v60 = vunpack.i.h.bf16 %v10740_v50  ;;  %v10741_v48 = vunpack.i.l.bf16 %v10740_v50 }
 0xd29   : > { %v4673_v49 = vmul.f32 1.442695, %v4655_v26  ;;  %v5253_v26 = vsel %vm1149_vm5, %v12951_v37, -inf }
 0xd2a   : > { %v12985_v62 = vpop.eup %11084  ;;  %v4675_v25 = vmul.f32 1.442695, %v4656_v32  ;;  %v10163_v3 = vpack.c.bf16 %v10742_v60, %v10741_v48  ;;  %v5265_v60 = vsel %vm1149_vm5, %v12961_v24, -inf  ;;  %v5268_v48 = vsel %vm1149_vm5, %v12959_v45, -inf }
 0xd2b   : > { %v10735_v7 = vpop.permute.xlu0 %10734  ;;  %v4683_v61 = vsel %vm1149_vm5, %v12985_v62, 0.0 }
 0xd2c   : > { %v10737_v63 = vunpack.i.h.bf16 %v10735_v7  ;;  %v10736_v20 = vunpack.i.l.bf16 %v10735_v7  ;;  %4684 = vadd.xlane.f32.xlu1 %v4683_v61  ;;  %11094 = vpow2.f32 %v4675_v25  ;;  %v5259_v25 = vsel %vm1149_vm5, %v12957_v28, -inf }
 0xd2d   : > { %11096 = vpow2.f32 %v4673_v49  ;;  %v5256_v7 = vsel %vm1149_vm5, %v12949_v29, -inf  ;;  %v5262_v61 = vsel %vm1149_vm5, %v12953_v58, -inf  ;;  %v5277_v49 = vsel %vm1149_vm5, %v12969_v47, -inf }
 0xd2e   : > { %v12990_v2 = vpop.eup %11086  ;;  %v10159_v6 = vpack.c.bf16 %v10737_v63, %v10736_v20  ;;  %v5271_v63 = vsel %vm1149_vm5, %v12965_v55, -inf  ;;  %v5274_v20 = vsel %vm1149_vm5, %v12963_v36, -inf }
 0xd2f   : > { %v12992_v44 = vpop.eup %11088  ;;  %v4692_v46 = vsel %vm1149_vm5, %v12990_v2, 0.0 }
 0xd30   : > { %v12996_v0 = vpop.eup %11090  ;;  %4693 = vadd.xlane.f32.xlu0 %v4692_v46  ;;  %10160 = vmatprep.subr.bf16.mxu1 %v10159_v6  ;;  %v4695_v27 = vsel %vm1149_vm5, %v12992_v44, 0.0 }
 0xd31   : > { %4696 = vadd.xlane.f32.xlu1 %v4695_v27  ;;  %10162 = vmatpush3.bf16.msra.mxu1 %v10159_v6  ;;  %v4689_v1 = vsel %vm1149_vm5, %v12996_v0, 0.0  ;;  %v5280_v6 = vsel %vm1177_vm6, %v12967_v56, -inf }
 0xd32   : > { %10164 = vmatprep.subr.bf16.mxu1 %v10163_v3  ;;  %v13002_v59 = vpop.eup %11092 }
 0xd33   : > { %v4698_v23 = vsel %vm1149_vm5, %v13002_v59, 0.0 }
 0xd34   : > { %4690 = vadd.xlane.f32.xlu0 %v4689_v1 }
 0xd35   : > { %10166 = vmatpush3.bf16.msra.mxu1 %v10163_v3 }
 0xd36   : > { %v13006_v38 = vpop.eup %11094 }
 0xd37   : > { %v4704_v57 = vsel %vm1177_vm6, %v13006_v38, 0.0  ;;  %v13010_v32 = vpop.eup %11096 }
 0xd38   : > { %4699 = vadd.xlane.f32.xlu0 %v4698_v23  ;;  %v4701_v50 = vsel %vm1149_vm5, %v13010_v32, 0.0 }
 0xd3c   : > { %4705 = vadd.xlane.f32.xlu0 %v4704_v57 }
 0xd40   : > { %4702 = vadd.xlane.f32.xlu0 %v4701_v50 }
 0xd42   : > { %10744 = vrot.lane.b32.xlu1 %v12758_v14, %s11388_s23 }
 0xd46   : > { %10754 = vrot.lane.b32.xlu1 %v12725_v13, %s11389_s14 }
 0xd4a   : > { %10759 = vrot.lane.b32.xlu1 %v12736_v33, %s11389_s14 }
 0xd4e   : > { %10764 = vrot.lane.b32.xlu1 %v12751_v41, %s11389_s14 }
 0xd52   : > { %10769 = vrot.lane.b32.xlu1 %v12758_v14, %s11389_s14 }
 0xd56   : > { %10774 = vrot.lane.b32.xlu1 %v12768_v31, %s11389_s14  ;;  %10749 = vrot.lane.b32.xlu0 %v12768_v31, %s11388_s23  ;;  %s14294_s14 = sld [smem:[#allocation35_spill]] (!%p8488_p5) }
 0xd5a   : > { %5696 = vrot.lane.b32.xlu1 %v12796_v42, %s11390_s5  ;;  %5694 = vrot.lane.b32.xlu0 %v12786_v16, %s11390_s5 }
 0xd5e   : > { %5700 = vrot.lane.b32.xlu1 %v12803_v15, %s11390_s5  ;;  %5698 = vrot.lane.b32.xlu0 %v12806_v35, %s11390_s5 }
 0xd62   : > { %5704 = vrot.lane.b32.xlu1 %v12813_v5, %s11390_s5  ;;  %5702 = vrot.lane.b32.xlu0 %v12816_v39, %s11390_s5 }
 0xd66   : > { %5708 = vrot.lane.b32.xlu1 %v12822_v18, %s11390_s5  ;;  %5706 = vrot.lane.b32.xlu0 %v12824_v9, %s11390_s5 }
 0xd6a   : > { %5712 = vrot.lane.b32.xlu1 %v12830_v22, %s11390_s5  ;;  %5710 = vrot.lane.b32.xlu0 %v12832_v30, %s11390_s5 }
 0xd89   : > { %5254 = vmax.xlane.f32.xlu0 %v5253_v26 }
 0xd8d   : > { %5260 = vmax.xlane.f32.xlu0 %v5259_v25 }
 0xd8e   : > { %5257 = vmax.xlane.f32.xlu1 %v5256_v7 }
 0xd91   : > { %5263 = vmax.xlane.f32.xlu0 %v5262_v61 }
 0xd92   : > { %5266 = vmax.xlane.f32.xlu1 %v5265_v60 }
 0xd95   : > { %5269 = vmax.xlane.f32.xlu0 %v5268_v48 }
 0xd96   : > { %5272 = vmax.xlane.f32.xlu1 %v5271_v63 }
 0xd99   : > { %5275 = vmax.xlane.f32.xlu0 %v5274_v20 }
 0xd9a   : > { %5278 = vmax.xlane.f32.xlu1 %v5277_v49 }
 0xd9d   : > { %5281 = vmax.xlane.f32.xlu0 %v5280_v6 }
 0xdab   : > { %10779 = vrot.lane.b32.xlu1 %v12725_v13, %s11391_s2 }
 0xdaf   : > { %10789 = vrot.lane.b32.xlu1 %v12751_v41, %s11391_s2 }
 0xdb0   : > { %v4682_v27 = vpop.xlane.xlu0 %4681 }
 0xdb1   : > { %v4679_v46 = vpop.xlane.xlu1 %4678 }
 0xdb2   : > { %11098 = vrcp.f32 %v4679_v46 }
 0xdb3   : > { %10784 = vrot.lane.b32.xlu0 %v12736_v33, %s11391_s2  ;;  %11100 = vrcp.f32 %v4682_v27 }
 0xdb5   : > { %v4688_v3 = vpop.xlane.xlu0 %4687 }
 0xdb9   : > { %v4685_v1 = vpop.xlane.xlu1 %4684 }
 0xdba   : > { %11102 = vrcp.f32 %v4685_v1 }
 0xdbb   : > { %11104 = vrcp.f32 %v4688_v3 }
 0xdbc   : > { %v11099_v23 = vpop.eup %11098 }
 0xdbd   : > { %v4694_v57 = vpop.xlane.xlu0 %4693  ;;  %v4717_v50 = vmul.f32 %v11099_v23, %v12973_v19 }
 0xdbe   : > { %v4697_v26 = vpop.xlane.xlu1 %4696 }
 0xdbf   : > { %9512 = vmatprep.mubr.msk.f32.mxu1 %vm1149_vm5, %v4717_v50 }
 0xdc1   : > { %v4691_v25 = vpop.xlane.xlu0 %4690 }
 0xdc2   : > { %v10745_v7 = vpop.permute.xlu1 %10744  ;;  %11106 = vrcp.f32 %v4691_v25 }
 0xdc3   : > { %v10747_v61 = vunpack.i.h.bf16 %v10745_v7  ;;  %v10746_v60 = vunpack.i.l.bf16 %v10745_v7  ;;  %11108 = vrcp.f32 %v4694_v57 }
 0xdc4   : > { %11110 = vrcp.f32 %v4697_v26 }
 0xdc5   : > { %v4700_v48 = vpop.xlane.xlu0 %4699  ;;  %v10167_v63 = vpack.c.bf16 %v10747_v61, %v10746_v60 }
 0xdc6   : > { %v10755_v20 = vpop.permute.xlu1 %10754  ;;  %11112 = vrcp.f32 %v4700_v48 }
 0xdc7   : > { %v10757_v49 = vunpack.i.h.bf16 %v10755_v20  ;;  %v10756_v6 = vunpack.i.l.bf16 %v10755_v20  ;;  %10168 = vmatprep.subr.bf16.mxu1 %v10167_v63 }
 0xdc8   : > { %10170 = vmatpush3.bf16.msra.mxu1 %v10167_v63 }
 0xdc9   : > { %v10229_v46 = vpack.c.bf16 %v10757_v49, %v10756_v6  ;;  %v4706_v51 = vpop.xlane.xlu0 %4705 }
 0xdca   : > { %v10760_v34 = vpop.permute.xlu1 %10759 }
 0xdcb   : > { %v10762_v4 = vunpack.i.h.bf16 %v10760_v34  ;;  %v10761_v19 = vunpack.i.l.bf16 %v10760_v34  ;;  %10231 = vmatprep.subr.msk.bf16.mxu0 %vm11749_vm4, %v10229_v46 }
 0xdcc   : > { %10234 = vmatpush3.bf16.xpose.msk.msra.mxu0 %vm11749_vm4, %v10229_v46  ;;  %v11329_v46 = vld [vmem:[%s11520_s22] sm:$0xff] }
 0xdcd   : > { %v10235_v23 = vpack.c.bf16 %v10762_v4, %v10761_v19  ;;  %v4703_v50 = vpop.xlane.xlu0 %4702  ;;  %v11101_v4 = vpop.eup %11100 }
 0xdce   : > { %v10765_v7 = vpop.permute.xlu1 %10764  ;;  %v11103_v6 = vpop.eup %11102  ;;  %v4718_v25 = vmul.f32 %v11101_v4, %v12971_v43  ;;  %11114 = vrcp.f32 %v4703_v50 }
 0xdcf   : > { %v10767_v61 = vunpack.i.h.bf16 %v10765_v7  ;;  %v10766_v60 = vunpack.i.l.bf16 %v10765_v7  ;;  %10237 = vmatprep.subr.msk.bf16.mxu0 %vm11749_vm4, %v10235_v23  ;;  %v11105_v19 = vpop.eup %11104  ;;  %11116 = vrcp.f32 %v4706_v51 }
 0xdd0   : > { %v11107_v7 = vpop.eup %11106  ;;  %v4720_v43 = vmul.f32 %v11105_v19, %v12980_v21 }
 0xdd1   : > { %v10750_v27 = vpop.permute.xlu0 %10749  ;;  %v10241_v20 = vpack.c.bf16 %v10767_v61, %v10766_v60  ;;  %v11109_v50 = vpop.eup %11108 }
 0xdd2   : > { %v10752_v63 = vunpack.i.h.bf16 %v10750_v27  ;;  %v10751_v34 = vunpack.i.l.bf16 %v10750_v27  ;;  %v10770_v49 = vpop.permute.xlu1 %10769  ;;  %v11111_v60 = vpop.eup %11110 }
 0xdd3   : > { %v10772_v57 = vunpack.i.h.bf16 %v10770_v49  ;;  %v10771_v26 = vunpack.i.l.bf16 %v10770_v49 }
 0xdd4   : > { %v10171_v1 = vpack.c.bf16 %v10752_v63, %v10751_v34  ;;  %10240 = vmatpush3.bf16.xpose.msk.msra.mxu0 %vm11749_vm4, %v10235_v23  ;;  %v4719_v23 = vmul.f32 %v11103_v6, %v12985_v62  ;;  %v4721_v62 = vmul.f32 %v11107_v7, %v12996_v0  ;;  %v4722_v63 = vmul.f32 %v11109_v50, %v12990_v2  ;;  %v11113_v34 = vpop.eup %11112 }
 0xdd5   : > { %10243 = vmatprep.subr.msk.bf16.mxu0 %vm11749_vm4, %v10241_v20  ;;  %v5695_v3 = vpop.permute.xlu0 %5694  ;;  %v10247_v61 = vpack.c.bf16 %v10772_v57, %v10771_v26  ;;  %v4724_v0 = vmul.f32 %v11113_v34, %v13002_v59 }
 0xdd6   : > { %10173 = vmatprep.subr.msk.bf16.mxu1 %vm11975_vm9, %v10171_v1  ;;  %9651 = vmatprep.mubr.msk.f32.mxu0 %vm983_vm3, %v5695_v3  ;;  %v10775_v48 = vpop.permute.xlu1 %10774 }
 0xdd7   : > { %10176 = vmatpush3.bf16.msk.msra.mxu1 %vm11975_vm9, %v10171_v1  ;;  %v10777_v51 = vunpack.i.h.bf16 %v10775_v48  ;;  %v10776_v27 = vunpack.i.l.bf16 %v10775_v48 }
 0xdd8   : > { %9527 = vmatprep.subr.mxu1 %v11329_v46  ;;  %v11115_v1 = vpop.eup %11114 }
 0xdd9   : > { %v10253_v21 = vpack.c.bf16 %v10777_v51, %v10776_v27  ;;  %v11117_v49 = vpop.eup %11116  ;;  %v4725_v2 = vmul.f32 %v11115_v1, %v13010_v32  ;;  %v5699_v3 = vpop.permute.xlu0 %5698 }
 0xdda   : > { %9513 = vmatmul.mubr.msk.f32.vlgmr.msra.gmra.mrb[60].mxu1 %vm1149_vm5, %v4718_v25  ;;  %v5697_v4 = vpop.permute.xlu1 %5696 }
 0xddb   : > { %9515 = vmatprep.mubr.msk.f32.mxu1 %vm1149_vm5, %v4719_v23  ;;  %9528 = vmatpush3.msra.mxu1 %v11329_v46 }
 0xddc   : > { %10246 = vmatpush3.bf16.xpose.msk.msra.mxu0 %vm11749_vm4, %v10241_v20  ;;  %v4723_v20 = vmul.f32 %v11111_v60, %v12992_v44  ;;  %v4726_v44 = vmul.f32 %v11117_v49, %v13006_v38 }
 0xddd   : > { %10249 = vmatprep.subr.msk.bf16.mxu0 %vm11749_vm4, %v10247_v61  ;;  %v5703_v6 = vpop.permute.xlu0 %5702 }
 0xdde   : > { %9516 = vmatmul.mubr.msk.f32.gmra.mrb[62].mxu1 %vm1149_vm5, %v4720_v43  ;;  %v5701_v59 = vpop.permute.xlu1 %5700 }
 0xddf   : > { %9518 = vmatprep.mubr.msk.f32.mxu1 %vm1149_vm5, %v4721_v62 }
 0xde1   : > { %v5707_v57 = vpop.permute.xlu0 %5706 }
 0xde2   : > { %9519 = vmatmul.mubr.msk.f32.gmra.mrb[64].mxu1 %vm1149_vm5, %v4722_v63  ;;  %v5705_v32 = vpop.permute.xlu1 %5704 }
 0xde3   : > { %9521 = vmatprep.mubr.msk.f32.mxu1 %vm1149_vm5, %v4723_v20 }
 0xde4   : > { %10252 = vmatpush3.bf16.xpose.msk.msra.mxu0 %vm11749_vm4, %v10247_v61 }
 0xde5   : > { %10255 = vmatprep.subr.msk.bf16.mxu0 %vm11749_vm4, %v10253_v21  ;;  %v5711_v26 = vpop.permute.xlu0 %5710 }
 0xde6   : > { %9522 = vmatmul.mubr.msk.f32.gmra.mrb[66].mxu1 %vm1149_vm5, %v4724_v0  ;;  %v5709_v38 = vpop.permute.xlu1 %5708 }
 0xde7   : > { %9524 = vmatprep.mubr.msk.f32.mxu1 %vm1149_vm5, %v4725_v2 }
 0xdea   : > { %9525 = vmatmul.mubr.msk.f32.gmra.mrb[68].mxu1 %vm1149_vm5, %v4726_v44  ;;  %v5713_v25 = vpop.permute.xlu1 %5712 }
 0xdec   : > { %10258 = vmatpush3.bf16.xpose.msk.msra.mxu0 %vm11749_vm4, %v10253_v21 }
 0xdf3   : > { %9652 = vmatmul.mubr.msk.f32.vlgmr.msra.gmra.mrb[90].mxu0 %vm983_vm3, %v5697_v4 }
 0xdf4   : > { %9654 = vmatprep.mubr.msk.f32.mxu0 %vm983_vm3, %v5699_v3 }
 0xdf7   : > { %9655 = vmatmul.mubr.msk.f32.gmra.mrb[92].mxu0 %vm983_vm3, %v5701_v59 }
 0xdf8   : > { %9657 = vmatprep.mubr.msk.f32.mxu0 %vm983_vm3, %v5703_v6 }
 0xdfb   : > { %9658 = vmatmul.mubr.msk.f32.gmra.mrb[94].mxu0 %vm983_vm3, %v5705_v32 }
 0xdfc   : > { %9660 = vmatprep.mubr.msk.f32.mxu0 %vm983_vm3, %v5707_v57 }
 0xdff   : > { %9661 = vmatmul.mubr.msk.f32.gmra.mrb[96].mxu0 %vm983_vm3, %v5709_v38 }
 0xe00   : > { %9663 = vmatprep.mubr.msk.f32.mxu0 %vm983_vm3, %v5711_v26 }
 0xe03   : > { %9664 = vmatmul.mubr.msk.f32.gmra.mrb[98].mxu0 %vm983_vm3, %v5713_v25 }
 0xe16   : > { %v5255_v46 = vpop.xlane.xlu0 %5254 }
 0xe17   : > { %v5283_v19 = vsub.f32 %v12951_v37, %v5255_v46 }
 0xe19   : > { %v5293_v23 = vmul.f32 1.442695, %v5283_v19 }
 0xe1a   : > { %v5261_v7 = vpop.xlane.xlu0 %5260 }
 0xe1b   : > { %11118 = vpow2.f32 %v5293_v23  ;;  %v5285_v61 = vsub.f32 %v12957_v28, %v5261_v7  ;;  %v5258_v48 = vpop.xlane.xlu1 %5257 }
 0xe1c   : > { %v5284_v43 = vsub.f32 %v12949_v29, %v5258_v48 }
 0xe1d   : > { %v5297_v50 = vmul.f32 1.442695, %v5285_v61 }
 0xe1e   : > { %v5295_v62 = vmul.f32 1.442695, %v5284_v43  ;;  %v5264_v60 = vpop.xlane.xlu0 %5263 }
 0xe1f   : > { %11120 = vpow2.f32 %v5297_v50  ;;  %v5286_v51 = vsub.f32 %v12953_v58, %v5264_v60  ;;  %v5267_v27 = vpop.xlane.xlu1 %5266 }
 0xe20   : > { %11122 = vpow2.f32 %v5295_v62  ;;  %v5287_v34 = vsub.f32 %v12961_v24, %v5267_v27 }
 0xe21   : > { %v5299_v63 = vmul.f32 1.442695, %v5286_v51 }
 0xe22   : > { %v5270_v37 = vpop.xlane.xlu0 %5269  ;;  %v5301_v0 = vmul.f32 1.442695, %v5287_v34 }
 0xe23   : > { %11124 = vpow2.f32 %v5299_v63  ;;  %v5288_v20 = vsub.f32 %v12959_v45, %v5270_v37  ;;  %v5273_v1 = vpop.xlane.xlu1 %5272 }
 0xe24   : > { %v5289_v28 = vsub.f32 %v12965_v55, %v5273_v1 }
 0xe25   : > { %v13136_v21 = vpop.eup %11118  ;;  %v5303_v29 = vmul.f32 1.442695, %v5288_v20 }
 0xe26   : > { %v5305_v49 = vmul.f32 1.442695, %v5289_v28  ;;  %v5276_v2 = vpop.xlane.xlu0 %5275  ;;  %v5313_v58 = vsel %vm1149_vm5, %v13136_v21, 0.0 }
 0xe27   : > { %11126 = vpow2.f32 %v5303_v29  ;;  %v5290_v44 = vsub.f32 %v12963_v36, %v5276_v2  ;;  %v5279_v24 = vpop.xlane.xlu1 %5278  ;;  %5314 = vadd.xlane.f32.xlu1 %v5313_v58 }
 0xe28   : > { %11128 = vpow2.f32 %v5305_v49  ;;  %v5291_v25 = vsub.f32 %v12969_v47, %v5279_v24 }
 0xe29   : > { %v13141_v4 = vpop.eup %11120  ;;  %11130 = vpow2.f32 %v5301_v0  ;;  %v5307_v55 = vmul.f32 1.442695, %v5290_v44 }
 0xe2a   : > { %v13143_v45 = vpop.eup %11122  ;;  %v5282_v3 = vpop.xlane.xlu0 %5281  ;;  %v5319_v59 = vsel %vm1149_vm5, %v13141_v4, 0.0  ;;  %v5309_v61 = vmul.f32 1.442695, %v5291_v25 }
 0xe2b   : > { %v5292_v6 = vsub.f32 %v12967_v56, %v5282_v3  ;;  %v10780_v32 = vpop.permute.xlu1 %10779  ;;  %5320 = vadd.xlane.f32.xlu1 %v5319_v59  ;;  %v5316_v36 = vsel %vm1149_vm5, %v13143_v45, 0.0  ;;  %11132 = vpow2.f32 %v5307_v55 }
 0xe2c   : > { %v10782_v57 = vunpack.i.h.bf16 %v10780_v32  ;;  %v10781_v38 = vunpack.i.l.bf16 %v10780_v32  ;;  %5317 = vadd.xlane.f32.xlu0 %v5316_v36 }
 0xe2d   : > { %v13150_v26 = vpop.eup %11124  ;;  %v5311_v46 = vmul.f32 1.442695, %v5292_v6 }
 0xe2e   : > { %v5322_v19 = vsel %vm1149_vm5, %v13150_v26, 0.0  ;;  %v10207_v23 = vpack.c.bf16 %v10782_v57, %v10781_v38 }
 0xe2f   : > { %11134 = vpow2.f32 %v5311_v46 }
 0xe30   : > { %5323 = vadd.xlane.f32.xlu0 %v5322_v19  ;;  %10208 = vmatprep.subr.bf16.mxu1 %v10207_v23  ;;  %11136 = vpow2.f32 %v5309_v61 }
 0xe31   : > { %v13155_v56 = vpop.eup %11126 }
 0xe32   : > { %v13157_v7 = vpop.eup %11128  ;;  %v5328_v48 = vsel %vm1149_vm5, %v13155_v56, 0.0 }
 0xe33   : > { %v5331_v47 = vsel %vm1149_vm5, %v13157_v7, 0.0  ;;  %v13163_v43 = vpop.eup %11130 }
 0xe34   : > { %5329 = vadd.xlane.f32.xlu0 %v5328_v48  ;;  %5332 = vadd.xlane.f32.xlu1 %v5331_v47  ;;  %v5325_v50 = vsel %vm1149_vm5, %v13163_v43, 0.0 }
 0xe35   : > { %v13167_v62 = vpop.eup %11132 }
 0xe36   : > { %v5334_v60 = vsel %vm1149_vm5, %v13167_v62, 0.0 }
 0xe38   : > { %5326 = vadd.xlane.f32.xlu0 %v5325_v50 }
 0xe39   : > { %v13171_v51 = vpop.eup %11134 }
 0xe3a   : > { %v5340_v27 = vsel %vm1177_vm6, %v13171_v51, 0.0  ;;  %v13175_v63 = vpop.eup %11136 }
 0xe3b   : > { %v5337_v34 = vsel %vm1149_vm5, %v13175_v63, 0.0 }
 0xe3c   : > { %5335 = vadd.xlane.f32.xlu0 %v5334_v60 }
 0xe40   : > { %5341 = vadd.xlane.f32.xlu0 %v5340_v27 }
 0xe44   : > { %5338 = vadd.xlane.f32.xlu0 %v5337_v34 }
 0xe45   : > { %10794 = vrot.lane.b32.xlu1 %v12758_v14, %s11391_s2 }
 0xe49   : > { %10804 = vrot.lane.b32.xlu1 %v12725_v13, %s11393_s6 }
 0xe4d   : > { %10809 = vrot.lane.b32.xlu1 %v12736_v33, %s11393_s6 }
 0xe51   : > { %10814 = vrot.lane.b32.xlu1 %v12751_v41, %s11393_s6 }
 0xe55   : > { %10819 = vrot.lane.b32.xlu1 %v12758_v14, %s11393_s6 }
 0xe59   : > { %10824 = vrot.lane.b32.xlu1 %v12768_v31, %s11393_s6 }
 0xe5a   : > { %10799 = vrot.lane.b32.xlu0 %v12768_v31, %s11391_s2 }
 0xe5d   : > { %6332 = vrot.lane.b32.xlu1 %v12796_v42, %s11394_s15 }
 0xe5e   : > { %6330 = vrot.lane.b32.xlu0 %v12786_v16, %s11394_s15  ;;  %v10785_v16 = vpop.permute.xlu0 %10784 }
 0xe5f   : > { %v10787_v42 = vunpack.i.h.bf16 %v10785_v16 }
 0xe61   : > { %6336 = vrot.lane.b32.xlu1 %v12803_v15, %s11394_s15  ;;  %v10786_v15 = vunpack.i.l.bf16 %v10785_v16 }
 0xe62   : > { %6334 = vrot.lane.b32.xlu0 %v12806_v35, %s11394_s15  ;;  %v10790_v35 = vpop.permute.xlu1 %10789 }
 0xe63   : > { %v10791_v20 = vunpack.i.l.bf16 %v10790_v35 }
 0xe65   : > { %6340 = vrot.lane.b32.xlu1 %v12813_v5, %s11394_s15 }
 0xe66   : > { %6338 = vrot.lane.b32.xlu0 %v12816_v39, %s11394_s15  ;;  %v10792_v39 = vunpack.i.h.bf16 %v10790_v35 }
 0xe68   : > { %v10215_v1 = vpack.c.bf16 %v10792_v39, %v10791_v20 }
 0xe69   : > { %6344 = vrot.lane.b32.xlu1 %v12822_v18, %s11394_s15  ;;  %v10211_v18 = vpack.c.bf16 %v10787_v42, %v10786_v15 }
 0xe6a   : > { %6342 = vrot.lane.b32.xlu0 %v12824_v9, %s11394_s15 }
 0xe6d   : > { %6348 = vrot.lane.b32.xlu1 %v12830_v22, %s11394_s15 }
 0xe6e   : > { %6346 = vrot.lane.b32.xlu0 %v12832_v30, %s11394_s15 }
 0xead   : > { %v9514_v5 = vpop.f32.mrb[60].mxu1 }
 0xeae   : > { %v4854_v37 = vpop.f32.mrb[61].mxu1 }
 0xeaf   : > { %9529 = vmatprep.mubr.msk.f32.mxu1 %vm983_vm3, %v4854_v37 }
 0xeb0   : > { %9530 = vmatmul.mubr.msk.f32.vlgmr.msra.gmra.mrb[70].mxu1 %vm983_vm3, %v9514_v5 }
 0xeb1   : > { %10210 = vmatpush3.bf16.msra.mxu1 %v10207_v23  ;;  %v9517_v9 = vpop.f32.mrb[62].mxu1 }
 0xeb2   : > { %10212 = vmatprep.subr.bf16.mxu1 %v10211_v18  ;;  %v4864_v22 = vpop.f32.mrb[63].mxu1 }
 0xeb3   : > { %9532 = vmatprep.mubr.msk.f32.mxu1 %vm983_vm3, %v4864_v22 }
 0xeb4   : > { %v5315_v30 = vpop.xlane.xlu1 %5314  ;;  %9533 = vmatmul.mubr.msk.f32.gmra.mrb[72].mxu1 %vm983_vm3, %v9517_v9 }
 0xeb5   : > { %11138 = vrcp.f32 %v5315_v30  ;;  %10214 = vmatpush3.bf16.msra.mxu1 %v10211_v18  ;;  %v9520_v28 = vpop.f32.mrb[64].mxu1 }
 0xeb6   : > { %10216 = vmatprep.subr.bf16.mxu1 %v10215_v1  ;;  %v4874_v29 = vpop.f32.mrb[65].mxu1 }
 0xeb7   : > { %9535 = vmatprep.mubr.msk.f32.mxu1 %vm983_vm3, %v4874_v29 }
 0xeb8   : > { %9536 = vmatmul.mubr.msk.f32.gmra.mrb[74].mxu1 %vm983_vm3, %v9520_v28  ;;  %v5321_v58 = vpop.xlane.xlu1 %5320 }
 0xeb9   : > { %v5318_v0 = vpop.xlane.xlu0 %5317  ;;  %10218 = vmatpush3.bf16.msra.mxu1 %v10215_v1  ;;  %v9523_v49 = vpop.f32.mrb[66].mxu1 }
 0xeba   : > { %v4884_v2 = vpop.f32.mrb[67].mxu1  ;;  %11140 = vrcp.f32 %v5318_v0 }
 0xebb   : > { %9538 = vmatprep.mubr.msk.f32.mxu1 %vm983_vm3, %v4884_v2  ;;  %11142 = vrcp.f32 %v5321_v58 }
 0xebc   : > { %9539 = vmatmul.mubr.msk.f32.gmra.mrb[76].mxu1 %vm983_vm3, %v9523_v49 }
 0xebd   : > { %v5324_v44 = vpop.xlane.xlu0 %5323  ;;  %v9526_v24 = vpop.f32.mrb[68].mxu1 }
 0xebe   : > { %v4894_v55 = vpop.f32.mrb[69].mxu1  ;;  %11144 = vrcp.f32 %v5324_v44 }
 0xebf   : > { %v11139_v3 = vpop.eup %11138  ;;  %9541 = vmatprep.mubr.msk.f32.mxu1 %vm983_vm3, %v4894_v55 }
 0xec0   : > { %9542 = vmatmul.mubr.msk.f32.gmra.mrb[78].mxu1 %vm983_vm3, %v9526_v24  ;;  %v5353_v59 = vmul.f32 %v11139_v3, %v13136_v21 }
 0xec1   : > { %v5330_v6 = vpop.xlane.xlu0 %5329  ;;  %v5333_v32 = vpop.xlane.xlu1 %5332 }
 0xec2   : > { %9599 = vmatprep.mubr.msk.f32.mxu1 %vm1149_vm5, %v5353_v59 }
 0xec5   : > { %v5327_v36 = vpop.xlane.xlu0 %5326  ;;  %v10795_v57 = vpop.permute.xlu1 %10794 }
 0xec6   : > { %v10797_v38 = vunpack.i.h.bf16 %v10795_v57  ;;  %v10796_v25 = vunpack.i.l.bf16 %v10795_v57  ;;  %v13225_v46 = vpop.f32.mrb[90].mxu0  ;;  %11146 = vrcp.f32 %v5327_v36 }
 0xec7   : > { %v13227_v19 = vpop.f32.mrb[91].mxu0  ;;  %v5892_v23 = vsel %vm1149_vm5, %v13225_v46, -inf  ;;  %11148 = vrcp.f32 %v5330_v6 }
 0xec8   : > { %5893 = vmax.xlane.f32.xlu1 %v5892_v23  ;;  %v5889_v61 = vsel %vm1149_vm5, %v13227_v19, -inf  ;;  %v10219_v21 = vpack.c.bf16 %v10797_v38, %v10796_v25  ;;  %11150 = vrcp.f32 %v5333_v32 }
 0xec9   : > { %v13233_v48 = vpop.xlane.xlu0 %5335  ;;  %v10805_v47 = vpop.permute.xlu1 %10804  ;;  %5890 = vmax.xlane.f32.xlu0 %v5889_v61 }
 0xeca   : > { %v10807_v50 = vunpack.i.h.bf16 %v10805_v47  ;;  %v10806_v60 = vunpack.i.l.bf16 %v10805_v47  ;;  %10220 = vmatprep.subr.bf16.mxu1 %v10219_v21  ;;  %v13235_v27 = vpop.f32.mrb[92].mxu0  ;;  %v11141_v61 = vpop.eup %11140  ;;  %11152 = vrcp.f32 %v13233_v48 }
 0xecb   : > { %10222 = vmatpush3.bf16.msra.mxu1 %v10219_v21  ;;  %v13237_v34 = vpop.f32.mrb[93].mxu0  ;;  %v5898_v9 = vsel %vm1149_vm5, %v13235_v27, -inf  ;;  %v11143_v21 = vpop.eup %11142  ;;  %v5354_v32 = vmul.f32 %v11141_v61, %v13143_v45 }
 0xecc   : > { %v10281_v16 = vpack.c.bf16 %v10807_v50, %v10806_v60  ;;  %v5895_v42 = vsel %vm1149_vm5, %v13237_v34, -inf }
 0xecd   : > { %v13241_v15 = vpop.xlane.xlu0 %5341  ;;  %v10810_v35 = vpop.permute.xlu1 %10809  ;;  %5896 = vmax.xlane.f32.xlu0 %v5895_v42 }
 0xece   : > { %v10812_v5 = vunpack.i.h.bf16 %v10810_v35  ;;  %v10811_v37 = vunpack.i.l.bf16 %v10810_v35  ;;  %v13243_v39 = vpop.f32.mrb[94].mxu0  ;;  %10283 = vmatprep.subr.msk.bf16.mxu0 %vm11749_vm4, %v10281_v16  ;;  %v11145_v42 = vpop.eup %11144  ;;  %v5355_v35 = vmul.f32 %v11143_v21, %v13141_v4 }
 0xecf   : > { %v13247_v20 = vpop.f32.mrb[95].mxu0  ;;  %10286 = vmatpush3.bf16.xpose.msk.msra.mxu0 %vm11749_vm4, %v10281_v16  ;;  %v5904_v2 = vsel %vm1149_vm5, %v13243_v39, -inf  ;;  %v11330_v16 = vld [vmem:[%s11520_s22 + $0x8] sm:$0xff]  ;;  %v5356_v45 = vmul.f32 %v11145_v42, %v13150_v26 }
 0xed0   : > { %v10287_v18 = vpack.c.bf16 %v10812_v5, %v10811_v37  ;;  %v5901_v22 = vsel %vm1149_vm5, %v13247_v20, -inf  ;;  %v11147_v5 = vpop.eup %11146 }
 0xed1   : > { %v5339_v30 = vpop.xlane.xlu0 %5338  ;;  %v10815_v1 = vpop.permute.xlu1 %10814  ;;  %5899 = vmax.xlane.f32.xlu0 %v5898_v9  ;;  %5902 = vmax.xlane.f32.xlu1 %v5901_v22  ;;  %v5357_v4 = vmul.f32 %v11147_v5, %v13163_v43 }
 0xed2   : > { %v10817_v28 = vunpack.i.h.bf16 %v10815_v1  ;;  %v10816_v29 = vunpack.i.l.bf16 %v10815_v1  ;;  %v13255_v0 = vpop.f32.mrb[96].mxu0  ;;  %10289 = vmatprep.subr.msk.bf16.mxu0 %vm11749_vm4, %v10287_v18  ;;  %11154 = vrcp.f32 %v5339_v30 }
 0xed3   : > { %v13259_v49 = vpop.f32.mrb[97].mxu0  ;;  %v5910_v25 = vsel %vm1149_vm5, %v13255_v0, -inf  ;;  %11156 = vrcp.f32 %v13241_v15 }
 0xed4   : > { %v5907_v58 = vsel %vm1149_vm5, %v13259_v49, -inf  ;;  %v10293_v55 = vpack.c.bf16 %v10817_v28, %v10816_v29 }
 0xed5   : > { %v10800_v24 = vpop.permute.xlu0 %10799  ;;  %5905 = vmax.xlane.f32.xlu0 %v5904_v2  ;;  %5908 = vmax.xlane.f32.xlu1 %v5907_v58  ;;  %v10820_v38 = vpop.permute.xlu1 %10819 }
 0xed6   : > { %v10802_v3 = vunpack.i.h.bf16 %v10800_v24  ;;  %v10801_v59 = vunpack.i.l.bf16 %v10800_v24  ;;  %v13265_v57 = vpop.f32.mrb[98].mxu0  ;;  %v10822_v47 = vunpack.i.h.bf16 %v10820_v38  ;;  %v10821_v50 = vunpack.i.l.bf16 %v10820_v38 }
 0xed7   : > { %v13267_v44 = vpop.f32.mrb[99].mxu0  ;;  %10292 = vmatpush3.bf16.xpose.msk.msra.mxu0 %vm11749_vm4, %v10287_v18  ;;  %v5916_v60 = vsel %vm1177_vm6, %v13265_v57, -inf  ;;  %v11149_v18 = vpop.eup %11148 }
 0xed8   : > { %v10223_v36 = vpack.c.bf16 %v10802_v3, %v10801_v59  ;;  %10295 = vmatprep.subr.msk.bf16.mxu0 %vm11749_vm4, %v10293_v55  ;;  %v5913_v23 = vsel %vm1149_vm5, %v13267_v44, -inf  ;;  %v10299_v37 = vpack.c.bf16 %v10822_v47, %v10821_v50  ;;  %v11151_v9 = vpop.eup %11150  ;;  %v5358_v15 = vmul.f32 %v11149_v18, %v13155_v56 }
 0xed9   : > { %v6331_v6 = vpop.permute.xlu0 %6330  ;;  %5911 = vmax.xlane.f32.xlu0 %v5910_v25  ;;  %5914 = vmax.xlane.f32.xlu1 %v5913_v23  ;;  %v10825_v48 = vpop.permute.xlu1 %10824  ;;  %v5359_v28 = vmul.f32 %v11151_v9, %v13157_v7 }
 0xeda   : > { %10225 = vmatprep.subr.msk.bf16.mxu1 %vm11975_vm9, %v10223_v36  ;;  %9738 = vmatprep.mubr.msk.f32.mxu0 %vm983_vm3, %v6331_v6  ;;  %v10827_v22 = vunpack.i.h.bf16 %v10825_v48  ;;  %v10826_v30 = vunpack.i.l.bf16 %v10825_v48  ;;  %v11153_v1 = vpop.eup %11152 }
 0xedb   : > { %10228 = vmatpush3.bf16.msk.msra.mxu1 %vm11975_vm9, %v10223_v36  ;;  %v5360_v26 = vmul.f32 %v11153_v1, %v13167_v62 }
 0xedc   : > { %9614 = vmatprep.subr.mxu1 %v11330_v16  ;;  %v11155_v29 = vpop.eup %11154  ;;  %v10305_v2 = vpack.c.bf16 %v10827_v22, %v10826_v30 }
 0xedd   : > { %5917 = vmax.xlane.f32.xlu0 %v5916_v60  ;;  %v11157_v43 = vpop.eup %11156  ;;  %v5361_v56 = vmul.f32 %v11155_v29, %v13175_v63  ;;  %v6333_v58 = vpop.permute.xlu1 %6332  ;;  %v13320_v63 = vld [vmem:[%s11520_s22 + $0x18] sm:$0xff] }
 0xede   : > { %9600 = vmatmul.mubr.msk.f32.vlgmr.msra.gmra.mrb[80].mxu1 %vm1149_vm5, %v5354_v32  ;;  %v5362_v7 = vmul.f32 %v11157_v43, %v13171_v51  ;;  %v6335_v62 = vpop.permute.xlu0 %6334 }
 0xedf   : > { %9602 = vmatprep.mubr.msk.f32.mxu1 %vm1149_vm5, %v5355_v35  ;;  %10298 = vmatpush3.bf16.xpose.msk.msra.mxu0 %vm11749_vm4, %v10293_v55 }
 0xee0   : > { %10301 = vmatprep.subr.msk.bf16.mxu0 %vm11749_vm4, %v10299_v37  ;;  %9615 = vmatpush3.msra.mxu1 %v11330_v16 }
 0xee1   : > { %v6337_v24 = vpop.permute.xlu1 %6336 }
 0xee2   : > { %9603 = vmatmul.mubr.msk.f32.gmra.mrb[82].mxu1 %vm1149_vm5, %v5356_v45  ;;  %v6339_v55 = vpop.permute.xlu0 %6338 }
 0xee3   : > { %9605 = vmatprep.mubr.msk.f32.mxu1 %vm1149_vm5, %v5357_v4 }
 0xee5   : > { %v6341_v11 = vpop.permute.xlu1 %6340 }
 0xee6   : > { %9606 = vmatmul.mubr.msk.f32.gmra.mrb[84].mxu1 %vm1149_vm5, %v5358_v15  ;;  %v6343_v51 = vpop.permute.xlu0 %6342 }
 0xee7   : > { %9608 = vmatprep.mubr.msk.f32.mxu1 %vm1149_vm5, %v5359_v28  ;;  %10304 = vmatpush3.bf16.xpose.msk.msra.mxu0 %vm11749_vm4, %v10299_v37 }
 0xee8   : > { %10307 = vmatprep.subr.msk.bf16.mxu0 %vm11749_vm4, %v10305_v2 }
 0xee9   : > { %v6345_v3 = vpop.permute.xlu1 %6344 }
 0xeea   : > { %10829 = vrot.lane.b32.xlu1 %v12725_v13, %s11395_s7  ;;  %9609 = vmatmul.mubr.msk.f32.gmra.mrb[86].mxu1 %vm1149_vm5, %v5360_v26  ;;  %v6347_v59 = vpop.permute.xlu0 %6346 }
 0xeeb   : > { %9611 = vmatprep.mubr.msk.f32.mxu1 %vm1149_vm5, %v5361_v56 }
 0xeed   : > { %v6349_v38 = vpop.permute.xlu1 %6348 }
 0xeee   : > { %10839 = vrot.lane.b32.xlu1 %v12751_v41, %s11395_s7  ;;  %9612 = vmatmul.mubr.msk.f32.gmra.mrb[88].mxu1 %vm1149_vm5, %v5362_v7 }
 0xeef   : > { %10310 = vmatpush3.bf16.xpose.msk.msra.mxu0 %vm11749_vm4, %v10305_v2 }
 0xef0   : > { %9788 = vmatprep.subr.mxu0 %v13320_v63 }
 0xef3   : > { %10834 = vrot.lane.b32.xlu0 %v12736_v33, %s11395_s7 }
 0xef6   : > { %9739 = vmatmul.mubr.msk.f32.vlgmr.msra.gmra.mrb[100].mxu0 %vm983_vm3, %v6333_v58 }
 0xef7   : > { %9741 = vmatprep.mubr.msk.f32.mxu0 %vm983_vm3, %v6335_v62  ;;  %9789 = vmatpush3.msra.mxu0 %v13320_v63 }
 0xef8   : > { %10334 = vmatprep.subr.bf16.mxu0 %v12524_v17 }
 0xefa   : > { %9742 = vmatmul.mubr.msk.f32.gmra.mrb[102].mxu0 %vm983_vm3, %v6337_v24 }
 0xefb   : > { %9744 = vmatprep.mubr.msk.f32.mxu0 %vm983_vm3, %v6339_v55 }
 0xefe   : > { %9745 = vmatmul.mubr.msk.f32.gmra.mrb[104].mxu0 %vm983_vm3, %v6341_v11 }
 0xeff   : > { %9747 = vmatprep.mubr.msk.f32.mxu0 %vm983_vm3, %v6343_v51 }
 0xf02   : > { %9748 = vmatmul.mubr.msk.f32.gmra.mrb[106].mxu0 %vm983_vm3, %v6345_v3 }
 0xf03   : > { %9750 = vmatprep.mubr.msk.f32.mxu0 %vm983_vm3, %v6347_v59 }
 0xf06   : > { %9751 = vmatmul.mubr.msk.f32.gmra.mrb[108].mxu0 %vm983_vm3, %v6349_v38 }
 0xf55   : > { %v5894_v36 = vpop.xlane.xlu1 %5893 }
 0xf56   : > { %v5920_v25 = vsub.f32 %v13225_v46, %v5894_v36  ;;  %v5891_v23 = vpop.xlane.xlu0 %5890 }
 0xf57   : > { %v5919_v61 = vsub.f32 %v13227_v19, %v5891_v23 }
 0xf58   : > { %v5931_v6 = vmul.f32 1.442695, %v5920_v25 }
 0xf59   : > { %v5929_v21 = vmul.f32 1.442695, %v5919_v61 }
 0xf5a   : > { %11158 = vpow2.f32 %v5931_v6  ;;  %v5897_v47 = vpop.xlane.xlu0 %5896 }
 0xf5b   : > { %11160 = vpow2.f32 %v5929_v21  ;;  %v5921_v50 = vsub.f32 %v13237_v34, %v5897_v47 }
 0xf5d   : > { %v5933_v32 = vmul.f32 1.442695, %v5921_v50 }
 0xf5e   : > { %v5900_v60 = vpop.xlane.xlu0 %5899  ;;  %v5903_v16 = vpop.xlane.xlu1 %5902 }
 0xf5f   : > { %11162 = vpow2.f32 %v5933_v32  ;;  %v5922_v42 = vsub.f32 %v13235_v27, %v5900_v60  ;;  %v5923_v35 = vsub.f32 %v13247_v20, %v5903_v16 }
 0xf61   : > { %v5935_v5 = vmul.f32 1.442695, %v5922_v42  ;;  %v5937_v18 = vmul.f32 1.442695, %v5923_v35 }
 0xf62   : > { %v5906_v46 = vpop.xlane.xlu0 %5905  ;;  %v5909_v37 = vpop.xlane.xlu1 %5908 }
 0xf63   : > { %11164 = vpow2.f32 %v5935_v5  ;;  %v5924_v19 = vsub.f32 %v13243_v39, %v5906_v46  ;;  %v5925_v48 = vsub.f32 %v13259_v49, %v5909_v37 }
 0xf64   : > { %v13343_v45 = vpop.eup %11158 }
 0xf65   : > { %v13345_v34 = vpop.eup %11160  ;;  %v5939_v4 = vmul.f32 1.442695, %v5924_v19  ;;  %v5941_v9 = vmul.f32 1.442695, %v5925_v48  ;;  %v5952_v27 = vsel %vm1149_vm5, %v13343_v45, 0.0 }
 0xf66   : > { %v5912_v22 = vpop.xlane.xlu0 %5911  ;;  %5953 = vadd.xlane.f32.xlu0 %v5952_v27  ;;  %v5915_v20 = vpop.xlane.xlu1 %5914  ;;  %v5949_v30 = vsel %vm1149_vm5, %v13345_v34, 0.0 }
 0xf67   : > { %11166 = vpow2.f32 %v5939_v4  ;;  %v5926_v39 = vsub.f32 %v13255_v0, %v5912_v22  ;;  %5950 = vadd.xlane.f32.xlu1 %v5949_v30  ;;  %v5927_v0 = vsub.f32 %v13267_v44, %v5915_v20 }
 0xf68   : > { %11168 = vpow2.f32 %v5941_v9 }
 0xf69   : > { %v13352_v49 = vpop.eup %11162  ;;  %11170 = vpow2.f32 %v5937_v18  ;;  %v5943_v15 = vmul.f32 1.442695, %v5926_v39  ;;  %v5945_v55 = vmul.f32 1.442695, %v5927_v0 }
 0xf6a   : > { %v5918_v1 = vpop.xlane.xlu0 %5917  ;;  %v10830_v28 = vpop.permute.xlu1 %10829  ;;  %v5955_v29 = vsel %vm1149_vm5, %v13352_v49, 0.0 }
 0xf6b   : > { %v5928_v2 = vsub.f32 %v13265_v57, %v5918_v1  ;;  %v10832_v26 = vunpack.i.h.bf16 %v10830_v28  ;;  %v10831_v43 = vunpack.i.l.bf16 %v10830_v28  ;;  %5956 = vadd.xlane.f32.xlu1 %v5955_v29  ;;  %11172 = vpow2.f32 %v5943_v15 }
 0xf6d   : > { %v13357_v56 = vpop.eup %11164  ;;  %v5947_v7 = vmul.f32 1.442695, %v5928_v2  ;;  %v10259_v58 = vpack.c.bf16 %v10832_v26, %v10831_v43 }
 0xf6e   : > { %v5958_v62 = vsel %vm1149_vm5, %v13357_v56, 0.0  ;;  %v10835_v6 = vpop.permute.xlu0 %10834  ;;  %v10840_v50 = vpop.permute.xlu1 %10839 }
 0xf6f   : > { %5959 = vadd.xlane.f32.xlu0 %v5958_v62  ;;  %10260 = vmatprep.subr.bf16.mxu1 %v10259_v58  ;;  %11174 = vpow2.f32 %v5947_v7  ;;  %v10837_v21 = vunpack.i.h.bf16 %v10835_v6  ;;  %v10836_v47 = vunpack.i.l.bf16 %v10835_v6  ;;  %v10842_v16 = vunpack.i.h.bf16 %v10840_v50 }
 0xf70   : > { %11176 = vpow2.f32 %v5945_v55  ;;  %v10841_v42 = vunpack.i.l.bf16 %v10840_v50 }
 0xf71   : > { %v13362_v24 = vpop.eup %11166  ;;  %v10263_v35 = vpack.c.bf16 %v10837_v21, %v10836_v47 }
 0xf72   : > { %v13364_v57 = vpop.eup %11168  ;;  %v5964_v11 = vsel %vm1149_vm5, %v13362_v24, 0.0  ;;  %v10267_v37 = vpack.c.bf16 %v10842_v16, %v10841_v42 }
 0xf73   : > { %v13368_v51 = vpop.eup %11170  ;;  %5965 = vadd.xlane.f32.xlu0 %v5964_v11  ;;  %v5967_v44 = vsel %vm1149_vm5, %v13364_v57, 0.0 }
 0xf74   : > { %5968 = vadd.xlane.f32.xlu1 %v5967_v44  ;;  %v5961_v3 = vsel %vm1149_vm5, %v13368_v51, 0.0 }
 0xf75   : > { %v13374_v59 = vpop.eup %11172 }
 0xf76   : > { %v5970_v38 = vsel %vm1149_vm5, %v13374_v59, 0.0 }
 0xf77   : > { %5962 = vadd.xlane.f32.xlu0 %v5961_v3 }
 0xf79   : > { %v13378_v36 = vpop.eup %11174 }
 0xf7a   : > { %v5976_v25 = vsel %vm1177_vm6, %v13378_v36, 0.0  ;;  %v13382_v23 = vpop.eup %11176 }
 0xf7b   : > { %5971 = vadd.xlane.f32.xlu0 %v5970_v38  ;;  %v5973_v61 = vsel %vm1149_vm5, %v13382_v23, 0.0 }
 0xf7f   : > { %5977 = vadd.xlane.f32.xlu0 %v5976_v25 }
 0xf83   : > { %5974 = vadd.xlane.f32.xlu0 %v5973_v61 }
 0xf85   : > { %10844 = vrot.lane.b32.xlu1 %v12758_v14, %s11395_s7 }
 0xf99   : > { %10849 = vrot.lane.b32.xlu0 %v12768_v31, %s11395_s7  ;;  %s14295_s7 = sld [smem:[#allocation34_spill]] (!%p8488_p5) }
 0xfb1   : > { %v9601_v32 = vpop.f32.mrb[80].mxu1 }
 0xfb2   : > { %v5490_v60 = vpop.f32.mrb[81].mxu1 }
 0xfb3   : > { %9616 = vmatprep.mubr.msk.f32.mxu1 %vm983_vm3, %v5490_v60 }
 0xfb4   : > { %9617 = vmatmul.mubr.msk.f32.vlgmr.msra.gmra.mrb[70].mxu1 %vm983_vm3, %v9601_v32 }
 0xfb5   : > { %10262 = vmatpush3.bf16.msra.mxu1 %v10259_v58  ;;  %v9604_v5 = vpop.f32.mrb[82].mxu1 }
 0xfb6   : > { %10264 = vmatprep.subr.bf16.mxu1 %v10263_v35  ;;  %v5500_v46 = vpop.f32.mrb[83].mxu1 }
 0xfb7   : > { %9619 = vmatprep.mubr.msk.f32.mxu1 %vm983_vm3, %v5500_v46 }
 0xfb8   : > { %9620 = vmatmul.mubr.msk.f32.gmra.mrb[72].mxu1 %vm983_vm3, %v9604_v5 }
 0xfb9   : > { %10266 = vmatpush3.bf16.msra.mxu1 %v10263_v35  ;;  %v9607_v19 = vpop.f32.mrb[84].mxu1 }
 0xfba   : > { %10268 = vmatprep.subr.bf16.mxu1 %v10267_v37  ;;  %v5510_v48 = vpop.f32.mrb[85].mxu1 }
 0xfbb   : > { %9622 = vmatprep.mubr.msk.f32.mxu1 %vm983_vm3, %v5510_v48 }
 0xfbc   : > { %9623 = vmatmul.mubr.msk.f32.gmra.mrb[74].mxu1 %vm983_vm3, %v9607_v19 }
 0xfbd   : > { %10270 = vmatpush3.bf16.msra.mxu1 %v10267_v37  ;;  %v9610_v18 = vpop.f32.mrb[86].mxu1 }
 0xfbe   : > { %v5520_v4 = vpop.f32.mrb[87].mxu1 }
 0xfbf   : > { %9625 = vmatprep.mubr.msk.f32.mxu1 %vm983_vm3, %v5520_v4 }
 0xfc0   : > { %9626 = vmatmul.mubr.msk.f32.gmra.mrb[76].mxu1 %vm983_vm3, %v9610_v18 }
 0xfc1   : > { %v9613_v9 = vpop.f32.mrb[88].mxu1 }
 0xfc2   : > { %v5530_v27 = vpop.f32.mrb[89].mxu1 }
 0xfc3   : > { %9628 = vmatprep.mubr.msk.f32.mxu1 %vm983_vm3, %v5530_v27  ;;  %v11332_v27 = vld [vmem:[%s11520_s22 + $0x10] sm:$0xff] }
 0xfc4   : > { %9629 = vmatmul.mubr.msk.f32.gmra.mrb[78].mxu1 %vm983_vm3, %v9613_v9 }
 0xfc9   : > { %v13400_v22 = vpop.f32.mrb[100].mxu0 }
 0xfca   : > { %v13402_v20 = vpop.f32.mrb[101].mxu0  ;;  %v6528_v30 = vsel %vm1149_vm5, %v13400_v22, -inf }
 0xfcb   : > { %6529 = vmax.xlane.f32.xlu0 %v6528_v30  ;;  %v6525_v39 = vsel %vm1149_vm5, %v13402_v20, -inf }
 0xfcc   : > { %6526 = vmax.xlane.f32.xlu1 %v6525_v39 }
 0xfcd   : > { %v13408_v15 = vpop.f32.mrb[102].mxu0 }
 0xfce   : > { %v13410_v1 = vpop.f32.mrb[103].mxu0  ;;  %v6534_v26 = vsel %vm1149_vm5, %v13408_v15, -inf }
 0xfcf   : > { %v6531_v28 = vsel %vm1149_vm5, %v13410_v1, -inf }
 0xfd0   : > { %6532 = vmax.xlane.f32.xlu1 %v6531_v28 }
 0xfd1   : > { %v13414_v29 = vpop.f32.mrb[104].mxu0 }
 0xfd2   : > { %v13416_v2 = vpop.f32.mrb[105].mxu0  ;;  %v6540_v11 = vsel %vm1149_vm5, %v13414_v29, -inf }
 0xfd3   : > { %v6537_v7 = vsel %vm1149_vm5, %v13416_v2, -inf }
 0xfd4   : > { %6535 = vmax.xlane.f32.xlu1 %v6534_v26 }
 0xfd5   : > { %v13420_v43 = vpop.f32.mrb[106].mxu0 }
 0xfd6   : > { %v13422_v0 = vpop.f32.mrb[107].mxu0  ;;  %v6546_v3 = vsel %vm1149_vm5, %v13420_v43, -inf }
 0xfd7   : > { %v6543_v58 = vsel %vm1149_vm5, %v13422_v0, -inf }
 0xfd8   : > { %6538 = vmax.xlane.f32.xlu1 %v6537_v7  ;;  %6544 = vmax.xlane.f32.xlu0 %v6543_v58 }
 0xfd9   : > { %v13428_v62 = vpop.f32.mrb[108].mxu0 }
 0xfda   : > { %v13430_v55 = vpop.f32.mrb[109].mxu0  ;;  %v6552_v38 = vsel %vm1177_vm6, %v13428_v62, -inf }
 0xfdb   : > { %v6549_v44 = vsel %vm1149_vm5, %v13430_v55, -inf }
 0xfdc   : > { %6541 = vmax.xlane.f32.xlu1 %v6540_v11  ;;  %6550 = vmax.xlane.f32.xlu0 %v6549_v44 }
 0xfe0   : > { %6547 = vmax.xlane.f32.xlu1 %v6546_v3 }
 0xfe4   : > { %6553 = vmax.xlane.f32.xlu1 %v6552_v38 }
 0xff2   : > { %10854 = vrot.lane.b32.xlu0 %v12725_v13, %s11396_s18 }
 0xff3   : > { %v5954_v61 = vpop.xlane.xlu0 %5953 }
 0xff4   : > { %v5951_v25 = vpop.xlane.xlu1 %5950 }
 0xff5   : > { %11178 = vrcp.f32 %v5951_v25  ;;  %10859 = vrot.lane.b32.xlu1 %v12736_v33, %s11396_s18 }
 0xff6   : > { %10864 = vrot.lane.b32.xlu0 %v12751_v41, %s11396_s18  ;;  %11180 = vrcp.f32 %v5954_v61 }
 0xff8   : > { %v5957_v21 = vpop.xlane.xlu1 %5956 }
 0xff9   : > { %11182 = vrcp.f32 %v5957_v21 }
 0xffc   : > { %v5960_v6 = vpop.xlane.xlu0 %5959 }
 0xffd   : > { %11184 = vrcp.f32 %v5960_v6 }
 0xfff   : > { %v11179_v47 = vpop.eup %11178 }
0x1000   : > { %v5966_v50 = vpop.xlane.xlu0 %5965  ;;  %v5989_v32 = vmul.f32 %v11179_v47, %v13345_v34  ;;  %v11181_v18 = vpop.eup %11180 }
0x1001   : > { %v5969_v60 = vpop.xlane.xlu1 %5968  ;;  %v5990_v9 = vmul.f32 %v11181_v18, %v13343_v45 }
0x1002   : > { %9686 = vmatprep.mubr.msk.f32.mxu1 %vm1149_vm5, %v5989_v32 }
0x1003   : > { %v11183_v4 = vpop.eup %11182 }
0x1004   : > { %v5963_v16 = vpop.xlane.xlu0 %5962  ;;  %v5991_v39 = vmul.f32 %v11183_v4, %v13352_v49 }
0x1005   : > { %v10845_v13 = vpop.permute.xlu1 %10844  ;;  %11186 = vrcp.f32 %v5963_v16 }
0x1006   : > { %v10847_v42 = vunpack.i.h.bf16 %v10845_v13  ;;  %v10846_v35 = vunpack.i.l.bf16 %v10845_v13  ;;  %11188 = vrcp.f32 %v5966_v50 }
0x1007   : > { %11190 = vrcp.f32 %v5969_v60  ;;  %v11185_v30 = vpop.eup %11184 }
0x1008   : > { %v10271_v5 = vpack.c.bf16 %v10847_v42, %v10846_v35  ;;  %v5972_v46 = vpop.xlane.xlu0 %5971  ;;  %v5992_v26 = vmul.f32 %v11185_v30, %v13357_v56 }
0x1009   : > { %11192 = vrcp.f32 %v5972_v46 }
0x100a   : > { %10272 = vmatprep.subr.bf16.mxu1 %v10271_v5 }
0x100b   : > { %10274 = vmatpush3.bf16.msra.mxu1 %v10271_v5 }
0x100c   : > { %v5978_v33 = vpop.xlane.xlu0 %5977 }
0x100f   : > { %v11187_v28 = vpop.eup %11186 }
0x1010   : > { %v5975_v41 = vpop.xlane.xlu0 %5974  ;;  %v11189_v7 = vpop.eup %11188  ;;  %v5993_v58 = vmul.f32 %v11187_v28, %v13368_v51 }
0x1011   : > { %11194 = vrcp.f32 %v5975_v41  ;;  %v11191_v11 = vpop.eup %11190  ;;  %v5994_v45 = vmul.f32 %v11189_v7, %v13362_v24 }
0x1012   : > { %11196 = vrcp.f32 %v5978_v33  ;;  %v5995_v44 = vmul.f32 %v11191_v11, %v13364_v57 }
0x1013   : > { %v11193_v49 = vpop.eup %11192 }
0x1014   : > { %v10850_v37 = vpop.permute.xlu0 %10849  ;;  %v5996_v56 = vmul.f32 %v11193_v49, %v13374_v59 }
0x1015   : > { %v10852_v34 = vunpack.i.h.bf16 %v10850_v37  ;;  %v10851_v19 = vunpack.i.l.bf16 %v10850_v37 }
0x1017   : > { %v10275_v48 = vpack.c.bf16 %v10852_v34, %v10851_v19 }
0x1019   : > { %10277 = vmatprep.subr.msk.bf16.mxu1 %vm11975_vm9, %v10275_v48 }
0x101a   : > { %10280 = vmatpush3.bf16.msk.msra.mxu1 %vm11975_vm9, %v10275_v48 }
0x101b   : > { %9701 = vmatprep.subr.mxu1 %v11332_v27  ;;  %v11195_v3 = vpop.eup %11194 }
0x101c   : > { %v11197_v38 = vpop.eup %11196  ;;  %v5997_v51 = vmul.f32 %v11195_v3, %v13382_v23 }
0x101d   : > { %9687 = vmatmul.mubr.msk.f32.vlgmr.msra.gmra.mrb[90].mxu1 %vm1149_vm5, %v5990_v9  ;;  %v5998_v25 = vmul.f32 %v11197_v38, %v13378_v36 }
0x101e   : > { %9689 = vmatprep.mubr.msk.f32.mxu1 %vm1149_vm5, %v5991_v39  ;;  %9702 = vmatpush3.msra.mxu1 %v11332_v27 }
0x1021   : > { %9690 = vmatmul.mubr.msk.f32.gmra.mrb[92].mxu1 %vm1149_vm5, %v5992_v26 }
0x1022   : > { %9692 = vmatprep.mubr.msk.f32.mxu1 %vm1149_vm5, %v5993_v58 }
0x1025   : > { %9693 = vmatmul.mubr.msk.f32.gmra.mrb[94].mxu1 %vm1149_vm5, %v5994_v45 }
0x1026   : > { %9695 = vmatprep.mubr.msk.f32.mxu1 %vm1149_vm5, %v5995_v44 }
0x1029   : > { %9696 = vmatmul.mubr.msk.f32.gmra.mrb[96].mxu1 %vm1149_vm5, %v5996_v56 }
0x102a   : > { %9698 = vmatprep.mubr.msk.f32.mxu1 %vm1149_vm5, %v5997_v51 }
0x102d   : > { %9699 = vmatmul.mubr.msk.f32.gmra.mrb[98].mxu1 %vm1149_vm5, %v5998_v25 }
0x1058   : > { %v6530_v24 = vpop.xlane.xlu0 %6529 }
0x1059   : > { %v6556_v57 = vsub.f32 %v13400_v22, %v6530_v24  ;;  %v6527_v61 = vpop.xlane.xlu1 %6526 }
0x105a   : > { %v6555_v6 = vsub.f32 %v13402_v20, %v6527_v61 }
0x105b   : > { %v6567_v21 = vmul.f32 1.442695, %v6556_v57 }
0x105c   : > { %v6565_v47 = vmul.f32 1.442695, %v6555_v6 }
0x105d   : > { %11198 = vpow2.f32 %v6567_v21  ;;  %v6533_v59 = vpop.xlane.xlu1 %6532 }
0x105e   : > { %11200 = vpow2.f32 %v6565_v47  ;;  %v6557_v23 = vsub.f32 %v13410_v1, %v6533_v59 }
0x1060   : > { %v6569_v50 = vmul.f32 1.442695, %v6557_v23 }
0x1061   : > { %v6536_v32 = vpop.xlane.xlu1 %6535 }
0x1062   : > { %11202 = vpow2.f32 %v6569_v50  ;;  %v6558_v36 = vsub.f32 %v13408_v15, %v6536_v32 }
0x1064   : > { %v6571_v60 = vmul.f32 1.442695, %v6558_v36 }
0x1065   : > { %v6545_v16 = vpop.xlane.xlu0 %6544  ;;  %v6539_v13 = vpop.xlane.xlu1 %6538 }
0x1066   : > { %11204 = vpow2.f32 %v6571_v60  ;;  %v6561_v22 = vsub.f32 %v13422_v0, %v6545_v16  ;;  %v6559_v1 = vsub.f32 %v13416_v2, %v6539_v13 }
0x1067   : > { %v13476_v42 = vpop.eup %11198 }
0x1068   : > { %v13478_v20 = vpop.eup %11200  ;;  %v6577_v35 = vmul.f32 1.442695, %v6561_v22  ;;  %v6588_v5 = vsel %vm1149_vm5, %v13476_v42, 0.0  ;;  %v6573_v34 = vmul.f32 1.442695, %v6559_v1 }
0x1069   : > { %6589 = vadd.xlane.f32.xlu1 %v6588_v5  ;;  %v6551_v46 = vpop.xlane.xlu0 %6550  ;;  %v6542_v33 = vpop.xlane.xlu1 %6541  ;;  %v6585_v15 = vsel %vm1149_vm5, %v13478_v20, 0.0 }
0x106a   : > { %11206 = vpow2.f32 %v6577_v35  ;;  %v6560_v41 = vsub.f32 %v13414_v29, %v6542_v33  ;;  %6586 = vadd.xlane.f32.xlu0 %v6585_v15  ;;  %v6563_v58 = vsub.f32 %v13430_v55, %v6551_v46 }
0x106c   : > { %v13486_v0 = vpop.eup %11202  ;;  %v6575_v37 = vmul.f32 1.442695, %v6560_v41  ;;  %v6581_v49 = vmul.f32 1.442695, %v6563_v58 }
0x106d   : > { %v10855_v19 = vpop.permute.xlu0 %10854  ;;  %v6548_v48 = vpop.xlane.xlu1 %6547  ;;  %v6591_v18 = vsel %vm1149_vm5, %v13486_v0, 0.0 }
0x106e   : > { %v10857_v2 = vunpack.i.h.bf16 %v10855_v19  ;;  %v10856_v4 = vunpack.i.l.bf16 %v10855_v19  ;;  %v6562_v9 = vsub.f32 %v13420_v43, %v6548_v48  ;;  %6592 = vadd.xlane.f32.xlu0 %v6591_v18  ;;  %11208 = vpow2.f32 %v6575_v37 }
0x106f   : > { %11210 = vpow2.f32 %v6573_v34 }
0x1070   : > { %v13491_v27 = vpop.eup %11204  ;;  %v10311_v30 = vpack.c.bf16 %v10857_v2, %v10856_v4  ;;  %v6579_v29 = vmul.f32 1.442695, %v6562_v9 }
0x1071   : > { %v6554_v39 = vpop.xlane.xlu1 %6553  ;;  %v6594_v28 = vsel %vm1149_vm5, %v13491_v27, 0.0  ;;  %v10865_v21 = vpop.permute.xlu0 %10864 }
0x1072   : > { %v6564_v26 = vsub.f32 %v13428_v62, %v6554_v39  ;;  %6595 = vadd.xlane.f32.xlu1 %v6594_v28  ;;  %10312 = vmatprep.subr.bf16.mxu1 %v10311_v30  ;;  %11212 = vpow2.f32 %v6579_v29  ;;  %v10867_v23 = vunpack.i.h.bf16 %v10865_v21  ;;  %v10866_v50 = vunpack.i.l.bf16 %v10865_v21 }
0x1074   : > { %v13496_v7 = vpop.eup %11206  ;;  %v6583_v43 = vmul.f32 1.442695, %v6564_v26 }
0x1075   : > { %v6603_v11 = vsel %vm1149_vm5, %v13496_v7, 0.0  ;;  %v10860_v57 = vpop.permute.xlu1 %10859 }
0x1076   : > { %6604 = vadd.xlane.f32.xlu0 %v6603_v11  ;;  %11214 = vpow2.f32 %v6583_v43  ;;  %v10862_v61 = vunpack.i.h.bf16 %v10860_v57  ;;  %v10861_v6 = vunpack.i.l.bf16 %v10860_v57 }
0x1077   : > { %11216 = vpow2.f32 %v6581_v49 }
0x1078   : > { %v13501_v45 = vpop.eup %11208  ;;  %v10315_v32 = vpack.c.bf16 %v10862_v61, %v10861_v6 }
0x1079   : > { %v6600_v44 = vsel %vm1149_vm5, %v13501_v45, 0.0  ;;  %v13505_v62 = vpop.eup %11210 }
0x107a   : > { %6601 = vadd.xlane.f32.xlu1 %v6600_v44  ;;  %v6597_v55 = vsel %vm1149_vm5, %v13505_v62, 0.0 }
0x107c   : > { %v13509_v3 = vpop.eup %11212 }
0x107d   : > { %v6606_v56 = vsel %vm1149_vm5, %v13509_v3, 0.0 }
0x107e   : > { %6598 = vadd.xlane.f32.xlu1 %v6597_v55 }
0x1080   : > { %v13513_v38 = vpop.eup %11214 }
0x1081   : > { %v6612_v51 = vsel %vm1177_vm6, %v13513_v38, 0.0  ;;  %v13517_v25 = vpop.eup %11216 }
0x1082   : > { %6607 = vadd.xlane.f32.xlu1 %v6606_v56  ;;  %v6609_v24 = vsel %vm1149_vm5, %v13517_v25, 0.0 }
0x1086   : > { %6613 = vadd.xlane.f32.xlu1 %v6612_v51 }
0x108a   : > { %6610 = vadd.xlane.f32.xlu1 %v6609_v24 }
0x108c   : > { %10874 = vrot.lane.b32.xlu0 %v12768_v31, %s11396_s18 }
0x109b   : > { %10869 = vrot.lane.b32.xlu1 %v12758_v14, %s11396_s18  ;;  %v10319_v14 = vpack.c.bf16 %v10867_v23, %v10866_v50 }
0x10f0   : > { %v9688_v47 = vpop.f32.mrb[90].mxu1 }
0x10f1   : > { %v6126_v59 = vpop.f32.mrb[91].mxu1 }
0x10f2   : > { %9703 = vmatprep.mubr.msk.f32.mxu1 %vm983_vm3, %v6126_v59 }
0x10f3   : > { %9704 = vmatmul.mubr.msk.f32.vlgmr.msra.gmra.mrb[70].mxu1 %vm983_vm3, %v9688_v47 }
0x10f4   : > { %10314 = vmatpush3.bf16.msra.mxu1 %v10311_v30  ;;  %v9691_v36 = vpop.f32.mrb[92].mxu1 }
0x10f5   : > { %10316 = vmatprep.subr.bf16.mxu1 %v10315_v32  ;;  %v6136_v31 = vpop.f32.mrb[93].mxu1 }
0x10f6   : > { %9706 = vmatprep.mubr.msk.f32.mxu1 %vm983_vm3, %v6136_v31  ;;  %v6590_v5 = vpop.xlane.xlu1 %6589 }
0x10f7   : > { %v6587_v60 = vpop.xlane.xlu0 %6586  ;;  %9707 = vmatmul.mubr.msk.f32.gmra.mrb[72].mxu1 %vm983_vm3, %v9691_v36 }
0x10f8   : > { %11218 = vrcp.f32 %v6587_v60  ;;  %10318 = vmatpush3.bf16.msra.mxu1 %v10315_v32  ;;  %v9694_v16 = vpop.f32.mrb[94].mxu1 }
0x10f9   : > { %10320 = vmatprep.subr.bf16.mxu1 %v10319_v14  ;;  %v6146_v13 = vpop.f32.mrb[95].mxu1  ;;  %11220 = vrcp.f32 %v6590_v5 }
0x10fa   : > { %9709 = vmatprep.mubr.msk.f32.mxu1 %vm983_vm3, %v6146_v13  ;;  %v11334_v13 = vld [vmem:[#allocation2 + $0x58] sm:$0xff] }
0x10fb   : > { %9710 = vmatmul.mubr.msk.f32.gmra.mrb[74].mxu1 %vm983_vm3, %v9694_v16  ;;  %v6593_v19 = vpop.xlane.xlu0 %6592 }
0x10fc   : > { %10322 = vmatpush3.bf16.msra.mxu1 %v10319_v14  ;;  %v9697_v22 = vpop.f32.mrb[96].mxu1  ;;  %11222 = vrcp.f32 %v6593_v19 }
0x10fd   : > { %v6156_v35 = vpop.f32.mrb[97].mxu1 }
0x10fe   : > { %9712 = vmatprep.mubr.msk.f32.mxu1 %vm983_vm3, %v6156_v35  ;;  %v11335_v35 = vld [vmem:[#allocation2 + $0x50] sm:$0xff] }
0x10ff   : > { %9713 = vmatmul.mubr.msk.f32.gmra.mrb[76].mxu1 %vm983_vm3, %v9697_v22  ;;  %v6596_v41 = vpop.xlane.xlu1 %6595 }
0x1100   : > { %v9700_v1 = vpop.f32.mrb[98].mxu1  ;;  %11224 = vrcp.f32 %v6596_v41  ;;  %v11336_v41 = vld [vmem:[#allocation2 + $0x68] sm:$0xff] }
0x1101   : > { %v6166_v46 = vpop.f32.mrb[99].mxu1 }
0x1102   : > { %v11219_v33 = vpop.eup %11218  ;;  %9715 = vmatprep.mubr.msk.f32.mxu1 %vm983_vm3, %v6166_v46 }
0x1103   : > { %9716 = vmatmul.mubr.msk.f32.gmra.mrb[78].mxu1 %vm983_vm3, %v9700_v1  ;;  %v6625_v15 = vmul.f32 %v11219_v33, %v13478_v20  ;;  %v6605_v18 = vpop.xlane.xlu0 %6604  ;;  %v11221_v43 = vpop.eup %11220 }
0x1104   : > { %v6626_v49 = vmul.f32 %v11221_v43, %v13476_v42 }
0x1105   : > { %9773 = vmatprep.mubr.msk.f32.mxu1 %vm1149_vm5, %v6625_v15 }
0x1106   : > { %v11223_v11 = vpop.eup %11222 }
0x1107   : > { %v6602_v37 = vpop.xlane.xlu1 %6601  ;;  %v10875_v9 = vpop.permute.xlu0 %10874  ;;  %v6627_v55 = vmul.f32 %v11223_v11, %v13486_v0 }
0x1108   : > { %v10877_v29 = vunpack.i.h.bf16 %v10875_v9  ;;  %v10876_v39 = vunpack.i.l.bf16 %v10875_v9 }
0x110a   : > { %v10327_v58 = vpack.c.bf16 %v10877_v29, %v10876_v39  ;;  %v11225_v44 = vpop.eup %11224  ;;  %v11338_v39 = vld [vmem:[#allocation2 + $0x70] sm:$0xff] }
0x110b   : > { %v6599_v34 = vpop.xlane.xlu1 %6598  ;;  %v6628_v51 = vmul.f32 %v11225_v44, %v13491_v27 }
0x110c   : > { %11226 = vrcp.f32 %v6599_v34 }
0x110d   : > { %11228 = vrcp.f32 %v6602_v37 }
0x110e   : > { %11230 = vrcp.f32 %v6605_v18  ;;  %v11337_v18 = vld [vmem:[#allocation2 + $0x60] sm:$0xff] }
0x110f   : > { %v6608_v48 = vpop.xlane.xlu1 %6607 }
0x1110   : > { %11232 = vrcp.f32 %v6608_v48 }
0x1113   : > { %v6614_v2 = vpop.xlane.xlu1 %6613 }
0x1116   : > { %v11227_v56 = vpop.eup %11226 }
0x1117   : > { %v6611_v4 = vpop.xlane.xlu1 %6610  ;;  %v11229_v8 = vpop.eup %11228  ;;  %v6629_v42 = vmul.f32 %v11227_v56, %v13505_v62 }
0x1118   : > { %11234 = vrcp.f32 %v6611_v4  ;;  %v11231_v24 = vpop.eup %11230  ;;  %v6630_v0 = vmul.f32 %v11229_v8, %v13501_v45 }
0x1119   : > { %11236 = vrcp.f32 %v6614_v2  ;;  %v6631_v61 = vmul.f32 %v11231_v24, %v13496_v7  ;;  %v11341_v24 = vld [vmem:[#allocation2 + $0x90] sm:$0xff] }
0x111a   : > { %v11233_v57 = vpop.eup %11232 }
0x111b   : > { %v10870_v30 = vpop.permute.xlu1 %10869 }
0x111c   : > { %v10872_v28 = vunpack.i.h.bf16 %v10870_v30  ;;  %v10871_v26 = vunpack.i.l.bf16 %v10870_v30 }
0x111e   : > { %v10323_v20 = vpack.c.bf16 %v10872_v28, %v10871_v26 }
0x1120   : > { %10324 = vmatprep.subr.bf16.mxu1 %v10323_v20 }
0x1121   : > { %10326 = vmatpush3.bf16.msra.mxu1 %v10323_v20 }
0x1122   : > { %10329 = vmatprep.subr.msk.bf16.mxu1 %vm11975_vm9, %v10327_v58  ;;  %v11235_v6 = vpop.eup %11234 }
0x1123   : > { %v11237_v27 = vpop.eup %11236  ;;  %v6633_v62 = vmul.f32 %v11235_v6, %v13517_v25 }
0x1124   : > { %v6634_v21 = vmul.f32 %v11237_v27, %v13513_v38 }
0x1125   : > { %10332 = vmatpush3.bf16.msk.msra.mxu1 %vm11975_vm9, %v10327_v58  ;;  %v11339_v58 = vld [vmem:[#allocation2 + $0x80] sm:$0xff] }
0x1126   : > { %10366 = vmatprep.subr.mxu1 %v13320_v63 }
0x1128   : > { %9774 = vmatmul.mubr.msk.f32.vlgmr.msra.gmra.mrb[100].mxu1 %vm1149_vm5, %v6626_v49  ;;  %v11340_v49 = vld [vmem:[#allocation2 + $0x78] sm:$0xff] }
0x1129   : > { %9776 = vmatprep.mubr.msk.f32.mxu1 %vm1149_vm5, %v6627_v55  ;;  %10367 = vmatpush3.msra.mxu1 %v13320_v63  ;;  %v6632_v63 = vmul.f32 %v11233_v57, %v13509_v3  ;;  %v11342_v57 = vld [vmem:[#allocation2 + $0x88] sm:$0xff] }
0x112a   : > { %10342 = vmatprep.subr.bf16.mxu1 %v12626_v54 }
0x112c   : > { %9777 = vmatmul.mubr.msk.f32.gmra.mrb[102].mxu1 %vm1149_vm5, %v6628_v51 }
0x112d   : > { %9779 = vmatprep.mubr.msk.f32.mxu1 %vm1149_vm5, %v6629_v42 }
0x1130   : > { %9780 = vmatmul.mubr.msk.f32.gmra.mrb[104].mxu1 %vm1149_vm5, %v6630_v0 }
0x1131   : > { %9782 = vmatprep.mubr.msk.f32.mxu1 %vm1149_vm5, %v6631_v61 }
0x1134   : > { %9783 = vmatmul.mubr.msk.f32.gmra.mrb[106].mxu1 %vm1149_vm5, %v6632_v63 }
0x1135   : > { %9785 = vmatprep.mubr.msk.f32.mxu1 %vm1149_vm5, %v6633_v62  ;;  %v11343_v62 = vld [vmem:[#allocation2 + $0x98] sm:$0x7f] }
0x1138   : > { %9786 = vmatmul.mubr.msk.f32.gmra.mrb[108].mxu1 %vm1149_vm5, %v6634_v21 }
0x11c6   : > { %v9705_v45 = vpop.f32.mrb[70].mxu1 }
0x11c7   : > { %v6271_v7 = vpop.f32.mrb[71].mxu1 }
0x11fb   : > { %v9775_v47 = vpop.f32.mrb[100].mxu1 }
0x11fc   : > { %v6762_v59 = vpop.f32.mrb[101].mxu1 }
0x11fd   : > { %9790 = vmatprep.mubr.msk.f32.mxu0 %vm983_vm3, %v6762_v59 }
0x11fe   : > { %9791 = vmatmul.mubr.msk.f32.vlgmr.msra.gmra.mrb[110].mxu0 %vm983_vm3, %v9775_v47 }
0x11ff   : > { %v9778_v3 = vpop.f32.mrb[102].mxu1  ;;  %10336 = vmatpush3.bf16.msra.mxu0 %v12524_v17 }
0x1200   : > { %v6772_v25 = vpop.f32.mrb[103].mxu1  ;;  %10338 = vmatprep.subr.bf16.mxu0 %v12530_v52 }
0x1201   : > { %9793 = vmatprep.mubr.msk.f32.mxu1 %vm983_vm3, %v6772_v25 }
0x1202   : > { %9794 = vmatmul.mubr.msk.f32.vlgmr.msra.gmra.mrb[72].mxu1 %vm983_vm3, %v9778_v3 }
0x1203   : > { %v9781_v38 = vpop.f32.mrb[104].mxu1  ;;  %10340 = vmatpush3.bf16.msra.mxu0 %v12530_v52  ;;  %10344 = vmatpush3.bf16.msra.mxu1 %v12626_v54 }
0x1204   : > { %v6782_v23 = vpop.f32.mrb[105].mxu1  ;;  %10346 = vmatprep.subr.bf16.mxu1 %v12632_v40 }
0x1205   : > { %9796 = vmatprep.mubr.msk.f32.mxu1 %vm983_vm3, %v6782_v23 }
0x1206   : > { %9797 = vmatmul.mubr.msk.f32.gmra.mrb[74].mxu1 %vm983_vm3, %v9781_v38 }
0x1207   : > { %v9784_v17 = vpop.f32.mrb[106].mxu1  ;;  %10348 = vmatpush3.bf16.msra.mxu1 %v12632_v40  ;;  %v11333_v40 = vld [vmem:[%s11526_s17] ss:$0 sm:$0xff] }
0x1208   : > { %v6792_v50 = vpop.f32.mrb[107].mxu1  ;;  %10350 = vmatprep.subr.bf16.mxu1 %v12638_v53  ;;  %v10378_v32 = vadd.f32 %v11333_v40, %v9705_v45  ;;  %v10380_v36 = vadd.f32 %v11333_v40, %v6271_v7 }
0x1209   : > { %9799 = vmatprep.mubr.msk.f32.mxu1 %vm983_vm3, %v6792_v50 }
0x120a   : > { %9800 = vmatmul.mubr.msk.f32.gmra.mrb[76].mxu1 %vm983_vm3, %v9784_v17 }
0x120b   : > { %v9787_v52 = vpop.f32.mrb[108].mxu1  ;;  %10352 = vmatpush3.bf16.msra.mxu1 %v12638_v53 }
0x120c   : > { %v6802_v54 = vpop.f32.mrb[109].mxu1  ;;  %10354 = vmatprep.subr.bf16.mxu1 %v12644_v10 }
0x120d   : > { %9802 = vmatprep.mubr.msk.f32.mxu1 %vm983_vm3, %v6802_v54 }
0x120e   : > { %9803 = vmatmul.mubr.msk.f32.gmra.mrb[78].mxu1 %vm983_vm3, %v9787_v52 }
0x120f   : > { %10356 = vmatpush3.bf16.msra.mxu1 %v12644_v10 }
0x12d1   : > { %v9792_v31 = vpop.f32.mrb[110].mxu0 }
0x12d2   : > { %v10379_v14 = vadd.f32 %v10378_v32, %v9792_v31  ;;  %v6907_v60 = vpop.f32.mrb[111].mxu0 }
0x12d3   : > { %v10381_v16 = vadd.f32 %v10380_v36, %v6907_v60 }
0x12d4   : > { %v6967_v22 = vadd.f32 %v11334_v13, %v10379_v14 }
0x12d5   : > { %v6966_v53 = vadd.f32 %v11335_v35, %v10381_v16  ;;  %v9795_v5 = vpop.f32.mrb[72].mxu1 }
0x12d6   : > { %v10382_v1 = vadd.f32 %v11333_v40, %v9795_v5  ;;  %v6917_v46 = vpop.f32.mrb[73].mxu1  ;;  %v6979_v33 = vsel %vm797_vm2, %v6967_v22, 0.0 }
0x12d7   : > { %v10383_v15 = vadd.f32 %v11333_v40, %v6917_v46  ;;  %6980 = vadd.xlane.f32.xlu1 %v6979_v33  ;;  %v6976_v10 = vsel %vm797_vm2, %v6966_v53, 0.0 }
0x12d8   : > { %v6969_v37 = vadd.f32 %v11336_v41, %v10382_v1  ;;  %6977 = vadd.xlane.f32.xlu0 %v6976_v10 }
0x12d9   : > { %v9798_v34 = vpop.f32.mrb[74].mxu1  ;;  %v6968_v2 = vadd.f32 %v11337_v18, %v10383_v15 }
0x12da   : > { %v6927_v19 = vpop.f32.mrb[75].mxu1  ;;  %v6985_v48 = vsel %vm797_vm2, %v6969_v37, 0.0  ;;  %v10384_v30 = vadd.f32 %v11333_v40, %v9798_v34 }
0x12db   : > { %v10385_v4 = vadd.f32 %v11333_v40, %v6927_v19  ;;  %v6982_v20 = vsel %vm797_vm2, %v6968_v2, 0.0 }
0x12dc   : > { %6986 = vadd.xlane.f32.xlu0 %v6985_v48  ;;  %v6971_v44 = vadd.f32 %v11340_v49, %v10384_v30  ;;  %v13624_v48 = vld [vmem:[%s700_s29] ss:$0 sm:$0xff] }
0x12dd   : > { %v9801_v9 = vpop.f32.mrb[76].mxu1  ;;  %v6970_v28 = vadd.f32 %v11338_v39, %v10385_v4 }
0x12de   : > { %v6937_v29 = vpop.f32.mrb[77].mxu1  ;;  %v10386_v56 = vadd.f32 %v11333_v40, %v9801_v9  ;;  %v6991_v63 = vsel %vm797_vm2, %v6971_v44, 0.0 }
0x12df   : > { %v10387_v26 = vadd.f32 %v11333_v40, %v6937_v29  ;;  %v6988_v8 = vsel %vm797_vm2, %v6970_v28, 0.0 }
0x12e0   : > { %6983 = vadd.xlane.f32.xlu0 %v6982_v20  ;;  %v6973_v61 = vadd.f32 %v11342_v57, %v10386_v56 }
0x12e1   : > { %v6972_v43 = vadd.f32 %v11339_v58, %v10387_v26  ;;  %v9804_v11 = vpop.f32.mrb[78].mxu1 }
0x12e2   : > { %v6947_v55 = vpop.f32.mrb[79].mxu1  ;;  %v10388_v6 = vadd.f32 %v11333_v40, %v9804_v11  ;;  %v6997_v45 = vsel %vm797_vm2, %v6973_v61, 0.0 }
0x12e3   : > { %v10389_v51 = vadd.f32 %v11333_v40, %v6947_v55  ;;  %v6994_v42 = vsel %vm797_vm2, %v6972_v43, 0.0  ;;  %v14275_v55 = vld [vmem:[#allocation17_spill] sm:$0xff] }
0x12e4   : > { %6989 = vadd.xlane.f32.xlu0 %v6988_v8  ;;  %6995 = vadd.xlane.f32.xlu1 %v6994_v42  ;;  %v6975_v21 = vadd.f32 %v11343_v62, %v10388_v6  ;;  %v4031_v56 = vadd.f32 %v14275_v55, %v13624_v48  ;;  %v14277_v8 = vld [vmem:[#allocation19_spill] sm:$0xff]  ;;  %v14278_v6 = vld [vmem:[#allocation8_spill] sm:$0xff] }
0x12e5   : > { %v6974_v0 = vadd.f32 %v11341_v24, %v10389_v51  ;;  %v4036_v42 = vadd.f32 %v13624_v48, %v14277_v8 }
0x12e6   : > { %v7003_v7 = vsel %vm3544_vm10, %v6975_v21, 0.0 }
0x12e7   : > { %v7000_v27 = vsel %vm797_vm2, %v6974_v0, 0.0 }
0x12e8   : > { %6992 = vadd.xlane.f32.xlu0 %v6991_v63  ;;  %7001 = vadd.xlane.f32.xlu1 %v7000_v27  ;;  %v13659_v63 = vadd.f32 %v4031_v56, %v14278_v6  ;;  %v14279_v27 = vld [vmem:[#allocation18_spill] sm:$0xff] }
0x12e9   : > { %v4041_v62 = vadd.f32 %v14279_v27, %v13624_v48 }
0x12ec   : > { %6998 = vadd.xlane.f32.xlu0 %v6997_v45  ;;  %v14280_v45 = vld [vmem:[#allocation9_spill] sm:$0xff] }
0x12f0   : > { %7004 = vadd.xlane.f32.xlu0 %v7003_v7  ;;  %v13664_v7 = vadd.f32 %v4036_v42, %v14280_v45 }
0x1364   : > { %v6981_v47 = vpop.xlane.xlu1 %6980 }
0x1365   : > { %v7007_v59 = vmul.f32 0.03125, %v6981_v47  ;;  %v6978_v3 = vpop.xlane.xlu0 %6977 }
0x1366   : > { %v7006_v25 = vmul.f32 0.03125, %v6978_v3 }
0x1367   : > { %v13593_v38 = vsub.f32 %v6967_v22, %v7007_v59 }
0x1368   : > { %v13595_v23 = vsub.f32 %v6966_v53, %v7006_v25  ;;  %v14282_v25 = vld [vmem:[#allocation10_spill] sm:$0xff] }
0x1369   : > { %v6987_v17 = vpop.xlane.xlu0 %6986  ;;  %v7027_v50 = vmul.f32 %v13593_v38, %v13593_v38 }
0x136a   : > { %v7009_v52 = vmul.f32 0.03125, %v6987_v17  ;;  %v7026_v54 = vmul.f32 %v13595_v23, %v13595_v23  ;;  %v13672_v17 = vadd.f32 %v4041_v62, %v14282_v25 }
0x136b   : > { %v7039_v40 = vsel %vm797_vm2, %v7027_v50, 0.0  ;;  %v14283_v50 = vld [vmem:[#allocation20_spill] sm:$0xff] }
0x136c   : > { %v13602_v32 = vsub.f32 %v6969_v37, %v7009_v52  ;;  %7040 = vadd.xlane.f32.xlu0 %v7039_v40  ;;  %v7036_v36 = vsel %vm797_vm2, %v7026_v54, 0.0  ;;  %v4051_v52 = vadd.f32 %v14283_v50, %v13624_v48  ;;  %v14284_v54 = vld [vmem:[#allocation11_spill] sm:$0xff] }
0x136d   : > { %v6984_v31 = vpop.xlane.xlu0 %6983  ;;  %7037 = vadd.xlane.f32.xlu1 %v7036_v36  ;;  %v14285_v36 = vld [vmem:[#allocation23_spill] sm:$0xff] }
0x136e   : > { %v7008_v14 = vmul.f32 0.03125, %v6984_v31  ;;  %v7029_v60 = vmul.f32 %v13602_v32, %v13602_v32  ;;  %v4056_v31 = vadd.f32 %v13624_v48, %v14285_v36 }
0x1370   : > { %v13607_v16 = vsub.f32 %v6968_v2, %v7008_v14  ;;  %v7045_v13 = vsel %vm797_vm2, %v7029_v60, 0.0  ;;  %v4087_v14 = vsel %vm797_vm2, %v13659_v63, 0.0  ;;  %v4090_v60 = vsel %vm797_vm2, %v13664_v7, 0.0 }
0x1371   : > { %v6990_v22 = vpop.xlane.xlu0 %6989  ;;  %v6996_v35 = vpop.xlane.xlu1 %6995  ;;  %7046 = vadd.xlane.f32.xlu0 %v7045_v13  ;;  %v14286_v13 = vld [vmem:[#allocation12_spill] sm:$0xff] }
0x1372   : > { %v7010_v53 = vmul.f32 0.03125, %v6990_v22  ;;  %v7012_v5 = vmul.f32 0.03125, %v6996_v35  ;;  %v7028_v1 = vmul.f32 %v13607_v16, %v13607_v16  ;;  %v13686_v22 = vadd.f32 %v4051_v52, %v14286_v13 }
0x1373   : > { %v4093_v35 = vsel %vm797_vm2, %v13672_v17, 0.0 }
0x1374   : > { %v13612_v46 = vsub.f32 %v6970_v28, %v7010_v53  ;;  %v13614_v33 = vsub.f32 %v6972_v43, %v7012_v5  ;;  %v7042_v15 = vsel %vm797_vm2, %v7028_v1, 0.0  ;;  %v4026_v28 = vadd.f32 %v13624_v48, %v12907_v12  ;;  %v14276_v12 = vld [vmem:[#allocation7_spill] sm:$0xff]  ;;  %v14287_v53 = vld [vmem:[#allocation22_spill] sm:$0xff]  ;;  %v14288_v1 = vld [vmem:[#allocation13_spill] sm:$0xff] }
0x1375   : > { %v6993_v10 = vpop.xlane.xlu0 %6992  ;;  %7043 = vadd.xlane.f32.xlu1 %v7042_v15  ;;  %v7002_v41 = vpop.xlane.xlu1 %7001  ;;  %v4061_v5 = vadd.f32 %v14287_v53, %v13624_v48  ;;  %v13693_v15 = vadd.f32 %v4056_v31, %v14288_v1 }
0x1376   : > { %v7011_v37 = vmul.f32 0.03125, %v6993_v10  ;;  %v7014_v34 = vmul.f32 0.03125, %v7002_v41  ;;  %v7030_v19 = vmul.f32 %v13612_v46, %v13612_v46  ;;  %v7032_v9 = vmul.f32 %v13614_v33, %v13614_v33  ;;  %v14289_v10 = vld [vmem:[#allocation25_spill] sm:$0xff] }
0x1377   : > { %v13648_v51 = vadd.f32 %v4026_v28, %v14276_v12  ;;  %v4066_v41 = vadd.f32 %v13624_v48, %v14289_v10  ;;  %v4102_v28 = vsel %vm797_vm2, %v13693_v15, 0.0 }
0x1378   : > { %v13626_v18 = vsub.f32 %v6971_v44, %v7011_v37  ;;  %v13628_v2 = vsub.f32 %v6974_v0, %v7014_v34  ;;  %v7048_v4 = vsel %vm797_vm2, %v7030_v19, 0.0  ;;  %v7054_v58 = vsel %vm797_vm2, %v7032_v9, 0.0  ;;  %v14290_v19 = vld [vmem:[#allocation14_spill] sm:$0xff]  ;;  %v14291_v9 = vld [vmem:[#allocation24_spill] sm:$0xff] }
0x1379   : > { %v6999_v30 = vpop.xlane.xlu0 %6998  ;;  %7049 = vadd.xlane.f32.xlu1 %v7048_v4  ;;  %v4084_v3 = vsel %vm797_vm2, %v13648_v51, 0.0  ;;  %v4099_v34 = vsel %vm797_vm2, %v13686_v22, 0.0  ;;  %v13702_v4 = vadd.f32 %v4061_v5, %v14290_v19 }
0x137a   : > { %v7013_v29 = vmul.f32 0.03125, %v6999_v30  ;;  %v7031_v39 = vmul.f32 %v13626_v18, %v13626_v18  ;;  %v7034_v43 = vmul.f32 %v13628_v2, %v13628_v2  ;;  %v4071_v30 = vadd.f32 %v14291_v9, %v13624_v48 }
0x137c   : > { %v13637_v26 = vsub.f32 %v6973_v61, %v7013_v29  ;;  %v7051_v20 = vsel %vm797_vm2, %v7031_v39, 0.0  ;;  %v7060_v57 = vsel %vm797_vm2, %v7034_v43, 0.0  ;;  %v14292_v29 = vld [vmem:[#allocation15_spill] sm:$0xff]  ;;  %v4105_v43 = vsel %vm797_vm2, %v13702_v4, 0.0 }
0x137d   : > { %7052 = vadd.xlane.f32.xlu0 %v7051_v20  ;;  %v7005_v11 = vpop.xlane.xlu0 %7004  ;;  %7055 = vadd.xlane.f32.xlu1 %v7054_v58  ;;  %v13707_v39 = vadd.f32 %v4066_v41, %v14292_v29  ;;  %v14293_v20 = vld [vmem:[#allocation16_spill] sm:$0xff]  ;;  %v11345_v41 = vld [vmem:[%s11538_s30] ss:$0 sm:$0xff] }
0x137e   : > { %v7015_v49 = vmul.f32 0.03125, %v7005_v11  ;;  %v7033_v44 = vmul.f32 %v13637_v26, %v13637_v26  ;;  %v13712_v58 = vadd.f32 %v4071_v30, %v14293_v20 }
0x137f   : > { %v4108_v11 = vsel %vm797_vm2, %v13707_v39, 0.0 }
0x1380   : > { %v13652_v24 = vsub.f32 %v6975_v21, %v7015_v49  ;;  %v7057_v0 = vsel %vm797_vm2, %v7033_v44, 0.0  ;;  %v14281_v21 = vld [vmem:[#allocation21_spill] sm:$0xff]  ;;  %v4111_v49 = vsel %vm3544_vm10, %v13712_v58, 0.0 }
0x1381   : > { %7058 = vadd.xlane.f32.xlu0 %v7057_v0  ;;  %7061 = vadd.xlane.f32.xlu1 %v7060_v57  ;;  %v4046_v47 = vadd.f32 %v13624_v48, %v14281_v21 }
0x1382   : > { %v7035_v61 = vmul.f32 %v13652_v24, %v13652_v24 }
0x1383   : > { %v13677_v40 = vadd.f32 %v4046_v47, %v14284_v54 }
0x1384   : > { %v7063_v59 = vsel %vm3544_vm10, %v7035_v61, 0.0 }
0x1385   : > { %7064 = vadd.xlane.f32.xlu0 %v7063_v59  ;;  %4085 = vadd.xlane.f32.xlu1 %v4084_v3  ;;  %v4096_v37 = vsel %vm797_vm2, %v13677_v40, 0.0 }
0x1389   : > { %4088 = vadd.xlane.f32.xlu0 %v4087_v14  ;;  %4091 = vadd.xlane.f32.xlu1 %v4090_v60  ;;  %v11344_v14 = vld [vmem:[%s11532_s28] ss:$0 sm:$0xff] }
0x138d   : > { %4094 = vadd.xlane.f32.xlu0 %v4093_v35  ;;  %4097 = vadd.xlane.f32.xlu1 %v4096_v37 }
0x1391   : > { %4100 = vadd.xlane.f32.xlu0 %v4099_v34  ;;  %4103 = vadd.xlane.f32.xlu1 %v4102_v28 }
0x1395   : > { %4106 = vadd.xlane.f32.xlu0 %v4105_v43  ;;  %4109 = vadd.xlane.f32.xlu1 %v4108_v11 }
0x1399   : > { %4112 = vadd.xlane.f32.xlu0 %v4111_v49 }
0x13f9   : > { %v7041_v44 = vpop.xlane.xlu0 %7040 }
0x13fa   : > { %v7067_v55 = vmul.f32 0.03125, %v7041_v44  ;;  %v7038_v56 = vpop.xlane.xlu1 %7037 }
0x13fb   : > { %v7066_v12 = vmul.f32 0.03125, %v7038_v56 }
0x13fc   : > { %v7077_v8 = vadd.f32 1e-05, %v7067_v55 }
0x13fd   : > { %v7076_v42 = vadd.f32 1e-05, %v7066_v12 }
0x13fe   : > { %11238 = vrsqrt.f32 %v7077_v8  ;;  %v7047_v0 = vpop.xlane.xlu0 %7046 }
0x13ff   : > { %11240 = vrsqrt.f32 %v7076_v42  ;;  %v7069_v57 = vmul.f32 0.03125, %v7047_v0 }
0x1401   : > { %v7079_v61 = vadd.f32 1e-05, %v7069_v57 }
0x1402   : > { %v7044_v6 = vpop.xlane.xlu1 %7043 }
0x1403   : > { %11242 = vrsqrt.f32 %v7079_v61  ;;  %v7068_v27 = vmul.f32 0.03125, %v7044_v6 }
0x1405   : > { %v7078_v62 = vadd.f32 1e-05, %v7068_v27 }
0x1406   : > { %v7050_v45 = vpop.xlane.xlu1 %7049 }
0x1407   : > { %11244 = vrsqrt.f32 %v7078_v62  ;;  %v7070_v21 = vmul.f32 0.03125, %v7050_v45 }
0x1408   : > { %v11239_v47 = vpop.eup %11238 }
0x1409   : > { %v11241_v59 = vpop.eup %11240  ;;  %v7097_v3 = vmul.f32 %v11239_v47, %v13593_v38  ;;  %v7080_v25 = vadd.f32 1e-05, %v7070_v21 }
0x140a   : > { %v7053_v50 = vpop.xlane.xlu0 %7052  ;;  %v7056_v52 = vpop.xlane.xlu1 %7055  ;;  %v7096_v54 = vmul.f32 %v11241_v59, %v13595_v23 }
0x140b   : > { %11246 = vrsqrt.f32 %v7080_v25  ;;  %v7071_v36 = vmul.f32 0.03125, %v7053_v50  ;;  %v7072_v31 = vmul.f32 0.03125, %v7056_v52  ;;  %v7107_v60 = vmul.f32 %v11344_v14, %v7097_v3 }
0x140c   : > { %v7106_v13 = vmul.f32 %v11344_v14, %v7096_v54 }
0x140d   : > { %v11243_v35 = vpop.eup %11242  ;;  %v7081_v53 = vadd.f32 1e-05, %v7071_v36  ;;  %v7082_v5 = vadd.f32 1e-05, %v7072_v31  ;;  %v13726_v38 = vadd.f32 %v11345_v41, %v7107_v60  ;;  %v11346_v36 = vld [vmem:[%s11549_s24] ss:$0 sm:$0xff] }
0x140e   : > { %v7059_v1 = vpop.xlane.xlu0 %7058  ;;  %v7062_v10 = vpop.xlane.xlu1 %7061  ;;  %v13724_v37 = vadd.f32 %v11345_v41, %v7106_v13  ;;  %v7099_v23 = vmul.f32 %v11243_v35, %v13602_v32 }
0x140f   : > { %11248 = vrsqrt.f32 %v7081_v53  ;;  %v7073_v34 = vmul.f32 0.03125, %v7059_v1  ;;  %v7074_v19 = vmul.f32 0.03125, %v7062_v10 }
0x1410   : > { %11250 = vrsqrt.f32 %v7082_v5  ;;  %9813 = vmatprep.mubr.msk.f32.mxu0 %vm797_vm2, %v13724_v37  ;;  %v7109_v11 = vmul.f32 %v11344_v14, %v7099_v23 }
0x1411   : > { %v11245_v9 = vpop.eup %11244  ;;  %v7083_v30 = vadd.f32 1e-05, %v7073_v34  ;;  %v7084_v29 = vadd.f32 1e-05, %v7074_v19  ;;  %9814 = vmatmul.mubr.msk.f32.vlgmr.msra.gmra.mrb[112].mxu0 %vm797_vm2, %v13726_v38 }
0x1412   : > { %v7065_v28 = vpop.xlane.xlu0 %7064  ;;  %v7098_v20 = vmul.f32 %v11245_v9, %v13607_v16  ;;  %v13737_v12 = vadd.f32 %v11345_v41, %v7109_v11 }
0x1413   : > { %11252 = vrsqrt.f32 %v7083_v30  ;;  %v7075_v43 = vmul.f32 0.03125, %v7065_v28 }
0x1414   : > { %11254 = vrsqrt.f32 %v7084_v29  ;;  %v7108_v49 = vmul.f32 %v11344_v14, %v7098_v20 }
0x1415   : > { %v11247_v44 = vpop.eup %11246  ;;  %v7085_v32 = vadd.f32 1e-05, %v7075_v43 }
0x1416   : > { %v13734_v55 = vadd.f32 %v11345_v41, %v7108_v49  ;;  %v7100_v56 = vmul.f32 %v11247_v44, %v13612_v46 }
0x1417   : > { %11256 = vrsqrt.f32 %v7085_v32 }
0x1418   : > { %9816 = vmatprep.mubr.msk.f32.mxu0 %vm797_vm2, %v13734_v55  ;;  %v7110_v8 = vmul.f32 %v11344_v14, %v7100_v56 }
0x1419   : > { %v11249_v42 = vpop.eup %11248  ;;  %9817 = vmatmul.mubr.msk.f32.gmra.mrb[114].mxu0 %vm797_vm2, %v13737_v12 }
0x141a   : > { %v11251_v16 = vpop.eup %11250  ;;  %v13743_v0 = vadd.f32 %v11345_v41, %v7110_v8  ;;  %v7101_v57 = vmul.f32 %v11249_v42, %v13626_v18 }
0x141b   : > { %v7102_v61 = vmul.f32 %v11251_v16, %v13614_v33 }
0x141c   : > { %9819 = vmatprep.mubr.msk.f32.mxu0 %vm797_vm2, %v13743_v0  ;;  %v7111_v46 = vmul.f32 %v11344_v14, %v7101_v57 }
0x141d   : > { %v11253_v6 = vpop.eup %11252  ;;  %v7112_v27 = vmul.f32 %v11344_v14, %v7102_v61 }
0x141e   : > { %v11255_v62 = vpop.eup %11254  ;;  %v13749_v45 = vadd.f32 %v11345_v41, %v7111_v46  ;;  %v7103_v21 = vmul.f32 %v11253_v6, %v13637_v26 }
0x141f   : > { %v13752_v47 = vadd.f32 %v11345_v41, %v7112_v27  ;;  %v7104_v59 = vmul.f32 %v11255_v62, %v13628_v2 }
0x1420   : > { %9820 = vmatmul.mubr.msk.f32.gmra.mrb[116].mxu0 %vm797_vm2, %v13749_v45  ;;  %v7113_v33 = vmul.f32 %v11344_v14, %v7103_v21 }
0x1421   : > { %v11257_v18 = vpop.eup %11256  ;;  %9822 = vmatprep.mubr.msk.f32.mxu0 %vm797_vm2, %v13752_v47  ;;  %v7114_v3 = vmul.f32 %v11344_v14, %v7104_v59 }
0x1422   : > { %v13759_v25 = vadd.f32 %v11345_v41, %v7113_v33  ;;  %v7105_v50 = vmul.f32 %v11257_v18, %v13652_v24 }
0x1423   : > { %v13762_v52 = vadd.f32 %v11345_v41, %v7114_v3 }
0x1424   : > { %9823 = vmatmul.mubr.msk.f32.gmra.mrb[118].mxu0 %vm797_vm2, %v13759_v25  ;;  %v7115_v26 = vmul.f32 %v11344_v14, %v7105_v50 }
0x1425   : > { %9825 = vmatprep.mubr.msk.f32.mxu0 %vm797_vm2, %v13762_v52 }
0x1426   : > { %v13768_v2 = vadd.f32 %v11345_v41, %v7115_v26 }
0x1428   : > { %9826 = vmatmul.mubr.msk.f32.gmra.mrb[120].mxu0 %vm797_vm2, %v13768_v2 }
0x14e4   : > { %v9815_v54 = vpop.f32.mrb[112].mxu0 }
0x14e5   : > { %v13773_v31 = vadd.f32 %v11346_v36, %v9815_v54  ;;  %v7222_v60 = vpop.f32.mrb[113].mxu0 }
0x14e6   : > { %v13775_v24 = vadd.f32 %v11346_v36, %v7222_v60 }
0x14e7   : > { %v7272_v13 = vmul.f32 %v13773_v31, %v13773_v31 }
0x14e8   : > { %v7271_v14 = vmul.f32 %v13775_v24, %v13775_v24 }
0x14e9   : > { %v7282_v35 = vmul.f32 %v7272_v13, %v13773_v31 }
0x14ea   : > { %v7281_v53 = vmul.f32 %v7271_v14, %v13775_v24 }
0x14eb   : > { %v7292_v5 = vmul.f32 0.044715, %v7282_v35 }
0x14ec   : > { %v7291_v1 = vmul.f32 0.044715, %v7281_v53  ;;  %v9818_v10 = vpop.f32.mrb[114].mxu0 }
0x14ed   : > { %v7302_v41 = vadd.f32 %v7292_v5, %v13773_v31  ;;  %v13784_v34 = vadd.f32 %v11346_v36, %v9818_v10  ;;  %v7232_v19 = vpop.f32.mrb[115].mxu0 }
0x14ee   : > { %v7301_v23 = vadd.f32 %v7291_v1, %v13775_v24  ;;  %v13787_v9 = vadd.f32 %v11346_v36, %v7232_v19 }
0x14ef   : > { %v7312_v30 = vmul.f32 0.7978846, %v7302_v41  ;;  %v7274_v29 = vmul.f32 %v13784_v34, %v13784_v34 }
0x14f0   : > { %v7311_v28 = vmul.f32 0.7978846, %v7301_v23  ;;  %v7273_v20 = vmul.f32 %v13787_v9, %v13787_v9 }
0x14f1   : > { %11258 = vtanh.f32 %v7312_v30  ;;  %v7284_v43 = vmul.f32 %v7274_v29, %v13784_v34 }
0x14f2   : > { %11260 = vtanh.f32 %v7311_v28  ;;  %v7283_v11 = vmul.f32 %v7273_v20, %v13787_v9 }
0x14f3   : > { %v7294_v49 = vmul.f32 0.044715, %v7284_v43  ;;  %v9821_v44 = vpop.f32.mrb[116].mxu0 }
0x14f4   : > { %v7293_v32 = vmul.f32 0.044715, %v7283_v11  ;;  %v13795_v56 = vadd.f32 %v11346_v36, %v9821_v44  ;;  %v7242_v8 = vpop.f32.mrb[117].mxu0 }
0x14f5   : > { %v7304_v42 = vadd.f32 %v7294_v49, %v13784_v34  ;;  %v13798_v16 = vadd.f32 %v11346_v36, %v7242_v8 }
0x14f6   : > { %v7303_v57 = vadd.f32 %v7293_v32, %v13787_v9  ;;  %v7276_v61 = vmul.f32 %v13795_v56, %v13795_v56 }
0x14f7   : > { %v7314_v46 = vmul.f32 0.7978846, %v7304_v42  ;;  %v7275_v6 = vmul.f32 %v13798_v16, %v13798_v16  ;;  %v9824_v27 = vpop.f32.mrb[118].mxu0 }
0x14f8   : > { %v7313_v62 = vmul.f32 0.7978846, %v7303_v57  ;;  %v7286_v21 = vmul.f32 %v7276_v61, %v13795_v56  ;;  %v13806_v59 = vadd.f32 %v11346_v36, %v9824_v27  ;;  %v7252_v33 = vpop.f32.mrb[119].mxu0 }
0x14f9   : > { %11262 = vtanh.f32 %v7314_v46  ;;  %v7285_v18 = vmul.f32 %v7275_v6, %v13798_v16  ;;  %v13809_v3 = vadd.f32 %v11346_v36, %v7252_v33 }
0x14fa   : > { %11264 = vtanh.f32 %v7313_v62  ;;  %v7296_v50 = vmul.f32 0.044715, %v7286_v21  ;;  %v7278_v26 = vmul.f32 %v13806_v59, %v13806_v59 }
0x14fb   : > { %v11259_v54 = vpop.eup %11258  ;;  %v7295_v60 = vmul.f32 0.044715, %v7285_v18  ;;  %v7277_v13 = vmul.f32 %v13809_v3, %v13809_v3  ;;  %v9827_v14 = vpop.f32.mrb[120].mxu0 }
0x14fc   : > { %v11261_v35 = vpop.eup %11260  ;;  %v7332_v53 = vadd.f32 1.0, %v11259_v54  ;;  %v7306_v5 = vadd.f32 %v7296_v50, %v13795_v56  ;;  %v7288_v1 = vmul.f32 %v7278_v26, %v13806_v59  ;;  %v13817_v10 = vadd.f32 %v11346_v36, %v9827_v14  ;;  %v7262_v41 = vpop.f32.mrb[121].mxu0 }
0x14fd   : > { %v7305_v19 = vadd.f32 %v7295_v60, %v13798_v16  ;;  %v7287_v23 = vmul.f32 %v7277_v13, %v13809_v3  ;;  %v13821_v30 = vadd.f32 %v11346_v36, %v7262_v41  ;;  %v7331_v29 = vadd.f32 1.0, %v11261_v35 }
0x14fe   : > { %v7342_v28 = vmul.f32 0.5, %v7332_v53  ;;  %v7316_v20 = vmul.f32 0.7978846, %v7306_v5  ;;  %v7298_v43 = vmul.f32 0.044715, %v7288_v1  ;;  %v7280_v11 = vmul.f32 %v13817_v10, %v13817_v10 }
0x14ff   : > { %v7315_v49 = vmul.f32 0.7978846, %v7305_v19  ;;  %v7297_v44 = vmul.f32 0.044715, %v7287_v23  ;;  %v7279_v32 = vmul.f32 %v13821_v30, %v13821_v30  ;;  %v7341_v8 = vmul.f32 0.5, %v7331_v29 }
0x1500   : > { %11266 = vtanh.f32 %v7316_v20  ;;  %v7308_v42 = vadd.f32 %v7298_v43, %v13806_v59  ;;  %v7290_v57 = vmul.f32 %v7280_v11, %v13817_v10  ;;  %v7352_v6 = vmul.f32 %v7342_v28, %v13773_v31 }
0x1501   : > { %11268 = vtanh.f32 %v7315_v49  ;;  %v7307_v36 = vadd.f32 %v7297_v44, %v13809_v3  ;;  %v7289_v61 = vmul.f32 %v7279_v32, %v13821_v30  ;;  %v7351_v46 = vmul.f32 %v7341_v8, %v13775_v24 }
0x1502   : > { %v7318_v27 = vmul.f32 0.7978846, %v7308_v42  ;;  %v7300_v62 = vmul.f32 0.044715, %v7290_v57 }
0x1503   : > { %v11263_v21 = vpop.eup %11262  ;;  %v7317_v33 = vmul.f32 0.7978846, %v7307_v36  ;;  %v7299_v18 = vmul.f32 0.044715, %v7289_v61  ;;  %9844 = vmatprep.mubr.msk.f32.mxu1 %vm3928_vm11, %v7351_v46 }
0x1504   : > { %v11265_v50 = vpop.eup %11264  ;;  %11270 = vtanh.f32 %v7318_v27  ;;  %v7310_v26 = vadd.f32 %v7300_v62, %v13817_v10  ;;  %9845 = vmatmul.mubr.msk.f32.vlgmr.msra.gmra.mrb[110].mxu1 %vm3928_vm11, %v7352_v6  ;;  %v7334_v54 = vadd.f32 1.0, %v11263_v21 }
0x1505   : > { %11272 = vtanh.f32 %v7317_v33  ;;  %v7309_v60 = vadd.f32 %v7299_v18, %v13821_v30  ;;  %v7333_v24 = vadd.f32 1.0, %v11265_v50 }
0x1506   : > { %v7320_v13 = vmul.f32 0.7978846, %v7310_v26  ;;  %v7344_v31 = vmul.f32 0.5, %v7334_v54  ;;  %v4089_v26 = vpop.xlane.xlu0 %4088 }
0x1507   : > { %v7319_v14 = vmul.f32 0.7978846, %v7309_v60  ;;  %v7343_v35 = vmul.f32 0.5, %v7333_v24  ;;  %v4086_v24 = vpop.xlane.xlu1 %4085 }
0x1508   : > { %11274 = vtanh.f32 %v7320_v13  ;;  %v7354_v1 = vmul.f32 %v7344_v31, %v13784_v34 }
0x1509   : > { %11276 = vtanh.f32 %v7319_v14  ;;  %v7353_v53 = vmul.f32 %v7343_v35, %v13787_v9 }
0x150a   : > { %v11267_v5 = vpop.eup %11266  ;;  %v4095_v35 = vpop.xlane.xlu0 %4094 }
0x150b   : > { %v11269_v41 = vpop.eup %11268  ;;  %9847 = vmatprep.mubr.msk.f32.mxu1 %vm3928_vm11, %v7353_v53  ;;  %v7336_v19 = vadd.f32 1.0, %v11267_v5  ;;  %v4092_v5 = vpop.xlane.xlu1 %4091 }
0x150c   : > { %9848 = vmatmul.mubr.msk.f32.gmra.mrb[112].mxu1 %vm3928_vm11, %v7354_v1  ;;  %v7335_v23 = vadd.f32 1.0, %v11269_v41 }
0x150d   : > { %v7346_v29 = vmul.f32 0.5, %v7336_v19 }
0x150e   : > { %v11271_v28 = vpop.eup %11270  ;;  %v7345_v20 = vmul.f32 0.5, %v7335_v23 }
0x150f   : > { %v11273_v43 = vpop.eup %11272  ;;  %v7338_v11 = vadd.f32 1.0, %v11271_v28  ;;  %v7356_v9 = vmul.f32 %v7346_v29, %v13795_v56  ;;  %v4115_v29 = vmul.f32 0.03125, %v4089_v26 }
0x1510   : > { %v7355_v49 = vmul.f32 %v7345_v20, %v13798_v16  ;;  %v7337_v44 = vadd.f32 1.0, %v11273_v43 }
0x1511   : > { %v7348_v32 = vmul.f32 0.5, %v7338_v11  ;;  %v4114_v11 = vmul.f32 0.03125, %v4086_v24 }
0x1512   : > { %v11275_v8 = vpop.eup %11274  ;;  %9850 = vmatprep.mubr.msk.f32.mxu1 %vm3928_vm11, %v7355_v49  ;;  %v7347_v34 = vmul.f32 0.5, %v7337_v44  ;;  %v4101_v49 = vpop.xlane.xlu0 %4100 }
0x1513   : > { %v11277_v42 = vpop.eup %11276  ;;  %9851 = vmatmul.mubr.msk.f32.gmra.mrb[114].mxu1 %vm3928_vm11, %v7356_v9  ;;  %v7340_v57 = vadd.f32 1.0, %v11275_v8  ;;  %v7358_v46 = vmul.f32 %v7348_v32, %v13806_v59  ;;  %v4098_v9 = vpop.xlane.xlu1 %4097 }
0x1514   : > { %v7357_v36 = vmul.f32 %v7347_v34, %v13809_v3  ;;  %v7339_v61 = vadd.f32 1.0, %v11277_v42  ;;  %v13898_v34 = vsub.f32 %v13659_v63, %v4115_v29  ;;  %v4117_v42 = vmul.f32 0.03125, %v4095_v35 }
0x1515   : > { %v7350_v6 = vmul.f32 0.5, %v7340_v57 }
0x1516   : > { %9853 = vmatprep.mubr.msk.f32.mxu1 %vm3928_vm11, %v7357_v36  ;;  %v7349_v16 = vmul.f32 0.5, %v7339_v61 }
0x1517   : > { %9854 = vmatmul.mubr.msk.f32.gmra.mrb[116].mxu1 %vm3928_vm11, %v7358_v46  ;;  %v7360_v27 = vmul.f32 %v7350_v6, %v13817_v10  ;;  %v13904_v46 = vsub.f32 %v13648_v51, %v4114_v11  ;;  %v4119_v51 = vmul.f32 0.03125, %v4101_v49 }
0x1518   : > { %v7359_v56 = vmul.f32 %v7349_v16, %v13821_v30  ;;  %v4107_v16 = vpop.xlane.xlu0 %4106 }
0x151a   : > { %9856 = vmatprep.mubr.msk.f32.mxu1 %vm3928_vm11, %v7359_v56 }
0x151b   : > { %9857 = vmatmul.mubr.msk.f32.gmra.mrb[118].mxu1 %vm3928_vm11, %v7360_v27  ;;  %v13916_v27 = vsub.f32 %v13672_v17, %v4117_v42  ;;  %v4134_v17 = vmul.f32 %v13904_v46, %v13904_v46 }
0x15d7   : > { %v9846_v62 = vpop.f32.mrb[110].mxu1 }
0x15d8   : > { %v7463_v3 = vadd.f32 %v9846_v62, %v13624_v48  ;;  %v7457_v21 = vpop.f32.mrb[111].mxu1  ;;  %v4104_v62 = vpop.xlane.xlu1 %4103 }
0x15d9   : > { %v7458_v59 = vadd.f32 %v13624_v48, %v7457_v21  ;;  %v4120_v26 = vmul.f32 0.03125, %v4104_v62 }
0x15da   : > { %v13856_v33 = vadd.f32 %v7463_v3, %v13726_v38  ;;  %v4135_v3 = vmul.f32 %v13898_v34, %v13898_v34 }
0x15db   : > { %v13859_v18 = vadd.f32 %v7458_v59, %v13724_v37  ;;  %v13930_v59 = vsub.f32 %v13686_v22, %v4119_v51  ;;  %v13948_v35 = vsub.f32 %v13693_v15, %v4120_v26 }
0x15dc   : > { %v7519_v30 = vsel %vm797_vm2, %v13856_v33, 0.0 }
0x15dd   : > { %7520 = vadd.xlane.f32.xlu0 %v7519_v30  ;;  %v7516_v10 = vsel %vm797_vm2, %v13859_v18, 0.0  ;;  %v4121_v30 = vmul.f32 0.03125, %v4107_v16  ;;  %v4140_v29 = vmul.f32 %v13948_v35, %v13948_v35 }
0x15de   : > { %7517 = vadd.xlane.f32.xlu1 %v7516_v10  ;;  %v4147_v10 = vsel %vm797_vm2, %v4135_v3, 0.0 }
0x15df   : > { %v9849_v50 = vpop.f32.mrb[112].mxu1  ;;  %v13942_v22 = vsub.f32 %v13702_v4, %v4121_v30 }
0x15e0   : > { %v7473_v54 = vadd.f32 %v9849_v50, %v13624_v48  ;;  %v7467_v60 = vpop.f32.mrb[113].mxu1  ;;  %v4137_v50 = vmul.f32 %v13916_v27, %v13916_v27 }
0x15e1   : > { %v7468_v38 = vadd.f32 %v13624_v48, %v7467_v60  ;;  %v4144_v60 = vsel %vm797_vm2, %v4134_v17, 0.0 }
0x15e2   : > { %v13868_v13 = vadd.f32 %v7473_v54, %v13737_v12  ;;  %v4113_v54 = vpop.xlane.xlu0 %4112 }
0x15e3   : > { %v13871_v37 = vadd.f32 %v7468_v38, %v13734_v55  ;;  %v4110_v38 = vpop.xlane.xlu1 %4109 }
0x15e4   : > { %v7525_v31 = vsel %vm797_vm2, %v13868_v13, 0.0 }
0x15e5   : > { %7526 = vadd.xlane.f32.xlu0 %v7525_v31  ;;  %v7522_v14 = vsel %vm797_vm2, %v13871_v37, 0.0  ;;  %v4123_v31 = vmul.f32 0.03125, %v4113_v54 }
0x15e6   : > { %v9852_v53 = vpop.f32.mrb[114].mxu1  ;;  %7523 = vadd.xlane.f32.xlu1 %v7522_v14  ;;  %v4153_v14 = vsel %vm797_vm2, %v4137_v50, 0.0 }
0x15e7   : > { %v7483_v1 = vadd.f32 %v9852_v53, %v13624_v48  ;;  %v7477_v41 = vpop.f32.mrb[115].mxu1  ;;  %v4122_v53 = vmul.f32 0.03125, %v4110_v38  ;;  %v13954_v4 = vsub.f32 %v13712_v58, %v4123_v31 }
0x15e8   : > { %v7478_v12 = vadd.f32 %v13624_v48, %v7477_v41 }
0x15e9   : > { %v13880_v19 = vadd.f32 %v7483_v1, %v13749_v45  ;;  %v4143_v58 = vmul.f32 %v13954_v4, %v13954_v4 }
0x15ea   : > { %v13883_v55 = vadd.f32 %v7478_v12, %v13743_v0  ;;  %v9855_v23 = vpop.f32.mrb[116].mxu1  ;;  %v4141_v12 = vmul.f32 %v13942_v22, %v13942_v22 }
0x15eb   : > { %v7493_v28 = vadd.f32 %v9855_v23, %v13624_v48  ;;  %v7487_v20 = vpop.f32.mrb[117].mxu1  ;;  %v7531_v43 = vsel %vm797_vm2, %v13880_v19, 0.0  ;;  %v13960_v23 = vsub.f32 %v13707_v39, %v4122_v53  ;;  %v4171_v39 = vsel %vm3544_vm10, %v4143_v58, 0.0 }
0x15ec   : > { %v7488_v44 = vadd.f32 %v13624_v48, %v7487_v20  ;;  %7532 = vadd.xlane.f32.xlu0 %v7531_v43  ;;  %v7528_v45 = vsel %vm797_vm2, %v13883_v55, 0.0  ;;  %v4162_v20 = vsel %vm797_vm2, %v4140_v29, 0.0 }
0x15ed   : > { %v13892_v0 = vadd.f32 %v7493_v28, %v13759_v25  ;;  %7529 = vadd.xlane.f32.xlu1 %v7528_v45  ;;  %v4116_v25 = vmul.f32 0.03125, %v4092_v5  ;;  %v4165_v28 = vsel %vm797_vm2, %v4141_v12, 0.0  ;;  %v4142_v43 = vmul.f32 %v13960_v23, %v13960_v23 }
0x15ee   : > { %v13895_v32 = vadd.f32 %v7488_v44, %v13752_v47  ;;  %v9858_v8 = vpop.f32.mrb[118].mxu1 }
0x15ef   : > { %v7503_v57 = vadd.f32 %v9858_v8, %v13624_v48  ;;  %v7497_v36 = vpop.f32.mrb[119].mxu1  ;;  %v7537_v61 = vsel %vm797_vm2, %v13892_v0, 0.0  ;;  %v13923_v21 = vsub.f32 %v13664_v7, %v4116_v25  ;;  %v4168_v11 = vsel %vm797_vm2, %v4142_v43, 0.0 }
0x15f0   : > { %v7498_v6 = vadd.f32 %v13624_v48, %v7497_v36  ;;  %7538 = vadd.xlane.f32.xlu0 %v7537_v61  ;;  %v7534_v47 = vsel %vm797_vm2, %v13895_v32, 0.0 }
0x15f1   : > { %v13910_v63 = vadd.f32 %v7503_v57, %v13768_v2  ;;  %7535 = vadd.xlane.f32.xlu1 %v7534_v47  ;;  %v4118_v2 = vmul.f32 0.03125, %v4098_v9  ;;  %v4136_v24 = vmul.f32 %v13923_v21, %v13923_v21 }
0x15f2   : > { %v13913_v56 = vadd.f32 %v7498_v6, %v13762_v52 }
0x15f3   : > { %v7543_v48 = vsel %vm3544_vm10, %v13910_v63, 0.0  ;;  %v13936_v7 = vsub.f32 %v13677_v40, %v4118_v2  ;;  %v4139_v40 = vmul.f32 %v13930_v59, %v13930_v59  ;;  %v4150_v5 = vsel %vm797_vm2, %v4136_v24, 0.0 }
0x15f4   : > { %7544 = vadd.xlane.f32.xlu0 %v7543_v48  ;;  %v7540_v52 = vsel %vm797_vm2, %v13913_v56, 0.0 }
0x15f5   : > { %7541 = vadd.xlane.f32.xlu1 %v7540_v52  ;;  %v4138_v1 = vmul.f32 %v13936_v7, %v13936_v7  ;;  %v4159_v41 = vsel %vm797_vm2, %v4139_v40, 0.0 }
0x15f7   : > { %v4156_v15 = vsel %vm797_vm2, %v4138_v1, 0.0 }
0x15f8   : > { %4148 = vadd.xlane.f32.xlu0 %v4147_v10 }
0x15f9   : > { %4145 = vadd.xlane.f32.xlu1 %v4144_v60 }
0x15fc   : > { %4154 = vadd.xlane.f32.xlu0 %v4153_v14 }
0x15fd   : > { %4151 = vadd.xlane.f32.xlu1 %v4150_v5 }
0x1600   : > { %4160 = vadd.xlane.f32.xlu0 %v4159_v41 }
0x1601   : > { %4157 = vadd.xlane.f32.xlu1 %v4156_v15 }
0x1604   : > { %4166 = vadd.xlane.f32.xlu0 %v4165_v28 }
0x1605   : > { %4163 = vadd.xlane.f32.xlu1 %v4162_v20 }
0x1608   : > { %4172 = vadd.xlane.f32.xlu0 %v4171_v39 }
0x1609   : > { %4169 = vadd.xlane.f32.xlu1 %v4168_v11 }
0x166a   : > { %v7521_v49 = vpop.xlane.xlu0 %7520 }
0x166b   : > { %v7547_v44 = vmul.f32 0.03125, %v7521_v49  ;;  %v7518_v45 = vpop.xlane.xlu1 %7517 }
0x166c   : > { %v7546_v9 = vmul.f32 0.03125, %v7518_v45 }
0x166d   : > { %v13974_v8 = vsub.f32 %v13856_v33, %v7547_v44 }
0x166e   : > { %v13977_v42 = vsub.f32 %v13859_v18, %v7546_v9 }
0x166f   : > { %v7567_v57 = vmul.f32 %v13974_v8, %v13974_v8 }
0x1670   : > { %v7566_v36 = vmul.f32 %v13977_v42, %v13977_v42 }
0x1671   : > { %v7579_v61 = vsel %vm797_vm2, %v7567_v57, 0.0 }
0x1672   : > { %v7527_v25 = vpop.xlane.xlu0 %7526  ;;  %7580 = vadd.xlane.f32.xlu0 %v7579_v61  ;;  %v7576_v6 = vsel %vm797_vm2, %v7566_v36, 0.0 }
0x1673   : > { %v7549_v47 = vmul.f32 0.03125, %v7527_v25  ;;  %7577 = vadd.xlane.f32.xlu1 %v7576_v6  ;;  %v7524_v16 = vpop.xlane.xlu1 %7523 }
0x1674   : > { %v7548_v33 = vmul.f32 0.03125, %v7524_v16 }
0x1675   : > { %v13986_v51 = vsub.f32 %v13868_v13, %v7549_v47 }
0x1676   : > { %v13989_v18 = vsub.f32 %v13871_v37, %v7548_v33 }
0x1677   : > { %v7569_v62 = vmul.f32 %v13986_v51, %v13986_v51 }
0x1678   : > { %v7568_v48 = vmul.f32 %v13989_v18, %v13989_v18 }
0x1679   : > { %v7533_v3 = vpop.xlane.xlu0 %7532  ;;  %v7585_v2 = vsel %vm797_vm2, %v7569_v62, 0.0 }
0x167a   : > { %v7551_v52 = vmul.f32 0.03125, %v7533_v3  ;;  %7586 = vadd.xlane.f32.xlu0 %v7585_v2  ;;  %v7530_v17 = vpop.xlane.xlu1 %7529  ;;  %v7582_v30 = vsel %vm797_vm2, %v7568_v48, 0.0 }
0x167b   : > { %v7550_v10 = vmul.f32 0.03125, %v7530_v17  ;;  %7583 = vadd.xlane.f32.xlu1 %v7582_v30 }
0x167c   : > { %v13998_v13 = vsub.f32 %v13880_v19, %v7551_v52 }
0x167d   : > { %v14001_v37 = vsub.f32 %v13883_v55, %v7550_v10  ;;  %v7539_v50 = vpop.xlane.xlu0 %7538  ;;  %v14038_v10 = vld [vmem:[%s703_s27] ss:$0 sm:$0xff] }
0x167e   : > { %v7553_v26 = vmul.f32 0.03125, %v7539_v50  ;;  %v7536_v54 = vpop.xlane.xlu1 %7535  ;;  %v7571_v60 = vmul.f32 %v13998_v13, %v13998_v13 }
0x167f   : > { %v7552_v24 = vmul.f32 0.03125, %v7536_v54  ;;  %v7570_v38 = vmul.f32 %v14001_v37, %v14001_v37 }
0x1680   : > { %v14008_v31 = vsub.f32 %v13892_v0, %v7553_v26  ;;  %v7591_v14 = vsel %vm797_vm2, %v7571_v60, 0.0 }
0x1681   : > { %v14012_v19 = vsub.f32 %v13895_v32, %v7552_v24  ;;  %7592 = vadd.xlane.f32.xlu0 %v7591_v14  ;;  %v7545_v55 = vpop.xlane.xlu0 %7544  ;;  %v7588_v40 = vsel %vm797_vm2, %v7570_v38, 0.0  ;;  %v14046_v38 = vld [vmem:[%s706_s3] ss:$0 sm:$0xff] }
0x1682   : > { %v7555_v53 = vmul.f32 0.03125, %v7545_v55  ;;  %7589 = vadd.xlane.f32.xlu1 %v7588_v40  ;;  %v7542_v5 = vpop.xlane.xlu1 %7541  ;;  %v7573_v1 = vmul.f32 %v14008_v31, %v14008_v31 }
0x1683   : > { %v7554_v41 = vmul.f32 0.03125, %v7542_v5  ;;  %v7572_v0 = vmul.f32 %v14012_v19, %v14012_v19 }
0x1684   : > { %v14020_v12 = vsub.f32 %v13910_v63, %v7555_v53  ;;  %v7597_v32 = vsel %vm797_vm2, %v7573_v1, 0.0 }
0x1685   : > { %v14024_v15 = vsub.f32 %v13913_v56, %v7554_v41  ;;  %7598 = vadd.xlane.f32.xlu0 %v7597_v32  ;;  %v4149_v29 = vpop.xlane.xlu0 %4148  ;;  %v7594_v28 = vsel %vm797_vm2, %v7572_v0, 0.0 }
0x1686   : > { %v4175_v58 = vmul.f32 0.03125, %v4149_v29  ;;  %7595 = vadd.xlane.f32.xlu1 %v7594_v28  ;;  %v4146_v20 = vpop.xlane.xlu1 %4145  ;;  %v7575_v43 = vmul.f32 %v14020_v12, %v14020_v12 }
0x1687   : > { %v4174_v39 = vmul.f32 0.03125, %v4146_v20  ;;  %v7574_v63 = vmul.f32 %v14024_v15, %v14024_v15 }
0x1688   : > { %v4185_v11 = vadd.f32 1e-05, %v4175_v58  ;;  %v7603_v49 = vsel %vm3544_vm10, %v7575_v43, 0.0 }
0x1689   : > { %v4184_v44 = vadd.f32 1e-05, %v4174_v39  ;;  %7604 = vadd.xlane.f32.xlu0 %v7603_v49  ;;  %v4155_v56 = vpop.xlane.xlu0 %4154  ;;  %v7600_v45 = vsel %vm797_vm2, %v7574_v63, 0.0 }
0x168a   : > { %11278 = vrsqrt.f32 %v4185_v11  ;;  %v4177_v9 = vmul.f32 0.03125, %v4155_v56  ;;  %7601 = vadd.xlane.f32.xlu1 %v7600_v45  ;;  %v4152_v57 = vpop.xlane.xlu1 %4151 }
0x168b   : > { %11280 = vrsqrt.f32 %v4184_v44  ;;  %v4176_v36 = vmul.f32 0.03125, %v4152_v57 }
0x168c   : > { %v4187_v61 = vadd.f32 1e-05, %v4177_v9 }
0x168d   : > { %v4186_v25 = vadd.f32 1e-05, %v4176_v36  ;;  %v4161_v6 = vpop.xlane.xlu0 %4160 }
0x168e   : > { %11282 = vrsqrt.f32 %v4187_v61  ;;  %v4179_v47 = vmul.f32 0.03125, %v4161_v6  ;;  %v4158_v16 = vpop.xlane.xlu1 %4157 }
0x168f   : > { %11284 = vrsqrt.f32 %v4186_v25  ;;  %v4178_v33 = vmul.f32 0.03125, %v4158_v16 }
0x1690   : > { %v4189_v62 = vadd.f32 1e-05, %v4179_v47 }
0x1691   : > { %v4188_v48 = vadd.f32 1e-05, %v4178_v33  ;;  %v4167_v3 = vpop.xlane.xlu0 %4166 }
0x1692   : > { %11286 = vrsqrt.f32 %v4189_v62  ;;  %v4181_v2 = vmul.f32 0.03125, %v4167_v3  ;;  %v4164_v52 = vpop.xlane.xlu1 %4163 }
0x1693   : > { %11288 = vrsqrt.f32 %v4188_v48  ;;  %v4180_v17 = vmul.f32 0.03125, %v4164_v52 }
0x1694   : > { %v11279_v30 = vpop.eup %11278  ;;  %v4191_v50 = vadd.f32 1e-05, %v4181_v2 }
0x1695   : > { %v11281_v26 = vpop.eup %11280  ;;  %v4205_v54 = vmul.f32 %v11279_v30, %v13898_v34  ;;  %v4190_v60 = vadd.f32 1e-05, %v4180_v17  ;;  %v4173_v24 = vpop.xlane.xlu0 %4172 }
0x1696   : > { %v4204_v14 = vmul.f32 %v11281_v26, %v13904_v46  ;;  %11290 = vrsqrt.f32 %v4191_v50  ;;  %v4183_v55 = vmul.f32 0.03125, %v4173_v24  ;;  %v4170_v40 = vpop.xlane.xlu1 %4169 }
0x1697   : > { %v4221_v53 = vmul.f32 %v14038_v10, %v4205_v54  ;;  %11292 = vrsqrt.f32 %v4190_v60  ;;  %v4182_v5 = vmul.f32 0.03125, %v4170_v40 }
0x1698   : > { %v11283_v1 = vpop.eup %11282  ;;  %v4220_v34 = vmul.f32 %v14038_v10, %v4204_v14  ;;  %v4193_v41 = vadd.f32 1e-05, %v4183_v55 }
0x1699   : > { %v11285_v0 = vpop.eup %11284  ;;  %v4237_v32 = vadd.f32 %v14046_v38, %v4221_v53  ;;  %v4207_v29 = vmul.f32 %v11283_v1, %v13916_v27  ;;  %v4192_v28 = vadd.f32 1e-05, %v4182_v5 }
0x169a   : > { %v4236_v58 = vadd.f32 %v14046_v38, %v4220_v34  ;;  %v4206_v46 = vmul.f32 %v11285_v0, %v13923_v21  ;;  %11294 = vrsqrt.f32 %v4193_v41 }
0x169b   : > { %4247 = vst.msk [vmem:[#allocation2 + $0x8] sm:$0xff] %vm797_vm2, %v4237_v32  ;;  %v4223_v20 = vmul.f32 %v14038_v10, %v4207_v29  ;;  %11296 = vrsqrt.f32 %v4192_v28 }
0x169c   : > { %v11287_v43 = vpop.eup %11286  ;;  %4246 = vst.msk [vmem:[#allocation2] sm:$0xff] %vm797_vm2, %v4236_v58  ;;  %v4222_v39 = vmul.f32 %v14038_v10, %v4206_v46 }
0x169d   : > { %v11289_v63 = vpop.eup %11288  ;;  %v4239_v11 = vadd.f32 %v14046_v38, %v4223_v20  ;;  %v4209_v27 = vmul.f32 %v11287_v43, %v13930_v59 }
0x169e   : > { %v4238_v49 = vadd.f32 %v14046_v38, %v4222_v39  ;;  %v4208_v21 = vmul.f32 %v11289_v63, %v13936_v7 }
0x169f   : > { %4249 = vst.msk [vmem:[#allocation2 + $0x18] sm:$0xff] %vm797_vm2, %v4239_v11  ;;  %v4225_v44 = vmul.f32 %v14038_v10, %v4209_v27 }
0x16a0   : > { %v11291_v56 = vpop.eup %11290  ;;  %4248 = vst.msk [vmem:[#allocation2 + $0x10] sm:$0xff] %vm797_vm2, %v4238_v49  ;;  %v4224_v45 = vmul.f32 %v14038_v10, %v4208_v21 }
0x16a1   : > { %v11293_v9 = vpop.eup %11292  ;;  %v4241_v57 = vadd.f32 %v14046_v38, %v4225_v44  ;;  %v4211_v36 = vmul.f32 %v11291_v56, %v13942_v22 }
0x16a2   : > { %v4240_v59 = vadd.f32 %v14046_v38, %v4224_v45  ;;  %v4210_v61 = vmul.f32 %v11293_v9, %v13948_v35 }
0x16a3   : > { %4251 = vst.msk [vmem:[#allocation2 + $0x28] sm:$0xff] %vm797_vm2, %v4241_v57  ;;  %v4227_v7 = vmul.f32 %v14038_v10, %v4211_v36 }
0x16a4   : > { %v11295_v25 = vpop.eup %11294  ;;  %4250 = vst.msk [vmem:[#allocation2 + $0x20] sm:$0xff] %vm797_vm2, %v4240_v59  ;;  %v4226_v6 = vmul.f32 %v14038_v10, %v4210_v61 }
0x16a5   : > { %v11297_v47 = vpop.eup %11296  ;;  %v4243_v16 = vadd.f32 %v14046_v38, %v4227_v7  ;;  %v4213_v33 = vmul.f32 %v11295_v25, %v13954_v4 }
0x16a6   : > { %v4242_v22 = vadd.f32 %v14046_v38, %v4226_v6  ;;  %v4212_v62 = vmul.f32 %v11297_v47, %v13960_v23 }
0x16a7   : > { %4253 = vst.msk [vmem:[#allocation2 + $0x38] sm:$0xff] %vm797_vm2, %v4243_v16  ;;  %v4229_v35 = vmul.f32 %v14038_v10, %v4213_v33 }
0x16a8   : > { %4252 = vst.msk [vmem:[#allocation2 + $0x30] sm:$0xff] %vm797_vm2, %v4242_v22  ;;  %v4228_v48 = vmul.f32 %v14038_v10, %v4212_v62 }
0x16a9   : > { %v4245_v3 = vadd.f32 %v14046_v38, %v4229_v35 }
0x16aa   : > { %v4244_v2 = vadd.f32 %v14046_v38, %v4228_v48 }
0x16ab   : > { %4255 = vst.msk [vmem:[#allocation2 + $0x48] sm:$0x7f] %vm3544_vm10, %v4245_v3 }
0x16ac   : > { %4254 = vst.msk [vmem:[#allocation2 + $0x40] sm:$0xff] %vm797_vm2, %v4244_v2 }
0x16ff   : > { %v7581_v4 = vpop.xlane.xlu0 %7580 }
0x1700   : > { %v7607_v52 = vmul.f32 0.03125, %v7581_v4  ;;  %v7578_v17 = vpop.xlane.xlu1 %7577 }
0x1701   : > { %v7606_v23 = vmul.f32 0.03125, %v7578_v17 }
0x1702   : > { %v7617_v30 = vadd.f32 1e-05, %v7607_v52 }
0x1703   : > { %v7616_v50 = vadd.f32 1e-05, %v7606_v23 }
0x1704   : > { %11298 = vrsqrt.f32 %v7617_v30 }
0x1705   : > { %11300 = vrsqrt.f32 %v7616_v50 }
0x1707   : > { %v7587_v26 = vpop.xlane.xlu0 %7586 }
0x1708   : > { %v7609_v54 = vmul.f32 0.03125, %v7587_v26  ;;  %v7584_v60 = vpop.xlane.xlu1 %7583 }
0x1709   : > { %v7608_v24 = vmul.f32 0.03125, %v7584_v60 }
0x170a   : > { %v7619_v14 = vadd.f32 1e-05, %v7609_v54 }
0x170b   : > { %v7618_v55 = vadd.f32 1e-05, %v7608_v24 }
0x170c   : > { %11302 = vrsqrt.f32 %v7619_v14 }
0x170d   : > { %11304 = vrsqrt.f32 %v7618_v55  ;;  %v7756_v55 = vld [vmem:[%s14212_s13 + $0x18] sm:$0xff] (!%p8488_p5) }
0x170e   : > { %v11299_v40 = vpop.eup %11298  ;;  %v7593_v53 = vpop.xlane.xlu0 %7592 }
0x170f   : > { %v11301_v5 = vpop.eup %11300  ;;  %v7637_v1 = vmul.f32 %v11299_v40, %v13974_v8  ;;  %v7611_v34 = vmul.f32 0.03125, %v7593_v53  ;;  %v7590_v41 = vpop.xlane.xlu1 %7589  ;;  %v11399_v40 = vmov (!%p8488_p5), 0.0   ;;  %v7680_v53 = vld [vmem:[#allocation2] sm:$0xff] (!%p8488_p5) }
0x1710   : > { %v7636_v0 = vmul.f32 %v11301_v5, %v13977_v42  ;;  %v7610_v32 = vmul.f32 0.03125, %v7590_v41  ;;  %9867 = vmatprep.mubr.msk.f32.mxu0 (!%p8488_p5), %vm11398_vm12, %v11399_v40  ;;  %v7681_v5 = vld [vmem:[#allocation2 + $0x8] sm:$0xff] (!%p8488_p5)  ;;  %v7700_v41 = vsel (!%p8488_p5), %vm797_vm2, %v7680_v53, 0.0  ;;  %9874 = vmatprep.mubr.msk.f32.mxu1 (!%p8488_p5), %vm11398_vm12, %v11399_v40 }
0x1711   : > { %v7647_v29 = vmul.f32 %v14038_v10, %v7637_v1  ;;  %v7621_v28 = vadd.f32 1e-05, %v7611_v34  ;;  %v7682_v1 = vld [vmem:[#allocation2 + $0x10] sm:$0xff] (!%p8488_p5)  ;;  %v7683_v34 = vld [vmem:[#allocation2 + $0x18] sm:$0xff] (!%p8488_p5) }
0x1712   : > { %v7646_v58 = vmul.f32 %v14038_v10, %v7636_v0  ;;  %v7620_v46 = vadd.f32 1e-05, %v7610_v32  ;;  %v7599_v20 = vpop.xlane.xlu0 %7598  ;;  %v7701_v0 = vsel (!%p8488_p5), %vm797_vm2, %v7681_v5, 0.0 }
0x1713   : > { %v7657_v43 = vadd.f32 %v14046_v38, %v7647_v29  ;;  %11306 = vrsqrt.f32 %v7621_v28  ;;  %v7613_v39 = vmul.f32 0.03125, %v7599_v20  ;;  %v7596_v63 = vpop.xlane.xlu1 %7595  ;;  %v7684_v29 = vld [vmem:[#allocation2 + $0x20] sm:$0xff] (!%p8488_p5)  ;;  %v7702_v28 = vadd.f32 (!%p8488_p5), %v7701_v0, %v7700_v41 }
0x1714   : > { %v7656_v11 = vadd.f32 %v14046_v38, %v7646_v58  ;;  %11308 = vrsqrt.f32 %v7620_v46  ;;  %v7612_v8 = vmul.f32 0.03125, %v7596_v63  ;;  %v7703_v58 = vsel (!%p8488_p5), %vm797_vm2, %v7682_v1, 0.0  ;;  %v7685_v46 = vld [vmem:[#allocation2 + $0x28] sm:$0xff] (!%p8488_p5) }
0x1715   : > { %7667 = vst.msk [vmem:[#allocation2 + $0x58] sm:$0xff] %vm797_vm2, %v7657_v43  ;;  %v7623_v42 = vadd.f32 1e-05, %v7613_v39  ;;  %v7705_v43 = vsel (!%p8488_p5), %vm797_vm2, %v7683_v34, 0.0 }
0x1716   : > { %v11303_v27 = vpop.eup %11302  ;;  %7666 = vst.msk [vmem:[#allocation2 + $0x50] sm:$0xff] %vm797_vm2, %v7656_v11  ;;  %v7622_v49 = vadd.f32 1e-05, %v7612_v8  ;;  %v7605_v21 = vpop.xlane.xlu0 %7604  ;;  %v7704_v8 = vadd.f32 (!%p8488_p5), %v7703_v58, %v7702_v28 }
0x1717   : > { %v11305_v44 = vpop.eup %11304  ;;  %v7639_v56 = vmul.f32 %v11303_v27, %v13986_v51  ;;  %11310 = vrsqrt.f32 %v7623_v42  ;;  %v7615_v45 = vmul.f32 0.03125, %v7605_v21  ;;  %v7602_v9 = vpop.xlane.xlu1 %7601  ;;  %v7707_v42 = vsel (!%p8488_p5), %vm797_vm2, %v7684_v29, 0.0 }
0x1718   : > { %v7638_v57 = vmul.f32 %v11305_v44, %v13989_v18  ;;  %11312 = vrsqrt.f32 %v7622_v49  ;;  %v7614_v36 = vmul.f32 0.03125, %v7602_v9  ;;  %v7686_v44 = vld [vmem:[#allocation2 + $0x30] sm:$0xff] (!%p8488_p5) }
0x1719   : > { %v7649_v59 = vmul.f32 %v14038_v10, %v7639_v56  ;;  %v7625_v61 = vadd.f32 1e-05, %v7615_v45  ;;  %v7706_v45 = vadd.f32 (!%p8488_p5), %v7705_v43, %v7704_v8 }
0x171a   : > { %v7648_v7 = vmul.f32 %v14038_v10, %v7638_v57  ;;  %v7624_v25 = vadd.f32 1e-05, %v7614_v36  ;;  %v7709_v57 = vsel (!%p8488_p5), %vm797_vm2, %v7685_v46, 0.0  ;;  %v7840_v46 = vld [vmem:[%s14294_s14] sm:$0xff] (!%p8488_p5) }
0x171b   : > { %v7659_v6 = vadd.f32 %v14046_v38, %v7649_v59  ;;  %11314 = vrsqrt.f32 %v7625_v61  ;;  %v7687_v59 = vld [vmem:[#allocation2 + $0x38] sm:$0xff] (!%p8488_p5) }
0x171c   : > { %v7658_v47 = vadd.f32 %v14046_v38, %v7648_v7  ;;  %11316 = vrsqrt.f32 %v7624_v25  ;;  %v7691_v39 = vld [vmem:[#allocation2 + $0x58] sm:$0xff] (!%p8488_p5)  ;;  %v7708_v7 = vadd.f32 (!%p8488_p5), %v7707_v42, %v7706_v45  ;;  %v8491_v42 = vld [vmem:[%s14296_s0] ss:$0 sm:$0xff] (!%p8488_p5) }
0x171d   : > { %v11307_v51 = vpop.eup %11306  ;;  %7669 = vst.msk [vmem:[#allocation2 + $0x68] sm:$0xff] %vm797_vm2, %v7659_v6  ;;  %v7690_v20 = vld [vmem:[#allocation2 + $0x50] sm:$0xff] (!%p8488_p5)  ;;  %v7726_v49 = vsel (!%p8488_p5), %vm797_vm2, %v7691_v39, 0.0  ;;  %v7711_v6 = vsel (!%p8488_p5), %vm797_vm2, %v7686_v44, 0.0  ;;  %v8489_v39 = vld [vmem:[%s14295_s7] ss:$0 sm:$0xff] (!%p8488_p5) }
0x171e   : > { %v11309_v16 = vpop.eup %11308  ;;  %7668 = vst.msk [vmem:[#allocation2 + $0x60] sm:$0xff] %vm797_vm2, %v7658_v47  ;;  %v7641_v18 = vmul.f32 %v11307_v51, %v13998_v13  ;;  %v7725_v27 = vsel (!%p8488_p5), %vm797_vm2, %v7690_v20, 0.0  ;;  %v7688_v51 = vld [vmem:[#allocation2 + $0x40] sm:$0xff] (!%p8488_p5)  ;;  %v7841_v20 = vld [vmem:[%s14294_s14 + $0x8] sm:$0xff] (!%p8488_p5) }
0x171f   : > { %v7640_v33 = vmul.f32 %v11309_v16, %v14001_v37  ;;  %v7727_v9 = vadd.f32 (!%p8488_p5), %v7726_v49, %v7725_v27  ;;  %v10364_v43 = vpack.c.bf16 (!%p8488_p5), %v7841_v20, %v7840_v46 }
0x1720   : > { %v7651_v22 = vmul.f32 %v14038_v10, %v7641_v18  ;;  %v7710_v18 = vadd.f32 (!%p8488_p5), %v7709_v57, %v7708_v7 }
0x1721   : > { %v11311_v62 = vpop.eup %11310  ;;  %v7650_v35 = vmul.f32 %v14038_v10, %v7640_v33 }
0x1722   : > { %v11313_v48 = vpop.eup %11312  ;;  %v7661_v3 = vadd.f32 %v14046_v38, %v7651_v22  ;;  %v7643_v2 = vmul.f32 %v11311_v62, %v14008_v31  ;;  %v7713_v22 = vsel (!%p8488_p5), %vm797_vm2, %v7687_v59, 0.0 }
0x1723   : > { %v7660_v4 = vadd.f32 %v14046_v38, %v7650_v35  ;;  %v7642_v52 = vmul.f32 %v11313_v48, %v14012_v19  ;;  %v7689_v35 = vld [vmem:[#allocation2 + $0x48] sm:$0x7f] (!%p8488_p5) }
0x1724   : > { %7671 = vst.msk [vmem:[#allocation2 + $0x78] sm:$0xff] %vm797_vm2, %v7661_v3  ;;  %v7653_v13 = vmul.f32 %v14038_v10, %v7643_v2  ;;  %v7693_v11 = vld [vmem:[#allocation2 + $0x68] sm:$0xff] (!%p8488_p5)  ;;  %v7712_v3 = vadd.f32 (!%p8488_p5), %v7711_v6, %v7710_v18 }
0x1725   : > { %v11315_v17 = vpop.eup %11314  ;;  %7670 = vst.msk [vmem:[#allocation2 + $0x70] sm:$0xff] %vm797_vm2, %v7660_v4  ;;  %v7652_v37 = vmul.f32 %v14038_v10, %v7642_v52  ;;  %v7692_v63 = vld [vmem:[#allocation2 + $0x60] sm:$0xff] (!%p8488_p5)  ;;  %v7730_v36 = vsel (!%p8488_p5), %vm797_vm2, %v7693_v11, 0.0  ;;  %v7715_v4 = vsel (!%p8488_p5), %vm797_vm2, %v7688_v51, 0.0 }
0x1726   : > { %v11317_v23 = vpop.eup %11316  ;;  %v7663_v30 = vadd.f32 %v14046_v38, %v7653_v13  ;;  %v7645_v50 = vmul.f32 %v11315_v17, %v14020_v12  ;;  %v7753_v12 = vld [vmem:[%s14212_s13] sm:$0xff] (!%p8488_p5)  ;;  %v7728_v21 = vsel (!%p8488_p5), %vm797_vm2, %v7692_v63, 0.0  ;;  %v7714_v17 = vadd.f32 (!%p8488_p5), %v7713_v22, %v7712_v3 }
0x1727   : > { %v7662_v31 = vadd.f32 %v14046_v38, %v7652_v37  ;;  %v7644_v26 = vmul.f32 %v11317_v23, %v14024_v15  ;;  %7679 = sbr.rel (%p8488_p5) target bundleno = 6390 (0x18f6), region = 96  ;;  %v7754_v15 = vld [vmem:[%s14212_s13 + $0x8] sm:$0xff] (!%p8488_p5)  ;;  %v7729_v25 = vadd.f32 (!%p8488_p5), %v7728_v21, %v7727_v9  ;;  %v7717_v23 = vsel (!%p8488_p5), %vm3544_vm10, %v7689_v35, 0.0 }
0x1728   : > { %7673 = vst.msk [vmem:[#allocation2 + $0x88] sm:$0xff] %vm797_vm2, %v7663_v30  ;;  %v7655_v19 = vmul.f32 %v14038_v10, %v7645_v50  ;;  %v10358_v14 = vpack.c.bf16 (!%p8488_p5), %v7754_v15, %v7753_v12 }
0x1729   : > { %7672 = vst.msk [vmem:[#allocation2 + $0x80] sm:$0xff] %vm797_vm2, %v7662_v31  ;;  %v7654_v54 = vmul.f32 %v14038_v10, %v7644_v26  ;;  %v7755_v10 = vld [vmem:[%s14212_s13 + $0x10] sm:$0xff] (!%p8488_p5)  ;;  %v7731_v33 = vadd.f32 (!%p8488_p5), %v7730_v36, %v7729_v25  ;;  %v7716_v31 = vadd.f32 (!%p8488_p5), %v7715_v4, %v7714_v17 }
0x172a   : > { %v7665_v60 = vadd.f32 %v14046_v38, %v7655_v19  ;;  %v10361_v32 = vpack.c.bf16 (!%p8488_p5), %v7756_v55, %v7755_v10 }
0x172b   : > { %v7664_v24 = vadd.f32 %v14046_v38, %v7654_v54  ;;  %v11397_v38 = vmov (!%p8488_p5), 0.0|0.0   ;;  %v7695_v61 = vld [vmem:[#allocation2 + $0x78] sm:$0xff] (!%p8488_p5)  ;;  %v7718_v54 = vadd.f32 (!%p8488_p5), %v7717_v23, %v7716_v31 }
0x172c   : > { %7675 = vst.msk [vmem:[#allocation2 + $0x98] sm:$0x7f] %vm3544_vm10, %v7665_v60  ;;  %10357 = vmatprep.subr.bf16.mxu0 (!%p8488_p5), %v11397_v38  ;;  %10363 = vmatprep.subr.bf16.mxu1 (!%p8488_p5), %v11397_v38  ;;  %v7694_v56 = vld [vmem:[#allocation2 + $0x70] sm:$0xff] (!%p8488_p5)  ;;  %v7734_v62 = vsel (!%p8488_p5), %vm797_vm2, %v7695_v61, 0.0 }
0x172d   : > { %7674 = vst.msk [vmem:[#allocation2 + $0x90] sm:$0xff] %vm797_vm2, %v7664_v24  ;;  %10359 = vmatpush3.bf16.msra.mxu0 (!%p8488_p5), %v10358_v14  ;;  %v7732_v47 = vsel (!%p8488_p5), %vm797_vm2, %v7694_v56, 0.0  ;;  %v7719_v12 = vrot.slane (!%p8488_p5), %v7718_v54, 4  ;;  %10365 = vmatpush3.bf16.msra.mxu1 (!%p8488_p5), %v10364_v43 }
0x172e   : > { %10360 = vmatprep.subr.bf16.mxu0 %v11397_v38  ;;  %v7733_v2 = vadd.f32 %v7732_v47, %v7731_v33 }
0x172f   : > { %v7697_v48 = vld [vmem:[#allocation2 + $0x88] sm:$0xff]  ;;  %v7720_v10 = vadd.f32 %v7719_v12, %v7718_v54 }
0x1730   : > { %v7696_v16 = vld [vmem:[#allocation2 + $0x80] sm:$0xff]  ;;  %v7735_v37 = vadd.f32 %v7734_v62, %v7733_v2  ;;  %v7738_v30 = vsel %vm797_vm2, %v7697_v48, 0.0 }
0x1731   : > { %10362 = vmatpush3.bf16.msra.mxu0 %v10361_v32  ;;  %v7736_v52 = vsel %vm797_vm2, %v7696_v16, 0.0  ;;  %v7721_v14 = vrot.slane %v7720_v10, 2 }
0x1732   : > { %v7737_v26 = vadd.f32 %v7736_v52, %v7735_v37 }
0x1733   : > { %v7699_v50 = vld [vmem:[#allocation2 + $0x98] sm:$0x7f]  ;;  %v7722_v40 = vadd.f32 %v7721_v14, %v7720_v10 }
0x1734   : > { %v7698_v13 = vld [vmem:[#allocation2 + $0x90] sm:$0xff]  ;;  %v7739_v60 = vadd.f32 %v7738_v30, %v7737_v26  ;;  %v7742_v24 = vsel %vm3544_vm10, %v7699_v50, 0.0 }
0x1735   : > { %v7740_v19 = vsel %vm797_vm2, %v7698_v13, 0.0  ;;  %v7723_v5 = vrot.slane %v7722_v40, 1 }
0x1736   : > { %v7741_v15 = vadd.f32 %v7740_v19, %v7739_v60 }
0x1737   : > { %v7724_v34 = vadd.f32 %v7723_v5, %v7722_v40 }
0x1738   : > { %v7743_v38 = vadd.f32 %v7742_v24, %v7741_v15 }
0x1739   : > { %v7751_v29 = vmul.f32 0.012658228, %v7724_v34 }
0x173a   : > { %v7744_v55 = vrot.slane %v7743_v38, 4 }
0x173c   : > { %v7745_v53 = vadd.f32 %v7744_v55, %v7743_v38 }
0x173e   : > { %v7746_v1 = vrot.slane %v7745_v53, 2 }
0x1740   : > { %v7747_v41 = vadd.f32 %v7746_v1, %v7745_v53 }
0x1742   : > { %v7748_v0 = vrot.slane %v7747_v41, 1 }
0x1744   : > { %v7749_v32 = vadd.f32 %v7748_v0, %v7747_v41 }
0x1746   : > { %v7752_v28 = vmul.f32 0.012658228, %v7749_v32 }
0x1748   : > { %v7767_v58 = vsel %vm7766_vm13, %v7752_v28, %v7751_v29 }
0x1749   : > { %9868 = vmatmul.mubr.msk.f32.vlgmr.msra.gmra.mrb[0].mxu0 %vm797_vm2, %v7767_v58 }
0x181c   : > { %v7836_v63 = vpop.f32.mrb[0].mxu0 }
0x181d   : > { %v7837_v11 = vadd.f32 %v8489_v39, %v7836_v63  ;;  %v9869_v8 = vpop.f32.mrb[1].mxu0 }
0x181f   : > { %9875 = vmatmul.mubr.msk.f32.vlgmr.msra.gmra.mrb[0].mxu1 %vm7849_vm14, %v7837_v11 }
0x18f2   : > { %v7919_v27 = vpop.f32.mrb[0].mxu1 }
0x18f3   : > { %v7920_v49 = vadd.f32 %v8491_v42, %v7919_v27  ;;  %v9876_v21 = vpop.f32.mrb[1].mxu1 }
0x18f5   : > { %7924 = vst.msk [vmem:[#allocation3] sm:$0x3] %vm7923_vm15, %v7920_v49 }
0x18f6 PF: > { %p10452_p6 = scmp.eq.s32.totalorder %s11497_s25, 1  ;;  %s11400_s22 = smov [#allocation3]  }
0x18f7   : > { %s7932_s28 = sshll.u32 %s11400_s22, 4  ;;  %s7933_s28 = int_to_ptr.vmem [resolvable:$true] %s7932_s28 }
0x18f8   : > { %s11347_s30 = scalar_lea.vmem %s7933_s28, 32  ;;  %p11354_p10 = scmp.lt.s32.totalorder %s7933_s28, %s7933_s28 }
0x18f9   : > { %p11348_p7 = scmp.ne.s32.totalorder %s7933_s28, %s11347_s30  ;;  %p11355_p11 = scmp.lt.s32.totalorder %s11347_s30, %s11347_s30 }
0x18fb   : > { %p11349_p8 = pnand %p11348_p7, %p10452_p6  ;;  %p11356_p12 = por %p11355_p11, %p11354_p10 }
0x18fd   : > { %p11350_p9 = pneg %p11349_p8 }
0x18ff   : > { %p11357_p13 = pnand %p11356_p12, %p11350_p9 }
0x1901   : > { %11360 = shalt.err (!%p11357_p13)
}
0x1902   : > { %s14297_s24 = sld [smem:[#allocation37_spill]] }
0x1908   : > { %s14298_s16 = smov %s14297_s24  ;;  %s11361_s29 = scalar_lea.hbm %s14297_s24, 32 }
0x1909   : > { %p11362_p0 = scmp.ne.s32.totalorder %s14298_s16, %s11361_s29  ;;  %p11367_p3 = scmp.lt.u32.totalorder %s11361_s29, %s14298_s16 }
0x190b   : > { %p11363_p1 = pnand %p11362_p0, %p10452_p6 }
0x190d   : > { %p11364_p2 = pneg %p11363_p1 }
0x190f   : > { %p11369_p4 = pnand %p11367_p3, %p11364_p2 }
0x1911   : > { %11372 = shalt.err (!%p11369_p4)
}
0x1912   : > { %10449 = dma.vmem_to_hbm [thread:$0]  (%p10452_p6), %s7933_s28, 32, %s14298_s16, [#allocation4]  }
0x1913   : > { %11378 = dma.done.wait (%p10452_p6), [#allocation4], 32  }
0x1914   : > { %11380 = vsyncadd (%p10452_p6), [#allocation4], 4294967264 }
0x1915 PF: > { %s14299_s5 = sld [smem:[#allocation6_spill]] }
0x191b   : > { %s28_s24 = sadd.s32 1, %s14299_s5  }
0x191c   : > { %p25_p5 = scmp.ge.s32.totalorder %s28_s24, 4  }
0x191e   :  { %27 = sbr.rel (!%p25_p5) target bundleno = 14 (0xe), region = 157 }
0x1925   :  { %7945 = vsyncpa [#allocation4], 1 }
0x1926   :  { %7947 = vsyncpa [#allocation4 + $0x1], 1 }

</bundles_post_ra>
